<compile_context>
chip_gen: v5e
topology: v5e:2x2
jax: 0.10.0
libtpu: 0.0.40
codegen_flags: <defaults>
</compile_context>

<pallas_src>
import functools

import jax
import jax.numpy as jnp
from jax.experimental import pallas as pl
from jax.experimental.pallas import tpu as pltpu  # noqa: F401  (no TPU-specific params needed at these sizes)


def _full_spec(shape):
    # Single grid step, full-array blocks (block == full array satisfies the
    # (8,128) rule); everything here is tiny compared to VMEM on v5e/v6e/v7x.
    return pl.BlockSpec(shape, lambda i, _nd=len(shape): (0,) * _nd)


def _sigmoid(z):
    # tanh-form sigmoid keeps the whole gate nonlinearity on the EUP.
    return 0.5 * jnp.tanh(0.5 * z) + 0.5


def _conv_relu_pool(x, w_ref, b_ref):
    """One CNN stage: Conv2d((3,1),(2,1)) + ReLU + MaxPool2d((2,1),(2,1)).

    x     : [Hin, M, Cin] f32 value (M = W*B padded to a multiple of 8; the conv
            has kernel width 1, so it is pointwise over M).
    w_ref : [3, Cin, Cout] (tap-major), b_ref: [1, Cout].
    returns [Hout//2, M, Cout] (floor pooling, matching torch).
    """
    Hin, M, Cin = x.shape
    Cout = w_ref.shape[2]
    Hout = (Hin - 3) // 2 + 1
    # In-kernel im2col via unit-stride slices + leading-dim even/odd regrouping:
    #   tap0 -> rows 0,2,..,2Hout-2 ; tap1 -> rows 1,3,..,2Hout-1 ; tap2 -> rows 2,4,..,2Hout
    pairs = x[0:2 * Hout].reshape(Hout, 2, M, Cin)
    tap0 = pairs[:, 0].reshape(Hout * M, Cin).astype(jnp.bfloat16)
    tap1 = pairs[:, 1].reshape(Hout * M, Cin).astype(jnp.bfloat16)
    tap2 = (x[1:1 + 2 * Hout].reshape(Hout, 2, M, Cin)[:, 1]
            .reshape(Hout * M, Cin).astype(jnp.bfloat16))
    w0 = w_ref[0].astype(jnp.bfloat16)
    w1 = w_ref[1].astype(jnp.bfloat16)
    w2 = w_ref[2].astype(jnp.bfloat16)
    z = (jnp.dot(tap0, w0, preferred_element_type=jnp.float32)
         + jnp.dot(tap1, w1, preferred_element_type=jnp.float32)
         + jnp.dot(tap2, w2, preferred_element_type=jnp.float32)
         + b_ref[...])
    z = jnp.maximum(z, 0.0).reshape(Hout, M, Cout)            # fused ReLU
    Hp = Hout // 2                                            # floor-mode pool
    zp = z[0:2 * Hp].reshape(Hp, 2, M, Cout)
    return jnp.maximum(zp[:, 0], zp[:, 1])                    # fused MaxPool(2,1)


def _lstm_steps(x2d, wih_ref, whh_ref, b_ref, T, B):
    """Uni-directional LSTM (batch_first module, run time-major here).

    x2d  : [T*B, nIn] f32, rows ordered (t, b).
    wih  : [nIn, 4H], whh: [H, 4H], b: [1, 4H]; gate order (i, f, g, o), b = b_ih + b_hh.
    returns list of T hidden states, each [B, H] f32.
    """
    H = whh_ref.shape[0]
    # Hoisted input projection: one [T*B, nIn] @ [nIn, 4H=128] lane-dense matmul.
    xp = jnp.dot(x2d.astype(jnp.bfloat16), wih_ref[...].astype(jnp.bfloat16),
                 preferred_element_type=jnp.float32) + b_ref[...]
    whh = whh_ref[...].astype(jnp.bfloat16)
    h = jnp.zeros((B, H), jnp.float32)
    c = jnp.zeros((B, H), jnp.float32)
    hs = []
    for t in range(T):                       # T is small & static -> unrolled
        g = xp[t * B:(t + 1) * B, :] + jnp.dot(h.astype(jnp.bfloat16), whh,
                                               preferred_element_type=jnp.float32)
        i_g = _sigmoid(g[:, 0:H])
        f_g = _sigmoid(g[:, H:2 * H])
        g_g = jnp.tanh(g[:, 2 * H:3 * H])
        o_g = _sigmoid(g[:, 3 * H:4 * H])
        c = f_g * c + i_g * g_g
        h = o_g * jnp.tanh(c)
        hs.append(h)
    return hs


def _crnn_kernel(T, B,
                 x_ref,
                 w0_ref, b0_ref, w1_ref, b1_ref, w2_ref, b2_ref,
                 wih1_ref, whh1_ref, bg1_ref, wemb1_ref, bemb1_ref,
                 wih2_ref, whh2_ref, bg2_ref,
                 wsoh_ref, bsoh_ref, wrul_ref, brul_ref,
                 soh_ref, rul_ref):
    # ---- CNN: conv0/relu/pool0 + conv1/relu/pool1 + conv2/relu/pool2 ------------
    a = x_ref[...]                                   # [H, Mpad, C]
    a = _conv_relu_pool(a, w0_ref, b0_ref)
    a = _conv_relu_pool(a, w1_ref, b1_ref)
    a = _conv_relu_pool(a, w2_ref, b2_ref)           # [1, Mpad, 64]
    # squeeze(2).permute(0,2,1): M is ordered (w, b), so this IS time-major (t, b).
    seq = a[0][0:T * B]                              # [T*B, 64], padding rows dropped

    # ---- BidirectionalLSTM #1 (nn.LSTM(64,nh) + Linear(nh, nh)) -----------------
    hs1 = _lstm_steps(seq, wih1_ref, whh1_ref, bg1_ref, T, B)
    h1 = jnp.concatenate(hs1, axis=0)                # [T*B, nh]  (deferred, single store-free stack)
    emb1 = (jnp.dot(h1.astype(jnp.bfloat16), wemb1_ref[...].astype(jnp.bfloat16),
                    preferred_element_type=jnp.float32) + bemb1_ref[...])

    # ---- BidirectionalLSTM #2 + soh head -----------------------------------------
    # Linear(nh,64) embedding and soh=Linear(64,1) are folded (exact: no dropout),
    # so the head is a single lane reduction over the hidden states.
    hs2 = _lstm_steps(emb1, wih2_ref, whh2_ref, bg2_ref, T, B)
    h2 = jnp.stack(hs2, axis=0)                      # [T, B, nh]
    soh = jnp.sum(h2 * wsoh_ref[...], axis=-1, keepdims=True) + bsoh_ref[...]   # [T, B, 1]
    soh_ref[...] = soh

    # ---- rul head: Linear(T=10, 1) over the sequence dim --------------------------
    rul_ref[...] = jnp.sum(soh * wrul_ref[...], axis=0) + brul_ref[...]          # [B, 1]


def crnn_forward(x_nchw, params):
    B, C, H, W = x_nchw.shape
    T = W
    M = W * B
    Mpad = ((M + 7) // 8) * 8

    h = H
    for _ in range(3):
        h = ((h - 3) // 2 + 1) // 2
    assert h == 1, "CNN must collapse H to 1 (torch squeeze(2) assumption)"
    assert params["rul_w"].shape[0] == T, "rul = nn.Linear(10, 1) requires W == 10"

    # Glue: NCHW -> [H, W*B, C] (w-major / b-minor so the CNN output is already
    # time-major for the LSTM); pad the pointwise dim M to a multiple of 8.
    x = jnp.transpose(x_nchw.astype(jnp.float32), (2, 3, 0, 1)).reshape(H, M, C)
    if Mpad > M:
        x = jnp.pad(x, ((0, 0), (0, Mpad - M), (0, 0)))

    # Glue (tiny weight prep): fold embedding2 (nh->64) into soh Linear(64->1).
    nh = params["l2_whh"].shape[0]
    w_soh_fold = (params["l2_wemb"] @ params["soh_w"]).T.reshape(1, 1, nh)
    b_soh_fold = (params["l2_bemb"] @ params["soh_w"] + params["soh_b"]).reshape(1, 1, 1)
    w_rul = params["rul_w"].reshape(T, 1, 1)

    in_arrays = (
        x,
        params["conv0_w"], params["conv0_b"],
        params["conv1_w"], params["conv1_b"],
        params["conv2_w"], params["conv2_b"],
        params["l1_wih"], params["l1_whh"], params["l1_b"],
        params["l1_wemb"], params["l1_bemb"],
        params["l2_wih"], params["l2_whh"], params["l2_b"],
        w_soh_fold, b_soh_fold, w_rul, params["rul_b"],
    )

    soh_tb1, rul = pl.pallas_call(
        functools.partial(_crnn_kernel, T, B),
        out_shape=(jax.ShapeDtypeStruct((T, B, 1), jnp.float32),
                   jax.ShapeDtypeStruct((B, 1), jnp.float32)),
        grid=(1,),
        in_specs=[_full_spec(a.shape) for a in in_arrays],
        out_specs=(_full_spec((T, B, 1)), _full_spec((B, 1))),
    )(*in_arrays)

    soh = jnp.transpose(soh_tb1[:, :, 0], (1, 0))     # [B, T]  (tiny glue transpose)
    return rul, soh


# ------------------------------------------------------------------ deterministic params

def init_params(key, nc=4, nh=32, no=64, T=10):
    def u(k, shape, fan_in):
        bound = 1.0 / float(fan_in) ** 0.5
        return jax.random.uniform(k, shape, jnp.float32, -bound, bound)

    ks = jax.random.split(key, 22)
    p = {}
    # Conv2d((3,1)) weights stored tap-major [K=3, Cin, Cout] (matmul-ready), bias [1, Cout]
    p["conv0_w"] = u(ks[0], (3, nc, 8), nc * 3)
    p["conv0_b"] = u(ks[1], (1, 8), nc * 3)
    p["conv1_w"] = u(ks[2], (3, 8, 16), 8 * 3)
    p["conv1_b"] = u(ks[3], (1, 16), 8 * 3)
    p["conv2_w"] = u(ks[4], (3, 16, 64), 16 * 3)
    p["conv2_b"] = u(ks[5], (1, 64), 16 * 3)
    # LSTM 1: nIn=64 -> H=nh, gates packed (i|f|g|o) along 4*nh; bias = b_ih + b_hh
    p["l1_wih"] = u(ks[6], (64, 4 * nh), nh)
    p["l1_whh"] = u(ks[7], (nh, 4 * nh), nh)
    p["l1_b"] = u(ks[8], (1, 4 * nh), nh) + u(ks[9], (1, 4 * nh), nh)
    p["l1_wemb"] = u(ks[10], (nh, nh), nh)
    p["l1_bemb"] = u(ks[11], (1, nh), nh)
    # LSTM 2: nIn=nh -> H=nh; embedding Linear(nh, no)
    p["l2_wih"] = u(ks[12], (nh, 4 * nh), nh)
    p["l2_whh"] = u(ks[13], (nh, 4 * nh), nh)
    p["l2_b"] = u(ks[14], (1, 4 * nh), nh) + u(ks[15], (1, 4 * nh), nh)
    p["l2_wemb"] = u(ks[16], (nh, no), nh)
    p["l2_bemb"] = u(ks[17], (1, no), nh)
    # heads: soh = Linear(no=64, 1); rul = Linear(10, 1)
    p["soh_w"] = u(ks[18], (no, 1), no)
    p["soh_b"] = u(ks[19], (1, 1), no)
    p["rul_w"] = u(ks[20], (T, 1), T)
    p["rul_b"] = u(ks[21], (1, 1), T)
    return p


if __name__ == "__main__":
    key = jax.random.PRNGKey(0)
    pkey, xkey = jax.random.split(key)
    params = init_params(pkey, nc=4, nh=32, no=64, T=10)
    # [B, C, H, W]: H=100 collapses to 1 through the three conv(stride 2)+pool(2) stages;
    # W=10 is required because rul = nn.Linear(10, 1) acts over the sequence dim.
    x = jax.random.normal(xkey, (2, 4, 100, 10), jnp.float32)
    rul, soh = jax.jit(crnn_forward)(x, params)
    jax.block_until_ready((rul, soh))
    assert rul.shape == (2, 1) and soh.shape == (2, 10)
    print("KERNEL_OK")
</pallas_src>

<mosaic_0001>
module attributes {stable_mosaic.version = 11 : i64} {
  func.func @_crnn_kernel(%arg0: i32, %arg1: memref<100x24x4xf32, #tpu.memory_space<vmem>>, %arg2: memref<3x4x8xf32, #tpu.memory_space<vmem>>, %arg3: memref<1x8xf32, #tpu.memory_space<vmem>>, %arg4: memref<3x8x16xf32, #tpu.memory_space<vmem>>, %arg5: memref<1x16xf32, #tpu.memory_space<vmem>>, %arg6: memref<3x16x64xf32, #tpu.memory_space<vmem>>, %arg7: memref<1x64xf32, #tpu.memory_space<vmem>>, %arg8: memref<64x128xf32, #tpu.memory_space<vmem>>, %arg9: memref<32x128xf32, #tpu.memory_space<vmem>>, %arg10: memref<1x128xf32, #tpu.memory_space<vmem>>, %arg11: memref<32x32xf32, #tpu.memory_space<vmem>>, %arg12: memref<1x32xf32, #tpu.memory_space<vmem>>, %arg13: memref<32x128xf32, #tpu.memory_space<vmem>>, %arg14: memref<32x128xf32, #tpu.memory_space<vmem>>, %arg15: memref<1x128xf32, #tpu.memory_space<vmem>>, %arg16: memref<1x1x32xf32, #tpu.memory_space<vmem>>, %arg17: memref<1x1x1xf32, #tpu.memory_space<vmem>>, %arg18: memref<10x1x1xf32, #tpu.memory_space<vmem>>, %arg19: memref<1x1xf32, #tpu.memory_space<vmem>>, %arg20: memref<10x2x1xf32, #tpu.memory_space<vmem>>, %arg21: memref<2x1xf32, #tpu.memory_space<vmem>>) attributes {dimension_semantics = [#tpu.dimension_semantics<arbitrary>], iteration_bounds = array<i64: 1>, scalar_prefetch = 0 : i64, scratch_operands = 0 : i64, tpu.core_type = #tpu.core_type<tc>, window_params = [{pipeline_mode = #tpu.pipeline_mode<synchronous>, transform_indices = @transform_0, window_bounds = array<i64: 100, 24, 4>}, {pipeline_mode = #tpu.pipeline_mode<synchronous>, transform_indices = @transform_1, window_bounds = array<i64: 3, 4, 8>}, {pipeline_mode = #tpu.pipeline_mode<synchronous>, transform_indices = @transform_2, window_bounds = array<i64: 1, 8>}, {pipeline_mode = #tpu.pipeline_mode<synchronous>, transform_indices = @transform_3, window_bounds = array<i64: 3, 8, 16>}, {pipeline_mode = #tpu.pipeline_mode<synchronous>, transform_indices = @transform_4, window_bounds = array<i64: 1, 16>}, {pipeline_mode = #tpu.pipeline_mode<synchronous>, transform_indices = @transform_5, window_bounds = array<i64: 3, 16, 64>}, {pipeline_mode = #tpu.pipeline_mode<synchronous>, transform_indices = @transform_6, window_bounds = array<i64: 1, 64>}, {pipeline_mode = #tpu.pipeline_mode<synchronous>, transform_indices = @transform_7, window_bounds = array<i64: 64, 128>}, {pipeline_mode = #tpu.pipeline_mode<synchronous>, transform_indices = @transform_8, window_bounds = array<i64: 32, 128>}, {pipeline_mode = #tpu.pipeline_mode<synchronous>, transform_indices = @transform_9, window_bounds = array<i64: 1, 128>}, {pipeline_mode = #tpu.pipeline_mode<synchronous>, transform_indices = @transform_10, window_bounds = array<i64: 32, 32>}, {pipeline_mode = #tpu.pipeline_mode<synchronous>, transform_indices = @transform_11, window_bounds = array<i64: 1, 32>}, {pipeline_mode = #tpu.pipeline_mode<synchronous>, transform_indices = @transform_12, window_bounds = array<i64: 32, 128>}, {pipeline_mode = #tpu.pipeline_mode<synchronous>, transform_indices = @transform_13, window_bounds = array<i64: 32, 128>}, {pipeline_mode = #tpu.pipeline_mode<synchronous>, transform_indices = @transform_14, window_bounds = array<i64: 1, 128>}, {pipeline_mode = #tpu.pipeline_mode<synchronous>, transform_indices = @transform_15, window_bounds = array<i64: 1, 1, 32>}, {pipeline_mode = #tpu.pipeline_mode<synchronous>, transform_indices = @transform_16, window_bounds = array<i64: 1, 1, 1>}, {pipeline_mode = #tpu.pipeline_mode<synchronous>, transform_indices = @transform_17, window_bounds = array<i64: 10, 1, 1>}, {pipeline_mode = #tpu.pipeline_mode<synchronous>, transform_indices = @transform_18, window_bounds = array<i64: 1, 1>}, {pipeline_mode = #tpu.pipeline_mode<synchronous>, transform_indices = @transform_19, window_bounds = array<i64: 10, 2, 1>}, {pipeline_mode = #tpu.pipeline_mode<synchronous>, transform_indices = @transform_20, window_bounds = array<i64: 2, 1>}]} {
    %c0 = arith.constant 0 : index
    %c0_0 = arith.constant 0 : index
    %c0_1 = arith.constant 0 : index
    %0 = vector.load %arg1[%c0, %c0_0, %c0_1] : memref<100x24x4xf32, #tpu.memory_space<vmem>>, vector<100x24x4xf32>
    %1 = vector.extract_strided_slice %0 {offsets = [0, 0, 0], sizes = [98, 24, 4], strides = [1, 1, 1]} : vector<100x24x4xf32> to vector<98x24x4xf32>
    %2 = vector.shape_cast %1 : vector<98x24x4xf32> to vector<49x2x24x4xf32>
    %3 = vector.extract_strided_slice %2 {offsets = [0, 0, 0, 0], sizes = [49, 1, 24, 4], strides = [1, 1, 1, 1]} : vector<49x2x24x4xf32> to vector<49x1x24x4xf32>
    %4 = vector.shape_cast %3 : vector<49x1x24x4xf32> to vector<49x24x4xf32>
    %5 = vector.shape_cast %4 : vector<49x24x4xf32> to vector<1176x4xf32>
    %6 = arith.truncf %5 : vector<1176x4xf32> to vector<1176x4xbf16>
    %7 = vector.extract_strided_slice %2 {offsets = [0, 1, 0, 0], sizes = [49, 1, 24, 4], strides = [1, 1, 1, 1]} : vector<49x2x24x4xf32> to vector<49x1x24x4xf32>
    %8 = vector.shape_cast %7 : vector<49x1x24x4xf32> to vector<49x24x4xf32>
    %9 = vector.shape_cast %8 : vector<49x24x4xf32> to vector<1176x4xf32>
    %10 = arith.truncf %9 : vector<1176x4xf32> to vector<1176x4xbf16>
    %11 = vector.extract_strided_slice %0 {offsets = [1, 0, 0], sizes = [98, 24, 4], strides = [1, 1, 1]} : vector<100x24x4xf32> to vector<98x24x4xf32>
    %12 = vector.shape_cast %11 : vector<98x24x4xf32> to vector<49x2x24x4xf32>
    %13 = vector.extract_strided_slice %12 {offsets = [0, 1, 0, 0], sizes = [49, 1, 24, 4], strides = [1, 1, 1, 1]} : vector<49x2x24x4xf32> to vector<49x1x24x4xf32>
    %14 = vector.shape_cast %13 : vector<49x1x24x4xf32> to vector<49x24x4xf32>
    %15 = vector.shape_cast %14 : vector<49x24x4xf32> to vector<1176x4xf32>
    %16 = arith.truncf %15 : vector<1176x4xf32> to vector<1176x4xbf16>
    %c0_2 = arith.constant 0 : index
    %c0_3 = arith.constant 0 : index
    %c0_4 = arith.constant 0 : index
    %17 = vector.load %arg2[%c0_2, %c0_3, %c0_4] : memref<3x4x8xf32, #tpu.memory_space<vmem>>, vector<1x4x8xf32>
    %18 = vector.shape_cast %17 : vector<1x4x8xf32> to vector<4x8xf32>
    %19 = arith.truncf %18 : vector<4x8xf32> to vector<4x8xbf16>
    %c1 = arith.constant 1 : index
    %c0_5 = arith.constant 0 : index
    %c0_6 = arith.constant 0 : index
    %20 = vector.load %arg2[%c1, %c0_5, %c0_6] : memref<3x4x8xf32, #tpu.memory_space<vmem>>, vector<1x4x8xf32>
    %21 = vector.shape_cast %20 : vector<1x4x8xf32> to vector<4x8xf32>
    %22 = arith.truncf %21 : vector<4x8xf32> to vector<4x8xbf16>
    %c2 = arith.constant 2 : index
    %c0_7 = arith.constant 0 : index
    %c0_8 = arith.constant 0 : index
    %23 = vector.load %arg2[%c2, %c0_7, %c0_8] : memref<3x4x8xf32, #tpu.memory_space<vmem>>, vector<1x4x8xf32>
    %24 = vector.shape_cast %23 : vector<1x4x8xf32> to vector<4x8xf32>
    %25 = arith.truncf %24 : vector<4x8xf32> to vector<4x8xbf16>
    %cst = arith.constant dense<0.000000e+00> : vector<1176x8xf32>
    %26 = tpu.matmul %6, %19, %cst {dimension_numbers = #tpu.dot_dimension_numbers<[1], [0], [0], [1], [0, 0, 1, 1], [], []>} : vector<1176x4xbf16>, vector<4x8xbf16>, vector<1176x8xf32> -> vector<1176x8xf32>
    %cst_9 = arith.constant dense<0.000000e+00> : vector<1176x8xf32>
    %27 = tpu.matmul %10, %22, %cst_9 {dimension_numbers = #tpu.dot_dimension_numbers<[1], [0], [0], [1], [0, 0, 1, 1], [], []>} : vector<1176x4xbf16>, vector<4x8xbf16>, vector<1176x8xf32> -> vector<1176x8xf32>
    %28 = arith.addf %26, %27 : vector<1176x8xf32>
    %cst_10 = arith.constant dense<0.000000e+00> : vector<1176x8xf32>
    %29 = tpu.matmul %16, %25, %cst_10 {dimension_numbers = #tpu.dot_dimension_numbers<[1], [0], [0], [1], [0, 0, 1, 1], [], []>} : vector<1176x4xbf16>, vector<4x8xbf16>, vector<1176x8xf32> -> vector<1176x8xf32>
    %30 = arith.addf %28, %29 : vector<1176x8xf32>
    %c0_11 = arith.constant 0 : index
    %c0_12 = arith.constant 0 : index
    %31 = vector.load %arg3[%c0_11, %c0_12] : memref<1x8xf32, #tpu.memory_space<vmem>>, vector<1x8xf32>
    %32 = vector.broadcast %31 : vector<1x8xf32> to vector<1176x8xf32>
    %33 = arith.addf %30, %32 : vector<1176x8xf32>
    %cst_13 = arith.constant 0.000000e+00 : f32
    %34 = vector.broadcast %cst_13 : f32 to vector<1176x8xf32>
    %35 = arith.maximumf %33, %34 : vector<1176x8xf32>
    %36 = vector.shape_cast %35 : vector<1176x8xf32> to vector<49x24x8xf32>
    %37 = vector.extract_strided_slice %36 {offsets = [0, 0, 0], sizes = [48, 24, 8], strides = [1, 1, 1]} : vector<49x24x8xf32> to vector<48x24x8xf32>
    %38 = vector.shape_cast %37 : vector<48x24x8xf32> to vector<24x2x24x8xf32>
    %39 = vector.extract_strided_slice %38 {offsets = [0, 0, 0, 0], sizes = [24, 1, 24, 8], strides = [1, 1, 1, 1]} : vector<24x2x24x8xf32> to vector<24x1x24x8xf32>
    %40 = vector.shape_cast %39 : vector<24x1x24x8xf32> to vector<24x24x8xf32>
    %41 = vector.extract_strided_slice %38 {offsets = [0, 1, 0, 0], sizes = [24, 1, 24, 8], strides = [1, 1, 1, 1]} : vector<24x2x24x8xf32> to vector<24x1x24x8xf32>
    %42 = vector.shape_cast %41 : vector<24x1x24x8xf32> to vector<24x24x8xf32>
    %43 = arith.maximumf %40, %42 : vector<24x24x8xf32>
    %44 = vector.extract_strided_slice %43 {offsets = [0, 0, 0], sizes = [22, 24, 8], strides = [1, 1, 1]} : vector<24x24x8xf32> to vector<22x24x8xf32>
    %45 = vector.shape_cast %44 : vector<22x24x8xf32> to vector<11x2x24x8xf32>
    %46 = vector.extract_strided_slice %45 {offsets = [0, 0, 0, 0], sizes = [11, 1, 24, 8], strides = [1, 1, 1, 1]} : vector<11x2x24x8xf32> to vector<11x1x24x8xf32>
    %47 = vector.shape_cast %46 : vector<11x1x24x8xf32> to vector<11x24x8xf32>
    %48 = vector.shape_cast %47 : vector<11x24x8xf32> to vector<264x8xf32>
    %49 = arith.truncf %48 : vector<264x8xf32> to vector<264x8xbf16>
    %50 = vector.extract_strided_slice %45 {offsets = [0, 1, 0, 0], sizes = [11, 1, 24, 8], strides = [1, 1, 1, 1]} : vector<11x2x24x8xf32> to vector<11x1x24x8xf32>
    %51 = vector.shape_cast %50 : vector<11x1x24x8xf32> to vector<11x24x8xf32>
    %52 = vector.shape_cast %51 : vector<11x24x8xf32> to vector<264x8xf32>
    %53 = arith.truncf %52 : vector<264x8xf32> to vector<264x8xbf16>
    %54 = vector.extract_strided_slice %43 {offsets = [1, 0, 0], sizes = [22, 24, 8], strides = [1, 1, 1]} : vector<24x24x8xf32> to vector<22x24x8xf32>
    %55 = vector.shape_cast %54 : vector<22x24x8xf32> to vector<11x2x24x8xf32>
    %56 = vector.extract_strided_slice %55 {offsets = [0, 1, 0, 0], sizes = [11, 1, 24, 8], strides = [1, 1, 1, 1]} : vector<11x2x24x8xf32> to vector<11x1x24x8xf32>
    %57 = vector.shape_cast %56 : vector<11x1x24x8xf32> to vector<11x24x8xf32>
    %58 = vector.shape_cast %57 : vector<11x24x8xf32> to vector<264x8xf32>
    %59 = arith.truncf %58 : vector<264x8xf32> to vector<264x8xbf16>
    %c0_14 = arith.constant 0 : index
    %c0_15 = arith.constant 0 : index
    %c0_16 = arith.constant 0 : index
    %60 = vector.load %arg4[%c0_14, %c0_15, %c0_16] : memref<3x8x16xf32, #tpu.memory_space<vmem>>, vector<1x8x16xf32>
    %61 = vector.shape_cast %60 : vector<1x8x16xf32> to vector<8x16xf32>
    %62 = arith.truncf %61 : vector<8x16xf32> to vector<8x16xbf16>
    %c1_17 = arith.constant 1 : index
    %c0_18 = arith.constant 0 : index
    %c0_19 = arith.constant 0 : index
    %63 = vector.load %arg4[%c1_17, %c0_18, %c0_19] : memref<3x8x16xf32, #tpu.memory_space<vmem>>, vector<1x8x16xf32>
    %64 = vector.shape_cast %63 : vector<1x8x16xf32> to vector<8x16xf32>
    %65 = arith.truncf %64 : vector<8x16xf32> to vector<8x16xbf16>
    %c2_20 = arith.constant 2 : index
    %c0_21 = arith.constant 0 : index
    %c0_22 = arith.constant 0 : index
    %66 = vector.load %arg4[%c2_20, %c0_21, %c0_22] : memref<3x8x16xf32, #tpu.memory_space<vmem>>, vector<1x8x16xf32>
    %67 = vector.shape_cast %66 : vector<1x8x16xf32> to vector<8x16xf32>
    %68 = arith.truncf %67 : vector<8x16xf32> to vector<8x16xbf16>
    %cst_23 = arith.constant dense<0.000000e+00> : vector<264x16xf32>
    %69 = tpu.matmul %49, %62, %cst_23 {dimension_numbers = #tpu.dot_dimension_numbers<[1], [0], [0], [1], [0, 0, 1, 1], [], []>} : vector<264x8xbf16>, vector<8x16xbf16>, vector<264x16xf32> -> vector<264x16xf32>
    %cst_24 = arith.constant dense<0.000000e+00> : vector<264x16xf32>
    %70 = tpu.matmul %53, %65, %cst_24 {dimension_numbers = #tpu.dot_dimension_numbers<[1], [0], [0], [1], [0, 0, 1, 1], [], []>} : vector<264x8xbf16>, vector<8x16xbf16>, vector<264x16xf32> -> vector<264x16xf32>
    %71 = arith.addf %69, %70 : vector<264x16xf32>
    %cst_25 = arith.constant dense<0.000000e+00> : vector<264x16xf32>
    %72 = tpu.matmul %59, %68, %cst_25 {dimension_numbers = #tpu.dot_dimension_numbers<[1], [0], [0], [1], [0, 0, 1, 1], [], []>} : vector<264x8xbf16>, vector<8x16xbf16>, vector<264x16xf32> -> vector<264x16xf32>
    %73 = arith.addf %71, %72 : vector<264x16xf32>
    %c0_26 = arith.constant 0 : index
    %c0_27 = arith.constant 0 : index
    %74 = vector.load %arg5[%c0_26, %c0_27] : memref<1x16xf32, #tpu.memory_space<vmem>>, vector<1x16xf32>
    %75 = vector.broadcast %74 : vector<1x16xf32> to vector<264x16xf32>
    %76 = arith.addf %73, %75 : vector<264x16xf32>
    %cst_28 = arith.constant 0.000000e+00 : f32
    %77 = vector.broadcast %cst_28 : f32 to vector<264x16xf32>
    %78 = arith.maximumf %76, %77 : vector<264x16xf32>
    %79 = vector.shape_cast %78 : vector<264x16xf32> to vector<11x24x16xf32>
    %80 = vector.extract_strided_slice %79 {offsets = [0, 0, 0], sizes = [10, 24, 16], strides = [1, 1, 1]} : vector<11x24x16xf32> to vector<10x24x16xf32>
    %81 = vector.shape_cast %80 : vector<10x24x16xf32> to vector<5x2x24x16xf32>
    %82 = vector.extract_strided_slice %81 {offsets = [0, 0, 0, 0], sizes = [5, 1, 24, 16], strides = [1, 1, 1, 1]} : vector<5x2x24x16xf32> to vector<5x1x24x16xf32>
    %83 = vector.shape_cast %82 : vector<5x1x24x16xf32> to vector<5x24x16xf32>
    %84 = vector.extract_strided_slice %81 {offsets = [0, 1, 0, 0], sizes = [5, 1, 24, 16], strides = [1, 1, 1, 1]} : vector<5x2x24x16xf32> to vector<5x1x24x16xf32>
    %85 = vector.shape_cast %84 : vector<5x1x24x16xf32> to vector<5x24x16xf32>
    %86 = arith.maximumf %83, %85 : vector<5x24x16xf32>
    %87 = vector.extract_strided_slice %86 {offsets = [0, 0, 0], sizes = [4, 24, 16], strides = [1, 1, 1]} : vector<5x24x16xf32> to vector<4x24x16xf32>
    %88 = vector.shape_cast %87 : vector<4x24x16xf32> to vector<2x2x24x16xf32>
    %89 = vector.extract_strided_slice %88 {offsets = [0, 0, 0, 0], sizes = [2, 1, 24, 16], strides = [1, 1, 1, 1]} : vector<2x2x24x16xf32> to vector<2x1x24x16xf32>
    %90 = vector.shape_cast %89 : vector<2x1x24x16xf32> to vector<2x24x16xf32>
    %91 = vector.shape_cast %90 : vector<2x24x16xf32> to vector<48x16xf32>
    %92 = arith.truncf %91 : vector<48x16xf32> to vector<48x16xbf16>
    %93 = vector.extract_strided_slice %88 {offsets = [0, 1, 0, 0], sizes = [2, 1, 24, 16], strides = [1, 1, 1, 1]} : vector<2x2x24x16xf32> to vector<2x1x24x16xf32>
    %94 = vector.shape_cast %93 : vector<2x1x24x16xf32> to vector<2x24x16xf32>
    %95 = vector.shape_cast %94 : vector<2x24x16xf32> to vector<48x16xf32>
    %96 = arith.truncf %95 : vector<48x16xf32> to vector<48x16xbf16>
    %97 = vector.extract_strided_slice %86 {offsets = [1, 0, 0], sizes = [4, 24, 16], strides = [1, 1, 1]} : vector<5x24x16xf32> to vector<4x24x16xf32>
    %98 = vector.shape_cast %97 : vector<4x24x16xf32> to vector<2x2x24x16xf32>
    %99 = vector.extract_strided_slice %98 {offsets = [0, 1, 0, 0], sizes = [2, 1, 24, 16], strides = [1, 1, 1, 1]} : vector<2x2x24x16xf32> to vector<2x1x24x16xf32>
    %100 = vector.shape_cast %99 : vector<2x1x24x16xf32> to vector<2x24x16xf32>
    %101 = vector.shape_cast %100 : vector<2x24x16xf32> to vector<48x16xf32>
    %102 = arith.truncf %101 : vector<48x16xf32> to vector<48x16xbf16>
    %c0_29 = arith.constant 0 : index
    %c0_30 = arith.constant 0 : index
    %c0_31 = arith.constant 0 : index
    %103 = vector.load %arg6[%c0_29, %c0_30, %c0_31] : memref<3x16x64xf32, #tpu.memory_space<vmem>>, vector<1x16x64xf32>
    %104 = vector.shape_cast %103 : vector<1x16x64xf32> to vector<16x64xf32>
    %105 = arith.truncf %104 : vector<16x64xf32> to vector<16x64xbf16>
    %c1_32 = arith.constant 1 : index
    %c0_33 = arith.constant 0 : index
    %c0_34 = arith.constant 0 : index
    %106 = vector.load %arg6[%c1_32, %c0_33, %c0_34] : memref<3x16x64xf32, #tpu.memory_space<vmem>>, vector<1x16x64xf32>
    %107 = vector.shape_cast %106 : vector<1x16x64xf32> to vector<16x64xf32>
    %108 = arith.truncf %107 : vector<16x64xf32> to vector<16x64xbf16>
    %c2_35 = arith.constant 2 : index
    %c0_36 = arith.constant 0 : index
    %c0_37 = arith.constant 0 : index
    %109 = vector.load %arg6[%c2_35, %c0_36, %c0_37] : memref<3x16x64xf32, #tpu.memory_space<vmem>>, vector<1x16x64xf32>
    %110 = vector.shape_cast %109 : vector<1x16x64xf32> to vector<16x64xf32>
    %111 = arith.truncf %110 : vector<16x64xf32> to vector<16x64xbf16>
    %cst_38 = arith.constant dense<0.000000e+00> : vector<48x64xf32>
    %112 = tpu.matmul %92, %105, %cst_38 {dimension_numbers = #tpu.dot_dimension_numbers<[1], [0], [0], [1], [0, 0, 1, 1], [], []>} : vector<48x16xbf16>, vector<16x64xbf16>, vector<48x64xf32> -> vector<48x64xf32>
    %cst_39 = arith.constant dense<0.000000e+00> : vector<48x64xf32>
    %113 = tpu.matmul %96, %108, %cst_39 {dimension_numbers = #tpu.dot_dimension_numbers<[1], [0], [0], [1], [0, 0, 1, 1], [], []>} : vector<48x16xbf16>, vector<16x64xbf16>, vector<48x64xf32> -> vector<48x64xf32>
    %114 = arith.addf %112, %113 : vector<48x64xf32>
    %cst_40 = arith.constant dense<0.000000e+00> : vector<48x64xf32>
    %115 = tpu.matmul %102, %111, %cst_40 {dimension_numbers = #tpu.dot_dimension_numbers<[1], [0], [0], [1], [0, 0, 1, 1], [], []>} : vector<48x16xbf16>, vector<16x64xbf16>, vector<48x64xf32> -> vector<48x64xf32>
    %116 = arith.addf %114, %115 : vector<48x64xf32>
    %c0_41 = arith.constant 0 : index
    %c0_42 = arith.constant 0 : index
    %117 = vector.load %arg7[%c0_41, %c0_42] : memref<1x64xf32, #tpu.memory_space<vmem>>, vector<1x64xf32>
    %118 = vector.broadcast %117 : vector<1x64xf32> to vector<48x64xf32>
    %119 = arith.addf %116, %118 : vector<48x64xf32>
    %cst_43 = arith.constant 0.000000e+00 : f32
    %120 = vector.broadcast %cst_43 : f32 to vector<48x64xf32>
    %121 = arith.maximumf %119, %120 : vector<48x64xf32>
    %122 = vector.shape_cast %121 : vector<48x64xf32> to vector<2x24x64xf32>
    %123 = vector.shape_cast %122 : vector<2x24x64xf32> to vector<1x2x24x64xf32>
    %124 = vector.extract_strided_slice %123 {offsets = [0, 0, 0, 0], sizes = [1, 1, 24, 64], strides = [1, 1, 1, 1]} : vector<1x2x24x64xf32> to vector<1x1x24x64xf32>
    %125 = vector.shape_cast %124 : vector<1x1x24x64xf32> to vector<1x24x64xf32>
    %126 = vector.extract_strided_slice %123 {offsets = [0, 1, 0, 0], sizes = [1, 1, 24, 64], strides = [1, 1, 1, 1]} : vector<1x2x24x64xf32> to vector<1x1x24x64xf32>
    %127 = vector.shape_cast %126 : vector<1x1x24x64xf32> to vector<1x24x64xf32>
    %128 = arith.maximumf %125, %127 : vector<1x24x64xf32>
    %129 = vector.shape_cast %128 : vector<1x24x64xf32> to vector<24x64xf32>
    %130 = vector.extract_strided_slice %129 {offsets = [0, 0], sizes = [20, 64], strides = [1, 1]} : vector<24x64xf32> to vector<20x64xf32>
    %131 = arith.truncf %130 : vector<20x64xf32> to vector<20x64xbf16>
    %c0_44 = arith.constant 0 : index
    %c0_45 = arith.constant 0 : index
    %132 = vector.load %arg8[%c0_44, %c0_45] : memref<64x128xf32, #tpu.memory_space<vmem>>, vector<64x128xf32>
    %133 = arith.truncf %132 : vector<64x128xf32> to vector<64x128xbf16>
    %cst_46 = arith.constant dense<0.000000e+00> : vector<20x128xf32>
    %134 = tpu.matmul %131, %133, %cst_46 {dimension_numbers = #tpu.dot_dimension_numbers<[1], [0], [0], [1], [0, 0, 1, 1], [], []>} : vector<20x64xbf16>, vector<64x128xbf16>, vector<20x128xf32> -> vector<20x128xf32>
    %c0_47 = arith.constant 0 : index
    %c0_48 = arith.constant 0 : index
    %135 = vector.load %arg10[%c0_47, %c0_48] : memref<1x128xf32, #tpu.memory_space<vmem>>, vector<1x128xf32>
    %136 = vector.broadcast %135 : vector<1x128xf32> to vector<20x128xf32>
    %137 = arith.addf %134, %136 : vector<20x128xf32>
    %c0_49 = arith.constant 0 : index
    %c0_50 = arith.constant 0 : index
    %138 = vector.load %arg9[%c0_49, %c0_50] : memref<32x128xf32, #tpu.memory_space<vmem>>, vector<32x128xf32>
    %139 = arith.truncf %138 : vector<32x128xf32> to vector<32x128xbf16>
    %cst_51 = arith.constant 0.000000e+00 : f32
    %140 = vector.broadcast %cst_51 : f32 to vector<2x32xf32>
    %cst_52 = arith.constant 0.000000e+00 : f32
    %141 = vector.broadcast %cst_52 : f32 to vector<2x32xf32>
    %142 = vector.extract_strided_slice %137 {offsets = [0, 0], sizes = [2, 128], strides = [1, 1]} : vector<20x128xf32> to vector<2x128xf32>
    %143 = arith.truncf %140 : vector<2x32xf32> to vector<2x32xbf16>
    %cst_53 = arith.constant dense<0.000000e+00> : vector<2x128xf32>
    %144 = tpu.matmul %143, %139, %cst_53 {dimension_numbers = #tpu.dot_dimension_numbers<[1], [0], [0], [1], [0, 0, 1, 1], [], []>} : vector<2x32xbf16>, vector<32x128xbf16>, vector<2x128xf32> -> vector<2x128xf32>
    %145 = arith.addf %142, %144 : vector<2x128xf32>
    %146 = vector.extract_strided_slice %145 {offsets = [0, 0], sizes = [2, 32], strides = [1, 1]} : vector<2x128xf32> to vector<2x32xf32>
    %cst_54 = arith.constant 5.000000e-01 : f32
    %147 = vector.broadcast %cst_54 : f32 to vector<2x32xf32>
    %148 = arith.mulf %147, %146 : vector<2x32xf32>
    %149 = math.tanh %148 : vector<2x32xf32>
    %cst_55 = arith.constant 5.000000e-01 : f32
    %150 = vector.broadcast %cst_55 : f32 to vector<2x32xf32>
    %151 = arith.mulf %150, %149 : vector<2x32xf32>
    %cst_56 = arith.constant 5.000000e-01 : f32
    %152 = vector.broadcast %cst_56 : f32 to vector<2x32xf32>
    %153 = arith.addf %151, %152 : vector<2x32xf32>
    %154 = vector.extract_strided_slice %145 {offsets = [0, 32], sizes = [2, 32], strides = [1, 1]} : vector<2x128xf32> to vector<2x32xf32>
    %cst_57 = arith.constant 5.000000e-01 : f32
    %155 = vector.broadcast %cst_57 : f32 to vector<2x32xf32>
    %156 = arith.mulf %155, %154 : vector<2x32xf32>
    %157 = math.tanh %156 : vector<2x32xf32>
    %cst_58 = arith.constant 5.000000e-01 : f32
    %158 = vector.broadcast %cst_58 : f32 to vector<2x32xf32>
    %159 = arith.mulf %158, %157 : vector<2x32xf32>
    %cst_59 = arith.constant 5.000000e-01 : f32
    %160 = vector.broadcast %cst_59 : f32 to vector<2x32xf32>
    %161 = arith.addf %159, %160 : vector<2x32xf32>
    %162 = vector.extract_strided_slice %145 {offsets = [0, 64], sizes = [2, 32], strides = [1, 1]} : vector<2x128xf32> to vector<2x32xf32>
    %163 = math.tanh %162 : vector<2x32xf32>
    %164 = vector.extract_strided_slice %145 {offsets = [0, 96], sizes = [2, 32], strides = [1, 1]} : vector<2x128xf32> to vector<2x32xf32>
    %cst_60 = arith.constant 5.000000e-01 : f32
    %165 = vector.broadcast %cst_60 : f32 to vector<2x32xf32>
    %166 = arith.mulf %165, %164 : vector<2x32xf32>
    %167 = math.tanh %166 : vector<2x32xf32>
    %cst_61 = arith.constant 5.000000e-01 : f32
    %168 = vector.broadcast %cst_61 : f32 to vector<2x32xf32>
    %169 = arith.mulf %168, %167 : vector<2x32xf32>
    %cst_62 = arith.constant 5.000000e-01 : f32
    %170 = vector.broadcast %cst_62 : f32 to vector<2x32xf32>
    %171 = arith.addf %169, %170 : vector<2x32xf32>
    %172 = arith.mulf %161, %141 : vector<2x32xf32>
    %173 = arith.mulf %153, %163 : vector<2x32xf32>
    %174 = arith.addf %172, %173 : vector<2x32xf32>
    %175 = math.tanh %174 : vector<2x32xf32>
    %176 = arith.mulf %171, %175 : vector<2x32xf32>
    %177 = vector.extract_strided_slice %137 {offsets = [2, 0], sizes = [2, 128], strides = [1, 1]} : vector<20x128xf32> to vector<2x128xf32>
    %178 = arith.truncf %176 : vector<2x32xf32> to vector<2x32xbf16>
    %cst_63 = arith.constant dense<0.000000e+00> : vector<2x128xf32>
    %179 = tpu.matmul %178, %139, %cst_63 {dimension_numbers = #tpu.dot_dimension_numbers<[1], [0], [0], [1], [0, 0, 1, 1], [], []>} : vector<2x32xbf16>, vector<32x128xbf16>, vector<2x128xf32> -> vector<2x128xf32>
    %180 = arith.addf %177, %179 : vector<2x128xf32>
    %181 = vector.extract_strided_slice %180 {offsets = [0, 0], sizes = [2, 32], strides = [1, 1]} : vector<2x128xf32> to vector<2x32xf32>
    %cst_64 = arith.constant 5.000000e-01 : f32
    %182 = vector.broadcast %cst_64 : f32 to vector<2x32xf32>
    %183 = arith.mulf %182, %181 : vector<2x32xf32>
    %184 = math.tanh %183 : vector<2x32xf32>
    %cst_65 = arith.constant 5.000000e-01 : f32
    %185 = vector.broadcast %cst_65 : f32 to vector<2x32xf32>
    %186 = arith.mulf %185, %184 : vector<2x32xf32>
    %cst_66 = arith.constant 5.000000e-01 : f32
    %187 = vector.broadcast %cst_66 : f32 to vector<2x32xf32>
    %188 = arith.addf %186, %187 : vector<2x32xf32>
    %189 = vector.extract_strided_slice %180 {offsets = [0, 32], sizes = [2, 32], strides = [1, 1]} : vector<2x128xf32> to vector<2x32xf32>
    %cst_67 = arith.constant 5.000000e-01 : f32
    %190 = vector.broadcast %cst_67 : f32 to vector<2x32xf32>
    %191 = arith.mulf %190, %189 : vector<2x32xf32>
    %192 = math.tanh %191 : vector<2x32xf32>
    %cst_68 = arith.constant 5.000000e-01 : f32
    %193 = vector.broadcast %cst_68 : f32 to vector<2x32xf32>
    %194 = arith.mulf %193, %192 : vector<2x32xf32>
    %cst_69 = arith.constant 5.000000e-01 : f32
    %195 = vector.broadcast %cst_69 : f32 to vector<2x32xf32>
    %196 = arith.addf %194, %195 : vector<2x32xf32>
    %197 = vector.extract_strided_slice %180 {offsets = [0, 64], sizes = [2, 32], strides = [1, 1]} : vector<2x128xf32> to vector<2x32xf32>
    %198 = math.tanh %197 : vector<2x32xf32>
    %199 = vector.extract_strided_slice %180 {offsets = [0, 96], sizes = [2, 32], strides = [1, 1]} : vector<2x128xf32> to vector<2x32xf32>
    %cst_70 = arith.constant 5.000000e-01 : f32
    %200 = vector.broadcast %cst_70 : f32 to vector<2x32xf32>
    %201 = arith.mulf %200, %199 : vector<2x32xf32>
    %202 = math.tanh %201 : vector<2x32xf32>
    %cst_71 = arith.constant 5.000000e-01 : f32
    %203 = vector.broadcast %cst_71 : f32 to vector<2x32xf32>
    %204 = arith.mulf %203, %202 : vector<2x32xf32>
    %cst_72 = arith.constant 5.000000e-01 : f32
    %205 = vector.broadcast %cst_72 : f32 to vector<2x32xf32>
    %206 = arith.addf %204, %205 : vector<2x32xf32>
    %207 = arith.mulf %196, %174 : vector<2x32xf32>
    %208 = arith.mulf %188, %198 : vector<2x32xf32>
    %209 = arith.addf %207, %208 : vector<2x32xf32>
    %210 = math.tanh %209 : vector<2x32xf32>
    %211 = arith.mulf %206, %210 : vector<2x32xf32>
    %212 = vector.extract_strided_slice %137 {offsets = [4, 0], sizes = [2, 128], strides = [1, 1]} : vector<20x128xf32> to vector<2x128xf32>
    %213 = arith.truncf %211 : vector<2x32xf32> to vector<2x32xbf16>
    %cst_73 = arith.constant dense<0.000000e+00> : vector<2x128xf32>
    %214 = tpu.matmul %213, %139, %cst_73 {dimension_numbers = #tpu.dot_dimension_numbers<[1], [0], [0], [1], [0, 0, 1, 1], [], []>} : vector<2x32xbf16>, vector<32x128xbf16>, vector<2x128xf32> -> vector<2x128xf32>
    %215 = arith.addf %212, %214 : vector<2x128xf32>
    %216 = vector.extract_strided_slice %215 {offsets = [0, 0], sizes = [2, 32], strides = [1, 1]} : vector<2x128xf32> to vector<2x32xf32>
    %cst_74 = arith.constant 5.000000e-01 : f32
    %217 = vector.broadcast %cst_74 : f32 to vector<2x32xf32>
    %218 = arith.mulf %217, %216 : vector<2x32xf32>
    %219 = math.tanh %218 : vector<2x32xf32>
    %cst_75 = arith.constant 5.000000e-01 : f32
    %220 = vector.broadcast %cst_75 : f32 to vector<2x32xf32>
    %221 = arith.mulf %220, %219 : vector<2x32xf32>
    %cst_76 = arith.constant 5.000000e-01 : f32
    %222 = vector.broadcast %cst_76 : f32 to vector<2x32xf32>
    %223 = arith.addf %221, %222 : vector<2x32xf32>
    %224 = vector.extract_strided_slice %215 {offsets = [0, 32], sizes = [2, 32], strides = [1, 1]} : vector<2x128xf32> to vector<2x32xf32>
    %cst_77 = arith.constant 5.000000e-01 : f32
    %225 = vector.broadcast %cst_77 : f32 to vector<2x32xf32>
    %226 = arith.mulf %225, %224 : vector<2x32xf32>
    %227 = math.tanh %226 : vector<2x32xf32>
    %cst_78 = arith.constant 5.000000e-01 : f32
    %228 = vector.broadcast %cst_78 : f32 to vector<2x32xf32>
    %229 = arith.mulf %228, %227 : vector<2x32xf32>
    %cst_79 = arith.constant 5.000000e-01 : f32
    %230 = vector.broadcast %cst_79 : f32 to vector<2x32xf32>
    %231 = arith.addf %229, %230 : vector<2x32xf32>
    %232 = vector.extract_strided_slice %215 {offsets = [0, 64], sizes = [2, 32], strides = [1, 1]} : vector<2x128xf32> to vector<2x32xf32>
    %233 = math.tanh %232 : vector<2x32xf32>
    %234 = vector.extract_strided_slice %215 {offsets = [0, 96], sizes = [2, 32], strides = [1, 1]} : vector<2x128xf32> to vector<2x32xf32>
    %cst_80 = arith.constant 5.000000e-01 : f32
    %235 = vector.broadcast %cst_80 : f32 to vector<2x32xf32>
    %236 = arith.mulf %235, %234 : vector<2x32xf32>
    %237 = math.tanh %236 : vector<2x32xf32>
    %cst_81 = arith.constant 5.000000e-01 : f32
    %238 = vector.broadcast %cst_81 : f32 to vector<2x32xf32>
    %239 = arith.mulf %238, %237 : vector<2x32xf32>
    %cst_82 = arith.constant 5.000000e-01 : f32
    %240 = vector.broadcast %cst_82 : f32 to vector<2x32xf32>
    %241 = arith.addf %239, %240 : vector<2x32xf32>
    %242 = arith.mulf %231, %209 : vector<2x32xf32>
    %243 = arith.mulf %223, %233 : vector<2x32xf32>
    %244 = arith.addf %242, %243 : vector<2x32xf32>
    %245 = math.tanh %244 : vector<2x32xf32>
    %246 = arith.mulf %241, %245 : vector<2x32xf32>
    %247 = vector.extract_strided_slice %137 {offsets = [6, 0], sizes = [2, 128], strides = [1, 1]} : vector<20x128xf32> to vector<2x128xf32>
    %248 = arith.truncf %246 : vector<2x32xf32> to vector<2x32xbf16>
    %cst_83 = arith.constant dense<0.000000e+00> : vector<2x128xf32>
    %249 = tpu.matmul %248, %139, %cst_83 {dimension_numbers = #tpu.dot_dimension_numbers<[1], [0], [0], [1], [0, 0, 1, 1], [], []>} : vector<2x32xbf16>, vector<32x128xbf16>, vector<2x128xf32> -> vector<2x128xf32>
    %250 = arith.addf %247, %249 : vector<2x128xf32>
    %251 = vector.extract_strided_slice %250 {offsets = [0, 0], sizes = [2, 32], strides = [1, 1]} : vector<2x128xf32> to vector<2x32xf32>
    %cst_84 = arith.constant 5.000000e-01 : f32
    %252 = vector.broadcast %cst_84 : f32 to vector<2x32xf32>
    %253 = arith.mulf %252, %251 : vector<2x32xf32>
    %254 = math.tanh %253 : vector<2x32xf32>
    %cst_85 = arith.constant 5.000000e-01 : f32
    %255 = vector.broadcast %cst_85 : f32 to vector<2x32xf32>
    %256 = arith.mulf %255, %254 : vector<2x32xf32>
    %cst_86 = arith.constant 5.000000e-01 : f32
    %257 = vector.broadcast %cst_86 : f32 to vector<2x32xf32>
    %258 = arith.addf %256, %257 : vector<2x32xf32>
    %259 = vector.extract_strided_slice %250 {offsets = [0, 32], sizes = [2, 32], strides = [1, 1]} : vector<2x128xf32> to vector<2x32xf32>
    %cst_87 = arith.constant 5.000000e-01 : f32
    %260 = vector.broadcast %cst_87 : f32 to vector<2x32xf32>
    %261 = arith.mulf %260, %259 : vector<2x32xf32>
    %262 = math.tanh %261 : vector<2x32xf32>
    %cst_88 = arith.constant 5.000000e-01 : f32
    %263 = vector.broadcast %cst_88 : f32 to vector<2x32xf32>
    %264 = arith.mulf %263, %262 : vector<2x32xf32>
    %cst_89 = arith.constant 5.000000e-01 : f32
    %265 = vector.broadcast %cst_89 : f32 to vector<2x32xf32>
    %266 = arith.addf %264, %265 : vector<2x32xf32>
    %267 = vector.extract_strided_slice %250 {offsets = [0, 64], sizes = [2, 32], strides = [1, 1]} : vector<2x128xf32> to vector<2x32xf32>
    %268 = math.tanh %267 : vector<2x32xf32>
    %269 = vector.extract_strided_slice %250 {offsets = [0, 96], sizes = [2, 32], strides = [1, 1]} : vector<2x128xf32> to vector<2x32xf32>
    %cst_90 = arith.constant 5.000000e-01 : f32
    %270 = vector.broadcast %cst_90 : f32 to vector<2x32xf32>
    %271 = arith.mulf %270, %269 : vector<2x32xf32>
    %272 = math.tanh %271 : vector<2x32xf32>
    %cst_91 = arith.constant 5.000000e-01 : f32
    %273 = vector.broadcast %cst_91 : f32 to vector<2x32xf32>
    %274 = arith.mulf %273, %272 : vector<2x32xf32>
    %cst_92 = arith.constant 5.000000e-01 : f32
    %275 = vector.broadcast %cst_92 : f32 to vector<2x32xf32>
    %276 = arith.addf %274, %275 : vector<2x32xf32>
    %277 = arith.mulf %266, %244 : vector<2x32xf32>
    %278 = arith.mulf %258, %268 : vector<2x32xf32>
    %279 = arith.addf %277, %278 : vector<2x32xf32>
    %280 = math.tanh %279 : vector<2x32xf32>
    %281 = arith.mulf %276, %280 : vector<2x32xf32>
    %282 = vector.extract_strided_slice %137 {offsets = [8, 0], sizes = [2, 128], strides = [1, 1]} : vector<20x128xf32> to vector<2x128xf32>
    %283 = arith.truncf %281 : vector<2x32xf32> to vector<2x32xbf16>
    %cst_93 = arith.constant dense<0.000000e+00> : vector<2x128xf32>
    %284 = tpu.matmul %283, %139, %cst_93 {dimension_numbers = #tpu.dot_dimension_numbers<[1], [0], [0], [1], [0, 0, 1, 1], [], []>} : vector<2x32xbf16>, vector<32x128xbf16>, vector<2x128xf32> -> vector<2x128xf32>
    %285 = arith.addf %282, %284 : vector<2x128xf32>
    %286 = vector.extract_strided_slice %285 {offsets = [0, 0], sizes = [2, 32], strides = [1, 1]} : vector<2x128xf32> to vector<2x32xf32>
    %cst_94 = arith.constant 5.000000e-01 : f32
    %287 = vector.broadcast %cst_94 : f32 to vector<2x32xf32>
    %288 = arith.mulf %287, %286 : vector<2x32xf32>
    %289 = math.tanh %288 : vector<2x32xf32>
    %cst_95 = arith.constant 5.000000e-01 : f32
    %290 = vector.broadcast %cst_95 : f32 to vector<2x32xf32>
    %291 = arith.mulf %290, %289 : vector<2x32xf32>
    %cst_96 = arith.constant 5.000000e-01 : f32
    %292 = vector.broadcast %cst_96 : f32 to vector<2x32xf32>
    %293 = arith.addf %291, %292 : vector<2x32xf32>
    %294 = vector.extract_strided_slice %285 {offsets = [0, 32], sizes = [2, 32], strides = [1, 1]} : vector<2x128xf32> to vector<2x32xf32>
    %cst_97 = arith.constant 5.000000e-01 : f32
    %295 = vector.broadcast %cst_97 : f32 to vector<2x32xf32>
    %296 = arith.mulf %295, %294 : vector<2x32xf32>
    %297 = math.tanh %296 : vector<2x32xf32>
    %cst_98 = arith.constant 5.000000e-01 : f32
    %298 = vector.broadcast %cst_98 : f32 to vector<2x32xf32>
    %299 = arith.mulf %298, %297 : vector<2x32xf32>
    %cst_99 = arith.constant 5.000000e-01 : f32
    %300 = vector.broadcast %cst_99 : f32 to vector<2x32xf32>
    %301 = arith.addf %299, %300 : vector<2x32xf32>
    %302 = vector.extract_strided_slice %285 {offsets = [0, 64], sizes = [2, 32], strides = [1, 1]} : vector<2x128xf32> to vector<2x32xf32>
    %303 = math.tanh %302 : vector<2x32xf32>
    %304 = vector.extract_strided_slice %285 {offsets = [0, 96], sizes = [2, 32], strides = [1, 1]} : vector<2x128xf32> to vector<2x32xf32>
    %cst_100 = arith.constant 5.000000e-01 : f32
    %305 = vector.broadcast %cst_100 : f32 to vector<2x32xf32>
    %306 = arith.mulf %305, %304 : vector<2x32xf32>
    %307 = math.tanh %306 : vector<2x32xf32>
    %cst_101 = arith.constant 5.000000e-01 : f32
    %308 = vector.broadcast %cst_101 : f32 to vector<2x32xf32>
    %309 = arith.mulf %308, %307 : vector<2x32xf32>
    %cst_102 = arith.constant 5.000000e-01 : f32
    %310 = vector.broadcast %cst_102 : f32 to vector<2x32xf32>
    %311 = arith.addf %309, %310 : vector<2x32xf32>
    %312 = arith.mulf %301, %279 : vector<2x32xf32>
    %313 = arith.mulf %293, %303 : vector<2x32xf32>
    %314 = arith.addf %312, %313 : vector<2x32xf32>
    %315 = math.tanh %314 : vector<2x32xf32>
    %316 = arith.mulf %311, %315 : vector<2x32xf32>
    %317 = vector.extract_strided_slice %137 {offsets = [10, 0], sizes = [2, 128], strides = [1, 1]} : vector<20x128xf32> to vector<2x128xf32>
    %318 = arith.truncf %316 : vector<2x32xf32> to vector<2x32xbf16>
    %cst_103 = arith.constant dense<0.000000e+00> : vector<2x128xf32>
    %319 = tpu.matmul %318, %139, %cst_103 {dimension_numbers = #tpu.dot_dimension_numbers<[1], [0], [0], [1], [0, 0, 1, 1], [], []>} : vector<2x32xbf16>, vector<32x128xbf16>, vector<2x128xf32> -> vector<2x128xf32>
    %320 = arith.addf %317, %319 : vector<2x128xf32>
    %321 = vector.extract_strided_slice %320 {offsets = [0, 0], sizes = [2, 32], strides = [1, 1]} : vector<2x128xf32> to vector<2x32xf32>
    %cst_104 = arith.constant 5.000000e-01 : f32
    %322 = vector.broadcast %cst_104 : f32 to vector<2x32xf32>
    %323 = arith.mulf %322, %321 : vector<2x32xf32>
    %324 = math.tanh %323 : vector<2x32xf32>
    %cst_105 = arith.constant 5.000000e-01 : f32
    %325 = vector.broadcast %cst_105 : f32 to vector<2x32xf32>
    %326 = arith.mulf %325, %324 : vector<2x32xf32>
    %cst_106 = arith.constant 5.000000e-01 : f32
    %327 = vector.broadcast %cst_106 : f32 to vector<2x32xf32>
    %328 = arith.addf %326, %327 : vector<2x32xf32>
    %329 = vector.extract_strided_slice %320 {offsets = [0, 32], sizes = [2, 32], strides = [1, 1]} : vector<2x128xf32> to vector<2x32xf32>
    %cst_107 = arith.constant 5.000000e-01 : f32
    %330 = vector.broadcast %cst_107 : f32 to vector<2x32xf32>
    %331 = arith.mulf %330, %329 : vector<2x32xf32>
    %332 = math.tanh %331 : vector<2x32xf32>
    %cst_108 = arith.constant 5.000000e-01 : f32
    %333 = vector.broadcast %cst_108 : f32 to vector<2x32xf32>
    %334 = arith.mulf %333, %332 : vector<2x32xf32>
    %cst_109 = arith.constant 5.000000e-01 : f32
    %335 = vector.broadcast %cst_109 : f32 to vector<2x32xf32>
    %336 = arith.addf %334, %335 : vector<2x32xf32>
    %337 = vector.extract_strided_slice %320 {offsets = [0, 64], sizes = [2, 32], strides = [1, 1]} : vector<2x128xf32> to vector<2x32xf32>
    %338 = math.tanh %337 : vector<2x32xf32>
    %339 = vector.extract_strided_slice %320 {offsets = [0, 96], sizes = [2, 32], strides = [1, 1]} : vector<2x128xf32> to vector<2x32xf32>
    %cst_110 = arith.constant 5.000000e-01 : f32
    %340 = vector.broadcast %cst_110 : f32 to vector<2x32xf32>
    %341 = arith.mulf %340, %339 : vector<2x32xf32>
    %342 = math.tanh %341 : vector<2x32xf32>
    %cst_111 = arith.constant 5.000000e-01 : f32
    %343 = vector.broadcast %cst_111 : f32 to vector<2x32xf32>
    %344 = arith.mulf %343, %342 : vector<2x32xf32>
    %cst_112 = arith.constant 5.000000e-01 : f32
    %345 = vector.broadcast %cst_112 : f32 to vector<2x32xf32>
    %346 = arith.addf %344, %345 : vector<2x32xf32>
    %347 = arith.mulf %336, %314 : vector<2x32xf32>
    %348 = arith.mulf %328, %338 : vector<2x32xf32>
    %349 = arith.addf %347, %348 : vector<2x32xf32>
    %350 = math.tanh %349 : vector<2x32xf32>
    %351 = arith.mulf %346, %350 : vector<2x32xf32>
    %352 = vector.extract_strided_slice %137 {offsets = [12, 0], sizes = [2, 128], strides = [1, 1]} : vector<20x128xf32> to vector<2x128xf32>
    %353 = arith.truncf %351 : vector<2x32xf32> to vector<2x32xbf16>
    %cst_113 = arith.constant dense<0.000000e+00> : vector<2x128xf32>
    %354 = tpu.matmul %353, %139, %cst_113 {dimension_numbers = #tpu.dot_dimension_numbers<[1], [0], [0], [1], [0, 0, 1, 1], [], []>} : vector<2x32xbf16>, vector<32x128xbf16>, vector<2x128xf32> -> vector<2x128xf32>
    %355 = arith.addf %352, %354 : vector<2x128xf32>
    %356 = vector.extract_strided_slice %355 {offsets = [0, 0], sizes = [2, 32], strides = [1, 1]} : vector<2x128xf32> to vector<2x32xf32>
    %cst_114 = arith.constant 5.000000e-01 : f32
    %357 = vector.broadcast %cst_114 : f32 to vector<2x32xf32>
    %358 = arith.mulf %357, %356 : vector<2x32xf32>
    %359 = math.tanh %358 : vector<2x32xf32>
    %cst_115 = arith.constant 5.000000e-01 : f32
    %360 = vector.broadcast %cst_115 : f32 to vector<2x32xf32>
    %361 = arith.mulf %360, %359 : vector<2x32xf32>
    %cst_116 = arith.constant 5.000000e-01 : f32
    %362 = vector.broadcast %cst_116 : f32 to vector<2x32xf32>
    %363 = arith.addf %361, %362 : vector<2x32xf32>
    %364 = vector.extract_strided_slice %355 {offsets = [0, 32], sizes = [2, 32], strides = [1, 1]} : vector<2x128xf32> to vector<2x32xf32>
    %cst_117 = arith.constant 5.000000e-01 : f32
    %365 = vector.broadcast %cst_117 : f32 to vector<2x32xf32>
    %366 = arith.mulf %365, %364 : vector<2x32xf32>
    %367 = math.tanh %366 : vector<2x32xf32>
    %cst_118 = arith.constant 5.000000e-01 : f32
    %368 = vector.broadcast %cst_118 : f32 to vector<2x32xf32>
    %369 = arith.mulf %368, %367 : vector<2x32xf32>
    %cst_119 = arith.constant 5.000000e-01 : f32
    %370 = vector.broadcast %cst_119 : f32 to vector<2x32xf32>
    %371 = arith.addf %369, %370 : vector<2x32xf32>
    %372 = vector.extract_strided_slice %355 {offsets = [0, 64], sizes = [2, 32], strides = [1, 1]} : vector<2x128xf32> to vector<2x32xf32>
    %373 = math.tanh %372 : vector<2x32xf32>
    %374 = vector.extract_strided_slice %355 {offsets = [0, 96], sizes = [2, 32], strides = [1, 1]} : vector<2x128xf32> to vector<2x32xf32>
    %cst_120 = arith.constant 5.000000e-01 : f32
    %375 = vector.broadcast %cst_120 : f32 to vector<2x32xf32>
    %376 = arith.mulf %375, %374 : vector<2x32xf32>
    %377 = math.tanh %376 : vector<2x32xf32>
    %cst_121 = arith.constant 5.000000e-01 : f32
    %378 = vector.broadcast %cst_121 : f32 to vector<2x32xf32>
    %379 = arith.mulf %378, %377 : vector<2x32xf32>
    %cst_122 = arith.constant 5.000000e-01 : f32
    %380 = vector.broadcast %cst_122 : f32 to vector<2x32xf32>
    %381 = arith.addf %379, %380 : vector<2x32xf32>
    %382 = arith.mulf %371, %349 : vector<2x32xf32>
    %383 = arith.mulf %363, %373 : vector<2x32xf32>
    %384 = arith.addf %382, %383 : vector<2x32xf32>
    %385 = math.tanh %384 : vector<2x32xf32>
    %386 = arith.mulf %381, %385 : vector<2x32xf32>
    %387 = vector.extract_strided_slice %137 {offsets = [14, 0], sizes = [2, 128], strides = [1, 1]} : vector<20x128xf32> to vector<2x128xf32>
    %388 = arith.truncf %386 : vector<2x32xf32> to vector<2x32xbf16>
    %cst_123 = arith.constant dense<0.000000e+00> : vector<2x128xf32>
    %389 = tpu.matmul %388, %139, %cst_123 {dimension_numbers = #tpu.dot_dimension_numbers<[1], [0], [0], [1], [0, 0, 1, 1], [], []>} : vector<2x32xbf16>, vector<32x128xbf16>, vector<2x128xf32> -> vector<2x128xf32>
    %390 = arith.addf %387, %389 : vector<2x128xf32>
    %391 = vector.extract_strided_slice %390 {offsets = [0, 0], sizes = [2, 32], strides = [1, 1]} : vector<2x128xf32> to vector<2x32xf32>
    %cst_124 = arith.constant 5.000000e-01 : f32
    %392 = vector.broadcast %cst_124 : f32 to vector<2x32xf32>
    %393 = arith.mulf %392, %391 : vector<2x32xf32>
    %394 = math.tanh %393 : vector<2x32xf32>
    %cst_125 = arith.constant 5.000000e-01 : f32
    %395 = vector.broadcast %cst_125 : f32 to vector<2x32xf32>
    %396 = arith.mulf %395, %394 : vector<2x32xf32>
    %cst_126 = arith.constant 5.000000e-01 : f32
    %397 = vector.broadcast %cst_126 : f32 to vector<2x32xf32>
    %398 = arith.addf %396, %397 : vector<2x32xf32>
    %399 = vector.extract_strided_slice %390 {offsets = [0, 32], sizes = [2, 32], strides = [1, 1]} : vector<2x128xf32> to vector<2x32xf32>
    %cst_127 = arith.constant 5.000000e-01 : f32
    %400 = vector.broadcast %cst_127 : f32 to vector<2x32xf32>
    %401 = arith.mulf %400, %399 : vector<2x32xf32>
    %402 = math.tanh %401 : vector<2x32xf32>
    %cst_128 = arith.constant 5.000000e-01 : f32
    %403 = vector.broadcast %cst_128 : f32 to vector<2x32xf32>
    %404 = arith.mulf %403, %402 : vector<2x32xf32>
    %cst_129 = arith.constant 5.000000e-01 : f32
    %405 = vector.broadcast %cst_129 : f32 to vector<2x32xf32>
    %406 = arith.addf %404, %405 : vector<2x32xf32>
    %407 = vector.extract_strided_slice %390 {offsets = [0, 64], sizes = [2, 32], strides = [1, 1]} : vector<2x128xf32> to vector<2x32xf32>
    %408 = math.tanh %407 : vector<2x32xf32>
    %409 = vector.extract_strided_slice %390 {offsets = [0, 96], sizes = [2, 32], strides = [1, 1]} : vector<2x128xf32> to vector<2x32xf32>
    %cst_130 = arith.constant 5.000000e-01 : f32
    %410 = vector.broadcast %cst_130 : f32 to vector<2x32xf32>
    %411 = arith.mulf %410, %409 : vector<2x32xf32>
    %412 = math.tanh %411 : vector<2x32xf32>
    %cst_131 = arith.constant 5.000000e-01 : f32
    %413 = vector.broadcast %cst_131 : f32 to vector<2x32xf32>
    %414 = arith.mulf %413, %412 : vector<2x32xf32>
    %cst_132 = arith.constant 5.000000e-01 : f32
    %415 = vector.broadcast %cst_132 : f32 to vector<2x32xf32>
    %416 = arith.addf %414, %415 : vector<2x32xf32>
    %417 = arith.mulf %406, %384 : vector<2x32xf32>
    %418 = arith.mulf %398, %408 : vector<2x32xf32>
    %419 = arith.addf %417, %418 : vector<2x32xf32>
    %420 = math.tanh %419 : vector<2x32xf32>
    %421 = arith.mulf %416, %420 : vector<2x32xf32>
    %422 = vector.extract_strided_slice %137 {offsets = [16, 0], sizes = [2, 128], strides = [1, 1]} : vector<20x128xf32> to vector<2x128xf32>
    %423 = arith.truncf %421 : vector<2x32xf32> to vector<2x32xbf16>
    %cst_133 = arith.constant dense<0.000000e+00> : vector<2x128xf32>
    %424 = tpu.matmul %423, %139, %cst_133 {dimension_numbers = #tpu.dot_dimension_numbers<[1], [0], [0], [1], [0, 0, 1, 1], [], []>} : vector<2x32xbf16>, vector<32x128xbf16>, vector<2x128xf32> -> vector<2x128xf32>
    %425 = arith.addf %422, %424 : vector<2x128xf32>
    %426 = vector.extract_strided_slice %425 {offsets = [0, 0], sizes = [2, 32], strides = [1, 1]} : vector<2x128xf32> to vector<2x32xf32>
    %cst_134 = arith.constant 5.000000e-01 : f32
    %427 = vector.broadcast %cst_134 : f32 to vector<2x32xf32>
    %428 = arith.mulf %427, %426 : vector<2x32xf32>
    %429 = math.tanh %428 : vector<2x32xf32>
    %cst_135 = arith.constant 5.000000e-01 : f32
    %430 = vector.broadcast %cst_135 : f32 to vector<2x32xf32>
    %431 = arith.mulf %430, %429 : vector<2x32xf32>
    %cst_136 = arith.constant 5.000000e-01 : f32
    %432 = vector.broadcast %cst_136 : f32 to vector<2x32xf32>
    %433 = arith.addf %431, %432 : vector<2x32xf32>
    %434 = vector.extract_strided_slice %425 {offsets = [0, 32], sizes = [2, 32], strides = [1, 1]} : vector<2x128xf32> to vector<2x32xf32>
    %cst_137 = arith.constant 5.000000e-01 : f32
    %435 = vector.broadcast %cst_137 : f32 to vector<2x32xf32>
    %436 = arith.mulf %435, %434 : vector<2x32xf32>
    %437 = math.tanh %436 : vector<2x32xf32>
    %cst_138 = arith.constant 5.000000e-01 : f32
    %438 = vector.broadcast %cst_138 : f32 to vector<2x32xf32>
    %439 = arith.mulf %438, %437 : vector<2x32xf32>
    %cst_139 = arith.constant 5.000000e-01 : f32
    %440 = vector.broadcast %cst_139 : f32 to vector<2x32xf32>
    %441 = arith.addf %439, %440 : vector<2x32xf32>
    %442 = vector.extract_strided_slice %425 {offsets = [0, 64], sizes = [2, 32], strides = [1, 1]} : vector<2x128xf32> to vector<2x32xf32>
    %443 = math.tanh %442 : vector<2x32xf32>
    %444 = vector.extract_strided_slice %425 {offsets = [0, 96], sizes = [2, 32], strides = [1, 1]} : vector<2x128xf32> to vector<2x32xf32>
    %cst_140 = arith.constant 5.000000e-01 : f32
    %445 = vector.broadcast %cst_140 : f32 to vector<2x32xf32>
    %446 = arith.mulf %445, %444 : vector<2x32xf32>
    %447 = math.tanh %446 : vector<2x32xf32>
    %cst_141 = arith.constant 5.000000e-01 : f32
    %448 = vector.broadcast %cst_141 : f32 to vector<2x32xf32>
    %449 = arith.mulf %448, %447 : vector<2x32xf32>
    %cst_142 = arith.constant 5.000000e-01 : f32
    %450 = vector.broadcast %cst_142 : f32 to vector<2x32xf32>
    %451 = arith.addf %449, %450 : vector<2x32xf32>
    %452 = arith.mulf %441, %419 : vector<2x32xf32>
    %453 = arith.mulf %433, %443 : vector<2x32xf32>
    %454 = arith.addf %452, %453 : vector<2x32xf32>
    %455 = math.tanh %454 : vector<2x32xf32>
    %456 = arith.mulf %451, %455 : vector<2x32xf32>
    %457 = vector.extract_strided_slice %137 {offsets = [18, 0], sizes = [2, 128], strides = [1, 1]} : vector<20x128xf32> to vector<2x128xf32>
    %458 = arith.truncf %456 : vector<2x32xf32> to vector<2x32xbf16>
    %cst_143 = arith.constant dense<0.000000e+00> : vector<2x128xf32>
    %459 = tpu.matmul %458, %139, %cst_143 {dimension_numbers = #tpu.dot_dimension_numbers<[1], [0], [0], [1], [0, 0, 1, 1], [], []>} : vector<2x32xbf16>, vector<32x128xbf16>, vector<2x128xf32> -> vector<2x128xf32>
    %460 = arith.addf %457, %459 : vector<2x128xf32>
    %461 = vector.extract_strided_slice %460 {offsets = [0, 0], sizes = [2, 32], strides = [1, 1]} : vector<2x128xf32> to vector<2x32xf32>
    %cst_144 = arith.constant 5.000000e-01 : f32
    %462 = vector.broadcast %cst_144 : f32 to vector<2x32xf32>
    %463 = arith.mulf %462, %461 : vector<2x32xf32>
    %464 = math.tanh %463 : vector<2x32xf32>
    %cst_145 = arith.constant 5.000000e-01 : f32
    %465 = vector.broadcast %cst_145 : f32 to vector<2x32xf32>
    %466 = arith.mulf %465, %464 : vector<2x32xf32>
    %cst_146 = arith.constant 5.000000e-01 : f32
    %467 = vector.broadcast %cst_146 : f32 to vector<2x32xf32>
    %468 = arith.addf %466, %467 : vector<2x32xf32>
    %469 = vector.extract_strided_slice %460 {offsets = [0, 32], sizes = [2, 32], strides = [1, 1]} : vector<2x128xf32> to vector<2x32xf32>
    %cst_147 = arith.constant 5.000000e-01 : f32
    %470 = vector.broadcast %cst_147 : f32 to vector<2x32xf32>
    %471 = arith.mulf %470, %469 : vector<2x32xf32>
    %472 = math.tanh %471 : vector<2x32xf32>
    %cst_148 = arith.constant 5.000000e-01 : f32
    %473 = vector.broadcast %cst_148 : f32 to vector<2x32xf32>
    %474 = arith.mulf %473, %472 : vector<2x32xf32>
    %cst_149 = arith.constant 5.000000e-01 : f32
    %475 = vector.broadcast %cst_149 : f32 to vector<2x32xf32>
    %476 = arith.addf %474, %475 : vector<2x32xf32>
    %477 = vector.extract_strided_slice %460 {offsets = [0, 64], sizes = [2, 32], strides = [1, 1]} : vector<2x128xf32> to vector<2x32xf32>
    %478 = math.tanh %477 : vector<2x32xf32>
    %479 = vector.extract_strided_slice %460 {offsets = [0, 96], sizes = [2, 32], strides = [1, 1]} : vector<2x128xf32> to vector<2x32xf32>
    %cst_150 = arith.constant 5.000000e-01 : f32
    %480 = vector.broadcast %cst_150 : f32 to vector<2x32xf32>
    %481 = arith.mulf %480, %479 : vector<2x32xf32>
    %482 = math.tanh %481 : vector<2x32xf32>
    %cst_151 = arith.constant 5.000000e-01 : f32
    %483 = vector.broadcast %cst_151 : f32 to vector<2x32xf32>
    %484 = arith.mulf %483, %482 : vector<2x32xf32>
    %cst_152 = arith.constant 5.000000e-01 : f32
    %485 = vector.broadcast %cst_152 : f32 to vector<2x32xf32>
    %486 = arith.addf %484, %485 : vector<2x32xf32>
    %487 = arith.mulf %476, %454 : vector<2x32xf32>
    %488 = arith.mulf %468, %478 : vector<2x32xf32>
    %489 = arith.addf %487, %488 : vector<2x32xf32>
    %490 = math.tanh %489 : vector<2x32xf32>
    %491 = arith.mulf %486, %490 : vector<2x32xf32>
    %492 = tpu.concatenate %176, %211, %246, %281, %316, %351, %386, %421, %456, %491 in 0 : vector<2x32xf32>, vector<2x32xf32>, vector<2x32xf32>, vector<2x32xf32>, vector<2x32xf32>, vector<2x32xf32>, vector<2x32xf32>, vector<2x32xf32>, vector<2x32xf32>, vector<2x32xf32> -> vector<20x32xf32>
    %493 = arith.truncf %492 : vector<20x32xf32> to vector<20x32xbf16>
    %c0_153 = arith.constant 0 : index
    %c0_154 = arith.constant 0 : index
    %494 = vector.load %arg11[%c0_153, %c0_154] : memref<32x32xf32, #tpu.memory_space<vmem>>, vector<32x32xf32>
    %495 = arith.truncf %494 : vector<32x32xf32> to vector<32x32xbf16>
    %cst_155 = arith.constant dense<0.000000e+00> : vector<20x32xf32>
    %496 = tpu.matmul %493, %495, %cst_155 {dimension_numbers = #tpu.dot_dimension_numbers<[1], [0], [0], [1], [0, 0, 1, 1], [], []>} : vector<20x32xbf16>, vector<32x32xbf16>, vector<20x32xf32> -> vector<20x32xf32>
    %c0_156 = arith.constant 0 : index
    %c0_157 = arith.constant 0 : index
    %497 = vector.load %arg12[%c0_156, %c0_157] : memref<1x32xf32, #tpu.memory_space<vmem>>, vector<1x32xf32>
    %498 = vector.broadcast %497 : vector<1x32xf32> to vector<20x32xf32>
    %499 = arith.addf %496, %498 : vector<20x32xf32>
    %500 = arith.truncf %499 : vector<20x32xf32> to vector<20x32xbf16>
    %c0_158 = arith.constant 0 : index
    %c0_159 = arith.constant 0 : index
    %501 = vector.load %arg13[%c0_158, %c0_159] : memref<32x128xf32, #tpu.memory_space<vmem>>, vector<32x128xf32>
    %502 = arith.truncf %501 : vector<32x128xf32> to vector<32x128xbf16>
    %cst_160 = arith.constant dense<0.000000e+00> : vector<20x128xf32>
    %503 = tpu.matmul %500, %502, %cst_160 {dimension_numbers = #tpu.dot_dimension_numbers<[1], [0], [0], [1], [0, 0, 1, 1], [], []>} : vector<20x32xbf16>, vector<32x128xbf16>, vector<20x128xf32> -> vector<20x128xf32>
    %c0_161 = arith.constant 0 : index
    %c0_162 = arith.constant 0 : index
    %504 = vector.load %arg15[%c0_161, %c0_162] : memref<1x128xf32, #tpu.memory_space<vmem>>, vector<1x128xf32>
    %505 = vector.broadcast %504 : vector<1x128xf32> to vector<20x128xf32>
    %506 = arith.addf %503, %505 : vector<20x128xf32>
    %c0_163 = arith.constant 0 : index
    %c0_164 = arith.constant 0 : index
    %507 = vector.load %arg14[%c0_163, %c0_164] : memref<32x128xf32, #tpu.memory_space<vmem>>, vector<32x128xf32>
    %508 = arith.truncf %507 : vector<32x128xf32> to vector<32x128xbf16>
    %cst_165 = arith.constant 0.000000e+00 : f32
    %509 = vector.broadcast %cst_165 : f32 to vector<2x32xf32>
    %cst_166 = arith.constant 0.000000e+00 : f32
    %510 = vector.broadcast %cst_166 : f32 to vector<2x32xf32>
    %511 = vector.extract_strided_slice %506 {offsets = [0, 0], sizes = [2, 128], strides = [1, 1]} : vector<20x128xf32> to vector<2x128xf32>
    %512 = arith.truncf %509 : vector<2x32xf32> to vector<2x32xbf16>
    %cst_167 = arith.constant dense<0.000000e+00> : vector<2x128xf32>
    %513 = tpu.matmul %512, %508, %cst_167 {dimension_numbers = #tpu.dot_dimension_numbers<[1], [0], [0], [1], [0, 0, 1, 1], [], []>} : vector<2x32xbf16>, vector<32x128xbf16>, vector<2x128xf32> -> vector<2x128xf32>
    %514 = arith.addf %511, %513 : vector<2x128xf32>
    %515 = vector.extract_strided_slice %514 {offsets = [0, 0], sizes = [2, 32], strides = [1, 1]} : vector<2x128xf32> to vector<2x32xf32>
    %cst_168 = arith.constant 5.000000e-01 : f32
    %516 = vector.broadcast %cst_168 : f32 to vector<2x32xf32>
    %517 = arith.mulf %516, %515 : vector<2x32xf32>
    %518 = math.tanh %517 : vector<2x32xf32>
    %cst_169 = arith.constant 5.000000e-01 : f32
    %519 = vector.broadcast %cst_169 : f32 to vector<2x32xf32>
    %520 = arith.mulf %519, %518 : vector<2x32xf32>
    %cst_170 = arith.constant 5.000000e-01 : f32
    %521 = vector.broadcast %cst_170 : f32 to vector<2x32xf32>
    %522 = arith.addf %520, %521 : vector<2x32xf32>
    %523 = vector.extract_strided_slice %514 {offsets = [0, 32], sizes = [2, 32], strides = [1, 1]} : vector<2x128xf32> to vector<2x32xf32>
    %cst_171 = arith.constant 5.000000e-01 : f32
    %524 = vector.broadcast %cst_171 : f32 to vector<2x32xf32>
    %525 = arith.mulf %524, %523 : vector<2x32xf32>
    %526 = math.tanh %525 : vector<2x32xf32>
    %cst_172 = arith.constant 5.000000e-01 : f32
    %527 = vector.broadcast %cst_172 : f32 to vector<2x32xf32>
    %528 = arith.mulf %527, %526 : vector<2x32xf32>
    %cst_173 = arith.constant 5.000000e-01 : f32
    %529 = vector.broadcast %cst_173 : f32 to vector<2x32xf32>
    %530 = arith.addf %528, %529 : vector<2x32xf32>
    %531 = vector.extract_strided_slice %514 {offsets = [0, 64], sizes = [2, 32], strides = [1, 1]} : vector<2x128xf32> to vector<2x32xf32>
    %532 = math.tanh %531 : vector<2x32xf32>
    %533 = vector.extract_strided_slice %514 {offsets = [0, 96], sizes = [2, 32], strides = [1, 1]} : vector<2x128xf32> to vector<2x32xf32>
    %cst_174 = arith.constant 5.000000e-01 : f32
    %534 = vector.broadcast %cst_174 : f32 to vector<2x32xf32>
    %535 = arith.mulf %534, %533 : vector<2x32xf32>
    %536 = math.tanh %535 : vector<2x32xf32>
    %cst_175 = arith.constant 5.000000e-01 : f32
    %537 = vector.broadcast %cst_175 : f32 to vector<2x32xf32>
    %538 = arith.mulf %537, %536 : vector<2x32xf32>
    %cst_176 = arith.constant 5.000000e-01 : f32
    %539 = vector.broadcast %cst_176 : f32 to vector<2x32xf32>
    %540 = arith.addf %538, %539 : vector<2x32xf32>
    %541 = arith.mulf %530, %510 : vector<2x32xf32>
    %542 = arith.mulf %522, %532 : vector<2x32xf32>
    %543 = arith.addf %541, %542 : vector<2x32xf32>
    %544 = math.tanh %543 : vector<2x32xf32>
    %545 = arith.mulf %540, %544 : vector<2x32xf32>
    %546 = vector.extract_strided_slice %506 {offsets = [2, 0], sizes = [2, 128], strides = [1, 1]} : vector<20x128xf32> to vector<2x128xf32>
    %547 = arith.truncf %545 : vector<2x32xf32> to vector<2x32xbf16>
    %cst_177 = arith.constant dense<0.000000e+00> : vector<2x128xf32>
    %548 = tpu.matmul %547, %508, %cst_177 {dimension_numbers = #tpu.dot_dimension_numbers<[1], [0], [0], [1], [0, 0, 1, 1], [], []>} : vector<2x32xbf16>, vector<32x128xbf16>, vector<2x128xf32> -> vector<2x128xf32>
    %549 = arith.addf %546, %548 : vector<2x128xf32>
    %550 = vector.extract_strided_slice %549 {offsets = [0, 0], sizes = [2, 32], strides = [1, 1]} : vector<2x128xf32> to vector<2x32xf32>
    %cst_178 = arith.constant 5.000000e-01 : f32
    %551 = vector.broadcast %cst_178 : f32 to vector<2x32xf32>
    %552 = arith.mulf %551, %550 : vector<2x32xf32>
    %553 = math.tanh %552 : vector<2x32xf32>
    %cst_179 = arith.constant 5.000000e-01 : f32
    %554 = vector.broadcast %cst_179 : f32 to vector<2x32xf32>
    %555 = arith.mulf %554, %553 : vector<2x32xf32>
    %cst_180 = arith.constant 5.000000e-01 : f32
    %556 = vector.broadcast %cst_180 : f32 to vector<2x32xf32>
    %557 = arith.addf %555, %556 : vector<2x32xf32>
    %558 = vector.extract_strided_slice %549 {offsets = [0, 32], sizes = [2, 32], strides = [1, 1]} : vector<2x128xf32> to vector<2x32xf32>
    %cst_181 = arith.constant 5.000000e-01 : f32
    %559 = vector.broadcast %cst_181 : f32 to vector<2x32xf32>
    %560 = arith.mulf %559, %558 : vector<2x32xf32>
    %561 = math.tanh %560 : vector<2x32xf32>
    %cst_182 = arith.constant 5.000000e-01 : f32
    %562 = vector.broadcast %cst_182 : f32 to vector<2x32xf32>
    %563 = arith.mulf %562, %561 : vector<2x32xf32>
    %cst_183 = arith.constant 5.000000e-01 : f32
    %564 = vector.broadcast %cst_183 : f32 to vector<2x32xf32>
    %565 = arith.addf %563, %564 : vector<2x32xf32>
    %566 = vector.extract_strided_slice %549 {offsets = [0, 64], sizes = [2, 32], strides = [1, 1]} : vector<2x128xf32> to vector<2x32xf32>
    %567 = math.tanh %566 : vector<2x32xf32>
    %568 = vector.extract_strided_slice %549 {offsets = [0, 96], sizes = [2, 32], strides = [1, 1]} : vector<2x128xf32> to vector<2x32xf32>
    %cst_184 = arith.constant 5.000000e-01 : f32
    %569 = vector.broadcast %cst_184 : f32 to vector<2x32xf32>
    %570 = arith.mulf %569, %568 : vector<2x32xf32>
    %571 = math.tanh %570 : vector<2x32xf32>
    %cst_185 = arith.constant 5.000000e-01 : f32
    %572 = vector.broadcast %cst_185 : f32 to vector<2x32xf32>
    %573 = arith.mulf %572, %571 : vector<2x32xf32>
    %cst_186 = arith.constant 5.000000e-01 : f32
    %574 = vector.broadcast %cst_186 : f32 to vector<2x32xf32>
    %575 = arith.addf %573, %574 : vector<2x32xf32>
    %576 = arith.mulf %565, %543 : vector<2x32xf32>
    %577 = arith.mulf %557, %567 : vector<2x32xf32>
    %578 = arith.addf %576, %577 : vector<2x32xf32>
    %579 = math.tanh %578 : vector<2x32xf32>
    %580 = arith.mulf %575, %579 : vector<2x32xf32>
    %581 = vector.extract_strided_slice %506 {offsets = [4, 0], sizes = [2, 128], strides = [1, 1]} : vector<20x128xf32> to vector<2x128xf32>
    %582 = arith.truncf %580 : vector<2x32xf32> to vector<2x32xbf16>
    %cst_187 = arith.constant dense<0.000000e+00> : vector<2x128xf32>
    %583 = tpu.matmul %582, %508, %cst_187 {dimension_numbers = #tpu.dot_dimension_numbers<[1], [0], [0], [1], [0, 0, 1, 1], [], []>} : vector<2x32xbf16>, vector<32x128xbf16>, vector<2x128xf32> -> vector<2x128xf32>
    %584 = arith.addf %581, %583 : vector<2x128xf32>
    %585 = vector.extract_strided_slice %584 {offsets = [0, 0], sizes = [2, 32], strides = [1, 1]} : vector<2x128xf32> to vector<2x32xf32>
    %cst_188 = arith.constant 5.000000e-01 : f32
    %586 = vector.broadcast %cst_188 : f32 to vector<2x32xf32>
    %587 = arith.mulf %586, %585 : vector<2x32xf32>
    %588 = math.tanh %587 : vector<2x32xf32>
    %cst_189 = arith.constant 5.000000e-01 : f32
    %589 = vector.broadcast %cst_189 : f32 to vector<2x32xf32>
    %590 = arith.mulf %589, %588 : vector<2x32xf32>
    %cst_190 = arith.constant 5.000000e-01 : f32
    %591 = vector.broadcast %cst_190 : f32 to vector<2x32xf32>
    %592 = arith.addf %590, %591 : vector<2x32xf32>
    %593 = vector.extract_strided_slice %584 {offsets = [0, 32], sizes = [2, 32], strides = [1, 1]} : vector<2x128xf32> to vector<2x32xf32>
    %cst_191 = arith.constant 5.000000e-01 : f32
    %594 = vector.broadcast %cst_191 : f32 to vector<2x32xf32>
    %595 = arith.mulf %594, %593 : vector<2x32xf32>
    %596 = math.tanh %595 : vector<2x32xf32>
    %cst_192 = arith.constant 5.000000e-01 : f32
    %597 = vector.broadcast %cst_192 : f32 to vector<2x32xf32>
    %598 = arith.mulf %597, %596 : vector<2x32xf32>
    %cst_193 = arith.constant 5.000000e-01 : f32
    %599 = vector.broadcast %cst_193 : f32 to vector<2x32xf32>
    %600 = arith.addf %598, %599 : vector<2x32xf32>
    %601 = vector.extract_strided_slice %584 {offsets = [0, 64], sizes = [2, 32], strides = [1, 1]} : vector<2x128xf32> to vector<2x32xf32>
    %602 = math.tanh %601 : vector<2x32xf32>
    %603 = vector.extract_strided_slice %584 {offsets = [0, 96], sizes = [2, 32], strides = [1, 1]} : vector<2x128xf32> to vector<2x32xf32>
    %cst_194 = arith.constant 5.000000e-01 : f32
    %604 = vector.broadcast %cst_194 : f32 to vector<2x32xf32>
    %605 = arith.mulf %604, %603 : vector<2x32xf32>
    %606 = math.tanh %605 : vector<2x32xf32>
    %cst_195 = arith.constant 5.000000e-01 : f32
    %607 = vector.broadcast %cst_195 : f32 to vector<2x32xf32>
    %608 = arith.mulf %607, %606 : vector<2x32xf32>
    %cst_196 = arith.constant 5.000000e-01 : f32
    %609 = vector.broadcast %cst_196 : f32 to vector<2x32xf32>
    %610 = arith.addf %608, %609 : vector<2x32xf32>
    %611 = arith.mulf %600, %578 : vector<2x32xf32>
    %612 = arith.mulf %592, %602 : vector<2x32xf32>
    %613 = arith.addf %611, %612 : vector<2x32xf32>
    %614 = math.tanh %613 : vector<2x32xf32>
    %615 = arith.mulf %610, %614 : vector<2x32xf32>
    %616 = vector.extract_strided_slice %506 {offsets = [6, 0], sizes = [2, 128], strides = [1, 1]} : vector<20x128xf32> to vector<2x128xf32>
    %617 = arith.truncf %615 : vector<2x32xf32> to vector<2x32xbf16>
    %cst_197 = arith.constant dense<0.000000e+00> : vector<2x128xf32>
    %618 = tpu.matmul %617, %508, %cst_197 {dimension_numbers = #tpu.dot_dimension_numbers<[1], [0], [0], [1], [0, 0, 1, 1], [], []>} : vector<2x32xbf16>, vector<32x128xbf16>, vector<2x128xf32> -> vector<2x128xf32>
    %619 = arith.addf %616, %618 : vector<2x128xf32>
    %620 = vector.extract_strided_slice %619 {offsets = [0, 0], sizes = [2, 32], strides = [1, 1]} : vector<2x128xf32> to vector<2x32xf32>
    %cst_198 = arith.constant 5.000000e-01 : f32
    %621 = vector.broadcast %cst_198 : f32 to vector<2x32xf32>
    %622 = arith.mulf %621, %620 : vector<2x32xf32>
    %623 = math.tanh %622 : vector<2x32xf32>
    %cst_199 = arith.constant 5.000000e-01 : f32
    %624 = vector.broadcast %cst_199 : f32 to vector<2x32xf32>
    %625 = arith.mulf %624, %623 : vector<2x32xf32>
    %cst_200 = arith.constant 5.000000e-01 : f32
    %626 = vector.broadcast %cst_200 : f32 to vector<2x32xf32>
    %627 = arith.addf %625, %626 : vector<2x32xf32>
    %628 = vector.extract_strided_slice %619 {offsets = [0, 32], sizes = [2, 32], strides = [1, 1]} : vector<2x128xf32> to vector<2x32xf32>
    %cst_201 = arith.constant 5.000000e-01 : f32
    %629 = vector.broadcast %cst_201 : f32 to vector<2x32xf32>
    %630 = arith.mulf %629, %628 : vector<2x32xf32>
    %631 = math.tanh %630 : vector<2x32xf32>
    %cst_202 = arith.constant 5.000000e-01 : f32
    %632 = vector.broadcast %cst_202 : f32 to vector<2x32xf32>
    %633 = arith.mulf %632, %631 : vector<2x32xf32>
    %cst_203 = arith.constant 5.000000e-01 : f32
    %634 = vector.broadcast %cst_203 : f32 to vector<2x32xf32>
    %635 = arith.addf %633, %634 : vector<2x32xf32>
    %636 = vector.extract_strided_slice %619 {offsets = [0, 64], sizes = [2, 32], strides = [1, 1]} : vector<2x128xf32> to vector<2x32xf32>
    %637 = math.tanh %636 : vector<2x32xf32>
    %638 = vector.extract_strided_slice %619 {offsets = [0, 96], sizes = [2, 32], strides = [1, 1]} : vector<2x128xf32> to vector<2x32xf32>
    %cst_204 = arith.constant 5.000000e-01 : f32
    %639 = vector.broadcast %cst_204 : f32 to vector<2x32xf32>
    %640 = arith.mulf %639, %638 : vector<2x32xf32>
    %641 = math.tanh %640 : vector<2x32xf32>
    %cst_205 = arith.constant 5.000000e-01 : f32
    %642 = vector.broadcast %cst_205 : f32 to vector<2x32xf32>
    %643 = arith.mulf %642, %641 : vector<2x32xf32>
    %cst_206 = arith.constant 5.000000e-01 : f32
    %644 = vector.broadcast %cst_206 : f32 to vector<2x32xf32>
    %645 = arith.addf %643, %644 : vector<2x32xf32>
    %646 = arith.mulf %635, %613 : vector<2x32xf32>
    %647 = arith.mulf %627, %637 : vector<2x32xf32>
    %648 = arith.addf %646, %647 : vector<2x32xf32>
    %649 = math.tanh %648 : vector<2x32xf32>
    %650 = arith.mulf %645, %649 : vector<2x32xf32>
    %651 = vector.extract_strided_slice %506 {offsets = [8, 0], sizes = [2, 128], strides = [1, 1]} : vector<20x128xf32> to vector<2x128xf32>
    %652 = arith.truncf %650 : vector<2x32xf32> to vector<2x32xbf16>
    %cst_207 = arith.constant dense<0.000000e+00> : vector<2x128xf32>
    %653 = tpu.matmul %652, %508, %cst_207 {dimension_numbers = #tpu.dot_dimension_numbers<[1], [0], [0], [1], [0, 0, 1, 1], [], []>} : vector<2x32xbf16>, vector<32x128xbf16>, vector<2x128xf32> -> vector<2x128xf32>
    %654 = arith.addf %651, %653 : vector<2x128xf32>
    %655 = vector.extract_strided_slice %654 {offsets = [0, 0], sizes = [2, 32], strides = [1, 1]} : vector<2x128xf32> to vector<2x32xf32>
    %cst_208 = arith.constant 5.000000e-01 : f32
    %656 = vector.broadcast %cst_208 : f32 to vector<2x32xf32>
    %657 = arith.mulf %656, %655 : vector<2x32xf32>
    %658 = math.tanh %657 : vector<2x32xf32>
    %cst_209 = arith.constant 5.000000e-01 : f32
    %659 = vector.broadcast %cst_209 : f32 to vector<2x32xf32>
    %660 = arith.mulf %659, %658 : vector<2x32xf32>
    %cst_210 = arith.constant 5.000000e-01 : f32
    %661 = vector.broadcast %cst_210 : f32 to vector<2x32xf32>
    %662 = arith.addf %660, %661 : vector<2x32xf32>
    %663 = vector.extract_strided_slice %654 {offsets = [0, 32], sizes = [2, 32], strides = [1, 1]} : vector<2x128xf32> to vector<2x32xf32>
    %cst_211 = arith.constant 5.000000e-01 : f32
    %664 = vector.broadcast %cst_211 : f32 to vector<2x32xf32>
    %665 = arith.mulf %664, %663 : vector<2x32xf32>
    %666 = math.tanh %665 : vector<2x32xf32>
    %cst_212 = arith.constant 5.000000e-01 : f32
    %667 = vector.broadcast %cst_212 : f32 to vector<2x32xf32>
    %668 = arith.mulf %667, %666 : vector<2x32xf32>
    %cst_213 = arith.constant 5.000000e-01 : f32
    %669 = vector.broadcast %cst_213 : f32 to vector<2x32xf32>
    %670 = arith.addf %668, %669 : vector<2x32xf32>
    %671 = vector.extract_strided_slice %654 {offsets = [0, 64], sizes = [2, 32], strides = [1, 1]} : vector<2x128xf32> to vector<2x32xf32>
    %672 = math.tanh %671 : vector<2x32xf32>
    %673 = vector.extract_strided_slice %654 {offsets = [0, 96], sizes = [2, 32], strides = [1, 1]} : vector<2x128xf32> to vector<2x32xf32>
    %cst_214 = arith.constant 5.000000e-01 : f32
    %674 = vector.broadcast %cst_214 : f32 to vector<2x32xf32>
    %675 = arith.mulf %674, %673 : vector<2x32xf32>
    %676 = math.tanh %675 : vector<2x32xf32>
    %cst_215 = arith.constant 5.000000e-01 : f32
    %677 = vector.broadcast %cst_215 : f32 to vector<2x32xf32>
    %678 = arith.mulf %677, %676 : vector<2x32xf32>
    %cst_216 = arith.constant 5.000000e-01 : f32
    %679 = vector.broadcast %cst_216 : f32 to vector<2x32xf32>
    %680 = arith.addf %678, %679 : vector<2x32xf32>
    %681 = arith.mulf %670, %648 : vector<2x32xf32>
    %682 = arith.mulf %662, %672 : vector<2x32xf32>
    %683 = arith.addf %681, %682 : vector<2x32xf32>
    %684 = math.tanh %683 : vector<2x32xf32>
    %685 = arith.mulf %680, %684 : vector<2x32xf32>
    %686 = vector.extract_strided_slice %506 {offsets = [10, 0], sizes = [2, 128], strides = [1, 1]} : vector<20x128xf32> to vector<2x128xf32>
    %687 = arith.truncf %685 : vector<2x32xf32> to vector<2x32xbf16>
    %cst_217 = arith.constant dense<0.000000e+00> : vector<2x128xf32>
    %688 = tpu.matmul %687, %508, %cst_217 {dimension_numbers = #tpu.dot_dimension_numbers<[1], [0], [0], [1], [0, 0, 1, 1], [], []>} : vector<2x32xbf16>, vector<32x128xbf16>, vector<2x128xf32> -> vector<2x128xf32>
    %689 = arith.addf %686, %688 : vector<2x128xf32>
    %690 = vector.extract_strided_slice %689 {offsets = [0, 0], sizes = [2, 32], strides = [1, 1]} : vector<2x128xf32> to vector<2x32xf32>
    %cst_218 = arith.constant 5.000000e-01 : f32
    %691 = vector.broadcast %cst_218 : f32 to vector<2x32xf32>
    %692 = arith.mulf %691, %690 : vector<2x32xf32>
    %693 = math.tanh %692 : vector<2x32xf32>
    %cst_219 = arith.constant 5.000000e-01 : f32
    %694 = vector.broadcast %cst_219 : f32 to vector<2x32xf32>
    %695 = arith.mulf %694, %693 : vector<2x32xf32>
    %cst_220 = arith.constant 5.000000e-01 : f32
    %696 = vector.broadcast %cst_220 : f32 to vector<2x32xf32>
    %697 = arith.addf %695, %696 : vector<2x32xf32>
    %698 = vector.extract_strided_slice %689 {offsets = [0, 32], sizes = [2, 32], strides = [1, 1]} : vector<2x128xf32> to vector<2x32xf32>
    %cst_221 = arith.constant 5.000000e-01 : f32
    %699 = vector.broadcast %cst_221 : f32 to vector<2x32xf32>
    %700 = arith.mulf %699, %698 : vector<2x32xf32>
    %701 = math.tanh %700 : vector<2x32xf32>
    %cst_222 = arith.constant 5.000000e-01 : f32
    %702 = vector.broadcast %cst_222 : f32 to vector<2x32xf32>
    %703 = arith.mulf %702, %701 : vector<2x32xf32>
    %cst_223 = arith.constant 5.000000e-01 : f32
    %704 = vector.broadcast %cst_223 : f32 to vector<2x32xf32>
    %705 = arith.addf %703, %704 : vector<2x32xf32>
    %706 = vector.extract_strided_slice %689 {offsets = [0, 64], sizes = [2, 32], strides = [1, 1]} : vector<2x128xf32> to vector<2x32xf32>
    %707 = math.tanh %706 : vector<2x32xf32>
    %708 = vector.extract_strided_slice %689 {offsets = [0, 96], sizes = [2, 32], strides = [1, 1]} : vector<2x128xf32> to vector<2x32xf32>
    %cst_224 = arith.constant 5.000000e-01 : f32
    %709 = vector.broadcast %cst_224 : f32 to vector<2x32xf32>
    %710 = arith.mulf %709, %708 : vector<2x32xf32>
    %711 = math.tanh %710 : vector<2x32xf32>
    %cst_225 = arith.constant 5.000000e-01 : f32
    %712 = vector.broadcast %cst_225 : f32 to vector<2x32xf32>
    %713 = arith.mulf %712, %711 : vector<2x32xf32>
    %cst_226 = arith.constant 5.000000e-01 : f32
    %714 = vector.broadcast %cst_226 : f32 to vector<2x32xf32>
    %715 = arith.addf %713, %714 : vector<2x32xf32>
    %716 = arith.mulf %705, %683 : vector<2x32xf32>
    %717 = arith.mulf %697, %707 : vector<2x32xf32>
    %718 = arith.addf %716, %717 : vector<2x32xf32>
    %719 = math.tanh %718 : vector<2x32xf32>
    %720 = arith.mulf %715, %719 : vector<2x32xf32>
    %721 = vector.extract_strided_slice %506 {offsets = [12, 0], sizes = [2, 128], strides = [1, 1]} : vector<20x128xf32> to vector<2x128xf32>
    %722 = arith.truncf %720 : vector<2x32xf32> to vector<2x32xbf16>
    %cst_227 = arith.constant dense<0.000000e+00> : vector<2x128xf32>
    %723 = tpu.matmul %722, %508, %cst_227 {dimension_numbers = #tpu.dot_dimension_numbers<[1], [0], [0], [1], [0, 0, 1, 1], [], []>} : vector<2x32xbf16>, vector<32x128xbf16>, vector<2x128xf32> -> vector<2x128xf32>
    %724 = arith.addf %721, %723 : vector<2x128xf32>
    %725 = vector.extract_strided_slice %724 {offsets = [0, 0], sizes = [2, 32], strides = [1, 1]} : vector<2x128xf32> to vector<2x32xf32>
    %cst_228 = arith.constant 5.000000e-01 : f32
    %726 = vector.broadcast %cst_228 : f32 to vector<2x32xf32>
    %727 = arith.mulf %726, %725 : vector<2x32xf32>
    %728 = math.tanh %727 : vector<2x32xf32>
    %cst_229 = arith.constant 5.000000e-01 : f32
    %729 = vector.broadcast %cst_229 : f32 to vector<2x32xf32>
    %730 = arith.mulf %729, %728 : vector<2x32xf32>
    %cst_230 = arith.constant 5.000000e-01 : f32
    %731 = vector.broadcast %cst_230 : f32 to vector<2x32xf32>
    %732 = arith.addf %730, %731 : vector<2x32xf32>
    %733 = vector.extract_strided_slice %724 {offsets = [0, 32], sizes = [2, 32], strides = [1, 1]} : vector<2x128xf32> to vector<2x32xf32>
    %cst_231 = arith.constant 5.000000e-01 : f32
    %734 = vector.broadcast %cst_231 : f32 to vector<2x32xf32>
    %735 = arith.mulf %734, %733 : vector<2x32xf32>
    %736 = math.tanh %735 : vector<2x32xf32>
    %cst_232 = arith.constant 5.000000e-01 : f32
    %737 = vector.broadcast %cst_232 : f32 to vector<2x32xf32>
    %738 = arith.mulf %737, %736 : vector<2x32xf32>
    %cst_233 = arith.constant 5.000000e-01 : f32
    %739 = vector.broadcast %cst_233 : f32 to vector<2x32xf32>
    %740 = arith.addf %738, %739 : vector<2x32xf32>
    %741 = vector.extract_strided_slice %724 {offsets = [0, 64], sizes = [2, 32], strides = [1, 1]} : vector<2x128xf32> to vector<2x32xf32>
    %742 = math.tanh %741 : vector<2x32xf32>
    %743 = vector.extract_strided_slice %724 {offsets = [0, 96], sizes = [2, 32], strides = [1, 1]} : vector<2x128xf32> to vector<2x32xf32>
    %cst_234 = arith.constant 5.000000e-01 : f32
    %744 = vector.broadcast %cst_234 : f32 to vector<2x32xf32>
    %745 = arith.mulf %744, %743 : vector<2x32xf32>
    %746 = math.tanh %745 : vector<2x32xf32>
    %cst_235 = arith.constant 5.000000e-01 : f32
    %747 = vector.broadcast %cst_235 : f32 to vector<2x32xf32>
    %748 = arith.mulf %747, %746 : vector<2x32xf32>
    %cst_236 = arith.constant 5.000000e-01 : f32
    %749 = vector.broadcast %cst_236 : f32 to vector<2x32xf32>
    %750 = arith.addf %748, %749 : vector<2x32xf32>
    %751 = arith.mulf %740, %718 : vector<2x32xf32>
    %752 = arith.mulf %732, %742 : vector<2x32xf32>
    %753 = arith.addf %751, %752 : vector<2x32xf32>
    %754 = math.tanh %753 : vector<2x32xf32>
    %755 = arith.mulf %750, %754 : vector<2x32xf32>
    %756 = vector.extract_strided_slice %506 {offsets = [14, 0], sizes = [2, 128], strides = [1, 1]} : vector<20x128xf32> to vector<2x128xf32>
    %757 = arith.truncf %755 : vector<2x32xf32> to vector<2x32xbf16>
    %cst_237 = arith.constant dense<0.000000e+00> : vector<2x128xf32>
    %758 = tpu.matmul %757, %508, %cst_237 {dimension_numbers = #tpu.dot_dimension_numbers<[1], [0], [0], [1], [0, 0, 1, 1], [], []>} : vector<2x32xbf16>, vector<32x128xbf16>, vector<2x128xf32> -> vector<2x128xf32>
    %759 = arith.addf %756, %758 : vector<2x128xf32>
    %760 = vector.extract_strided_slice %759 {offsets = [0, 0], sizes = [2, 32], strides = [1, 1]} : vector<2x128xf32> to vector<2x32xf32>
    %cst_238 = arith.constant 5.000000e-01 : f32
    %761 = vector.broadcast %cst_238 : f32 to vector<2x32xf32>
    %762 = arith.mulf %761, %760 : vector<2x32xf32>
    %763 = math.tanh %762 : vector<2x32xf32>
    %cst_239 = arith.constant 5.000000e-01 : f32
    %764 = vector.broadcast %cst_239 : f32 to vector<2x32xf32>
    %765 = arith.mulf %764, %763 : vector<2x32xf32>
    %cst_240 = arith.constant 5.000000e-01 : f32
    %766 = vector.broadcast %cst_240 : f32 to vector<2x32xf32>
    %767 = arith.addf %765, %766 : vector<2x32xf32>
    %768 = vector.extract_strided_slice %759 {offsets = [0, 32], sizes = [2, 32], strides = [1, 1]} : vector<2x128xf32> to vector<2x32xf32>
    %cst_241 = arith.constant 5.000000e-01 : f32
    %769 = vector.broadcast %cst_241 : f32 to vector<2x32xf32>
    %770 = arith.mulf %769, %768 : vector<2x32xf32>
    %771 = math.tanh %770 : vector<2x32xf32>
    %cst_242 = arith.constant 5.000000e-01 : f32
    %772 = vector.broadcast %cst_242 : f32 to vector<2x32xf32>
    %773 = arith.mulf %772, %771 : vector<2x32xf32>
    %cst_243 = arith.constant 5.000000e-01 : f32
    %774 = vector.broadcast %cst_243 : f32 to vector<2x32xf32>
    %775 = arith.addf %773, %774 : vector<2x32xf32>
    %776 = vector.extract_strided_slice %759 {offsets = [0, 64], sizes = [2, 32], strides = [1, 1]} : vector<2x128xf32> to vector<2x32xf32>
    %777 = math.tanh %776 : vector<2x32xf32>
    %778 = vector.extract_strided_slice %759 {offsets = [0, 96], sizes = [2, 32], strides = [1, 1]} : vector<2x128xf32> to vector<2x32xf32>
    %cst_244 = arith.constant 5.000000e-01 : f32
    %779 = vector.broadcast %cst_244 : f32 to vector<2x32xf32>
    %780 = arith.mulf %779, %778 : vector<2x32xf32>
    %781 = math.tanh %780 : vector<2x32xf32>
    %cst_245 = arith.constant 5.000000e-01 : f32
    %782 = vector.broadcast %cst_245 : f32 to vector<2x32xf32>
    %783 = arith.mulf %782, %781 : vector<2x32xf32>
    %cst_246 = arith.constant 5.000000e-01 : f32
    %784 = vector.broadcast %cst_246 : f32 to vector<2x32xf32>
    %785 = arith.addf %783, %784 : vector<2x32xf32>
    %786 = arith.mulf %775, %753 : vector<2x32xf32>
    %787 = arith.mulf %767, %777 : vector<2x32xf32>
    %788 = arith.addf %786, %787 : vector<2x32xf32>
    %789 = math.tanh %788 : vector<2x32xf32>
    %790 = arith.mulf %785, %789 : vector<2x32xf32>
    %791 = vector.extract_strided_slice %506 {offsets = [16, 0], sizes = [2, 128], strides = [1, 1]} : vector<20x128xf32> to vector<2x128xf32>
    %792 = arith.truncf %790 : vector<2x32xf32> to vector<2x32xbf16>
    %cst_247 = arith.constant dense<0.000000e+00> : vector<2x128xf32>
    %793 = tpu.matmul %792, %508, %cst_247 {dimension_numbers = #tpu.dot_dimension_numbers<[1], [0], [0], [1], [0, 0, 1, 1], [], []>} : vector<2x32xbf16>, vector<32x128xbf16>, vector<2x128xf32> -> vector<2x128xf32>
    %794 = arith.addf %791, %793 : vector<2x128xf32>
    %795 = vector.extract_strided_slice %794 {offsets = [0, 0], sizes = [2, 32], strides = [1, 1]} : vector<2x128xf32> to vector<2x32xf32>
    %cst_248 = arith.constant 5.000000e-01 : f32
    %796 = vector.broadcast %cst_248 : f32 to vector<2x32xf32>
    %797 = arith.mulf %796, %795 : vector<2x32xf32>
    %798 = math.tanh %797 : vector<2x32xf32>
    %cst_249 = arith.constant 5.000000e-01 : f32
    %799 = vector.broadcast %cst_249 : f32 to vector<2x32xf32>
    %800 = arith.mulf %799, %798 : vector<2x32xf32>
    %cst_250 = arith.constant 5.000000e-01 : f32
    %801 = vector.broadcast %cst_250 : f32 to vector<2x32xf32>
    %802 = arith.addf %800, %801 : vector<2x32xf32>
    %803 = vector.extract_strided_slice %794 {offsets = [0, 32], sizes = [2, 32], strides = [1, 1]} : vector<2x128xf32> to vector<2x32xf32>
    %cst_251 = arith.constant 5.000000e-01 : f32
    %804 = vector.broadcast %cst_251 : f32 to vector<2x32xf32>
    %805 = arith.mulf %804, %803 : vector<2x32xf32>
    %806 = math.tanh %805 : vector<2x32xf32>
    %cst_252 = arith.constant 5.000000e-01 : f32
    %807 = vector.broadcast %cst_252 : f32 to vector<2x32xf32>
    %808 = arith.mulf %807, %806 : vector<2x32xf32>
    %cst_253 = arith.constant 5.000000e-01 : f32
    %809 = vector.broadcast %cst_253 : f32 to vector<2x32xf32>
    %810 = arith.addf %808, %809 : vector<2x32xf32>
    %811 = vector.extract_strided_slice %794 {offsets = [0, 64], sizes = [2, 32], strides = [1, 1]} : vector<2x128xf32> to vector<2x32xf32>
    %812 = math.tanh %811 : vector<2x32xf32>
    %813 = vector.extract_strided_slice %794 {offsets = [0, 96], sizes = [2, 32], strides = [1, 1]} : vector<2x128xf32> to vector<2x32xf32>
    %cst_254 = arith.constant 5.000000e-01 : f32
    %814 = vector.broadcast %cst_254 : f32 to vector<2x32xf32>
    %815 = arith.mulf %814, %813 : vector<2x32xf32>
    %816 = math.tanh %815 : vector<2x32xf32>
    %cst_255 = arith.constant 5.000000e-01 : f32
    %817 = vector.broadcast %cst_255 : f32 to vector<2x32xf32>
    %818 = arith.mulf %817, %816 : vector<2x32xf32>
    %cst_256 = arith.constant 5.000000e-01 : f32
    %819 = vector.broadcast %cst_256 : f32 to vector<2x32xf32>
    %820 = arith.addf %818, %819 : vector<2x32xf32>
    %821 = arith.mulf %810, %788 : vector<2x32xf32>
    %822 = arith.mulf %802, %812 : vector<2x32xf32>
    %823 = arith.addf %821, %822 : vector<2x32xf32>
    %824 = math.tanh %823 : vector<2x32xf32>
    %825 = arith.mulf %820, %824 : vector<2x32xf32>
    %826 = vector.extract_strided_slice %506 {offsets = [18, 0], sizes = [2, 128], strides = [1, 1]} : vector<20x128xf32> to vector<2x128xf32>
    %827 = arith.truncf %825 : vector<2x32xf32> to vector<2x32xbf16>
    %cst_257 = arith.constant dense<0.000000e+00> : vector<2x128xf32>
    %828 = tpu.matmul %827, %508, %cst_257 {dimension_numbers = #tpu.dot_dimension_numbers<[1], [0], [0], [1], [0, 0, 1, 1], [], []>} : vector<2x32xbf16>, vector<32x128xbf16>, vector<2x128xf32> -> vector<2x128xf32>
    %829 = arith.addf %826, %828 : vector<2x128xf32>
    %830 = vector.extract_strided_slice %829 {offsets = [0, 0], sizes = [2, 32], strides = [1, 1]} : vector<2x128xf32> to vector<2x32xf32>
    %cst_258 = arith.constant 5.000000e-01 : f32
    %831 = vector.broadcast %cst_258 : f32 to vector<2x32xf32>
    %832 = arith.mulf %831, %830 : vector<2x32xf32>
    %833 = math.tanh %832 : vector<2x32xf32>
    %cst_259 = arith.constant 5.000000e-01 : f32
    %834 = vector.broadcast %cst_259 : f32 to vector<2x32xf32>
    %835 = arith.mulf %834, %833 : vector<2x32xf32>
    %cst_260 = arith.constant 5.000000e-01 : f32
    %836 = vector.broadcast %cst_260 : f32 to vector<2x32xf32>
    %837 = arith.addf %835, %836 : vector<2x32xf32>
    %838 = vector.extract_strided_slice %829 {offsets = [0, 32], sizes = [2, 32], strides = [1, 1]} : vector<2x128xf32> to vector<2x32xf32>
    %cst_261 = arith.constant 5.000000e-01 : f32
    %839 = vector.broadcast %cst_261 : f32 to vector<2x32xf32>
    %840 = arith.mulf %839, %838 : vector<2x32xf32>
    %841 = math.tanh %840 : vector<2x32xf32>
    %cst_262 = arith.constant 5.000000e-01 : f32
    %842 = vector.broadcast %cst_262 : f32 to vector<2x32xf32>
    %843 = arith.mulf %842, %841 : vector<2x32xf32>
    %cst_263 = arith.constant 5.000000e-01 : f32
    %844 = vector.broadcast %cst_263 : f32 to vector<2x32xf32>
    %845 = arith.addf %843, %844 : vector<2x32xf32>
    %846 = vector.extract_strided_slice %829 {offsets = [0, 64], sizes = [2, 32], strides = [1, 1]} : vector<2x128xf32> to vector<2x32xf32>
    %847 = math.tanh %846 : vector<2x32xf32>
    %848 = vector.extract_strided_slice %829 {offsets = [0, 96], sizes = [2, 32], strides = [1, 1]} : vector<2x128xf32> to vector<2x32xf32>
    %cst_264 = arith.constant 5.000000e-01 : f32
    %849 = vector.broadcast %cst_264 : f32 to vector<2x32xf32>
    %850 = arith.mulf %849, %848 : vector<2x32xf32>
    %851 = math.tanh %850 : vector<2x32xf32>
    %cst_265 = arith.constant 5.000000e-01 : f32
    %852 = vector.broadcast %cst_265 : f32 to vector<2x32xf32>
    %853 = arith.mulf %852, %851 : vector<2x32xf32>
    %cst_266 = arith.constant 5.000000e-01 : f32
    %854 = vector.broadcast %cst_266 : f32 to vector<2x32xf32>
    %855 = arith.addf %853, %854 : vector<2x32xf32>
    %856 = arith.mulf %845, %823 : vector<2x32xf32>
    %857 = arith.mulf %837, %847 : vector<2x32xf32>
    %858 = arith.addf %856, %857 : vector<2x32xf32>
    %859 = math.tanh %858 : vector<2x32xf32>
    %860 = arith.mulf %855, %859 : vector<2x32xf32>
    %861 = vector.shape_cast %545 : vector<2x32xf32> to vector<1x2x32xf32>
    %862 = vector.shape_cast %580 : vector<2x32xf32> to vector<1x2x32xf32>
    %863 = vector.shape_cast %615 : vector<2x32xf32> to vector<1x2x32xf32>
    %864 = vector.shape_cast %650 : vector<2x32xf32> to vector<1x2x32xf32>
    %865 = vector.shape_cast %685 : vector<2x32xf32> to vector<1x2x32xf32>
    %866 = vector.shape_cast %720 : vector<2x32xf32> to vector<1x2x32xf32>
    %867 = vector.shape_cast %755 : vector<2x32xf32> to vector<1x2x32xf32>
    %868 = vector.shape_cast %790 : vector<2x32xf32> to vector<1x2x32xf32>
    %869 = vector.shape_cast %825 : vector<2x32xf32> to vector<1x2x32xf32>
    %870 = vector.shape_cast %860 : vector<2x32xf32> to vector<1x2x32xf32>
    %871 = tpu.concatenate %861, %862, %863, %864, %865, %866, %867, %868, %869, %870 in 0 : vector<1x2x32xf32>, vector<1x2x32xf32>, vector<1x2x32xf32>, vector<1x2x32xf32>, vector<1x2x32xf32>, vector<1x2x32xf32>, vector<1x2x32xf32>, vector<1x2x32xf32>, vector<1x2x32xf32>, vector<1x2x32xf32> -> vector<10x2x32xf32>
    %c0_267 = arith.constant 0 : index
    %c0_268 = arith.constant 0 : index
    %c0_269 = arith.constant 0 : index
    %872 = vector.load %arg16[%c0_267, %c0_268, %c0_269] : memref<1x1x32xf32, #tpu.memory_space<vmem>>, vector<1x1x32xf32>
    %873 = vector.broadcast %872 : vector<1x1x32xf32> to vector<10x2x32xf32>
    %874 = arith.mulf %871, %873 : vector<10x2x32xf32>
    %cst_270 = arith.constant dense<0.000000e+00> : vector<10x2xf32>
    %875 = vector.multi_reduction <add>, %874, %cst_270 [2] : vector<10x2x32xf32> to vector<10x2xf32>
    %876 = vector.shape_cast %875 : vector<10x2xf32> to vector<10x2x1xf32>
    %c0_271 = arith.constant 0 : index
    %c0_272 = arith.constant 0 : index
    %c0_273 = arith.constant 0 : index
    %877 = vector.load %arg17[%c0_271, %c0_272, %c0_273] : memref<1x1x1xf32, #tpu.memory_space<vmem>>, vector<1x1x1xf32>
    %878 = vector.broadcast %877 : vector<1x1x1xf32> to vector<10x2x1xf32>
    %879 = arith.addf %876, %878 : vector<10x2x1xf32>
    %c0_274 = arith.constant 0 : index
    %c0_275 = arith.constant 0 : index
    %c0_276 = arith.constant 0 : index
    %880 = vector.load %arg20[%c0_274, %c0_275, %c0_276] : memref<10x2x1xf32, #tpu.memory_space<vmem>>, vector<10x2x1xf32>
    tpu.vector_store %arg20[%c0_274, %c0_275, %c0_276], %879 {strides = array<i32>} : memref<10x2x1xf32, #tpu.memory_space<vmem>>, vector<10x2x1xf32>,
    %c0_277 = arith.constant 0 : index
    %c0_278 = arith.constant 0 : index
    %c0_279 = arith.constant 0 : index
    %881 = vector.load %arg18[%c0_277, %c0_278, %c0_279] : memref<10x1x1xf32, #tpu.memory_space<vmem>>, vector<10x1x1xf32>
    %882 = vector.broadcast %881 : vector<10x1x1xf32> to vector<10x2x1xf32>
    %883 = arith.mulf %879, %882 : vector<10x2x1xf32>
    %cst_280 = arith.constant dense<0.000000e+00> : vector<2x1xf32>
    %884 = vector.multi_reduction <add>, %883, %cst_280 [0] : vector<10x2x1xf32> to vector<2x1xf32>
    %c0_281 = arith.constant 0 : index
    %c0_282 = arith.constant 0 : index
    %885 = vector.load %arg19[%c0_281, %c0_282] : memref<1x1xf32, #tpu.memory_space<vmem>>, vector<1x1xf32>
    %886 = vector.broadcast %885 : vector<1x1xf32> to vector<2x1xf32>
    %887 = arith.addf %884, %886 : vector<2x1xf32>
    %c0_283 = arith.constant 0 : index
    %c0_284 = arith.constant 0 : index
    %888 = vector.load %arg21[%c0_283, %c0_284] : memref<2x1xf32, #tpu.memory_space<vmem>>, vector<2x1xf32>
    tpu.vector_store %arg21[%c0_283, %c0_284], %887 {strides = array<i32>} : memref<2x1xf32, #tpu.memory_space<vmem>>, vector<2x1xf32>,
    return
  }
  func.func @transform_0(%arg0: i32) -> (i32, i32, i32) {
    %c0_i32 = arith.constant 0 : i32
    %c0_i32_0 = arith.constant 0 : i32
    %c0_i32_1 = arith.constant 0 : i32
    %c0_i32_2 = arith.constant 0 : i32
    return %c0_i32, %c0_i32_0, %c0_i32_1 : i32, i32, i32
  }
  func.func @transform_1(%arg0: i32) -> (i32, i32, i32) {
    %c0_i32 = arith.constant 0 : i32
    %c0_i32_0 = arith.constant 0 : i32
    %c0_i32_1 = arith.constant 0 : i32
    %c0_i32_2 = arith.constant 0 : i32
    return %c0_i32, %c0_i32_0, %c0_i32_1 : i32, i32, i32
  }
  func.func @transform_2(%arg0: i32) -> (i32, i32) {
    %c0_i32 = arith.constant 0 : i32
    %c0_i32_0 = arith.constant 0 : i32
    %c0_i32_1 = arith.constant 0 : i32
    return %c0_i32, %c0_i32_0 : i32, i32
  }
  func.func @transform_3(%arg0: i32) -> (i32, i32, i32) {
    %c0_i32 = arith.constant 0 : i32
    %c0_i32_0 = arith.constant 0 : i32
    %c0_i32_1 = arith.constant 0 : i32
    %c0_i32_2 = arith.constant 0 : i32
    return %c0_i32, %c0_i32_0, %c0_i32_1 : i32, i32, i32
  }
  func.func @transform_4(%arg0: i32) -> (i32, i32) {
    %c0_i32 = arith.constant 0 : i32
    %c0_i32_0 = arith.constant 0 : i32
    %c0_i32_1 = arith.constant 0 : i32
    return %c0_i32, %c0_i32_0 : i32, i32
  }
  func.func @transform_5(%arg0: i32) -> (i32, i32, i32) {
    %c0_i32 = arith.constant 0 : i32
    %c0_i32_0 = arith.constant 0 : i32
    %c0_i32_1 = arith.constant 0 : i32
    %c0_i32_2 = arith.constant 0 : i32
    return %c0_i32, %c0_i32_0, %c0_i32_1 : i32, i32, i32
  }
  func.func @transform_6(%arg0: i32) -> (i32, i32) {
    %c0_i32 = arith.constant 0 : i32
    %c0_i32_0 = arith.constant 0 : i32
    %c0_i32_1 = arith.constant 0 : i32
    return %c0_i32, %c0_i32_0 : i32, i32
  }
  func.func @transform_7(%arg0: i32) -> (i32, i32) {
    %c0_i32 = arith.constant 0 : i32
    %c0_i32_0 = arith.constant 0 : i32
    %c0_i32_1 = arith.constant 0 : i32
    return %c0_i32, %c0_i32_0 : i32, i32
  }
  func.func @transform_8(%arg0: i32) -> (i32, i32) {
    %c0_i32 = arith.constant 0 : i32
    %c0_i32_0 = arith.constant 0 : i32
    %c0_i32_1 = arith.constant 0 : i32
    return %c0_i32, %c0_i32_0 : i32, i32
  }
  func.func @transform_9(%arg0: i32) -> (i32, i32) {
    %c0_i32 = arith.constant 0 : i32
    %c0_i32_0 = arith.constant 0 : i32
    %c0_i32_1 = arith.constant 0 : i32
    return %c0_i32, %c0_i32_0 : i32, i32
  }
  func.func @transform_10(%arg0: i32) -> (i32, i32) {
    %c0_i32 = arith.constant 0 : i32
    %c0_i32_0 = arith.constant 0 : i32
    %c0_i32_1 = arith.constant 0 : i32
    return %c0_i32, %c0_i32_0 : i32, i32
  }
  func.func @transform_11(%arg0: i32) -> (i32, i32) {
    %c0_i32 = arith.constant 0 : i32
    %c0_i32_0 = arith.constant 0 : i32
    %c0_i32_1 = arith.constant 0 : i32
    return %c0_i32, %c0_i32_0 : i32, i32
  }
  func.func @transform_12(%arg0: i32) -> (i32, i32) {
    %c0_i32 = arith.constant 0 : i32
    %c0_i32_0 = arith.constant 0 : i32
    %c0_i32_1 = arith.constant 0 : i32
    return %c0_i32, %c0_i32_0 : i32, i32
  }
  func.func @transform_13(%arg0: i32) -> (i32, i32) {
    %c0_i32 = arith.constant 0 : i32
    %c0_i32_0 = arith.constant 0 : i32
    %c0_i32_1 = arith.constant 0 : i32
    return %c0_i32, %c0_i32_0 : i32, i32
  }
  func.func @transform_14(%arg0: i32) -> (i32, i32) {
    %c0_i32 = arith.constant 0 : i32
    %c0_i32_0 = arith.constant 0 : i32
    %c0_i32_1 = arith.constant 0 : i32
    return %c0_i32, %c0_i32_0 : i32, i32
  }
  func.func @transform_15(%arg0: i32) -> (i32, i32, i32) {
    %c0_i32 = arith.constant 0 : i32
    %c0_i32_0 = arith.constant 0 : i32
    %c0_i32_1 = arith.constant 0 : i32
    %c0_i32_2 = arith.constant 0 : i32
    return %c0_i32, %c0_i32_0, %c0_i32_1 : i32, i32, i32
  }
  func.func @transform_16(%arg0: i32) -> (i32, i32, i32) {
    %c0_i32 = arith.constant 0 : i32
    %c0_i32_0 = arith.constant 0 : i32
    %c0_i32_1 = arith.constant 0 : i32
    %c0_i32_2 = arith.constant 0 : i32
    return %c0_i32, %c0_i32_0, %c0_i32_1 : i32, i32, i32
  }
  func.func @transform_17(%arg0: i32) -> (i32, i32, i32) {
    %c0_i32 = arith.constant 0 : i32
    %c0_i32_0 = arith.constant 0 : i32
    %c0_i32_1 = arith.constant 0 : i32
    %c0_i32_2 = arith.constant 0 : i32
    return %c0_i32, %c0_i32_0, %c0_i32_1 : i32, i32, i32
  }
  func.func @transform_18(%arg0: i32) -> (i32, i32) {
    %c0_i32 = arith.constant 0 : i32
    %c0_i32_0 = arith.constant 0 : i32
    %c0_i32_1 = arith.constant 0 : i32
    return %c0_i32, %c0_i32_0 : i32, i32
  }
  func.func @transform_19(%arg0: i32) -> (i32, i32, i32) {
    %c0_i32 = arith.constant 0 : i32
    %c0_i32_0 = arith.constant 0 : i32
    %c0_i32_1 = arith.constant 0 : i32
    %c0_i32_2 = arith.constant 0 : i32
    return %c0_i32, %c0_i32_0, %c0_i32_1 : i32, i32, i32
  }
  func.func @transform_20(%arg0: i32) -> (i32, i32) {
    %c0_i32 = arith.constant 0 : i32
    %c0_i32_0 = arith.constant 0 : i32
    %c0_i32_1 = arith.constant 0 : i32
    return %c0_i32, %c0_i32_0 : i32, i32
  }
}

</mosaic_0001>

<bundles_post_ra>
// kernel: crnn_forward.1
= control target key start
LH: loop header
LB: loop body
LE: loop exit
PB: predicated region body
PF: predicated region fallthrough
CT: control target
= control target key end

     0   :  { %vm819_vm0 = vcmask 1041408   ;;  %vm596_vm1 = vcmask 31744   ;;  %vm2978_vm2 = vcmask 1043456   ;;  %vm2926_vm3 = vcmask 64512   ;;  %s5393_s26 = smov 64   ;;  %s8027_s1 = inlined_call_operand.vmem [shape: f32[3,4,8], index: 1, kind: input, shape index: {}]   ;;  %s8028_s0 = inlined_call_operand.vmem [shape: f32[100,24,4], index: 0, kind: input, shape index: {}]   ;;  %s8029_s2 = inlined_call_operand.vmem [shape: f32[1,8], index: 2, kind: input, shape index: {}]   ;;  %s8030_s3 = inlined_call_operand.vmem [shape: f32[3,8,16], index: 3, kind: input, shape index: {}]   ;;  %s8031_s5 = inlined_call_operand.vmem [shape: f32[3,16,64], index: 5, kind: input, shape index: {}]   ;;  %s8032_s4 = inlined_call_operand.vmem [shape: f32[1,16], index: 4, kind: input, shape index: {}]   ;;  %s8033_s6 = inlined_call_operand.vmem [shape: f32[1,64], index: 6, kind: input, shape index: {}]   ;;  %s8034_s9 = inlined_call_operand.vmem [shape: f32[1,128], index: 9, kind: input, shape index: {}]   ;;  %s8035_s7 = inlined_call_operand.vmem [shape: f32[64,128], index: 7, kind: input, shape index: {}]   ;;  %s8036_s8 = inlined_call_operand.vmem [shape: f32[32,128], index: 8, kind: input, shape index: {}]   ;;  %s8037_s12 = inlined_call_operand.vmem [shape: f32[32,128], index: 12, kind: input, shape index: {}]   ;;  %s8038_s13 = inlined_call_operand.vmem [shape: f32[32,128], index: 13, kind: input, shape index: {}]   ;;  %s8039_s10 = inlined_call_operand.vmem [shape: f32[32,32], index: 10, kind: input, shape index: {}]   ;;  %s8040_s11 = inlined_call_operand.vmem [shape: f32[1,32], index: 11, kind: input, shape index: {}]   ;;  %s8041_s14 = inlined_call_operand.vmem [shape: f32[1,128], index: 14, kind: input, shape index: {}]   ;;  %s8042_s15 = inlined_call_operand.vmem [shape: f32[1,1,32], index: 15, kind: input, shape index: {}]   ;;  %s8043_s17 = inlined_call_operand.vmem [shape: f32[10,1,1], index: 17, kind: input, shape index: {}]   ;;  %s8044_s16 = inlined_call_operand.<no memory space> [shape: f32[1,1,1], index: 16, kind: input, shape index: {}]   ;;  %s8045_s19 = inlined_call_operand.vmem [shape: f32[10,2,1], index: 19, kind: output, shape index: {0}]   ;;  %s8046_s18 = inlined_call_operand.<no memory space> [shape: f32[1,1], index: 18, kind: input, shape index: {}]   ;;  %s8047_s20 = inlined_call_operand.vmem [shape: f32[2,1], index: 20, kind: output, shape index: {1}]  }
   0x1   :  { %8058 = sst [smem:[#allocation32_spill]] %s8027_s1  ;;  %vm3489_vm4 = vcmask 130048   ;;  %vm3632_vm5 = vcmask 523264   ;;  %vm3663_vm6 = vcmask 261120   ;;  %vm4146_vm7 = vcmask 1045504  }
   0x2   :  { %8059 = sst [smem:[#allocation33_spill]] %s8028_s0  ;;  %vm4790_vm8 = vcmask 254976   ;;  %vm4835_vm9 = vcmask 1024  }
   0x3   :  { %8060 = sst [smem:[#allocation34_spill]] %s8029_s2 }
   0x4   :  { %8061 = sst [smem:[#allocation35_spill]] %s8030_s3 }
   0x5   :  { %8062 = sst [smem:[#allocation36_spill]] %s8031_s5 }
   0x6   :  { %s8063_s23 = sld [smem:[#allocation32_spill]] }
   0x7   :  { %s8064_s28 = sld [smem:[#allocation33_spill]] }
   0x8   :  { %s8065_s30 = sld [smem:[#allocation34_spill]] }
   0x9   :  { %s8066_s24 = sld [smem:[#allocation35_spill]] }
   0xa   :  { %s8103_s22 = sld [smem:[#allocation36_spill]] }
   0xc   :  { %v4929_v0 = vld [vmem:[%s8063_s23 + $0x4] sm:$0xf]  ;;  %v588_v1 = vld [vmem:[%s8063_s23] sm:$0xf]  ;;  %v4930_v2 = vld [vmem:[%s8063_s23 + $0x8] sm:$0xf] }
   0xd   :  { %v592_v3 = vpack.c.bf16 %v4929_v0, %v4929_v0  ;;  %v589_v4 = vpack.c.bf16 %v588_v1, %v588_v1  ;;  %v595_v5 = vpack.c.bf16 %v4930_v2, %v4930_v2  ;;  %v72_v6 = vld [vmem:[%s8064_s28 + $0x18] sm:$0xff]  ;;  %v73_v7 = vld [vmem:[%s8064_s28 + $0x20] sm:$0xff]  ;;  %v70_v10 = vld [vmem:[%s8064_s28 + $0x8] sm:$0xff]  ;;  %s5395_s23 = smov 96  }
   0xe   :  { %v69_v8 = vld [vmem:[%s8064_s28] sm:$0xff]  ;;  %v440_v9 = vpack.c.bf16 %v73_v7, %v72_v6  ;;  %v75_v11 = vld [vmem:[%s8064_s28 + $0x30] sm:$0xff]  ;;  %v76_v12 = vld [vmem:[%s8064_s28 + $0x38] sm:$0xff] }
   0xf   :  { %v821_v13 = vsel %vm819_vm0, %v592_v3, 0  ;;  %v1415_v14 = vsel %vm819_vm0, %v589_v4, 0  ;;  %v2009_v15 = vsel %vm819_vm0, %v595_v5, 0  ;;  %v366_v16 = vpack.c.bf16 %v70_v10, %v69_v8  ;;  %v74_v18 = vld [vmem:[%s8064_s28 + $0x28] sm:$0xff]  ;;  %v71_v20 = vld [vmem:[%s8064_s28 + $0x10] sm:$0xff]  ;;  %v77_v21 = vld [vmem:[%s8064_s28 + $0x40] sm:$0xff] }
  0x10   :  { %830 = vmatpush.bf16.msra.mxu0 %v821_v13  ;;  %1424 = vmatpush.bf16.msra.mxu1 %v1415_v14  ;;  %v514_v17 = vpack.c.bf16 %v76_v12, %v75_v11  ;;  %v78_v19 = vld [vmem:[%s8064_s28 + $0x48] sm:$0xff]  ;;  %v81_v22 = vld [vmem:[%s8064_s28 + $0x60] sm:$0xff]  ;;  %v367_v24 = vpack.c.bf16 %v75_v11, %v71_v20  ;;  %v79_v26 = vld [vmem:[%s8064_s28 + $0x50] sm:$0xff]  ;;  %v368_v31 = vpack.c.bf16 %v77_v21, %v76_v12 }
  0x11   :  { %2018 = vmatpush.bf16.msra.mxu2 %v2009_v15  ;;  %v441_v23 = vpack.c.bf16 %v78_v19, %v74_v18  ;;  %v515_v25 = vpack.c.bf16 %v81_v22, %v77_v21  ;;  %v80_v27 = vld [vmem:[%s8064_s28 + $0x58] sm:$0xff]  ;;  %v82_v28 = vld [vmem:[%s8064_s28 + $0x68] sm:$0xff]  ;;  %v83_v29 = vld [vmem:[%s8064_s28 + $0x70] sm:$0xff] }
  0x12   :  { %v442_v30 = vpack.c.bf16 %v80_v27, %v79_v26  ;;  %v516_v32 = vpack.c.bf16 %v83_v29, %v82_v28  ;;  %v84_v33 = vld [vmem:[%s8064_s28 + $0x78] sm:$0xff]  ;;  %v85_v34 = vld [vmem:[%s8064_s28 + $0x80] sm:$0xff]  ;;  %v87_v35 = vld [vmem:[%s8064_s28 + $0x90] sm:$0xff]  ;;  %v369_v38 = vpack.c.bf16 %v82_v28, %v81_v22 }
  0x13   :  { %4931 = vmatmul.msk.bf16.vlgmr.msra.gmra.mxu0 %vm596_vm1, %v440_v9  ;;  %5005 = vmatmul.msk.bf16.vlgmr.msra.gmra.mxu1 %vm596_vm1, %v366_v16  ;;  %v88_v36 = vld [vmem:[%s8064_s28 + $0x98] sm:$0xff]  ;;  %v443_v37 = vpack.c.bf16 %v85_v34, %v84_v33  ;;  %v86_v40 = vld [vmem:[%s8064_s28 + $0x88] sm:$0xff]  ;;  %v89_v42 = vld [vmem:[%s8064_s28 + $0xa0] sm:$0xff]  ;;  %v370_v45 = vpack.c.bf16 %v87_v35, %v83_v29 }
  0x14   :  { %5079 = vmatmul.msk.bf16.vlgmr.msra.gmra.mxu2 %vm596_vm1, %v514_v17  ;;  %v517_v39 = vpack.c.bf16 %v88_v36, %v87_v35  ;;  %v90_v41 = vld [vmem:[%s8064_s28 + $0xa8] sm:$0xff]  ;;  %v93_v43 = vld [vmem:[%s8064_s28 + $0xc0] sm:$0xff]  ;;  %v91_v47 = vld [vmem:[%s8064_s28 + $0xb0] sm:$0xff]  ;;  %v371_v52 = vpack.c.bf16 %v89_v42, %v88_v36 }
  0x15   :  { %v444_v44 = vpack.c.bf16 %v90_v41, %v86_v40  ;;  %v518_v46 = vpack.c.bf16 %v93_v43, %v89_v42  ;;  %v92_v48 = vld [vmem:[%s8064_s28 + $0xb8] sm:$0xff]  ;;  %v94_v49 = vld [vmem:[%s8064_s28 + $0xc8] sm:$0xff]  ;;  %v95_v50 = vld [vmem:[%s8064_s28 + $0xd0] sm:$0xff] }
  0x16   :  { %v445_v51 = vpack.c.bf16 %v92_v48, %v91_v47  ;;  %v519_v53 = vpack.c.bf16 %v95_v50, %v94_v49  ;;  %v96_v54 = vld [vmem:[%s8064_s28 + $0xd8] sm:$0xff]  ;;  %v97_v55 = vld [vmem:[%s8064_s28 + $0xe0] sm:$0xff]  ;;  %v99_v56 = vld [vmem:[%s8064_s28 + $0xf0] sm:$0xff]  ;;  %v372_v59 = vpack.c.bf16 %v94_v49, %v93_v43 }
  0x17   :  { %v100_v57 = vld [vmem:[%s8064_s28 + $0xf8] sm:$0xff]  ;;  %v446_v58 = vpack.c.bf16 %v97_v55, %v96_v54  ;;  %v98_v61 = vld [vmem:[%s8064_s28 + $0xe8] sm:$0xff]  ;;  %v101_v63 = vld [vmem:[%s8064_s28 + $0x100] sm:$0xff]  ;;  %v373_v2 = vpack.c.bf16 %v99_v56, %v95_v50 }
  0x18   :  { %v520_v60 = vpack.c.bf16 %v100_v57, %v99_v56  ;;  %v102_v62 = vld [vmem:[%s8064_s28 + $0x108] sm:$0xff]  ;;  %v105_v0 = vld [vmem:[%s8064_s28 + $0x120] sm:$0xff]  ;;  %v103_v4 = vld [vmem:[%s8064_s28 + $0x110] sm:$0xff]  ;;  %v374_v9 = vpack.c.bf16 %v101_v63, %v100_v57 }
  0x19   :  { %v447_v1 = vpack.c.bf16 %v102_v62, %v98_v61  ;;  %v521_v3 = vpack.c.bf16 %v105_v0, %v101_v63  ;;  %v104_v5 = vld [vmem:[%s8064_s28 + $0x118] sm:$0xff]  ;;  %v106_v6 = vld [vmem:[%s8064_s28 + $0x128] sm:$0xff]  ;;  %v107_v7 = vld [vmem:[%s8064_s28 + $0x130] sm:$0xff] }
  0x1a   :  { %v448_v8 = vpack.c.bf16 %v104_v5, %v103_v4  ;;  %v522_v12 = vpack.c.bf16 %v107_v7, %v106_v6  ;;  %v108_v19 = vld [vmem:[%s8064_s28 + $0x138] sm:$0xff]  ;;  %v109_v20 = vld [vmem:[%s8064_s28 + $0x140] sm:$0xff]  ;;  %v111_v21 = vld [vmem:[%s8064_s28 + $0x150] sm:$0xff] }
  0x1b   :  { %v5669_v22 = vld [vmem:[%s8064_s28 + $0x158] sm:$0xff]  ;;  %v5678_v36 = vld [vmem:[%s8065_s30] ss:$0 sm:$0xff]  ;;  %v376_v43 = vpack.c.bf16 %v111_v21, %v107_v7  ;;  %v115_v63 = vld [vmem:[%s8064_s28 + $0x170] sm:$0xff] }
  0x1c   :  { %v523_v29 = vpack.c.bf16 %v5669_v22, %v111_v21  ;;  %v5692_v40 = vld [vmem:[%s8064_s28 + $0x180] sm:$0xff]  ;;  %v120_v21 = vld [vmem:[%s8064_s28 + $0x198] sm:$0xff] }
  0x23   :  { %4932 = vmatmul.msk.bf16.gmra.mxu0 %vm596_vm1, %v441_v23  ;;  %5006 = vmatmul.msk.bf16.gmra.mxu1 %vm596_vm1, %v367_v24  ;;  %v449_v24 = vpack.c.bf16 %v109_v20, %v108_v19  ;;  %v5153_v20 = vld [vmem:[%s8066_s24 + $0x8] sm:$0xff] }
  0x24   :  { %5080 = vmatmul.msk.bf16.gmra.mxu2 %vm596_vm1, %v515_v25  ;;  %v375_v25 = vpack.c.bf16 %v106_v6, %v105_v0  ;;  %v116_v0 = vld [vmem:[%s8064_s28 + $0x178] sm:$0xff] }
  0x25   :  { %v451_v5 = vpack.c.bf16 %v116_v0, %v115_v63 }
  0x33   :  { %4933 = vmatmul.msk.bf16.gmra.mxu0 %vm596_vm1, %v442_v30  ;;  %5007 = vmatmul.msk.bf16.gmra.mxu1 %vm596_vm1, %v368_v31 }
  0x34   :  { %5081 = vmatmul.msk.bf16.gmra.mxu2 %vm596_vm1, %v516_v32 }
  0x43   :  { %4934 = vmatmul.msk.bf16.gmra.mxu0 %vm596_vm1, %v443_v37  ;;  %5008 = vmatmul.msk.bf16.gmra.mxu1 %vm596_vm1, %v369_v38  ;;  %v110_v37 = vld [vmem:[%s8064_s28 + $0x148] sm:$0xff] }
  0x44   :  { %5082 = vmatmul.msk.bf16.gmra.mxu2 %vm596_vm1, %v517_v39  ;;  %v114_v38 = vld [vmem:[%s8064_s28 + $0x168] sm:$0xff]  ;;  %v113_v39 = vld [vmem:[%s8064_s28 + $0x160] sm:$0xff] }
  0x45   :  { %v450_v42 = vpack.c.bf16 %v114_v38, %v110_v37  ;;  %v524_v48 = vpack.c.bf16 %v5692_v40, %v113_v39  ;;  %v377_v6 = vpack.c.bf16 %v113_v39, %v5669_v22  ;;  %v121_v22 = vld [vmem:[%s8064_s28 + $0x1a0] sm:$0xff]  ;;  %v122_v39 = vld [vmem:[%s8064_s28 + $0x1a8] sm:$0xff] }
  0x53   :  { %4935 = vmatmul.msk.bf16.gmra.mxu0 %vm596_vm1, %v444_v44  ;;  %5009 = vmatmul.msk.bf16.gmra.mxu1 %vm596_vm1, %v370_v45 }
  0x54   :  { %5083 = vmatmul.msk.bf16.gmra.mxu2 %vm596_vm1, %v518_v46 }
  0x63   :  { %4936 = vmatmul.msk.bf16.gmra.mxu0 %vm596_vm1, %v445_v51  ;;  %5010 = vmatmul.msk.bf16.gmra.mxu1 %vm596_vm1, %v371_v52 }
  0x64   :  { %5084 = vmatmul.msk.bf16.gmra.mxu2 %vm596_vm1, %v519_v53 }
  0x73   :  { %4937 = vmatmul.msk.bf16.gmra.mxu0 %vm596_vm1, %v446_v58  ;;  %5011 = vmatmul.msk.bf16.gmra.mxu1 %vm596_vm1, %v372_v59 }
  0x74   :  { %5085 = vmatmul.msk.bf16.gmra.mxu2 %vm596_vm1, %v520_v60 }
  0x83   :  { %4938 = vmatmul.msk.bf16.gmra.mxu0 %vm596_vm1, %v447_v1  ;;  %5012 = vmatmul.msk.bf16.gmra.mxu1 %vm596_vm1, %v373_v2  ;;  %v118_v1 = vld [vmem:[%s8064_s28 + $0x188] sm:$0xff]  ;;  %v119_v2 = vld [vmem:[%s8064_s28 + $0x190] sm:$0xff] }
  0x84   :  { %5086 = vmatmul.msk.bf16.gmra.mxu2 %vm596_vm1, %v521_v3 }
  0x90   :  { %v832_v10 = vpop.f32.mrf.mxu0  ;;  %v1426_v11 = vpop.f32.mrf.mxu1 }
  0x91   :  { %v1427_v13 = vadd.f32 %v1426_v11, %v832_v10 }
  0x93   :  { %4939 = vmatmul.msk.bf16.gmra.mxu0 %vm596_vm1, %v448_v8  ;;  %5013 = vmatmul.msk.bf16.gmra.mxu1 %vm596_vm1, %v374_v9 }
  0x94   :  { %5087 = vmatmul.msk.bf16.gmra.mxu2 %vm596_vm1, %v522_v12  ;;  %v525_v12 = vpack.c.bf16 %v119_v2, %v118_v1 }
  0x97   :  { %v2020_v14 = vpop.f32.mrf.mxu2 }
  0x98   :  { %v2380_v15 = vadd.f32 %v2020_v14, %v1427_v13  ;;  %v834_v16 = vpop.f32.mrf.mxu0  ;;  %v1428_v17 = vpop.f32.mrf.mxu1 }
  0x99   :  { %v1429_v18 = vadd.f32 %v1428_v17, %v834_v16 }
  0x9a   :  { %v2522_v44 = vadd.f32 %v5678_v36, %v2380_v15 }
  0x9c   :  { %v2660_v51 = vmax.f32 %v2522_v44, 0.0 }
  0x9f   :  { %v2022_v23 = vpop.f32.mrf.mxu2 }
  0xa0   :  { %v2381_v26 = vadd.f32 %v2022_v23, %v1429_v18  ;;  %v837_v27 = vpop.f32.mrf.mxu0  ;;  %v1431_v28 = vpop.f32.mrf.mxu1  ;;  %v2922_v23 = vpack.c.bf16 %v5153_v20, %v5153_v20 }
  0xa1   :  { %v1432_v30 = vadd.f32 %v1431_v28, %v837_v27  ;;  %v378_v27 = vpack.c.bf16 %v118_v1, %v5692_v40  ;;  %v126_v40 = vld [vmem:[%s8064_s28 + $0x1c8] sm:$0xff] }
  0xa2   :  { %v2523_v55 = vadd.f32 %v5678_v36, %v2381_v26  ;;  %v2980_v26 = vsel %vm2978_vm2, %v2922_v23, 0 }
  0xa3   :  { %4940 = vmatmul.msk.bf16.gmra.mxu0 %vm596_vm1, %v449_v24  ;;  %5014 = vmatmul.msk.bf16.gmra.mxu1 %vm596_vm1, %v375_v25  ;;  %v123_v24 = vld [vmem:[%s8064_s28 + $0x1b0] sm:$0xff]  ;;  %v5743_v25 = vld [vmem:[%s8064_s28 + $0x1b8] sm:$0xff] }
  0xa4   :  { %5088 = vmatmul.msk.bf16.gmra.mxu2 %vm596_vm1, %v523_v29  ;;  %v2661_v61 = vmax.f32 %v2523_v55, 0.0  ;;  %v452_v29 = vpack.c.bf16 %v121_v22, %v120_v21  ;;  %2989 = vmatpush.bf16.msra.mxu3 %v2980_v26 }
  0xa7   :  { %v2025_v31 = vpop.f32.mrf.mxu2 }
  0xa8   :  { %v2382_v32 = vadd.f32 %v2025_v31, %v1432_v30  ;;  %v839_v33 = vpop.f32.mrf.mxu0  ;;  %v1433_v34 = vpop.f32.mrf.mxu1 }
  0xa9   :  { %v1434_v35 = vadd.f32 %v1433_v34, %v839_v33 }
  0xaa   :  { %v2524_v7 = vadd.f32 %v5678_v36, %v2382_v32  ;;  %v526_v32 = vpack.c.bf16 %v5743_v25, %v123_v24 }
  0xac   :  { %v2662_v14 = vmax.f32 %v2524_v7, 0.0  ;;  %v127_v7 = vld [vmem:[%s8064_s28 + $0x1d0] sm:$0xff] }
  0xaf   :  { %v2027_v41 = vpop.f32.mrf.mxu2 }
  0xb0   :  { %v2383_v45 = vadd.f32 %v2027_v41, %v1434_v35  ;;  %v842_v46 = vpop.f32.mrf.mxu0  ;;  %v1436_v47 = vpop.f32.mrf.mxu1  ;;  %v125_v41 = vld [vmem:[%s8064_s28 + $0x1c0] sm:$0xff] }
  0xb1   :  { %v1437_v49 = vadd.f32 %v1436_v47, %v842_v46 }
  0xb2   :  { %v2525_v50 = vadd.f32 %v5678_v36, %v2383_v45  ;;  %v453_v45 = vpack.c.bf16 %v126_v40, %v122_v39 }
  0xb3   :  { %4941 = vmatmul.msk.bf16.gmra.mxu0 %vm596_vm1, %v450_v42  ;;  %5015 = vmatmul.msk.bf16.gmra.mxu1 %vm596_vm1, %v376_v43  ;;  %v5763_v42 = vld [vmem:[%s8064_s28 + $0x1e0] sm:$0xff]  ;;  %v379_v43 = vpack.c.bf16 %v123_v24, %v119_v2 }
  0xb4   :  { %v2663_v52 = vmax.f32 %v2525_v50, 0.0  ;;  %5089 = vmatmul.msk.bf16.gmra.mxu2 %vm596_vm1, %v524_v48  ;;  %v527_v50 = vpack.c.bf16 %v5763_v42, %v125_v41 }
  0xb6   :  { %v5700_v53 = vmax.f32 %v2660_v51, %v2663_v52 }
  0xb7   :  { %v2030_v54 = vpop.f32.mrf.mxu2 }
  0xb8   :  { %v2384_v56 = vadd.f32 %v2030_v54, %v1437_v49  ;;  %v844_v57 = vpop.f32.mrf.mxu0  ;;  %v1438_v58 = vpop.f32.mrf.mxu1 }
  0xb9   :  { %v1439_v59 = vadd.f32 %v1438_v58, %v844_v57 }
  0xba   :  { %v2526_v60 = vadd.f32 %v5678_v36, %v2384_v56 }
  0xbc   :  { %v2664_v62 = vmax.f32 %v2526_v60, 0.0 }
  0xbe   :  { %v5716_v3 = vmax.f32 %v2661_v61, %v2664_v62 }
  0xbf   :  { %v2032_v4 = vpop.f32.mrf.mxu2 }
  0xc0   :  { %v2385_v9 = vadd.f32 %v2032_v4, %v1439_v59  ;;  %v847_v10 = vpop.f32.mrf.mxu0  ;;  %v1441_v11 = vpop.f32.mrf.mxu1 }
  0xc1   :  { %v1442_v46 = vadd.f32 %v1441_v11, %v847_v10  ;;  %v130_v10 = vld [vmem:[%s8064_s28 + $0x1e8] sm:$0xff]  ;;  %v5785_v11 = vld [vmem:[%s8064_s28 + $0x1f0] sm:$0xff] }
  0xc2   :  { %v2527_v13 = vadd.f32 %v5678_v36, %v2385_v9  ;;  %v128_v9 = vld [vmem:[%s8064_s28 + $0x1d8] sm:$0xff]  ;;  %v528_v23 = vpack.c.bf16 %v5785_v11, %v130_v10 }
  0xc3   :  { %4942 = vmatmul.msk.bf16.gmra.mxu0 %vm596_vm1, %v451_v5  ;;  %5016 = vmatmul.msk.bf16.gmra.mxu1 %vm596_vm1, %v377_v6 }
  0xc4   :  { %v2665_v15 = vmax.f32 %v2527_v13, 0.0  ;;  %5090 = vmatmul.msk.bf16.gmra.mxu2 %vm596_vm1, %v525_v12 }
  0xc6   :  { %v5726_v16 = vmax.f32 %v2662_v14, %v2665_v15  ;;  %v454_v15 = vpack.c.bf16 %v128_v9, %v127_v7 }
  0xc7   :  { %v2035_v17 = vpop.f32.mrf.mxu2 }
  0xc8   :  { %v849_v18 = vpop.f32.mrf.mxu0  ;;  %v1443_v19 = vpop.f32.mrf.mxu1  ;;  %v2386_v54 = vadd.f32 %v2035_v17, %v1442_v46  ;;  %v380_v17 = vpack.c.bf16 %v125_v41, %v5743_v25  ;;  %v381_v41 = vpack.c.bf16 %v130_v10, %v5763_v42  ;;  %v134_v42 = vld [vmem:[%s8064_s28 + $0x208] sm:$0xff] }
  0xc9   :  { %v1444_v51 = vadd.f32 %v1443_v19, %v849_v18 }
  0xca   :  { %v2528_v59 = vadd.f32 %v5678_v36, %v2386_v54  ;;  %v138_v54 = vld [vmem:[%s8064_s28 + $0x228] sm:$0xff] }
  0xcc   :  { %v2666_v4 = vmax.f32 %v2528_v59, 0.0 }
  0xcf   :  { %v2037_v28 = vpop.f32.mrf.mxu2 }
  0xd0   :  { %v852_v30 = vpop.f32.mrf.mxu0  ;;  %v1446_v31 = vpop.f32.mrf.mxu1  ;;  %v2387_v55 = vadd.f32 %v2037_v28, %v1444_v51 }
  0xd1   :  { %v1447_v33 = vadd.f32 %v1446_v31, %v852_v30 }
  0xd2   :  { %v2529_v60 = vadd.f32 %v5678_v36, %v2387_v55  ;;  %v137_v55 = vld [vmem:[%s8064_s28 + $0x220] sm:$0xff] }
  0xd3   :  { %4943 = vmatmul.msk.bf16.gmra.mxu0 %vm596_vm1, %v452_v29  ;;  %5017 = vmatmul.msk.bf16.gmra.mxu1 %vm596_vm1, %v378_v27 }
  0xd4   :  { %5091 = vmatmul.msk.bf16.gmra.mxu2 %vm596_vm1, %v526_v32  ;;  %v2667_v5 = vmax.f32 %v2529_v60, 0.0 }
  0xd7   :  { %v2040_v34 = vpop.f32.mrf.mxu2 }
  0xd8   :  { %v2388_v35 = vadd.f32 %v2040_v34, %v1447_v33  ;;  %v854_v37 = vpop.f32.mrf.mxu0  ;;  %v1448_v38 = vpop.f32.mrf.mxu1  ;;  %v132_v34 = vld [vmem:[%s8064_s28 + $0x1f8] sm:$0xff] }
  0xd9   :  { %v1449_v47 = vadd.f32 %v1448_v38, %v854_v37  ;;  %v135_v37 = vld [vmem:[%s8064_s28 + $0x210] sm:$0xff]  ;;  %v5809_v38 = vld [vmem:[%s8064_s28 + $0x218] sm:$0xff] }
  0xda   :  { %v2530_v18 = vadd.f32 %v5678_v36, %v2388_v35  ;;  %v133_v35 = vld [vmem:[%s8064_s28 + $0x200] sm:$0xff]  ;;  %v529_v46 = vpack.c.bf16 %v5809_v38, %v135_v37  ;;  %v382_v59 = vpack.c.bf16 %v135_v37, %v5785_v11 }
  0xdb   :  { %v455_v40 = vpack.c.bf16 %v133_v35, %v132_v34 }
  0xdc   :  { %v2668_v27 = vmax.f32 %v2530_v18, 0.0 }
  0xdf   :  { %v2042_v44 = vpop.f32.mrf.mxu2 }
  0xe0   :  { %v857_v48 = vpop.f32.mrf.mxu0  ;;  %v1451_v49 = vpop.f32.mrf.mxu1  ;;  %v2389_v52 = vadd.f32 %v2042_v44, %v1449_v47 }
  0xe1   :  { %v1452_v56 = vadd.f32 %v1451_v49, %v857_v48 }
  0xe2   :  { %v2531_v57 = vadd.f32 %v5678_v36, %v2389_v52 }
  0xe3   :  { %4944 = vmatmul.msk.bf16.gmra.mxu0 %vm596_vm1, %v453_v45  ;;  %5018 = vmatmul.msk.bf16.gmra.mxu1 %vm596_vm1, %v379_v43 }
  0xe4   :  { %5092 = vmatmul.msk.bf16.gmra.mxu2 %vm596_vm1, %v527_v50  ;;  %v2669_v1 = vmax.f32 %v2531_v57, 0.0 }
  0xe6   :  { %v2801_v13 = vmax.f32 %v2666_v4, %v2669_v1 }
  0xe7   :  { %v2045_v58 = vpop.f32.mrf.mxu2 }
  0xe8   :  { %v2390_v61 = vadd.f32 %v2045_v58, %v1452_v56  ;;  %v859_v62 = vpop.f32.mrf.mxu0  ;;  %v1453_v63 = vpop.f32.mrf.mxu1  ;;  %v5828_v56 = vld [vmem:[%s8064_s28 + $0x240] sm:$0xff]  ;;  %v456_v58 = vpack.c.bf16 %v138_v54, %v134_v42 }
  0xe9   :  { %v1454_v0 = vadd.f32 %v1453_v63, %v859_v62 }
  0xea   :  { %v2532_v2 = vadd.f32 %v5678_v36, %v2390_v61 }
  0xec   :  { %v2670_v6 = vmax.f32 %v2532_v2, 0.0 }
  0xee   :  { %v2802_v12 = vmax.f32 %v2667_v5, %v2670_v6 }
  0xef   :  { %v2047_v14 = vpop.f32.mrf.mxu2 }
  0xf0   :  { %v2391_v19 = vadd.f32 %v2047_v14, %v1454_v0  ;;  %v862_v20 = vpop.f32.mrf.mxu0  ;;  %v1456_v21 = vpop.f32.mrf.mxu1  ;;  %v2884_v22 = vpack.c.bf16 %v2802_v12, %v2801_v13  ;;  %v530_v0 = vpack.c.bf16 %v5828_v56, %v137_v55 }
  0xf1   :  { %v1457_v24 = vadd.f32 %v1456_v21, %v862_v20  ;;  %v140_v20 = vld [vmem:[%s8064_s28 + $0x238] sm:$0xff]  ;;  %v142_v21 = vld [vmem:[%s8064_s28 + $0x248] sm:$0xff] }
  0xf2   :  { %v2533_v26 = vadd.f32 %v5678_v36, %v2391_v19  ;;  %5155 = vmatmul.msk.bf16.vlgmr.msra.gmra.mxu3 %vm2926_vm3, %v2884_v22  ;;  %v139_v19 = vld [vmem:[%s8064_s28 + $0x230] sm:$0xff] }
  0xf3   :  { %4945 = vmatmul.msk.bf16.gmra.mxu0 %vm596_vm1, %v454_v15  ;;  %5019 = vmatmul.msk.bf16.gmra.mxu1 %vm596_vm1, %v380_v17  ;;  %v143_v22 = vld [vmem:[%s8064_s28 + $0x250] sm:$0xff] }
  0xf4   :  { %v2671_v28 = vmax.f32 %v2533_v26, 0.0  ;;  %5093 = vmatmul.msk.bf16.gmra.mxu2 %vm596_vm1, %v528_v23  ;;  %v457_v26 = vpack.c.bf16 %v140_v20, %v139_v19 }
  0xf6   :  { %v5795_v25 = vmax.f32 %v2668_v27, %v2671_v28  ;;  %v383_v27 = vpack.c.bf16 %v137_v55, %v5809_v38 }
  0xf7   :  { %v2050_v29 = vpop.f32.mrf.mxu2 }
  0xf8   :  { %v2392_v30 = vadd.f32 %v2050_v29, %v1457_v24  ;;  %v864_v31 = vpop.f32.mrf.mxu0  ;;  %v1458_v32 = vpop.f32.mrf.mxu1 }
  0xf9   :  { %v1459_v33 = vadd.f32 %v1458_v32, %v864_v31 }
  0xfa   :  { %v2534_v60 = vadd.f32 %v5678_v36, %v2392_v30 }
  0xfc   :  { %v2672_v4 = vmax.f32 %v2534_v60, 0.0  ;;  %v149_v60 = vld [vmem:[%s8064_s28 + $0x280] sm:$0xff] }
  0xff   :  { %v2052_v39 = vpop.f32.mrf.mxu2 }
 0x100   :  { %v2393_v43 = vadd.f32 %v2052_v39, %v1459_v33  ;;  %v867_v44 = vpop.f32.mrf.mxu0  ;;  %v1461_v45 = vpop.f32.mrf.mxu1  ;;  %v531_v33 = vpack.c.bf16 %v143_v22, %v142_v21 }
 0x101   :  { %v1462_v47 = vadd.f32 %v1461_v45, %v867_v44  ;;  %v145_v44 = vld [vmem:[%s8064_s28 + $0x260] sm:$0xff]  ;;  %v147_v45 = vld [vmem:[%s8064_s28 + $0x270] sm:$0xff] }
 0x102   :  { %v2535_v9 = vadd.f32 %v5678_v36, %v2393_v43  ;;  %v144_v43 = vld [vmem:[%s8064_s28 + $0x258] sm:$0xff] }
 0x103   :  { %4946 = vmatmul.msk.bf16.gmra.mxu0 %vm596_vm1, %v455_v40  ;;  %5020 = vmatmul.msk.bf16.gmra.mxu1 %vm596_vm1, %v381_v41 }
 0x104   :  { %5094 = vmatmul.msk.bf16.gmra.mxu2 %vm596_vm1, %v529_v46  ;;  %v2673_v17 = vmax.f32 %v2535_v9, 0.0  ;;  %v5879_v46 = vld [vmem:[%s8064_s28 + $0x278] sm:$0xff] }
 0x107   :  { %v2055_v48 = vpop.f32.mrf.mxu2 }
 0x108   :  { %v2394_v49 = vadd.f32 %v2055_v48, %v1462_v47  ;;  %v869_v50 = vpop.f32.mrf.mxu0  ;;  %v1463_v51 = vpop.f32.mrf.mxu1  ;;  %v458_v48 = vpack.c.bf16 %v145_v44, %v144_v43 }
 0x109   :  { %v1464_v52 = vadd.f32 %v1463_v51, %v869_v50 }
 0x10a   :  { %v2536_v28 = vadd.f32 %v5678_v36, %v2394_v49  ;;  %v384_v49 = vpack.c.bf16 %v142_v21, %v5828_v56  ;;  %v150_v56 = vld [vmem:[%s8064_s28 + $0x288] sm:$0xff] }
 0x10c   :  { %v2674_v35 = vmax.f32 %v2536_v28, 0.0  ;;  %v151_v28 = vld [vmem:[%s8064_s28 + $0x290] sm:$0xff] }
 0x10f   :  { %v2057_v57 = vpop.f32.mrf.mxu2 }
 0x110   :  { %v2395_v61 = vadd.f32 %v2057_v57, %v1464_v52  ;;  %v872_v62 = vpop.f32.mrf.mxu0  ;;  %v1466_v63 = vpop.f32.mrf.mxu1  ;;  %v532_v52 = vpack.c.bf16 %v5879_v46, %v147_v45 }
 0x111   :  { %v1467_v1 = vadd.f32 %v1466_v63, %v872_v62 }
 0x112   :  { %v2537_v2 = vadd.f32 %v5678_v36, %v2395_v61  ;;  %v5898_v61 = vld [vmem:[%s8064_s28 + $0x2a0] sm:$0xff] }
 0x113   :  { %4947 = vmatmul.msk.bf16.gmra.mxu0 %vm596_vm1, %v456_v58  ;;  %5021 = vmatmul.msk.bf16.gmra.mxu1 %vm596_vm1, %v382_v59  ;;  %v146_v59 = vld [vmem:[%s8064_s28 + $0x268] sm:$0xff]  ;;  %v533_v9 = vpack.c.bf16 %v5898_v61, %v149_v60 }
 0x114   :  { %v2675_v5 = vmax.f32 %v2537_v2, 0.0  ;;  %5095 = vmatmul.msk.bf16.gmra.mxu2 %vm596_vm1, %v530_v0  ;;  %v459_v0 = vpack.c.bf16 %v150_v56, %v146_v59 }
 0x116   :  { %v5837_v6 = vmax.f32 %v2672_v4, %v2675_v5 }
 0x117   :  { %v2060_v7 = vpop.f32.mrf.mxu2 }
 0x118   :  { %v2396_v10 = vadd.f32 %v2060_v7, %v1467_v1  ;;  %v874_v11 = vpop.f32.mrf.mxu0  ;;  %v1468_v12 = vpop.f32.mrf.mxu1  ;;  %v385_v1 = vpack.c.bf16 %v147_v45, %v143_v22 }
 0x119   :  { %v1469_v14 = vadd.f32 %v1468_v12, %v874_v11 }
 0x11a   :  { %v2538_v15 = vadd.f32 %v5678_v36, %v2396_v10 }
 0x11c   :  { %v2676_v18 = vmax.f32 %v2538_v15, 0.0 }
 0x11e   :  { %v5855_v23 = vmax.f32 %v2673_v17, %v2676_v18 }
 0x11f   :  { %v2062_v24 = vpop.f32.mrf.mxu2 }
 0x120   :  { %v2397_v30 = vadd.f32 %v2062_v24, %v1469_v14  ;;  %v877_v31 = vpop.f32.mrf.mxu0  ;;  %v1471_v32 = vpop.f32.mrf.mxu1 }
 0x121   :  { %v1472_v54 = vadd.f32 %v1471_v32, %v877_v31  ;;  %v154_v31 = vld [vmem:[%s8064_s28 + $0x2a8] sm:$0xff] }
 0x122   :  { %v2539_v34 = vadd.f32 %v5678_v36, %v2397_v30  ;;  %v152_v30 = vld [vmem:[%s8064_s28 + $0x298] sm:$0xff] }
 0x123   :  { %4948 = vmatmul.msk.bf16.gmra.mxu0 %vm596_vm1, %v457_v26  ;;  %5022 = vmatmul.msk.bf16.gmra.mxu1 %vm596_vm1, %v383_v27 }
 0x124   :  { %v2677_v37 = vmax.f32 %v2539_v34, 0.0  ;;  %5096 = vmatmul.msk.bf16.gmra.mxu2 %vm596_vm1, %v531_v33 }
 0x126   :  { %v5865_v38 = vmax.f32 %v2674_v35, %v2677_v37  ;;  %v460_v35 = vpack.c.bf16 %v152_v30, %v151_v28  ;;  %v386_v37 = vpack.c.bf16 %v149_v60, %v5879_v46  ;;  %v156_v60 = vld [vmem:[%s8064_s28 + $0x2b8] sm:$0xff] }
 0x127   :  { %v2065_v39 = vpop.f32.mrf.mxu2 }
 0x128   :  { %v879_v40 = vpop.f32.mrf.mxu0  ;;  %v1473_v41 = vpop.f32.mrf.mxu1  ;;  %v2398_v58 = vadd.f32 %v2065_v39, %v1472_v54 }
 0x129   :  { %v1474_v22 = vadd.f32 %v1473_v41, %v879_v40 }
 0x12a   :  { %v2540_v2 = vadd.f32 %v5678_v36, %v2398_v58 }
 0x12c   :  { %v2678_v11 = vmax.f32 %v2540_v2, 0.0 }
 0x12f   :  { %v2067_v47 = vpop.f32.mrf.mxu2 }
 0x130   :  { %v882_v50 = vpop.f32.mrf.mxu0  ;;  %v1476_v51 = vpop.f32.mrf.mxu1  ;;  %v2399_v26 = vadd.f32 %v2067_v47, %v1474_v22 }
 0x131   :  { %v1477_v18 = vadd.f32 %v1476_v51, %v882_v50 }
 0x132   :  { %v2541_v39 = vadd.f32 %v5678_v36, %v2399_v26 }
 0x133   :  { %4949 = vmatmul.msk.bf16.gmra.mxu0 %vm596_vm1, %v458_v48  ;;  %5023 = vmatmul.msk.bf16.gmra.mxu1 %vm596_vm1, %v384_v49 }
 0x134   :  { %5097 = vmatmul.msk.bf16.gmra.mxu2 %vm596_vm1, %v532_v52  ;;  %v2679_v50 = vmax.f32 %v2541_v39, 0.0 }
 0x137   :  { %v2070_v42 = vpop.f32.mrf.mxu2 }
 0x138   :  { %v884_v55 = vpop.f32.mrf.mxu0  ;;  %v1478_v57 = vpop.f32.mrf.mxu1  ;;  %v2400_v27 = vadd.f32 %v2070_v42, %v1477_v18 }
 0x139   :  { %v1479_v62 = vadd.f32 %v1478_v57, %v884_v55 }
 0x13a   :  { %v2542_v40 = vadd.f32 %v5678_v36, %v2400_v27 }
 0x13c   :  { %v2680_v51 = vmax.f32 %v2542_v40, 0.0 }
 0x13f   :  { %v2072_v63 = vpop.f32.mrf.mxu2 }
 0x140   :  { %v2401_v4 = vadd.f32 %v2072_v63, %v1479_v62  ;;  %v887_v5 = vpop.f32.mrf.mxu0  ;;  %v1481_v7 = vpop.f32.mrf.mxu1  ;;  %v157_v62 = vld [vmem:[%s8064_s28 + $0x2c0] sm:$0xff]  ;;  %v159_v63 = vld [vmem:[%s8064_s28 + $0x2d0] sm:$0xff] }
 0x141   :  { %v1482_v14 = vadd.f32 %v1481_v7, %v887_v5  ;;  %v461_v2 = vpack.c.bf16 %v157_v62, %v156_v60 }
 0x142   :  { %v2543_v10 = vadd.f32 %v5678_v36, %v2401_v4  ;;  %v387_v4 = vpack.c.bf16 %v154_v31, %v5898_v61  ;;  %v158_v61 = vld [vmem:[%s8064_s28 + $0x2c8] sm:$0xff] }
 0x143   :  { %4950 = vmatmul.msk.bf16.gmra.mxu0 %vm596_vm1, %v459_v0  ;;  %5024 = vmatmul.msk.bf16.gmra.mxu1 %vm596_vm1, %v385_v1  ;;  %v5944_v0 = vld [vmem:[%s8064_s28 + $0x2d8] sm:$0xff] }
 0x144   :  { %v2681_v12 = vmax.f32 %v2543_v10, 0.0  ;;  %5098 = vmatmul.msk.bf16.gmra.mxu2 %vm596_vm1, %v533_v9  ;;  %v535_v10 = vpack.c.bf16 %v5944_v0, %v159_v63 }
 0x146   :  { %v2807_v15 = vmax.f32 %v2678_v11, %v2681_v12 }
 0x147   :  { %v2075_v17 = vpop.f32.mrf.mxu2 }
 0x148   :  { %v889_v19 = vpop.f32.mrf.mxu0  ;;  %v1483_v20 = vpop.f32.mrf.mxu1  ;;  %v2885_v21 = vpack.c.bf16 %v2807_v15, %v5795_v25  ;;  %v2402_v24 = vadd.f32 %v2075_v17, %v1482_v14  ;;  %v5920_v25 = vld [vmem:[%s8064_s28 + $0x2b0] sm:$0xff] }
 0x149   :  { %v1484_v33 = vadd.f32 %v1483_v20, %v889_v19  ;;  %v534_v45 = vpack.c.bf16 %v5920_v25, %v154_v31  ;;  %v162_v19 = vld [vmem:[%s8064_s28 + $0x2e8] sm:$0xff]  ;;  %v161_v20 = vld [vmem:[%s8064_s28 + $0x2e0] sm:$0xff]  ;;  %v388_v26 = vpack.c.bf16 %v159_v63, %v5920_v25 }
 0x14a   :  { %5156 = vmatmul.msk.bf16.gmra.mxu3 %vm2926_vm3, %v2885_v21  ;;  %v2544_v32 = vadd.f32 %v5678_v36, %v2402_v24  ;;  %v5963_v21 = vld [vmem:[%s8064_s28 + $0x300] sm:$0xff]  ;;  %v462_v24 = vpack.c.bf16 %v162_v19, %v158_v61 }
 0x14c   :  { %v2682_v48 = vmax.f32 %v2544_v32, 0.0  ;;  %v536_v32 = vpack.c.bf16 %v5963_v21, %v161_v20 }
 0x14e   :  { %v2808_v52 = vmax.f32 %v2679_v50, %v2682_v48  ;;  %v163_v50 = vld [vmem:[%s8064_s28 + $0x2f0] sm:$0xff] }
 0x14f   :  { %v2077_v34 = vpop.f32.mrf.mxu2 }
 0x150   :  { %v2403_v41 = vadd.f32 %v2077_v34, %v1484_v33  ;;  %v892_v43 = vpop.f32.mrf.mxu0  ;;  %v1486_v44 = vpop.f32.mrf.mxu1 }
 0x151   :  { %v1487_v47 = vadd.f32 %v1486_v44, %v892_v43 }
 0x152   :  { %v2545_v49 = vadd.f32 %v5678_v36, %v2403_v41 }
 0x153   :  { %4951 = vmatmul.msk.bf16.gmra.mxu0 %vm596_vm1, %v460_v35  ;;  %5025 = vmatmul.msk.bf16.gmra.mxu1 %vm596_vm1, %v386_v37 }
 0x154   :  { %v2683_v46 = vmax.f32 %v2545_v49, 0.0  ;;  %5099 = vmatmul.msk.bf16.gmra.mxu2 %vm596_vm1, %v534_v45 }
 0x156   :  { %v2809_v42 = vmax.f32 %v2680_v51, %v2683_v46  ;;  %v164_v51 = vld [vmem:[%s8064_s28 + $0x2f8] sm:$0xff]  ;;  %v166_v46 = vld [vmem:[%s8064_s28 + $0x308] sm:$0xff] }
 0x157   :  { %v2080_v54 = vpop.f32.mrf.mxu2 }
 0x158   :  { %v2404_v55 = vadd.f32 %v2080_v54, %v1487_v47  ;;  %v894_v57 = vpop.f32.mrf.mxu0  ;;  %v1488_v58 = vpop.f32.mrf.mxu1  ;;  %v2886_v59 = vpack.c.bf16 %v2809_v42, %v2808_v52  ;;  %v167_v52 = vld [vmem:[%s8064_s28 + $0x310] sm:$0xff] }
 0x159   :  { %v1489_v56 = vadd.f32 %v1488_v58, %v894_v57  ;;  %v389_v57 = vpack.c.bf16 %v161_v20, %v5944_v0  ;;  %v537_v63 = vpack.c.bf16 %v167_v52, %v166_v46 }
 0x15a   :  { %5157 = vmatmul.msk.bf16.gmra.mxu3 %vm2926_vm3, %v2886_v59  ;;  %v2546_v27 = vadd.f32 %v5678_v36, %v2404_v55  ;;  %v463_v55 = vpack.c.bf16 %v164_v51, %v163_v50 }
 0x15c   :  { %v2684_v35 = vmax.f32 %v2546_v27, 0.0 }
 0x15f   :  { %v2082_v1 = vpop.f32.mrf.mxu2 }
 0x160   :  { %v2405_v5 = vadd.f32 %v2082_v1, %v1489_v56  ;;  %v897_v7 = vpop.f32.mrf.mxu0  ;;  %v1491_v9 = vpop.f32.mrf.mxu1 }
 0x161   :  { %v1492_v11 = vadd.f32 %v1491_v9, %v897_v7 }
 0x162   :  { %v2547_v40 = vadd.f32 %v5678_v36, %v2405_v5 }
 0x163   :  { %4952 = vmatmul.msk.bf16.gmra.mxu0 %vm596_vm1, %v461_v2  ;;  %5026 = vmatmul.msk.bf16.gmra.mxu1 %vm596_vm1, %v387_v4 }
 0x164   :  { %5100 = vmatmul.msk.bf16.gmra.mxu2 %vm596_vm1, %v535_v10  ;;  %v2685_v48 = vmax.f32 %v2547_v40, 0.0  ;;  %v168_v10 = vld [vmem:[%s8064_s28 + $0x318] sm:$0xff] }
 0x167   :  { %v2085_v12 = vpop.f32.mrf.mxu2 }
 0x168   :  { %v2406_v14 = vadd.f32 %v2085_v12, %v1492_v11  ;;  %v899_v15 = vpop.f32.mrf.mxu0  ;;  %v1493_v17 = vpop.f32.mrf.mxu1  ;;  %v169_v11 = vld [vmem:[%s8064_s28 + $0x320] sm:$0xff]  ;;  %v171_v12 = vld [vmem:[%s8064_s28 + $0x330] sm:$0xff] }
 0x169   :  { %v1494_v18 = vadd.f32 %v1493_v17, %v899_v15  ;;  %v464_v17 = vpack.c.bf16 %v169_v11, %v168_v10 }
 0x16a   :  { %v2548_v58 = vadd.f32 %v5678_v36, %v2406_v14  ;;  %v6012_v14 = vld [vmem:[%s8064_s28 + $0x338] sm:$0xff] }
 0x16b   :  { %v538_v20 = vpack.c.bf16 %v6012_v14, %v171_v12 }
 0x16c   :  { %v2686_v2 = vmax.f32 %v2548_v58, 0.0 }
 0x16f   :  { %v2087_v22 = vpop.f32.mrf.mxu2 }
 0x170   :  { %v2407_v28 = vadd.f32 %v2087_v22, %v1494_v18  ;;  %v902_v30 = vpop.f32.mrf.mxu0  ;;  %v1496_v31 = vpop.f32.mrf.mxu1  ;;  %v390_v18 = vpack.c.bf16 %v166_v46, %v5963_v21  ;;  %v174_v21 = vld [vmem:[%s8064_s28 + $0x348] sm:$0xff] }
 0x171   :  { %v1497_v33 = vadd.f32 %v1496_v31, %v902_v30  ;;  %v170_v30 = vld [vmem:[%s8064_s28 + $0x328] sm:$0xff]  ;;  %v173_v31 = vld [vmem:[%s8064_s28 + $0x340] sm:$0xff] }
 0x172   :  { %v2549_v34 = vadd.f32 %v5678_v36, %v2407_v28 }
 0x173   :  { %4953 = vmatmul.msk.bf16.gmra.mxu0 %vm596_vm1, %v462_v24  ;;  %5027 = vmatmul.msk.bf16.gmra.mxu1 %vm596_vm1, %v388_v26 }
 0x174   :  { %v2687_v37 = vmax.f32 %v2549_v34, 0.0  ;;  %5101 = vmatmul.msk.bf16.gmra.mxu2 %vm596_vm1, %v536_v32  ;;  %v6031_v32 = vld [vmem:[%s8064_s28 + $0x360] sm:$0xff]  ;;  %v465_v34 = vpack.c.bf16 %v174_v21, %v170_v30 }
 0x176   :  { %v5972_v39 = vmax.f32 %v2684_v35, %v2687_v37  ;;  %v391_v35 = vpack.c.bf16 %v171_v12, %v167_v52 }
 0x177   :  { %v2090_v25 = vpop.f32.mrf.mxu2 }
 0x178   :  { %v2408_v41 = vadd.f32 %v2090_v25, %v1497_v33  ;;  %v904_v43 = vpop.f32.mrf.mxu0  ;;  %v1498_v44 = vpop.f32.mrf.mxu1 }
 0x179   :  { %v1499_v45 = vadd.f32 %v1498_v44, %v904_v43  ;;  %v539_v43 = vpack.c.bf16 %v6031_v32, %v173_v31 }
 0x17a   :  { %v2550_v47 = vadd.f32 %v5678_v36, %v2408_v41 }
 0x17c   :  { %v2688_v49 = vmax.f32 %v2550_v47, 0.0 }
 0x17e   :  { %v5988_v42 = vmax.f32 %v2685_v48, %v2688_v49 }
 0x17f   :  { %v2092_v54 = vpop.f32.mrf.mxu2 }
 0x180   :  { %v2409_v56 = vadd.f32 %v2092_v54, %v1499_v45  ;;  %v907_v60 = vpop.f32.mrf.mxu0  ;;  %v1501_v62 = vpop.f32.mrf.mxu1 }
 0x181   :  { %v1502_v37 = vadd.f32 %v1501_v62, %v907_v60 }
 0x182   :  { %v2551_v1 = vadd.f32 %v5678_v36, %v2409_v56 }
 0x183   :  { %4954 = vmatmul.msk.bf16.gmra.mxu0 %vm596_vm1, %v463_v55  ;;  %5028 = vmatmul.msk.bf16.gmra.mxu1 %vm596_vm1, %v389_v57 }
 0x184   :  { %v2689_v4 = vmax.f32 %v2551_v1, 0.0  ;;  %5102 = vmatmul.msk.bf16.gmra.mxu2 %vm596_vm1, %v537_v63 }
 0x186   :  { %v5998_v0 = vmax.f32 %v2686_v2, %v2689_v4  ;;  %v175_v2 = vld [vmem:[%s8064_s28 + $0x350] sm:$0xff]  ;;  %v176_v4 = vld [vmem:[%s8064_s28 + $0x358] sm:$0xff] }
 0x187   :  { %v2095_v5 = vpop.f32.mrf.mxu2  ;;  %v466_v12 = vpack.c.bf16 %v176_v4, %v175_v2 }
 0x188   :  { %v909_v7 = vpop.f32.mrf.mxu0  ;;  %v1503_v9 = vpop.f32.mrf.mxu1  ;;  %v2410_v47 = vadd.f32 %v2095_v5, %v1502_v37  ;;  %v178_v5 = vld [vmem:[%s8064_s28 + $0x368] sm:$0xff]  ;;  %v181_v37 = vld [vmem:[%s8064_s28 + $0x380] sm:$0xff] }
 0x189   :  { %v1504_v44 = vadd.f32 %v1503_v9, %v909_v7  ;;  %v179_v7 = vld [vmem:[%s8064_s28 + $0x370] sm:$0xff] }
 0x18a   :  { %v2552_v46 = vadd.f32 %v5678_v36, %v2410_v47 }
 0x18c   :  { %v2690_v62 = vmax.f32 %v2552_v46, 0.0 }
 0x18f   :  { %v2097_v15 = vpop.f32.mrf.mxu2 }
 0x190   :  { %v912_v61 = vpop.f32.mrf.mxu0  ;;  %v1506_v19 = vpop.f32.mrf.mxu1  ;;  %v2411_v48 = vadd.f32 %v2097_v15, %v1504_v44  ;;  %v392_v15 = vpack.c.bf16 %v173_v31, %v6012_v14  ;;  %v393_v44 = vpack.c.bf16 %v178_v5, %v6031_v32  ;;  %v182_v32 = vld [vmem:[%s8064_s28 + $0x388] sm:$0xff] }
 0x191   :  { %v1507_v22 = vadd.f32 %v1506_v19, %v912_v61 }
 0x192   :  { %v2553_v52 = vadd.f32 %v5678_v36, %v2411_v48 }
 0x193   :  { %4955 = vmatmul.msk.bf16.gmra.mxu0 %vm596_vm1, %v464_v17  ;;  %5029 = vmatmul.msk.bf16.gmra.mxu1 %vm596_vm1, %v390_v18 }
 0x194   :  { %5103 = vmatmul.msk.bf16.gmra.mxu2 %vm596_vm1, %v538_v20  ;;  %v2691_v63 = vmax.f32 %v2553_v52, 0.0 }
 0x197   :  { %v2100_v24 = vpop.f32.mrf.mxu2 }
 0x198   :  { %v2412_v26 = vadd.f32 %v2100_v24, %v1507_v22  ;;  %v914_v27 = vpop.f32.mrf.mxu0  ;;  %v1508_v28 = vpop.f32.mrf.mxu1  ;;  %v540_v22 = vpack.c.bf16 %v179_v7, %v178_v5 }
 0x199   :  { %v1509_v25 = vadd.f32 %v1508_v28, %v914_v27 }
 0x19a   :  { %v2554_v17 = vadd.f32 %v5678_v36, %v2412_v26 }
 0x19c   :  { %v2692_v28 = vmax.f32 %v2554_v17, 0.0 }
 0x19f   :  { %v2102_v33 = vpop.f32.mrf.mxu2 }
 0x1a0   :  { %v917_v40 = vpop.f32.mrf.mxu0  ;;  %v1511_v41 = vpop.f32.mrf.mxu1  ;;  %v2413_v45 = vadd.f32 %v2102_v33, %v1509_v25  ;;  %v183_v25 = vld [vmem:[%s8064_s28 + $0x390] sm:$0xff] }
 0x1a1   :  { %v1512_v49 = vadd.f32 %v1511_v41, %v917_v40  ;;  %v6074_v40 = vld [vmem:[%s8064_s28 + $0x398] sm:$0xff] }
 0x1a2   :  { %v2555_v50 = vadd.f32 %v5678_v36, %v2413_v45 }
 0x1a3   :  { %4956 = vmatmul.msk.bf16.gmra.mxu0 %vm596_vm1, %v465_v34  ;;  %5030 = vmatmul.msk.bf16.gmra.mxu1 %vm596_vm1, %v391_v35  ;;  %v180_v35 = vld [vmem:[%s8064_s28 + $0x378] sm:$0xff] }
 0x1a4   :  { %5104 = vmatmul.msk.bf16.gmra.mxu2 %vm596_vm1, %v539_v43  ;;  %v2693_v56 = vmax.f32 %v2555_v50, 0.0  ;;  %v467_v43 = vpack.c.bf16 %v181_v37, %v180_v35 }
 0x1a6   :  { %v2813_v10 = vmax.f32 %v2690_v62, %v2693_v56  ;;  %v6093_v56 = vld [vmem:[%s8064_s28 + $0x3c0] sm:$0xff] }
 0x1a7   :  { %v2105_v51 = vpop.f32.mrf.mxu2 }
 0x1a8   :  { %v2414_v54 = vadd.f32 %v2105_v51, %v1512_v49  ;;  %v919_v55 = vpop.f32.mrf.mxu0  ;;  %v1513_v57 = vpop.f32.mrf.mxu1  ;;  %v541_v49 = vpack.c.bf16 %v6074_v40, %v183_v25 }
 0x1a9   :  { %v1514_v58 = vadd.f32 %v1513_v57, %v919_v55  ;;  %v186_v57 = vld [vmem:[%s8064_s28 + $0x3a8] sm:$0xff] }
 0x1aa   :  { %v2556_v60 = vadd.f32 %v5678_v36, %v2414_v54  ;;  %v468_v62 = vpack.c.bf16 %v186_v57, %v182_v32  ;;  %v195_v32 = vld [vmem:[%s8064_s28 + $0x3f0] sm:$0xff]  ;;  %v6146_v57 = vld [vmem:[%s8064_s28 + $0x3f8] sm:$0xff] }
 0x1ac   :  { %v2694_v1 = vmax.f32 %v2556_v60, 0.0 }
 0x1ae   :  { %v2814_v9 = vmax.f32 %v2691_v63, %v2694_v1  ;;  %v394_v63 = vpack.c.bf16 %v183_v25, %v179_v7 }
 0x1af   :  { %v2107_v11 = vpop.f32.mrf.mxu2 }
 0x1b0   :  { %v2415_v18 = vadd.f32 %v2107_v11, %v1514_v58  ;;  %v922_v61 = vpop.f32.mrf.mxu0  ;;  %v1516_v19 = vpop.f32.mrf.mxu1  ;;  %v2887_v20 = vpack.c.bf16 %v2814_v9, %v2813_v10  ;;  %v185_v58 = vld [vmem:[%s8064_s28 + $0x3a0] sm:$0xff] }
 0x1b1   :  { %v1517_v24 = vadd.f32 %v1516_v19, %v922_v61  ;;  %v542_v9 = vpack.c.bf16 %v6093_v56, %v185_v58  ;;  %v395_v37 = vpack.c.bf16 %v185_v58, %v6074_v40 }
 0x1b2   :  { %v2557_v27 = vadd.f32 %v5678_v36, %v2415_v18  ;;  %5158 = vmatmul.msk.bf16.gmra.mxu3 %vm2926_vm3, %v2887_v20 }
 0x1b3   :  { %4957 = vmatmul.msk.bf16.gmra.mxu0 %vm596_vm1, %v466_v12  ;;  %5031 = vmatmul.msk.bf16.gmra.mxu1 %vm596_vm1, %v392_v15 }
 0x1b4   :  { %v2695_v30 = vmax.f32 %v2557_v27, 0.0  ;;  %5105 = vmatmul.msk.bf16.gmra.mxu2 %vm596_vm1, %v540_v22 }
 0x1b6   :  { %v6060_v14 = vmax.f32 %v2692_v28, %v2695_v30  ;;  %v187_v30 = vld [vmem:[%s8064_s28 + $0x3b0] sm:$0xff] }
 0x1b7   :  { %v2110_v26 = vpop.f32.mrf.mxu2 }
 0x1b8   :  { %v2416_v21 = vadd.f32 %v2110_v26, %v1517_v24  ;;  %v924_v31 = vpop.f32.mrf.mxu0  ;;  %v1518_v33 = vpop.f32.mrf.mxu1  ;;  %v188_v26 = vld [vmem:[%s8064_s28 + $0x3b8] sm:$0xff] }
 0x1b9   :  { %v1519_v34 = vadd.f32 %v1518_v33, %v924_v31  ;;  %v191_v31 = vld [vmem:[%s8064_s28 + $0x3d0] sm:$0xff]  ;;  %v469_v35 = vpack.c.bf16 %v188_v26, %v187_v30 }
 0x1ba   :  { %v2558_v1 = vadd.f32 %v5678_v36, %v2416_v21  ;;  %v190_v21 = vld [vmem:[%s8064_s28 + $0x3c8] sm:$0xff] }
 0x1bc   :  { %v2696_v12 = vmax.f32 %v2558_v1, 0.0 }
 0x1bf   :  { %v2112_v41 = vpop.f32.mrf.mxu2 }
 0x1c0   :  { %v2417_v45 = vadd.f32 %v2112_v41, %v1519_v34  ;;  %v927_v47 = vpop.f32.mrf.mxu0  ;;  %v1521_v48 = vpop.f32.mrf.mxu1 }
 0x1c1   :  { %v1522_v50 = vadd.f32 %v1521_v48, %v927_v47  ;;  %v543_v47 = vpack.c.bf16 %v191_v31, %v190_v21  ;;  %v6126_v48 = vld [vmem:[%s8065_s30] ss:$0 sm:$0xff] }
 0x1c2   :  { %v2559_v18 = vadd.f32 %v5678_v36, %v2417_v45 }
 0x1c3   :  { %4958 = vmatmul.msk.bf16.gmra.mxu0 %vm596_vm1, %v467_v43  ;;  %5032 = vmatmul.msk.bf16.gmra.mxu1 %vm596_vm1, %v393_v44 }
 0x1c4   :  { %5106 = vmatmul.msk.bf16.gmra.mxu2 %vm596_vm1, %v541_v49  ;;  %v2697_v27 = vmax.f32 %v2559_v18, 0.0 }
 0x1c7   :  { %v2115_v51 = vpop.f32.mrf.mxu2 }
 0x1c8   :  { %v2418_v46 = vadd.f32 %v2115_v51, %v1522_v50  ;;  %v929_v52 = vpop.f32.mrf.mxu0  ;;  %v1523_v54 = vpop.f32.mrf.mxu1 }
 0x1c9   :  { %v1524_v55 = vadd.f32 %v1523_v54, %v929_v52  ;;  %v192_v54 = vld [vmem:[%s8064_s28 + $0x3d8] sm:$0xff] }
 0x1ca   :  { %v2560_v25 = vadd.f32 %v5678_v36, %v2418_v46 }
 0x1cc   :  { %v2698_v40 = vmax.f32 %v2560_v25, 0.0 }
 0x1cf   :  { %v2117_v60 = vpop.f32.mrf.mxu2 }
 0x1d0   :  { %v2419_v2 = vadd.f32 %v2117_v60, %v1524_v55  ;;  %v932_v4 = vpop.f32.mrf.mxu0  ;;  %v1526_v5 = vpop.f32.mrf.mxu1  ;;  %v193_v55 = vld [vmem:[%s8064_s28 + $0x3e0] sm:$0xff] }
 0x1d1   :  { %v1527_v10 = vadd.f32 %v1526_v5, %v932_v4  ;;  %v470_v60 = vpack.c.bf16 %v193_v55, %v192_v54  ;;  %v200_v54 = vld [vmem:[%s8064_s28 + $0x418] sm:$0xff]  ;;  %v202_v55 = vld [vmem:[%s8064_s28 + $0x428] sm:$0xff] }
 0x1d2   :  { %v2561_v11 = vadd.f32 %v5678_v36, %v2419_v2  ;;  %v544_v2 = vpack.c.bf16 %v6146_v57, %v195_v32 }
 0x1d3   :  { %4959 = vmatmul.msk.bf16.gmra.mxu0 %vm596_vm1, %v468_v62  ;;  %5033 = vmatmul.msk.bf16.gmra.mxu1 %vm596_vm1, %v394_v63  ;;  %v396_v62 = vpack.c.bf16 %v190_v21, %v6093_v56  ;;  %v198_v56 = vld [vmem:[%s8064_s28 + $0x408] sm:$0xff] }
 0x1d4   :  { %v2699_v15 = vmax.f32 %v2561_v11, 0.0  ;;  %5107 = vmatmul.msk.bf16.gmra.mxu2 %vm596_vm1, %v542_v9 }
 0x1d6   :  { %v6101_v17 = vmax.f32 %v2696_v12, %v2699_v15  ;;  %v194_v12 = vld [vmem:[%s8064_s28 + $0x3e8] sm:$0xff]  ;;  %v197_v15 = vld [vmem:[%s8064_s28 + $0x400] sm:$0xff] }
 0x1d7   :  { %v2120_v7 = vpop.f32.mrf.mxu2 }
 0x1d8   :  { %v2420_v61 = vadd.f32 %v2120_v7, %v1527_v10  ;;  %v934_v19 = vpop.f32.mrf.mxu0  ;;  %v1528_v20 = vpop.f32.mrf.mxu1  ;;  %v6165_v7 = vld [vmem:[%s8064_s28 + $0x420] sm:$0xff] }
 0x1d9   :  { %v1529_v22 = vadd.f32 %v1528_v20, %v934_v19  ;;  %v471_v19 = vpack.c.bf16 %v198_v56, %v194_v12  ;;  %v397_v20 = vpack.c.bf16 %v195_v32, %v191_v31  ;;  %v545_v30 = vpack.c.bf16 %v6165_v7, %v197_v15 }
 0x1da   :  { %v2562_v24 = vadd.f32 %v5678_v36, %v2420_v61 }
 0x1dc   :  { %v2700_v28 = vmax.f32 %v2562_v24, 0.0 }
 0x1de   :  { %v6117_v33 = vmax.f32 %v2697_v27, %v2700_v28 }
 0x1df   :  { %v2122_v34 = vpop.f32.mrf.mxu2 }
 0x1e0   :  { %v2421_v43 = vadd.f32 %v2122_v34, %v1529_v22  ;;  %v937_v44 = vpop.f32.mrf.mxu0  ;;  %v1531_v45 = vpop.f32.mrf.mxu1 }
 0x1e1   :  { %v1532_v5 = vadd.f32 %v1531_v45, %v937_v44 }
 0x1e2   :  { %v2563_v49 = vadd.f32 %v6126_v48, %v2421_v43 }
 0x1e3   :  { %4960 = vmatmul.msk.bf16.gmra.mxu0 %vm596_vm1, %v469_v35  ;;  %5034 = vmatmul.msk.bf16.gmra.mxu1 %vm596_vm1, %v395_v37 }
 0x1e4   :  { %v2701_v36 = vmax.f32 %v2563_v49, 0.0  ;;  %5108 = vmatmul.msk.bf16.gmra.mxu2 %vm596_vm1, %v543_v47 }
 0x1e6   :  { %v6132_v50 = vmax.f32 %v2698_v40, %v2701_v36 }
 0x1e7   :  { %v2125_v51 = vpop.f32.mrf.mxu2 }
 0x1e8   :  { %v939_v46 = vpop.f32.mrf.mxu0  ;;  %v1533_v52 = vpop.f32.mrf.mxu1  ;;  %v2422_v11 = vadd.f32 %v2125_v51, %v1532_v5  ;;  %v199_v51 = vld [vmem:[%s8064_s28 + $0x410] sm:$0xff] }
 0x1e9   :  { %v1534_v47 = vadd.f32 %v1533_v52, %v939_v46 }
 0x1ea   :  { %v2564_v22 = vadd.f32 %v6126_v48, %v2422_v11 }
 0x1ec   :  { %v2702_v21 = vmax.f32 %v2564_v22, 0.0 }
 0x1ef   :  { %v2127_v58 = vpop.f32.mrf.mxu2 }
 0x1f0   :  { %v942_v63 = vpop.f32.mrf.mxu0  ;;  %v1536_v1 = vpop.f32.mrf.mxu1  ;;  %v2423_v40 = vadd.f32 %v2127_v58, %v1534_v47  ;;  %v472_v58 = vpack.c.bf16 %v200_v54, %v199_v51  ;;  %v210_v54 = vld [vmem:[%s8064_s28 + $0x468] sm:$0xff] }
 0x1f1   :  { %v1537_v25 = vadd.f32 %v1536_v1, %v942_v63 }
 0x1f3   :  { %4961 = vmatmul.msk.bf16.gmra.mxu0 %vm596_vm1, %v470_v60  ;;  %5035 = vmatmul.msk.bf16.gmra.mxu1 %vm596_vm1, %v396_v62  ;;  %v398_v60 = vpack.c.bf16 %v197_v15, %v6146_v57  ;;  %v2565_v62 = vadd.f32 %v6126_v48, %v2423_v40 }
 0x1f4   :  { %5109 = vmatmul.msk.bf16.gmra.mxu2 %vm596_vm1, %v544_v2 }
 0x1f5   :  { %v2703_v12 = vmax.f32 %v2565_v62, 0.0 }
 0x1f7   :  { %v2130_v4 = vpop.f32.mrf.mxu2 }
 0x1f8   :  { %v944_v9 = vpop.f32.mrf.mxu0  ;;  %v1538_v10 = vpop.f32.mrf.mxu1  ;;  %v2424_v36 = vadd.f32 %v2130_v4, %v1537_v25 }
 0x1f9   :  { %v1539_v18 = vadd.f32 %v1538_v10, %v944_v9 }
 0x1fa   :  { %v2566_v63 = vadd.f32 %v6126_v48, %v2424_v36 }
 0x1fc   :  { %v2704_v56 = vmax.f32 %v2566_v63, 0.0 }
 0x1ff   :  { %v2132_v61 = vpop.f32.mrf.mxu2 }
 0x200   :  { %v2425_v24 = vadd.f32 %v2132_v61, %v1539_v18  ;;  %v947_v27 = vpop.f32.mrf.mxu0  ;;  %v1541_v28 = vpop.f32.mrf.mxu1 }
 0x201   :  { %v1542_v35 = vadd.f32 %v1541_v28, %v947_v27  ;;  %v204_v28 = vld [vmem:[%s8064_s28 + $0x438] sm:$0xff] }
 0x202   :  { %v2567_v26 = vadd.f32 %v6126_v48, %v2425_v24 }
 0x203   :  { %4962 = vmatmul.msk.bf16.gmra.mxu0 %vm596_vm1, %v471_v19  ;;  %5036 = vmatmul.msk.bf16.gmra.mxu1 %vm596_vm1, %v397_v20 }
 0x204   :  { %v2705_v34 = vmax.f32 %v2567_v26, 0.0  ;;  %5110 = vmatmul.msk.bf16.gmra.mxu2 %vm596_vm1, %v545_v30  ;;  %v205_v30 = vld [vmem:[%s8064_s28 + $0x440] sm:$0xff]  ;;  %v207_v26 = vld [vmem:[%s8064_s28 + $0x450] sm:$0xff] }
 0x206   :  { %v2819_v37 = vmax.f32 %v2702_v21, %v2705_v34  ;;  %v6211_v21 = vld [vmem:[%s8064_s28 + $0x458] sm:$0xff] }
 0x207   :  { %v2135_v31 = vpop.f32.mrf.mxu2 }
 0x208   :  { %v949_v43 = vpop.f32.mrf.mxu0  ;;  %v1543_v44 = vpop.f32.mrf.mxu1  ;;  %v2888_v45 = vpack.c.bf16 %v2819_v37, %v6060_v14  ;;  %v2426_v49 = vadd.f32 %v2135_v31, %v1542_v35  ;;  %v6187_v14 = vld [vmem:[%s8064_s28 + $0x430] sm:$0xff]  ;;  %v473_v35 = vpack.c.bf16 %v205_v30, %v204_v28  ;;  %v399_v37 = vpack.c.bf16 %v202_v55, %v6165_v7  ;;  %v206_v7 = vld [vmem:[%s8064_s28 + $0x448] sm:$0xff] }
 0x209   :  { %v1544_v52 = vadd.f32 %v1543_v44, %v949_v43  ;;  %v546_v5 = vpack.c.bf16 %v6187_v14, %v202_v55  ;;  %v547_v44 = vpack.c.bf16 %v6211_v21, %v207_v26  ;;  %v209_v55 = vld [vmem:[%s8064_s28 + $0x460] sm:$0xff]  ;;  %v215_v28 = vld [vmem:[%s8064_s28 + $0x490] sm:$0xff] }
 0x20a   :  { %5159 = vmatmul.msk.bf16.gmra.mxu3 %vm2926_vm3, %v2888_v45  ;;  %v2568_v46 = vadd.f32 %v6126_v48, %v2426_v49 }
 0x20c   :  { %v2706_v10 = vmax.f32 %v2568_v46, 0.0  ;;  %v6230_v46 = vld [vmem:[%s8064_s28 + $0x480] sm:$0xff] }
 0x20e   :  { %v2820_v15 = vmax.f32 %v2703_v12, %v2706_v10 }
 0x20f   :  { %v2137_v32 = vpop.f32.mrf.mxu2 }
 0x210   :  { %v2427_v1 = vadd.f32 %v2137_v32, %v1544_v52  ;;  %v952_v2 = vpop.f32.mrf.mxu0  ;;  %v1546_v4 = vpop.f32.mrf.mxu1  ;;  %v474_v32 = vpack.c.bf16 %v210_v54, %v206_v7  ;;  %v216_v54 = vld [vmem:[%s8064_s28 + $0x498] sm:$0xff] }
 0x211   :  { %v1547_v9 = vadd.f32 %v1546_v4, %v952_v2  ;;  %v548_v2 = vpack.c.bf16 %v6230_v46, %v209_v55 }
 0x212   :  { %v2569_v11 = vadd.f32 %v6126_v48, %v2427_v1 }
 0x213   :  { %4963 = vmatmul.msk.bf16.gmra.mxu0 %vm596_vm1, %v472_v58  ;;  %5037 = vmatmul.msk.bf16.gmra.mxu1 %vm596_vm1, %v398_v60  ;;  %v400_v58 = vpack.c.bf16 %v207_v26, %v6187_v14 }
 0x214   :  { %v2707_v57 = vmax.f32 %v2569_v11, 0.0  ;;  %5111 = vmatmul.msk.bf16.gmra.mxu2 %vm596_vm1, %v546_v5 }
 0x216   :  { %v2821_v18 = vmax.f32 %v2704_v56, %v2707_v57 }
 0x217   :  { %v2140_v61 = vpop.f32.mrf.mxu2 }
 0x218   :  { %v2428_v19 = vadd.f32 %v2140_v61, %v1547_v9  ;;  %v954_v20 = vpop.f32.mrf.mxu0  ;;  %v1548_v22 = vpop.f32.mrf.mxu1  ;;  %v2889_v24 = vpack.c.bf16 %v2821_v18, %v2820_v15 }
 0x219   :  { %v1549_v27 = vadd.f32 %v1548_v22, %v954_v20  ;;  %v211_v22 = vld [vmem:[%s8064_s28 + $0x470] sm:$0xff] }
 0x21a   :  { %5160 = vmatmul.msk.bf16.gmra.mxu3 %vm2926_vm3, %v2889_v24  ;;  %v2570_v60 = vadd.f32 %v6126_v48, %v2428_v19  ;;  %v212_v24 = vld [vmem:[%s8064_s28 + $0x478] sm:$0xff] }
 0x21c   :  { %v2708_v9 = vmax.f32 %v2570_v60, 0.0 }
 0x21f   :  { %v2142_v34 = vpop.f32.mrf.mxu2 }
 0x220   :  { %v2429_v31 = vadd.f32 %v2142_v34, %v1549_v27  ;;  %v957_v25 = vpop.f32.mrf.mxu0  ;;  %v1551_v43 = vpop.f32.mrf.mxu1  ;;  %v214_v27 = vld [vmem:[%s8064_s28 + $0x488] sm:$0xff]  ;;  %v475_v34 = vpack.c.bf16 %v212_v24, %v211_v22 }
 0x221   :  { %v1552_v45 = vadd.f32 %v1551_v43, %v957_v25 }
 0x222   :  { %v2571_v12 = vadd.f32 %v6126_v48, %v2429_v31 }
 0x223   :  { %4964 = vmatmul.msk.bf16.gmra.mxu0 %vm596_vm1, %v473_v35  ;;  %5038 = vmatmul.msk.bf16.gmra.mxu1 %vm596_vm1, %v399_v37  ;;  %v401_v35 = vpack.c.bf16 %v209_v55, %v6211_v21  ;;  %v217_v55 = vld [vmem:[%s8064_s28 + $0x4a0] sm:$0xff] }
 0x224   :  { %5112 = vmatmul.msk.bf16.gmra.mxu2 %vm596_vm1, %v547_v44  ;;  %v2709_v19 = vmax.f32 %v2571_v12, 0.0  ;;  %v476_v60 = vpack.c.bf16 %v217_v55, %v216_v54  ;;  %v218_v12 = vld [vmem:[%s8064_s28 + $0x4a8] sm:$0xff] }
 0x227   :  { %v2145_v47 = vpop.f32.mrf.mxu2 }
 0x228   :  { %v2430_v49 = vadd.f32 %v2145_v47, %v1552_v45  ;;  %v959_v40 = vpop.f32.mrf.mxu0  ;;  %v1553_v36 = vpop.f32.mrf.mxu1  ;;  %v549_v45 = vpack.c.bf16 %v215_v28, %v214_v27 }
 0x229   :  { %v1554_v51 = vadd.f32 %v1553_v36, %v959_v40 }
 0x22a   :  { %v2572_v37 = vadd.f32 %v6126_v48, %v2430_v49 }
 0x22c   :  { %v2710_v40 = vmax.f32 %v2572_v37, 0.0 }
 0x22f   :  { %v2147_v52 = vpop.f32.mrf.mxu2 }
 0x230   :  { %v2431_v62 = vadd.f32 %v2147_v52, %v1554_v51  ;;  %v962_v63 = vpop.f32.mrf.mxu0  ;;  %v1556_v1 = vpop.f32.mrf.mxu1  ;;  %v219_v52 = vld [vmem:[%s8064_s28 + $0x4b0] sm:$0xff] }
 0x231   :  { %v1557_v4 = vadd.f32 %v1556_v1, %v962_v63 }
 0x232   :  { %v2573_v5 = vadd.f32 %v6126_v48, %v2431_v62  ;;  %v402_v62 = vpack.c.bf16 %v214_v27, %v6230_v46  ;;  %v222_v46 = vld [vmem:[%s8064_s28 + $0x4c8] sm:$0xff] }
 0x233   :  { %4965 = vmatmul.msk.bf16.gmra.mxu0 %vm596_vm1, %v474_v32  ;;  %5039 = vmatmul.msk.bf16.gmra.mxu1 %vm596_vm1, %v400_v58  ;;  %v6279_v32 = vld [vmem:[%s8064_s28 + $0x4b8] sm:$0xff] }
 0x234   :  { %v2711_v10 = vmax.f32 %v2573_v5, 0.0  ;;  %5113 = vmatmul.msk.bf16.gmra.mxu2 %vm596_vm1, %v548_v2  ;;  %v550_v2 = vpack.c.bf16 %v6279_v32, %v219_v52 }
 0x236   :  { %v6239_v11 = vmax.f32 %v2708_v9, %v2711_v10 }
 0x237   :  { %v2150_v14 = vpop.f32.mrf.mxu2 }
 0x238   :  { %v2432_v56 = vadd.f32 %v2150_v14, %v1557_v4  ;;  %v964_v57 = vpop.f32.mrf.mxu0  ;;  %v1558_v15 = vpop.f32.mrf.mxu1 }
 0x239   :  { %v1559_v18 = vadd.f32 %v1558_v15, %v964_v57  ;;  %v6298_v57 = vld [vmem:[%s8064_s28 + $0x4e0] sm:$0xff] }
 0x23a   :  { %v2574_v61 = vadd.f32 %v6126_v48, %v2432_v56  ;;  %v221_v56 = vld [vmem:[%s8064_s28 + $0x4c0] sm:$0xff] }
 0x23b   :  { %v551_v27 = vpack.c.bf16 %v6298_v57, %v221_v56 }
 0x23c   :  { %v2712_v20 = vmax.f32 %v2574_v61, 0.0  ;;  %v403_v61 = vpack.c.bf16 %v219_v52, %v215_v28 }
 0x23e   :  { %v6255_v30 = vmax.f32 %v2709_v19, %v2712_v20 }
 0x23f   :  { %v2152_v26 = vpop.f32.mrf.mxu2 }
 0x240   :  { %v2433_v25 = vadd.f32 %v2152_v26, %v1559_v18  ;;  %v967_v43 = vpop.f32.mrf.mxu0  ;;  %v1561_v44 = vpop.f32.mrf.mxu1  ;;  %v477_v18 = vpack.c.bf16 %v222_v46, %v218_v12 }
 0x241   :  { %v1562_v19 = vadd.f32 %v1561_v44, %v967_v43 }
 0x242   :  { %v2575_v47 = vadd.f32 %v6126_v48, %v2433_v25 }
 0x243   :  { %4966 = vmatmul.msk.bf16.gmra.mxu0 %vm596_vm1, %v475_v34  ;;  %5040 = vmatmul.msk.bf16.gmra.mxu1 %vm596_vm1, %v401_v35 }
 0x244   :  { %v2713_v36 = vmax.f32 %v2575_v47, 0.0  ;;  %5114 = vmatmul.msk.bf16.gmra.mxu2 %vm596_vm1, %v549_v45 }
 0x246   :  { %v6265_v21 = vmax.f32 %v2710_v40, %v2713_v36 }
 0x247   :  { %v2155_v49 = vpop.f32.mrf.mxu2 }
 0x248   :  { %v969_v51 = vpop.f32.mrf.mxu0  ;;  %v1563_v7 = vpop.f32.mrf.mxu1  ;;  %v2434_v35 = vadd.f32 %v2155_v49, %v1562_v19 }
 0x249   :  { %v1564_v26 = vadd.f32 %v1563_v7, %v969_v51 }
 0x24a   :  { %v2576_v43 = vadd.f32 %v6126_v48, %v2434_v35  ;;  %v228_v35 = vld [vmem:[%s8064_s28 + $0x4f8] sm:$0xff] }
 0x24c   :  { %v2714_v55 = vmax.f32 %v2576_v43, 0.0 }
 0x24f   :  { %v2157_v58 = vpop.f32.mrf.mxu2 }
 0x250   :  { %v972_v63 = vpop.f32.mrf.mxu0  ;;  %v1566_v1 = vpop.f32.mrf.mxu1  ;;  %v2435_v37 = vadd.f32 %v2157_v58, %v1564_v26  ;;  %v223_v58 = vld [vmem:[%s8064_s28 + $0x4d0] sm:$0xff] }
 0x251   :  { %v1567_v4 = vadd.f32 %v1566_v1, %v972_v63  ;;  %v227_v63 = vld [vmem:[%s8064_s28 + $0x4f0] sm:$0xff] }
 0x252   :  { %v2577_v44 = vadd.f32 %v6126_v48, %v2435_v37  ;;  %v229_v37 = vld [vmem:[%s8064_s28 + $0x500] sm:$0xff] }
 0x253   :  { %4967 = vmatmul.msk.bf16.gmra.mxu0 %vm596_vm1, %v476_v60  ;;  %5041 = vmatmul.msk.bf16.gmra.mxu1 %vm596_vm1, %v402_v62  ;;  %v224_v60 = vld [vmem:[%s8064_s28 + $0x4d8] sm:$0xff]  ;;  %v226_v62 = vld [vmem:[%s8064_s28 + $0x4e8] sm:$0xff]  ;;  %v479_v43 = vpack.c.bf16 %v229_v37, %v228_v35 }
 0x254   :  { %5115 = vmatmul.msk.bf16.gmra.mxu2 %vm596_vm1, %v550_v2  ;;  %v2715_v49 = vmax.f32 %v2577_v44, 0.0  ;;  %v405_v44 = vpack.c.bf16 %v226_v62, %v6298_v57  ;;  %v230_v57 = vld [vmem:[%s8064_s28 + $0x508] sm:$0xff] }
 0x257   :  { %v2160_v5 = vpop.f32.mrf.mxu2 }
 0x258   :  { %v2436_v9 = vadd.f32 %v2160_v5, %v1567_v4  ;;  %v974_v10 = vpop.f32.mrf.mxu0  ;;  %v1568_v14 = vpop.f32.mrf.mxu1  ;;  %v478_v5 = vpack.c.bf16 %v224_v60, %v223_v58  ;;  %v234_v60 = vld [vmem:[%s8064_s28 + $0x528] sm:$0xff] }
 0x259   :  { %v1569_v20 = vadd.f32 %v1568_v14, %v974_v10  ;;  %v404_v10 = vpack.c.bf16 %v221_v56, %v6279_v32 }
 0x25a   :  { %v2578_v14 = vadd.f32 %v6126_v48, %v2436_v9 }
 0x25f   :  { %v2162_v15 = vpop.f32.mrf.mxu2 }
 0x260   :  { %v977_v22 = vpop.f32.mrf.mxu0  ;;  %v1571_v24 = vpop.f32.mrf.mxu1  ;;  %v2437_v34 = vadd.f32 %v2162_v15, %v1569_v20 }
 0x261   :  { %v1572_v25 = vadd.f32 %v1571_v24, %v977_v22  ;;  %v2716_v22 = vmax.f32 %v2578_v14, 0.0 }
 0x262   :  { %v2579_v45 = vadd.f32 %v6126_v48, %v2437_v34 }
 0x263   :  { %4968 = vmatmul.msk.bf16.gmra.mxu0 %vm596_vm1, %v477_v18  ;;  %5042 = vmatmul.msk.bf16.gmra.mxu1 %vm596_vm1, %v403_v61  ;;  %v552_v61 = vpack.c.bf16 %v227_v63, %v226_v62  ;;  %v233_v62 = vld [vmem:[%s8064_s28 + $0x520] sm:$0xff] }
 0x264   :  { %5116 = vmatmul.msk.bf16.gmra.mxu2 %vm596_vm1, %v551_v27  ;;  %v2717_v7 = vmax.f32 %v2579_v45, 0.0  ;;  %v6341_v45 = vld [vmem:[%s8064_s28 + $0x518] sm:$0xff] }
 0x266   :  { %v2825_v2 = vmax.f32 %v2714_v55, %v2717_v7 }
 0x267   :  { %v2165_v28 = vpop.f32.mrf.mxu2 }
 0x268   :  { %v2438_v47 = vadd.f32 %v2165_v28, %v1572_v25  ;;  %v979_v40 = vpop.f32.mrf.mxu0  ;;  %v1573_v36 = vpop.f32.mrf.mxu1  ;;  %v231_v25 = vld [vmem:[%s8064_s28 + $0x510] sm:$0xff] }
 0x269   :  { %v1574_v51 = vadd.f32 %v1573_v36, %v979_v40 }
 0x26a   :  { %v2580_v54 = vadd.f32 %v6126_v48, %v2438_v47 }
 0x26c   :  { %v2718_v52 = vmax.f32 %v2580_v54, 0.0 }
 0x26e   :  { %v2826_v1 = vmax.f32 %v2715_v49, %v2718_v52 }
 0x26f   :  { %v2167_v4 = vpop.f32.mrf.mxu2 }
 0x270   :  { %v2439_v12 = vadd.f32 %v2167_v4, %v1574_v51  ;;  %v982_v46 = vpop.f32.mrf.mxu0  ;;  %v1576_v15 = vpop.f32.mrf.mxu1  ;;  %v2890_v18 = vpack.c.bf16 %v2826_v1, %v2825_v2  ;;  %v553_v51 = vpack.c.bf16 %v6341_v45, %v231_v25  ;;  %v237_v1 = vld [vmem:[%s8064_s28 + $0x540] sm:$0xff]  ;;  %v480_v4 = vpack.c.bf16 %v234_v60, %v230_v57 }
 0x271   :  { %v1577_v19 = vadd.f32 %v1576_v15, %v982_v46  ;;  %v554_v15 = vpack.c.bf16 %v237_v1, %v233_v62 }
 0x272   :  { %v2581_v20 = vadd.f32 %v6126_v48, %v2439_v12  ;;  %5161 = vmatmul.msk.bf16.gmra.mxu3 %vm2926_vm3, %v2890_v18 }
 0x273   :  { %4969 = vmatmul.msk.bf16.gmra.mxu0 %vm596_vm1, %v478_v5  ;;  %5043 = vmatmul.msk.bf16.gmra.mxu1 %vm596_vm1, %v404_v10  ;;  %v406_v5 = vpack.c.bf16 %v231_v25, %v227_v63  ;;  %v235_v25 = vld [vmem:[%s8064_s28 + $0x530] sm:$0xff] }
 0x274   :  { %v2719_v24 = vmax.f32 %v2581_v20, 0.0  ;;  %5117 = vmatmul.msk.bf16.gmra.mxu2 %vm596_vm1, %v552_v61 }
 0x276   :  { %v6327_v32 = vmax.f32 %v2716_v22, %v2719_v24 }
 0x277   :  { %v2170_v9 = vpop.f32.mrf.mxu2 }
 0x278   :  { %v2440_v56 = vadd.f32 %v2170_v9, %v1577_v19  ;;  %v984_v27 = vpop.f32.mrf.mxu0  ;;  %v1578_v26 = vpop.f32.mrf.mxu1 }
 0x279   :  { %v1579_v34 = vadd.f32 %v1578_v26, %v984_v27 }
 0x27a   :  { %v2582_v10 = vadd.f32 %v6126_v48, %v2440_v56 }
 0x27c   :  { %v2720_v19 = vmax.f32 %v2582_v10, 0.0  ;;  %v240_v10 = vld [vmem:[%s8064_s28 + $0x558] sm:$0xff] }
 0x27f   :  { %v2172_v28 = vpop.f32.mrf.mxu2 }
 0x280   :  { %v2441_v47 = vadd.f32 %v2172_v28, %v1579_v34  ;;  %v987_v40 = vpop.f32.mrf.mxu0  ;;  %v1581_v36 = vpop.f32.mrf.mxu1  ;;  %v236_v28 = vld [vmem:[%s8064_s28 + $0x538] sm:$0xff] }
 0x281   :  { %v1582_v7 = vadd.f32 %v1581_v36, %v987_v40  ;;  %v481_v36 = vpack.c.bf16 %v236_v28, %v235_v25 }
 0x282   :  { %v2583_v24 = vadd.f32 %v6126_v48, %v2441_v47 }
 0x283   :  { %4970 = vmatmul.msk.bf16.gmra.mxu0 %vm596_vm1, %v479_v43  ;;  %5044 = vmatmul.msk.bf16.gmra.mxu1 %vm596_vm1, %v405_v44  ;;  %v238_v43 = vld [vmem:[%s8064_s28 + $0x548] sm:$0xff]  ;;  %v239_v44 = vld [vmem:[%s8064_s28 + $0x550] sm:$0xff] }
 0x284   :  { %5118 = vmatmul.msk.bf16.gmra.mxu2 %vm596_vm1, %v553_v51  ;;  %v2721_v35 = vmax.f32 %v2583_v24, 0.0  ;;  %v407_v51 = vpack.c.bf16 %v233_v62, %v6341_v45  ;;  %v555_v57 = vpack.c.bf16 %v239_v44, %v238_v43 }
 0x287   :  { %v2175_v54 = vpop.f32.mrf.mxu2 }
 0x288   :  { %v2442_v55 = vadd.f32 %v2175_v54, %v1582_v7  ;;  %v989_v49 = vpop.f32.mrf.mxu0  ;;  %v1583_v52 = vpop.f32.mrf.mxu1 }
 0x289   :  { %v1584_v58 = vadd.f32 %v1583_v52, %v989_v49 }
 0x28a   :  { %v2584_v7 = vadd.f32 %v6126_v48, %v2442_v55 }
 0x28f   :  { %v2177_v2 = vpop.f32.mrf.mxu2 }
 0x290   :  { %v2443_v14 = vadd.f32 %v2177_v2, %v1584_v58  ;;  %v992_v12 = vpop.f32.mrf.mxu0  ;;  %v1586_v46 = vpop.f32.mrf.mxu1  ;;  %v2722_v2 = vmax.f32 %v2584_v7, 0.0 }
 0x291   :  { %v1587_v18 = vadd.f32 %v1586_v46, %v992_v12  ;;  %v243_v12 = vld [vmem:[%s8064_s28 + $0x570] sm:$0xff]  ;;  %v6405_v46 = vld [vmem:[%s8064_s28 + $0x578] sm:$0xff] }
 0x292   :  { %v2585_v61 = vadd.f32 %v6126_v48, %v2443_v14  ;;  %v241_v14 = vld [vmem:[%s8064_s28 + $0x560] sm:$0xff] }
 0x293   :  { %4971 = vmatmul.msk.bf16.gmra.mxu0 %vm596_vm1, %v480_v4  ;;  %5045 = vmatmul.msk.bf16.gmra.mxu1 %vm596_vm1, %v406_v5 }
 0x294   :  { %v2723_v20 = vmax.f32 %v2585_v61, 0.0  ;;  %5119 = vmatmul.msk.bf16.gmra.mxu2 %vm596_vm1, %v554_v15  ;;  %v408_v61 = vpack.c.bf16 %v238_v43, %v237_v1  ;;  %v246_v1 = vld [vmem:[%s8064_s28 + $0x588] sm:$0xff] }
 0x296   :  { %v6365_v22 = vmax.f32 %v2720_v19, %v2723_v20 }
 0x297   :  { %v2180_v63 = vpop.f32.mrf.mxu2 }
 0x298   :  { %v2444_v9 = vadd.f32 %v2180_v63, %v1587_v18  ;;  %v994_v56 = vpop.f32.mrf.mxu0  ;;  %v1588_v27 = vpop.f32.mrf.mxu1  ;;  %v482_v18 = vpack.c.bf16 %v241_v14, %v240_v10  ;;  %v556_v63 = vpack.c.bf16 %v6405_v46, %v243_v12 }
 0x299   :  { %v1589_v26 = vadd.f32 %v1588_v27, %v994_v56 }
 0x29a   :  { %v2586_v34 = vadd.f32 %v6126_v48, %v2444_v9 }
 0x29c   :  { %v2724_v37 = vmax.f32 %v2586_v34, 0.0  ;;  %v242_v34 = vld [vmem:[%s8064_s28 + $0x568] sm:$0xff] }
 0x29d   :  { %v483_v43 = vpack.c.bf16 %v246_v1, %v242_v34 }
 0x29e   :  { %v6381_v47 = vmax.f32 %v2721_v35, %v2724_v37  ;;  %v245_v35 = vld [vmem:[%s8064_s28 + $0x580] sm:$0xff] }
 0x29f   :  { %v2182_v40 = vpop.f32.mrf.mxu2  ;;  %v6423_v37 = vld [vmem:[%s8064_s28 + $0x5a0] sm:$0xff] }
 0x2a0   :  { %v2445_v49 = vadd.f32 %v2182_v40, %v1589_v26  ;;  %v997_v52 = vpop.f32.mrf.mxu0  ;;  %v1591_v58 = vpop.f32.mrf.mxu1  ;;  %v409_v40 = vpack.c.bf16 %v243_v12, %v239_v44 }
 0x2a1   :  { %v1592_v9 = vadd.f32 %v1591_v58, %v997_v52  ;;  %v557_v52 = vpack.c.bf16 %v6423_v37, %v245_v35 }
 0x2a2   :  { %v2587_v60 = vadd.f32 %v6126_v48, %v2445_v49 }
 0x2a3   :  { %4972 = vmatmul.msk.bf16.gmra.mxu0 %vm596_vm1, %v481_v36  ;;  %5046 = vmatmul.msk.bf16.gmra.mxu1 %vm596_vm1, %v407_v51 }
 0x2a4   :  { %v2725_v4 = vmax.f32 %v2587_v60, 0.0  ;;  %5120 = vmatmul.msk.bf16.gmra.mxu2 %vm596_vm1, %v555_v57 }
 0x2a6   :  { %v6391_v45 = vmax.f32 %v2722_v2, %v2725_v4 }
 0x2a7   :  { %v2185_v55 = vpop.f32.mrf.mxu2 }
 0x2a8   :  { %v999_v62 = vpop.f32.mrf.mxu0  ;;  %v1593_v5 = vpop.f32.mrf.mxu1  ;;  %v2446_v26 = vadd.f32 %v2185_v55, %v1592_v9 }
 0x2aa   :  { %v2588_v36 = vadd.f32 %v6126_v48, %v2446_v26 }
 0x2ac   :  { %v2726_v57 = vmax.f32 %v2588_v36, 0.0 }
 0x2af   :  { %v2187_v15 = vpop.f32.mrf.mxu2 }
 0x2b0   :  { %v1002_v19 = vpop.f32.mrf.mxu0  ;;  %v1596_v20 = vpop.f32.mrf.mxu1 }
 0x2b1   :  { %v1597_v55 = vadd.f32 %v1596_v20, %v1002_v19  ;;  %v250_v19 = vld [vmem:[%s8064_s28 + $0x5a8] sm:$0xff] }
 0x2b3   :  { %4973 = vmatmul.msk.bf16.gmra.mxu0 %vm596_vm1, %v482_v18  ;;  %5047 = vmatmul.msk.bf16.gmra.mxu1 %vm596_vm1, %v408_v61  ;;  %v1594_v18 = vadd.f32 %v1593_v5, %v999_v62 }
 0x2b4   :  { %5121 = vmatmul.msk.bf16.gmra.mxu2 %vm596_vm1, %v556_v63 }
 0x2b5   :  { %v2447_v63 = vadd.f32 %v2187_v15, %v1594_v18 }
 0x2b7   :  { %v2190_v24 = vpop.f32.mrf.mxu2  ;;  %v2589_v26 = vadd.f32 %v6126_v48, %v2447_v63  ;;  %v411_v63 = vpack.c.bf16 %v250_v19, %v6423_v37  ;;  %v254_v37 = vld [vmem:[%s8064_s28 + $0x5c8] sm:$0xff] }
 0x2b8   :  { %v1004_v56 = vpop.f32.mrf.mxu0  ;;  %v1598_v27 = vpop.f32.mrf.mxu1  ;;  %v2448_v9 = vadd.f32 %v2190_v24, %v1597_v55  ;;  %v410_v24 = vpack.c.bf16 %v245_v35, %v6405_v46  ;;  %v252_v55 = vld [vmem:[%s8064_s28 + $0x5b8] sm:$0xff] }
 0x2b9   :  { %v1599_v25 = vadd.f32 %v1598_v27, %v1004_v56  ;;  %v247_v56 = vld [vmem:[%s8064_s28 + $0x590] sm:$0xff]  ;;  %v248_v27 = vld [vmem:[%s8064_s28 + $0x598] sm:$0xff] }
 0x2ba   :  { %v484_v20 = vpack.c.bf16 %v248_v27, %v247_v56  ;;  %v2590_v34 = vadd.f32 %v6126_v48, %v2448_v9 }
 0x2bf   :  { %v2192_v28 = vpop.f32.mrf.mxu2 }
 0x2c0   :  { %v2449_v51 = vadd.f32 %v2192_v28, %v1599_v25  ;;  %v1007_v7 = vpop.f32.mrf.mxu0  ;;  %v1601_v49 = vpop.f32.mrf.mxu1 }
 0x2c1   :  { %v1602_v2 = vadd.f32 %v1601_v49, %v1007_v7  ;;  %v2727_v7 = vmax.f32 %v2589_v26, 0.0  ;;  %v2728_v49 = vmax.f32 %v2590_v34, 0.0 }
 0x2c2   :  { %v2591_v58 = vadd.f32 %v6126_v48, %v2449_v51 }
 0x2c3   :  { %4974 = vmatmul.msk.bf16.gmra.mxu0 %vm596_vm1, %v483_v43  ;;  %5048 = vmatmul.msk.bf16.gmra.mxu1 %vm596_vm1, %v409_v40 }
 0x2c4   :  { %v2729_v60 = vmax.f32 %v2591_v58, 0.0  ;;  %5122 = vmatmul.msk.bf16.gmra.mxu2 %vm596_vm1, %v557_v52 }
 0x2c6   :  { %v2831_v4 = vmax.f32 %v2726_v57, %v2729_v60 }
 0x2c7   :  { %v2195_v44 = vpop.f32.mrf.mxu2 }
 0x2c8   :  { %v1009_v10 = vpop.f32.mrf.mxu0  ;;  %v1603_v14 = vpop.f32.mrf.mxu1  ;;  %v2891_v12 = vpack.c.bf16 %v2831_v4, %v6327_v32  ;;  %v2450_v61 = vadd.f32 %v2195_v44, %v1602_v2  ;;  %v6445_v32 = vld [vmem:[%s8064_s28 + $0x5b0] sm:$0xff] }
 0x2c9   :  { %v1604_v5 = vadd.f32 %v1603_v14, %v1009_v10  ;;  %v558_v43 = vpack.c.bf16 %v6445_v32, %v250_v19  ;;  %v253_v10 = vld [vmem:[%s8064_s28 + $0x5c0] sm:$0xff]  ;;  %v255_v14 = vld [vmem:[%s8064_s28 + $0x5d0] sm:$0xff]  ;;  %v258_v19 = vld [vmem:[%s8064_s28 + $0x5e8] sm:$0xff] }
 0x2ca   :  { %5162 = vmatmul.msk.bf16.gmra.mxu3 %vm2926_vm3, %v2891_v12  ;;  %v2592_v62 = vadd.f32 %v6126_v48, %v2450_v61  ;;  %v6469_v12 = vld [vmem:[%s8064_s28 + $0x5d8] sm:$0xff]  ;;  %v485_v61 = vpack.c.bf16 %v253_v10, %v252_v55 }
 0x2cc   :  { %v2730_v36 = vmax.f32 %v2592_v62, 0.0  ;;  %v559_v62 = vpack.c.bf16 %v6469_v12, %v255_v14 }
 0x2ce   :  { %v2832_v35 = vmax.f32 %v2727_v7, %v2730_v36 }
 0x2cf   :  { %v2197_v15 = vpop.f32.mrf.mxu2 }
 0x2d0   :  { %v2451_v1 = vadd.f32 %v2197_v15, %v1604_v5  ;;  %v1012_v25 = vpop.f32.mrf.mxu0  ;;  %v1606_v28 = vpop.f32.mrf.mxu1 }
 0x2d1   :  { %v1607_v40 = vadd.f32 %v1606_v28, %v1012_v25  ;;  %v6488_v25 = vld [vmem:[%s8064_s28 + $0x600] sm:$0xff] }
 0x2d2   :  { %v2593_v51 = vadd.f32 %v6126_v48, %v2451_v1  ;;  %v257_v1 = vld [vmem:[%s8064_s28 + $0x5e0] sm:$0xff] }
 0x2d3   :  { %4975 = vmatmul.msk.bf16.gmra.mxu0 %vm596_vm1, %v484_v20  ;;  %5049 = vmatmul.msk.bf16.gmra.mxu1 %vm596_vm1, %v410_v24 }
 0x2d4   :  { %v2731_v46 = vmax.f32 %v2593_v51, 0.0  ;;  %5123 = vmatmul.msk.bf16.gmra.mxu2 %vm596_vm1, %v558_v43  ;;  %v486_v43 = vpack.c.bf16 %v258_v19, %v254_v37 }
 0x2d6   :  { %v2833_v52 = vmax.f32 %v2728_v49, %v2731_v46  ;;  %v560_v46 = vpack.c.bf16 %v6488_v25, %v257_v1 }
 0x2d7   :  { %v2200_v58 = vpop.f32.mrf.mxu2 }
 0x2d8   :  { %v2452_v57 = vadd.f32 %v2200_v58, %v1607_v40  ;;  %v1014_v60 = vpop.f32.mrf.mxu0  ;;  %v1608_v2 = vpop.f32.mrf.mxu1  ;;  %v2892_v4 = vpack.c.bf16 %v2833_v52, %v2832_v35  ;;  %v412_v40 = vpack.c.bf16 %v255_v14, %v6445_v32 }
 0x2d9   :  { %v1609_v44 = vadd.f32 %v1608_v2, %v1014_v60 }
 0x2da   :  { %5163 = vmatmul.msk.bf16.gmra.mxu3 %vm2926_vm3, %v2892_v4  ;;  %v2594_v36 = vadd.f32 %v6126_v48, %v2452_v57 }
 0x2dc   :  { %v2732_v58 = vmax.f32 %v2594_v36, 0.0 }
 0x2df   :  { %v2202_v18 = vpop.f32.mrf.mxu2 }
 0x2e0   :  { %v2453_v9 = vadd.f32 %v2202_v18, %v1609_v44  ;;  %v1017_v56 = vpop.f32.mrf.mxu0  ;;  %v1611_v27 = vpop.f32.mrf.mxu1 }
 0x2e1   :  { %v1612_v5 = vadd.f32 %v1611_v27, %v1017_v56  ;;  %v260_v56 = vld [vmem:[%s8064_s28 + $0x5f8] sm:$0xff]  ;;  %v263_v27 = vld [vmem:[%s8064_s28 + $0x610] sm:$0xff] }
 0x2e2   :  { %v2595_v57 = vadd.f32 %v6126_v48, %v2453_v9  ;;  %v262_v9 = vld [vmem:[%s8064_s28 + $0x608] sm:$0xff] }
 0x2e3   :  { %4976 = vmatmul.msk.bf16.gmra.mxu0 %vm596_vm1, %v485_v61  ;;  %5050 = vmatmul.msk.bf16.gmra.mxu1 %vm596_vm1, %v411_v63  ;;  %v259_v63 = vld [vmem:[%s8064_s28 + $0x5f0] sm:$0xff] }
 0x2e4   :  { %5124 = vmatmul.msk.bf16.gmra.mxu2 %vm596_vm1, %v559_v62  ;;  %v2733_v18 = vmax.f32 %v2595_v57, 0.0 }
 0x2e7   :  { %v2205_v15 = vpop.f32.mrf.mxu2 }
 0x2e8   :  { %v2454_v20 = vadd.f32 %v2205_v15, %v1612_v5  ;;  %v1019_v24 = vpop.f32.mrf.mxu0  ;;  %v1613_v26 = vpop.f32.mrf.mxu1  ;;  %v487_v15 = vpack.c.bf16 %v260_v56, %v259_v63  ;;  %v266_v63 = vld [vmem:[%s8064_s28 + $0x628] sm:$0xff]  ;;  %v269_v56 = vld [vmem:[%s8064_s28 + $0x640] sm:$0xff] }
 0x2e9   :  { %v1614_v34 = vadd.f32 %v1613_v26, %v1019_v24  ;;  %v413_v24 = vpack.c.bf16 %v257_v1, %v6469_v12 }
 0x2ea   :  { %v2596_v26 = vadd.f32 %v6126_v48, %v2454_v20 }
 0x2ec   :  { %v2734_v36 = vmax.f32 %v2596_v26, 0.0 }
 0x2ef   :  { %v2207_v28 = vpop.f32.mrf.mxu2 }
 0x2f0   :  { %v2455_v51 = vadd.f32 %v2207_v28, %v1614_v34  ;;  %v1022_v7 = vpop.f32.mrf.mxu0  ;;  %v1616_v49 = vpop.f32.mrf.mxu1 }
 0x2f1   :  { %v1617_v35 = vadd.f32 %v1616_v49, %v1022_v7  ;;  %v264_v49 = vld [vmem:[%s8064_s28 + $0x618] sm:$0xff] }
 0x2f2   :  { %v2597_v52 = vadd.f32 %v6126_v48, %v2455_v51 }
 0x2f3   :  { %4977 = vmatmul.msk.bf16.gmra.mxu0 %vm596_vm1, %v486_v43  ;;  %5051 = vmatmul.msk.bf16.gmra.mxu1 %vm596_vm1, %v412_v40  ;;  %v561_v43 = vpack.c.bf16 %v263_v27, %v262_v9 }
 0x2f4   :  { %v2735_v60 = vmax.f32 %v2597_v52, 0.0  ;;  %5125 = vmatmul.msk.bf16.gmra.mxu2 %vm596_vm1, %v560_v46  ;;  %v265_v46 = vld [vmem:[%s8064_s28 + $0x620] sm:$0xff]  ;;  %v6537_v52 = vld [vmem:[%s8064_s28 + $0x638] sm:$0xff] }
 0x2f6   :  { %v6497_v2 = vmax.f32 %v2732_v58, %v2735_v60  ;;  %v488_v60 = vpack.c.bf16 %v265_v46, %v264_v49 }
 0x2f7   :  { %v2210_v32 = vpop.f32.mrf.mxu2 }
 0x2f8   :  { %v2456_v4 = vadd.f32 %v2210_v32, %v1617_v35  ;;  %v1024_v44 = vpop.f32.mrf.mxu0  ;;  %v1618_v55 = vpop.f32.mrf.mxu1  ;;  %v267_v35 = vld [vmem:[%s8064_s28 + $0x630] sm:$0xff]  ;;  %v414_v32 = vpack.c.bf16 %v262_v9, %v6488_v25  ;;  %v270_v25 = vld [vmem:[%s8064_s28 + $0x648] sm:$0xff]  ;;  %v6556_v9 = vld [vmem:[%s8064_s28 + $0x660] sm:$0xff] }
 0x2f9   :  { %v1619_v10 = vadd.f32 %v1618_v55, %v1024_v44  ;;  %v562_v44 = vpack.c.bf16 %v6537_v52, %v267_v35 }
 0x2fa   :  { %v2598_v14 = vadd.f32 %v6126_v48, %v2456_v4 }
 0x2fc   :  { %v2736_v61 = vmax.f32 %v2598_v14, 0.0 }
 0x2fe   :  { %v6513_v62 = vmax.f32 %v2733_v18, %v2736_v61 }
 0x2ff   :  { %v2212_v5 = vpop.f32.mrf.mxu2 }
 0x300   :  { %v2457_v37 = vadd.f32 %v2212_v5, %v1619_v10  ;;  %v1027_v19 = vpop.f32.mrf.mxu0  ;;  %v1621_v28 = vpop.f32.mrf.mxu1 }
 0x301   :  { %v1622_v26 = vadd.f32 %v1621_v28, %v1027_v19  ;;  %v6566_v19 = vld [vmem:[%s8065_s30] ss:$0 sm:$0xff] }
 0x302   :  { %v2599_v40 = vadd.f32 %v6126_v48, %v2457_v37 }
 0x303   :  { %4978 = vmatmul.msk.bf16.gmra.mxu0 %vm596_vm1, %v487_v15  ;;  %5052 = vmatmul.msk.bf16.gmra.mxu1 %vm596_vm1, %v413_v24  ;;  %v489_v15 = vpack.c.bf16 %v270_v25, %v266_v63  ;;  %v415_v24 = vpack.c.bf16 %v267_v35, %v263_v27  ;;  %v274_v63 = vld [vmem:[%s8064_s28 + $0x668] sm:$0xff]  ;;  %v275_v25 = vld [vmem:[%s8064_s28 + $0x670] sm:$0xff] }
 0x304   :  { %v2737_v51 = vmax.f32 %v2599_v40, 0.0  ;;  %5126 = vmatmul.msk.bf16.gmra.mxu2 %vm596_vm1, %v561_v43 }
 0x306   :  { %v6523_v12 = vmax.f32 %v2734_v36, %v2737_v51  ;;  %v563_v36 = vpack.c.bf16 %v6556_v9, %v269_v56 }
 0x307   :  { %v2215_v20 = vpop.f32.mrf.mxu2 }
 0x308   :  { %v1029_v1 = vpop.f32.mrf.mxu0  ;;  %v1623_v7 = vpop.f32.mrf.mxu1  ;;  %v2458_v46 = vadd.f32 %v2215_v20, %v1622_v26 }
 0x309   :  { %v1624_v51 = vadd.f32 %v1623_v7, %v1029_v1 }
 0x30a   :  { %v2600_v28 = vadd.f32 %v6566_v19, %v2458_v46  ;;  %v564_v46 = vpack.c.bf16 %v275_v25, %v274_v63 }
 0x30f   :  { %v2217_v58 = vpop.f32.mrf.mxu2 }
 0x310   :  { %v1032_v57 = vpop.f32.mrf.mxu0  ;;  %v1626_v4 = vpop.f32.mrf.mxu1 }
 0x311   :  { %v1627_v55 = vadd.f32 %v1626_v4, %v1032_v57 }
 0x313   :  { %4979 = vmatmul.msk.bf16.gmra.mxu0 %vm596_vm1, %v488_v60  ;;  %5053 = vmatmul.msk.bf16.gmra.mxu1 %vm596_vm1, %v414_v32  ;;  %v2459_v60 = vadd.f32 %v2217_v58, %v1624_v51 }
 0x314   :  { %5127 = vmatmul.msk.bf16.gmra.mxu2 %vm596_vm1, %v562_v44 }
 0x315   :  { %v2601_v1 = vadd.f32 %v6566_v19, %v2459_v60 }
 0x317   :  { %v2220_v10 = vpop.f32.mrf.mxu2 }
 0x318   :  { %v2460_v14 = vadd.f32 %v2220_v10, %v1627_v55  ;;  %v1034_v18 = vpop.f32.mrf.mxu0  ;;  %v1628_v61 = vpop.f32.mrf.mxu1  ;;  %v2738_v55 = vmax.f32 %v2600_v28, 0.0  ;;  %v2739_v10 = vmax.f32 %v2601_v1, 0.0 }
 0x319   :  { %v1629_v37 = vadd.f32 %v1628_v61, %v1034_v18  ;;  %v271_v18 = vld [vmem:[%s8064_s28 + $0x650] sm:$0xff]  ;;  %v272_v61 = vld [vmem:[%s8064_s28 + $0x658] sm:$0xff] }
 0x31a   :  { %v490_v26 = vpack.c.bf16 %v272_v61, %v271_v18 }
 0x31f   :  { %v2222_v5 = vpop.f32.mrf.mxu2 }
 0x320   :  { %v1037_v43 = vpop.f32.mrf.mxu0  ;;  %v1631_v40 = vpop.f32.mrf.mxu1  ;;  %v2461_v49 = vadd.f32 %v2222_v5, %v1629_v37  ;;  %v416_v37 = vpack.c.bf16 %v269_v56, %v6537_v52 }
 0x321   :  { %v1632_v32 = vadd.f32 %v1631_v40, %v1037_v43  ;;  %v2602_v43 = vadd.f32 %v6566_v19, %v2460_v14 }
 0x322   :  { %v2603_v57 = vadd.f32 %v6126_v48, %v2461_v49 }
 0x323   :  { %4980 = vmatmul.msk.bf16.gmra.mxu0 %vm596_vm1, %v489_v15  ;;  %5054 = vmatmul.msk.bf16.gmra.mxu1 %vm596_vm1, %v415_v24 }
 0x324   :  { %5128 = vmatmul.msk.bf16.gmra.mxu2 %vm596_vm1, %v563_v36  ;;  %v2741_v58 = vmax.f32 %v2603_v57, 0.0  ;;  %v2740_v57 = vmax.f32 %v2602_v43, 0.0 }
 0x326   :  { %v2837_v15 = vmax.f32 %v2738_v55, %v2741_v58  ;;  %v6604_v58 = vld [vmem:[%s8064_s28 + $0x698] sm:$0xff] }
 0x327   :  { %v2225_v27 = vpop.f32.mrf.mxu2 }
 0x328   :  { %v2462_v7 = vadd.f32 %v2225_v27, %v1632_v32  ;;  %v1039_v35 = vpop.f32.mrf.mxu0  ;;  %v1633_v4 = vpop.f32.mrf.mxu1 }
 0x329   :  { %v1634_v20 = vadd.f32 %v1633_v4, %v1039_v35  ;;  %v276_v35 = vld [vmem:[%s8064_s28 + $0x678] sm:$0xff]  ;;  %v277_v4 = vld [vmem:[%s8064_s28 + $0x680] sm:$0xff] }
 0x32a   :  { %v2604_v44 = vadd.f32 %v6566_v19, %v2462_v7  ;;  %v491_v55 = vpack.c.bf16 %v277_v4, %v276_v35 }
 0x32c   :  { %v2742_v48 = vmax.f32 %v2604_v44, 0.0 }
 0x32e   :  { %v2838_v5 = vmax.f32 %v2739_v10, %v2742_v48  ;;  %v417_v10 = vpack.c.bf16 %v274_v63, %v6556_v9  ;;  %v278_v9 = vld [vmem:[%s8064_s28 + $0x688] sm:$0xff] }
 0x32f   :  { %v2227_v24 = vpop.f32.mrf.mxu2  ;;  %v282_v63 = vld [vmem:[%s8064_s28 + $0x6a8] sm:$0xff] }
 0x330   :  { %v2463_v40 = vadd.f32 %v2227_v24, %v1634_v20  ;;  %v1042_v36 = vpop.f32.mrf.mxu0  ;;  %v1636_v51 = vpop.f32.mrf.mxu1  ;;  %v2893_v49 = vpack.c.bf16 %v2838_v5, %v2837_v15  ;;  %v279_v20 = vld [vmem:[%s8064_s28 + $0x690] sm:$0xff] }
 0x331   :  { %v1637_v60 = vadd.f32 %v1636_v51, %v1042_v36  ;;  %v565_v5 = vpack.c.bf16 %v6604_v58, %v279_v20  ;;  %v281_v36 = vld [vmem:[%s8064_s28 + $0x6a0] sm:$0xff] }
 0x332   :  { %v2605_v32 = vadd.f32 %v6566_v19, %v2463_v40  ;;  %5164 = vmatmul.msk.bf16.gmra.mxu3 %vm2926_vm3, %v2893_v49  ;;  %v285_v51 = vld [vmem:[%s8064_s28 + $0x6c0] sm:$0xff] }
 0x333   :  { %4981 = vmatmul.msk.bf16.gmra.mxu0 %vm596_vm1, %v490_v26  ;;  %5055 = vmatmul.msk.bf16.gmra.mxu1 %vm596_vm1, %v416_v37 }
 0x334   :  { %v2743_v27 = vmax.f32 %v2605_v32, 0.0  ;;  %5129 = vmatmul.msk.bf16.gmra.mxu2 %vm596_vm1, %v564_v46  ;;  %v492_v46 = vpack.c.bf16 %v282_v63, %v278_v9 }
 0x336   :  { %v6590_v52 = vmax.f32 %v2740_v57, %v2743_v27 }
 0x337   :  { %v2230_v14 = vpop.f32.mrf.mxu2 }
 0x338   :  { %v2464_v56 = vadd.f32 %v2230_v14, %v1637_v60  ;;  %v1044_v28 = vpop.f32.mrf.mxu0  ;;  %v1638_v1 = vpop.f32.mrf.mxu1  ;;  %v418_v60 = vpack.c.bf16 %v279_v20, %v275_v25 }
 0x339   :  { %v1639_v7 = vadd.f32 %v1638_v1, %v1044_v28  ;;  %v566_v28 = vpack.c.bf16 %v285_v51, %v281_v36 }
 0x33a   :  { %v2606_v32 = vadd.f32 %v6566_v19, %v2464_v56 }
 0x33c   :  { %v2744_v35 = vmax.f32 %v2606_v32, 0.0 }
 0x33f   :  { %v2232_v44 = vpop.f32.mrf.mxu2 }
 0x340   :  { %v2465_v48 = vadd.f32 %v2232_v44, %v1639_v7  ;;  %v1047_v18 = vpop.f32.mrf.mxu0  ;;  %v1641_v61 = vpop.f32.mrf.mxu1 }
 0x341   :  { %v1642_v15 = vadd.f32 %v1641_v61, %v1047_v18 }
 0x342   :  { %v2607_v56 = vadd.f32 %v6566_v19, %v2465_v48  ;;  %v286_v48 = vld [vmem:[%s8064_s28 + $0x6c8] sm:$0xff] }
 0x343   :  { %4982 = vmatmul.msk.bf16.gmra.mxu0 %vm596_vm1, %v491_v55  ;;  %5056 = vmatmul.msk.bf16.gmra.mxu1 %vm596_vm1, %v417_v10 }
 0x344   :  { %5130 = vmatmul.msk.bf16.gmra.mxu2 %vm596_vm1, %v565_v5  ;;  %v2745_v5 = vmax.f32 %v2607_v56, 0.0  ;;  %v291_v56 = vld [vmem:[%s8064_s28 + $0x6f0] sm:$0xff] }
 0x347   :  { %v2235_v24 = vpop.f32.mrf.mxu2 }
 0x348   :  { %v2466_v26 = vadd.f32 %v2235_v24, %v1642_v15  ;;  %v1049_v37 = vpop.f32.mrf.mxu0  ;;  %v1643_v43 = vpop.f32.mrf.mxu1  ;;  %v283_v24 = vld [vmem:[%s8064_s28 + $0x6b0] sm:$0xff] }
 0x349   :  { %v1644_v40 = vadd.f32 %v1643_v43, %v1049_v37  ;;  %v284_v37 = vld [vmem:[%s8064_s28 + $0x6b8] sm:$0xff]  ;;  %v287_v43 = vld [vmem:[%s8064_s28 + $0x6d0] sm:$0xff] }
 0x34a   :  { %v493_v63 = vpack.c.bf16 %v284_v37, %v283_v24 }
 0x34f   :  { %v2237_v49 = vpop.f32.mrf.mxu2 }
 0x350   :  { %v2467_v57 = vadd.f32 %v2237_v49, %v1644_v40  ;;  %v1052_v27 = vpop.f32.mrf.mxu0  ;;  %v1646_v14 = vpop.f32.mrf.mxu1  ;;  %v419_v49 = vpack.c.bf16 %v281_v36, %v6604_v58 }
 0x351   :  { %v1647_v1 = vadd.f32 %v1646_v14, %v1052_v27  ;;  %v567_v14 = vpack.c.bf16 %v287_v43, %v286_v48 }
 0x352   :  { %v2609_v7 = vadd.f32 %v6566_v19, %v2467_v57 }
 0x353   :  { %4983 = vmatmul.msk.bf16.gmra.mxu0 %vm596_vm1, %v492_v46  ;;  %5057 = vmatmul.msk.bf16.gmra.mxu1 %vm596_vm1, %v418_v60  ;;  %v2608_v46 = vadd.f32 %v6566_v19, %v2466_v26 }
 0x354   :  { %v2747_v4 = vmax.f32 %v2609_v7, 0.0  ;;  %5131 = vmatmul.msk.bf16.gmra.mxu2 %vm596_vm1, %v566_v28 }
 0x356   :  { %v6628_v44 = vmax.f32 %v2744_v35, %v2747_v4  ;;  %v288_v4 = vld [vmem:[%s8064_s28 + $0x6d8] sm:$0xff] }
 0x357   :  { %v2240_v25 = vpop.f32.mrf.mxu2 }
 0x358   :  { %v2468_v20 = vadd.f32 %v2240_v25, %v1647_v1  ;;  %v1054_v55 = vpop.f32.mrf.mxu0  ;;  %v1648_v10 = vpop.f32.mrf.mxu1  ;;  %v2746_v1 = vmax.f32 %v2608_v46, 0.0  ;;  %v289_v25 = vld [vmem:[%s8064_s28 + $0x6e0] sm:$0xff]  ;;  %v290_v46 = vld [vmem:[%s8064_s28 + $0x6e8] sm:$0xff] }
 0x359   :  { %v1649_v18 = vadd.f32 %v1648_v10, %v1054_v55  ;;  %v494_v10 = vpack.c.bf16 %v289_v25, %v288_v4 }
 0x35a   :  { %v2610_v61 = vadd.f32 %v6566_v19, %v2468_v20  ;;  %v6668_v20 = vld [vmem:[%s8064_s28 + $0x6f8] sm:$0xff] }
 0x35c   :  { %v2748_v15 = vmax.f32 %v2610_v61, 0.0 }
 0x35e   :  { %v6644_v40 = vmax.f32 %v2745_v5, %v2748_v15  ;;  %v568_v15 = vpack.c.bf16 %v6668_v20, %v291_v56 }
 0x35f   :  { %v2242_v9 = vpop.f32.mrf.mxu2 }
 0x360   :  { %v2469_v32 = vadd.f32 %v2242_v9, %v1649_v18  ;;  %v1057_v57 = vpop.f32.mrf.mxu0  ;;  %v1651_v27 = vpop.f32.mrf.mxu1  ;;  %v420_v18 = vpack.c.bf16 %v286_v48, %v285_v51  ;;  %v294_v51 = vld [vmem:[%s8064_s28 + $0x708] sm:$0xff]  ;;  %v293_v48 = vld [vmem:[%s8064_s28 + $0x700] sm:$0xff] }
 0x361   :  { %v1652_v37 = vadd.f32 %v1651_v27, %v1057_v57 }
 0x362   :  { %v2611_v28 = vadd.f32 %v6566_v19, %v2469_v32  ;;  %v6686_v32 = vld [vmem:[%s8064_s28 + $0x720] sm:$0xff] }
 0x363   :  { %4984 = vmatmul.msk.bf16.gmra.mxu0 %vm596_vm1, %v493_v63  ;;  %5058 = vmatmul.msk.bf16.gmra.mxu1 %vm596_vm1, %v419_v49  ;;  %v569_v25 = vpack.c.bf16 %v6686_v32, %v293_v48 }
 0x364   :  { %v2749_v7 = vmax.f32 %v2611_v28, 0.0  ;;  %5132 = vmatmul.msk.bf16.gmra.mxu2 %vm596_vm1, %v567_v14  ;;  %v495_v14 = vpack.c.bf16 %v294_v51, %v290_v46  ;;  %v421_v28 = vpack.c.bf16 %v291_v56, %v287_v43 }
 0x366   :  { %v6654_v58 = vmax.f32 %v2746_v1, %v2749_v7 }
 0x367   :  { %v2245_v26 = vpop.f32.mrf.mxu2 }
 0x368   :  { %v1059_v36 = vpop.f32.mrf.mxu0  ;;  %v1653_v35 = vpop.f32.mrf.mxu1  ;;  %v2470_v49 = vadd.f32 %v2245_v26, %v1652_v37 }
 0x369   :  { %v1654_v51 = vadd.f32 %v1653_v35, %v1059_v36 }
 0x36a   :  { %v2612_v1 = vadd.f32 %v6566_v19, %v2470_v49 }
 0x36f   :  { %v2247_v55 = vpop.f32.mrf.mxu2 }
 0x370   :  { %v1062_v61 = vpop.f32.mrf.mxu0  ;;  %v1656_v5 = vpop.f32.mrf.mxu1 }
 0x371   :  { %v1657_v56 = vadd.f32 %v1656_v5, %v1062_v61  ;;  %v298_v61 = vld [vmem:[%s8064_s28 + $0x728] sm:$0xff] }
 0x373   :  { %4985 = vmatmul.msk.bf16.gmra.mxu0 %vm596_vm1, %v494_v10  ;;  %5059 = vmatmul.msk.bf16.gmra.mxu1 %vm596_vm1, %v420_v18  ;;  %v2750_v18 = vmax.f32 %v2612_v1, 0.0  ;;  %v296_v1 = vld [vmem:[%s8064_s28 + $0x718] sm:$0xff] }
 0x374   :  { %5133 = vmatmul.msk.bf16.gmra.mxu2 %vm596_vm1, %v568_v15 }
 0x377   :  { %v2250_v24 = vpop.f32.mrf.mxu2 }
 0x378   :  { %v1064_v9 = vpop.f32.mrf.mxu0  ;;  %v1658_v63 = vpop.f32.mrf.mxu1 }
 0x379   :  { %v1659_v57 = vadd.f32 %v1658_v63, %v1064_v9 }
 0x37f   :  { %v2252_v27 = vpop.f32.mrf.mxu2 }
 0x380   :  { %v2473_v7 = vadd.f32 %v2252_v27, %v1659_v57  ;;  %v1067_v26 = vpop.f32.mrf.mxu0  ;;  %v1661_v4 = vpop.f32.mrf.mxu1  ;;  %v2471_v27 = vadd.f32 %v2247_v55, %v1654_v51 }
 0x381   :  { %v1662_v37 = vadd.f32 %v1661_v4, %v1067_v26 }
 0x382   :  { %v2615_v10 = vadd.f32 %v6566_v19, %v2473_v7  ;;  %v2613_v7 = vadd.f32 %v6566_v19, %v2471_v27 }
 0x383   :  { %4986 = vmatmul.msk.bf16.gmra.mxu0 %vm596_vm1, %v495_v14  ;;  %5060 = vmatmul.msk.bf16.gmra.mxu1 %vm596_vm1, %v421_v28  ;;  %v2472_v14 = vadd.f32 %v2250_v24, %v1657_v56  ;;  %v295_v28 = vld [vmem:[%s8064_s28 + $0x710] sm:$0xff]  ;;  %v422_v24 = vpack.c.bf16 %v293_v48, %v6668_v20 }
 0x384   :  { %v2753_v15 = vmax.f32 %v2615_v10, 0.0  ;;  %5134 = vmatmul.msk.bf16.gmra.mxu2 %vm596_vm1, %v569_v25  ;;  %v496_v5 = vpack.c.bf16 %v296_v1, %v295_v28  ;;  %v300_v28 = vld [vmem:[%s8064_s28 + $0x738] sm:$0xff]  ;;  %v301_v1 = vld [vmem:[%s8064_s28 + $0x740] sm:$0xff] }
 0x385   :  { %v2614_v26 = vadd.f32 %v6566_v19, %v2472_v14 }
 0x386   :  { %v2843_v9 = vmax.f32 %v2750_v18, %v2753_v15 }
 0x387   :  { %v2255_v43 = vpop.f32.mrf.mxu2  ;;  %v2752_v56 = vmax.f32 %v2614_v26, 0.0 }
 0x388   :  { %v1069_v63 = vpop.f32.mrf.mxu0  ;;  %v1663_v49 = vpop.f32.mrf.mxu1  ;;  %v2894_v46 = vpack.c.bf16 %v2843_v9, %v6590_v52  ;;  %v2474_v57 = vadd.f32 %v2255_v43, %v1662_v37  ;;  %v6708_v52 = vld [vmem:[%s8064_s28 + $0x730] sm:$0xff]  ;;  %v2751_v43 = vmax.f32 %v2613_v7, 0.0 }
 0x389   :  { %v1664_v35 = vadd.f32 %v1663_v49, %v1069_v63  ;;  %v570_v18 = vpack.c.bf16 %v6708_v52, %v298_v61 }
 0x38a   :  { %5165 = vmatmul.msk.bf16.gmra.mxu3 %vm2926_vm3, %v2894_v46  ;;  %v2616_v36 = vadd.f32 %v6566_v19, %v2474_v57 }
 0x38c   :  { %v2754_v37 = vmax.f32 %v2616_v36, 0.0  ;;  %v303_v36 = vld [vmem:[%s8064_s28 + $0x750] sm:$0xff] }
 0x38e   :  { %v2844_v48 = vmax.f32 %v2751_v43, %v2754_v37 }
 0x38f   :  { %v2257_v55 = vpop.f32.mrf.mxu2 }
 0x390   :  { %v2475_v4 = vadd.f32 %v2257_v55, %v1664_v35  ;;  %v1072_v25 = vpop.f32.mrf.mxu0  ;;  %v1666_v10 = vpop.f32.mrf.mxu1  ;;  %v6732_v35 = vld [vmem:[%s8064_s28 + $0x758] sm:$0xff] }
 0x391   :  { %v1667_v15 = vadd.f32 %v1666_v10, %v1072_v25  ;;  %v571_v25 = vpack.c.bf16 %v6732_v35, %v303_v36 }
 0x392   :  { %v2617_v9 = vadd.f32 %v6566_v19, %v2475_v4 }
 0x393   :  { %4987 = vmatmul.msk.bf16.gmra.mxu0 %vm596_vm1, %v496_v5  ;;  %5061 = vmatmul.msk.bf16.gmra.mxu1 %vm596_vm1, %v422_v24  ;;  %v497_v5 = vpack.c.bf16 %v301_v1, %v300_v28  ;;  %v423_v24 = vpack.c.bf16 %v298_v61, %v6686_v32 }
 0x394   :  { %v2755_v20 = vmax.f32 %v2617_v9, 0.0  ;;  %5135 = vmatmul.msk.bf16.gmra.mxu2 %vm596_vm1, %v570_v18  ;;  %v2918_v18 = vld [vmem:[%s8066_s24] sm:$0xff] }
 0x395   :  { %v2919_v37 = vpack.c.bf16 %v2918_v18, %v2918_v18 }
 0x396   :  { %v2845_v63 = vmax.f32 %v2752_v56, %v2755_v20  ;;  %v302_v20 = vld [vmem:[%s8064_s28 + $0x748] sm:$0xff] }
 0x397   :  { %v2260_v49 = vpop.f32.mrf.mxu2  ;;  %v3124_v56 = vsel %vm2978_vm2, %v2919_v37, 0 }
 0x398   :  { %v2476_v46 = vadd.f32 %v2260_v49, %v1667_v15  ;;  %v1074_v51 = vpop.f32.mrf.mxu0  ;;  %v1668_v57 = vpop.f32.mrf.mxu1  ;;  %v2895_v27 = vpack.c.bf16 %v2845_v63, %v2844_v48  ;;  %3133 = vmatpush.bf16.msrb.mxu3 %v3124_v56  ;;  %v306_v48 = vld [vmem:[%s8064_s28 + $0x768] sm:$0xff]  ;;  %v305_v63 = vld [vmem:[%s8064_s28 + $0x760] sm:$0xff]  ;;  %v307_v56 = vld [vmem:[%s8064_s28 + $0x770] sm:$0xff] }
 0x399   :  { %v1669_v14 = vadd.f32 %v1668_v57, %v1074_v51  ;;  %v6755_v49 = vld [vmem:[%s8064_s28 + $0x780] sm:$0xff]  ;;  %v498_v57 = vpack.c.bf16 %v306_v48, %v302_v20  ;;  %v308_v20 = vld [vmem:[%s8064_s28 + $0x778] sm:$0xff]  ;;  %v311_v48 = vld [vmem:[%s8064_s28 + $0x790] sm:$0xff] }
 0x39a   :  { %5166 = vmatmul.msk.bf16.gmra.mxu3 %vm2926_vm3, %v2895_v27  ;;  %v424_v27 = vpack.c.bf16 %v303_v36, %v6708_v52 }
 0x39f   :  { %v2262_v55 = vpop.f32.mrf.mxu2 }
 0x3a0   :  { %v2477_v7 = vadd.f32 %v2262_v55, %v1669_v14  ;;  %v1077_v26 = vpop.f32.mrf.mxu0  ;;  %v1671_v4 = vpop.f32.mrf.mxu1  ;;  %v2618_v14 = vadd.f32 %v6566_v19, %v2476_v46 }
 0x3a1   :  { %v1672_v10 = vadd.f32 %v1671_v4, %v1077_v26 }
 0x3a2   :  { %v2756_v4 = vmax.f32 %v2618_v14, 0.0  ;;  %v2619_v46 = vadd.f32 %v6566_v19, %v2477_v7  ;;  %v310_v7 = vld [vmem:[%s8064_s28 + $0x788] sm:$0xff]  ;;  %v425_v14 = vpack.c.bf16 %v305_v63, %v6732_v35 }
 0x3a3   :  { %4988 = vmatmul.msk.bf16.gmra.mxu0 %vm596_vm1, %v497_v5  ;;  %5062 = vmatmul.msk.bf16.gmra.mxu1 %vm596_vm1, %v423_v24  ;;  %v572_v5 = vpack.c.bf16 %v6755_v49, %v305_v63 }
 0x3a4   :  { %5136 = vmatmul.msk.bf16.gmra.mxu2 %vm596_vm1, %v571_v25 }
 0x3a7   :  { %v2265_v15 = vpop.f32.mrf.mxu2 }
 0x3a8   :  { %v2478_v9 = vadd.f32 %v2265_v15, %v1672_v10  ;;  %v1079_v32 = vpop.f32.mrf.mxu0  ;;  %v1673_v61 = vpop.f32.mrf.mxu1 }
 0x3a9   :  { %v1674_v43 = vadd.f32 %v1673_v61, %v1079_v32  ;;  %v2757_v61 = vmax.f32 %v2619_v46, 0.0 }
 0x3af   :  { %v2267_v51 = vpop.f32.mrf.mxu2 }
 0x3b0   :  { %v2479_v28 = vadd.f32 %v2267_v51, %v1674_v43  ;;  %v1082_v1 = vpop.f32.mrf.mxu0  ;;  %v1676_v55 = vpop.f32.mrf.mxu1 }
 0x3b1   :  { %v1677_v24 = vadd.f32 %v1676_v55, %v1082_v1 }
 0x3b2   :  { %v2621_v26 = vadd.f32 %v6566_v19, %v2479_v28  ;;  %v2620_v28 = vadd.f32 %v6566_v19, %v2478_v9 }
 0x3b3   :  { %4989 = vmatmul.msk.bf16.gmra.mxu0 %vm596_vm1, %v498_v57  ;;  %5063 = vmatmul.msk.bf16.gmra.mxu1 %vm596_vm1, %v424_v27  ;;  %v499_v27 = vpack.c.bf16 %v308_v20, %v307_v56 }
 0x3b4   :  { %v2759_v25 = vmax.f32 %v2621_v26, 0.0  ;;  %5137 = vmatmul.msk.bf16.gmra.mxu2 %vm596_vm1, %v572_v5  ;;  %v573_v26 = vpack.c.bf16 %v311_v48, %v310_v7 }
 0x3b6   :  { %v6764_v10 = vmax.f32 %v2756_v4, %v2759_v25  ;;  %v2758_v25 = vmax.f32 %v2620_v28, 0.0 }
 0x3b7   :  { %v2270_v52 = vpop.f32.mrf.mxu2 }
 0x3b8   :  { %v2480_v36 = vadd.f32 %v2270_v52, %v1677_v24  ;;  %v1084_v18 = vpop.f32.mrf.mxu0  ;;  %v1678_v15 = vpop.f32.mrf.mxu1 }
 0x3b9   :  { %v1679_v37 = vadd.f32 %v1678_v15, %v1084_v18  ;;  %v313_v18 = vld [vmem:[%s8064_s28 + $0x7a0] sm:$0xff]  ;;  %v315_v15 = vld [vmem:[%s8064_s28 + $0x7b0] sm:$0xff] }
 0x3ba   :  { %v2622_v32 = vadd.f32 %v6566_v19, %v2480_v36  ;;  %v312_v36 = vld [vmem:[%s8064_s28 + $0x798] sm:$0xff] }
 0x3bc   :  { %v2760_v43 = vmax.f32 %v2622_v32, 0.0 }
 0x3be   :  { %v6780_v51 = vmax.f32 %v2757_v61, %v2760_v43  ;;  %v500_v61 = vpack.c.bf16 %v313_v18, %v312_v36  ;;  %v426_v43 = vpack.c.bf16 %v310_v7, %v6755_v49  ;;  %v318_v49 = vld [vmem:[%s8064_s28 + $0x7c8] sm:$0xff]  ;;  %v317_v7 = vld [vmem:[%s8064_s28 + $0x7c0] sm:$0xff]  ;;  %v427_v18 = vpack.c.bf16 %v315_v15, %v311_v48  ;;  %v6830_v48 = vpop.f32.mrf.mxu3 }
 0x3bf   :  { %v2272_v57 = vpop.f32.mrf.mxu2  ;;  %8067 = vst [vmem:[#allocation4_spill] sm:$0xff] %v6830_v48 }
 0x3c0   :  { %v2481_v55 = vadd.f32 %v2272_v57, %v1679_v37  ;;  %v1087_v5 = vpop.f32.mrf.mxu0  ;;  %v1681_v24 = vpop.f32.mrf.mxu1  ;;  %v6804_v37 = vld [vmem:[%s8064_s28 + $0x7b8] sm:$0xff] }
 0x3c1   :  { %v574_v57 = vpack.c.bf16 %v6804_v37, %v315_v15 }
 0x3c2   :  { %v2623_v4 = vadd.f32 %v6566_v19, %v2481_v55 }
 0x3c3   :  { %4990 = vmatmul.msk.bf16.gmra.mxu0 %vm596_vm1, %v499_v27  ;;  %5064 = vmatmul.msk.bf16.gmra.mxu1 %vm596_vm1, %v425_v14 }
 0x3c4   :  { %v2761_v52 = vmax.f32 %v2623_v4, 0.0  ;;  %5138 = vmatmul.msk.bf16.gmra.mxu2 %vm596_vm1, %v573_v26  ;;  %v314_v4 = vld [vmem:[%s8064_s28 + $0x7a8] sm:$0xff] }
 0x3c5   :  { %v501_v36 = vpack.c.bf16 %v318_v49, %v314_v4 }
 0x3c6   :  { %v6790_v35 = vmax.f32 %v2758_v25, %v2761_v52  ;;  %v6823_v25 = vld [vmem:[%s8064_s28 + $0x7e0] sm:$0xff] }
 0x3c7   :  { %v2275_v9 = vpop.f32.mrf.mxu2 }
 0x3c8   :  { %v1089_v63 = vpop.f32.mrf.mxu0  ;;  %v1683_v46 = vpop.f32.mrf.mxu1 }
 0x3cf   :  { %v2277_v32 = vpop.f32.mrf.mxu2 }
 0x3d0   :  { %v1092_v56 = vpop.f32.mrf.mxu0  ;;  %v1686_v20 = vpop.f32.mrf.mxu1 }
 0x3d1   :  { %v1687_v27 = vadd.f32 %v1686_v20, %v1092_v56 }
 0x3d3   :  { %4991 = vmatmul.msk.bf16.gmra.mxu0 %vm596_vm1, %v500_v61  ;;  %5065 = vmatmul.msk.bf16.gmra.mxu1 %vm596_vm1, %v426_v43  ;;  %v1682_v61 = vadd.f32 %v1681_v24, %v1087_v5 }
 0x3d4   :  { %5139 = vmatmul.msk.bf16.gmra.mxu2 %vm596_vm1, %v574_v57  ;;  %v575_v57 = vpack.c.bf16 %v6823_v25, %v317_v7 }
 0x3d5   :  { %v2482_v60 = vadd.f32 %v2275_v9, %v1682_v61 }
 0x3d7   :  { %v2280_v14 = vpop.f32.mrf.mxu2  ;;  %v2624_v24 = vadd.f32 %v6566_v19, %v2482_v60  ;;  %v320_v60 = vld [vmem:[%s8064_s28 + $0x7d8] sm:$0xff] }
 0x3d8   :  { %v2484_v28 = vadd.f32 %v2280_v14, %v1687_v27  ;;  %v1094_v55 = vpop.f32.mrf.mxu0  ;;  %v1688_v26 = vpop.f32.mrf.mxu1  ;;  %v1684_v27 = vadd.f32 %v1683_v46, %v1089_v63 }
 0x3d9   :  { %v1689_v43 = vadd.f32 %v1688_v26, %v1094_v55 }
 0x3da   :  { %v2483_v54 = vadd.f32 %v2277_v32, %v1684_v27  ;;  %v2762_v32 = vmax.f32 %v2624_v24, 0.0  ;;  %v2626_v27 = vadd.f32 %v6566_v19, %v2484_v28 }
 0x3dc   :  { %v2625_v15 = vadd.f32 %v6566_v19, %v2483_v54  ;;  %v323_v54 = vld [vmem:[%s8064_s28 + $0x7f0] sm:$0xff] }
 0x3df   :  { %v2282_v52 = vpop.f32.mrf.mxu2 }
 0x3e0   :  { %v1097_v56 = vpop.f32.mrf.mxu0  ;;  %v1691_v20 = vpop.f32.mrf.mxu1  ;;  %v2485_v14 = vadd.f32 %v2282_v52, %v1689_v43  ;;  %v2763_v52 = vmax.f32 %v2625_v15, 0.0 }
 0x3e1   :  { %v1692_v41 = vadd.f32 %v1691_v20, %v1097_v56 }
 0x3e2   :  { %v2627_v4 = vadd.f32 %v6566_v19, %v2485_v14 }
 0x3e3   :  { %4992 = vmatmul.msk.bf16.gmra.mxu0 %vm596_vm1, %v501_v36  ;;  %5066 = vmatmul.msk.bf16.gmra.mxu1 %vm596_vm1, %v427_v18  ;;  %v319_v18 = vld [vmem:[%s8064_s28 + $0x7d0] sm:$0xff] }
 0x3e4   :  { %5140 = vmatmul.msk.bf16.gmra.mxu2 %vm596_vm1, %v575_v57  ;;  %v2765_v49 = vmax.f32 %v2627_v4, 0.0  ;;  %v502_v20 = vpack.c.bf16 %v320_v60, %v319_v18  ;;  %v428_v57 = vpack.c.bf16 %v317_v7, %v6804_v37  ;;  %v327_v18 = vld [vmem:[%s8064_s28 + $0x810] sm:$0xff]  ;;  %v328_v60 = vld [vmem:[%s8064_s28 + $0x818] sm:$0xff] }
 0x3e6   :  { %v2849_v61 = vmax.f32 %v2762_v32, %v2765_v49  ;;  %v2764_v49 = vmax.f32 %v2626_v27, 0.0  ;;  %v577_v27 = vpack.c.bf16 %v328_v60, %v327_v18 }
 0x3e7   :  { %v2285_v5 = vpop.f32.mrf.mxu2 }
 0x3e8   :  { %v2486_v63 = vadd.f32 %v2285_v5, %v1692_v41  ;;  %v1099_v46 = vpop.f32.mrf.mxu0  ;;  %v1693_v55 = vpop.f32.mrf.mxu1  ;;  %v322_v41 = vld [vmem:[%s8064_s28 + $0x7e8] sm:$0xff] }
 0x3e9   :  { %v1694_v26 = vadd.f32 %v1693_v55, %v1099_v46  ;;  %v576_v15 = vpack.c.bf16 %v323_v54, %v322_v41  ;;  %v6849_v46 = vpop.f32.mrf.mxu3 }
 0x3ea   :  { %v2628_v9 = vadd.f32 %v6566_v19, %v2486_v63  ;;  %8068 = vst [vmem:[#allocation5_spill] sm:$0xff] %v6849_v46 }
 0x3ec   :  { %v2766_v36 = vmax.f32 %v2628_v9, 0.0 }
 0x3ee   :  { %v2850_v43 = vmax.f32 %v2763_v52, %v2766_v36  ;;  %v324_v52 = vld [vmem:[%s8064_s28 + $0x7f8] sm:$0xff]  ;;  %v325_v36 = vld [vmem:[%s8064_s28 + $0x800] sm:$0xff] }
 0x3ef   :  { %v2287_v56 = vpop.f32.mrf.mxu2 }
 0x3f0   :  { %v2896_v14 = vpack.c.bf16 %v2850_v43, %v2849_v61  ;;  %v2487_v4 = vadd.f32 %v2287_v56, %v1694_v26  ;;  %v1102_v5 = vpop.f32.mrf.mxu0  ;;  %v1696_v24 = vpop.f32.mrf.mxu1  ;;  %v503_v43 = vpack.c.bf16 %v325_v36, %v324_v52  ;;  %v429_v56 = vpack.c.bf16 %v322_v41, %v6823_v25  ;;  %v330_v25 = vld [vmem:[%s8064_s28 + $0x828] sm:$0xff]  ;;  %v329_v41 = vld [vmem:[%s8064_s28 + $0x820] sm:$0xff] }
 0x3f1   :  { %v1697_v63 = vadd.f32 %v1696_v24, %v1102_v5 }
 0x3f2   :  { %v2629_v55 = vadd.f32 %v6566_v19, %v2487_v4  ;;  %5167 = vmatmul.msk.bf16.gmra.mxu3 %vm2926_vm3, %v2896_v14 }
 0x3f3   :  { %4993 = vmatmul.msk.bf16.gmra.mxu0 %vm596_vm1, %v502_v20  ;;  %5067 = vmatmul.msk.bf16.gmra.mxu1 %vm596_vm1, %v428_v57 }
 0x3f4   :  { %v2767_v37 = vmax.f32 %v2629_v55, 0.0  ;;  %5141 = vmatmul.msk.bf16.gmra.mxu2 %vm596_vm1, %v576_v15  ;;  %v6888_v55 = vld [vmem:[%s8064_s28 + $0x840] sm:$0xff] }
 0x3f5   :  { %8069 = vst [vmem:[#allocation6_spill] sm:$0xff] %v6888_v55 }
 0x3f6   :  { %v6856_v28 = vmax.f32 %v2764_v49, %v2767_v37 }
 0x3f7   :  { %v2290_v7 = vpop.f32.mrf.mxu2 }
 0x3f8   :  { %v2488_v26 = vadd.f32 %v2290_v7, %v1697_v63  ;;  %v1104_v9 = vpop.f32.mrf.mxu0  ;;  %v1698_v32 = vpop.f32.mrf.mxu1  ;;  %v326_v63 = vld [vmem:[%s8064_s28 + $0x808] sm:$0xff]  ;;  %v430_v7 = vpack.c.bf16 %v327_v18, %v323_v54 }
 0x3f9   :  { %v504_v37 = vpack.c.bf16 %v330_v25, %v326_v63 }
 0x3fa   :  { %v2630_v54 = vadd.f32 %v6566_v19, %v2488_v26  ;;  %v332_v26 = vld [vmem:[%s8064_s28 + $0x838] sm:$0xff] }
 0x3fc   :  { %v2768_v25 = vmax.f32 %v2630_v54, 0.0 }
 0x3ff   :  { %v2292_v61 = vpop.f32.mrf.mxu2 }
 0x400   :  { %v1107_v20 = vpop.f32.mrf.mxu0  ;;  %v1701_v57 = vpop.f32.mrf.mxu1 }
 0x401   :  { %v1702_v14 = vadd.f32 %v1701_v57, %v1107_v20  ;;  %v1699_v57 = vadd.f32 %v1698_v32, %v1104_v9 }
 0x403   :  { %4994 = vmatmul.msk.bf16.gmra.mxu0 %vm596_vm1, %v503_v43  ;;  %5068 = vmatmul.msk.bf16.gmra.mxu1 %vm596_vm1, %v429_v56  ;;  %v578_v56 = vpack.c.bf16 %v6888_v55, %v329_v41 }
 0x404   :  { %5142 = vmatmul.msk.bf16.gmra.mxu2 %vm596_vm1, %v577_v27 }
 0x407   :  { %v2295_v4 = vpop.f32.mrf.mxu2 }
 0x408   :  { %v6874_v5 = vadd.f32 %v2295_v4, %v1702_v14  ;;  %v1109_v24 = vpop.f32.mrf.mxu0  ;;  %v1703_v15 = vpop.f32.mrf.mxu1  ;;  %v2489_v14 = vadd.f32 %v2292_v61, %v1699_v57 }
 0x409   :  { %v1704_v52 = vadd.f32 %v1703_v15, %v1109_v24 }
 0x40a   :  { %v2631_v18 = vadd.f32 %v6566_v19, %v2489_v14 }
 0x40f   :  { %v2297_v49 = vpop.f32.mrf.mxu2 }
 0x410   :  { %v1112_v36 = vpop.f32.mrf.mxu0  ;;  %v1706_v43 = vpop.f32.mrf.mxu1  ;;  %v2491_v27 = vadd.f32 %v2297_v49, %v1704_v52  ;;  %v2769_v49 = vmax.f32 %v2631_v18, 0.0 }
 0x411   :  { %v1707_v20 = vadd.f32 %v1706_v43, %v1112_v36 }
 0x412   :  { %v2633_v4 = vadd.f32 %v6566_v19, %v2491_v27 }
 0x413   :  { %4995 = vmatmul.msk.bf16.gmra.mxu0 %vm596_vm1, %v504_v37  ;;  %5069 = vmatmul.msk.bf16.gmra.mxu1 %vm596_vm1, %v430_v7  ;;  %v331_v37 = vld [vmem:[%s8064_s28 + $0x830] sm:$0xff] }
 0x414   :  { %5143 = vmatmul.msk.bf16.gmra.mxu2 %vm596_vm1, %v578_v56  ;;  %v2771_v9 = vmax.f32 %v2633_v4, 0.0  ;;  %v6916_v7 = vld [vmem:[%s8064_s28 + $0x850] sm:$0xff]  ;;  %v505_v56 = vpack.c.bf16 %v332_v26, %v331_v37 }
 0x415   :  { %8071 = vst [vmem:[#allocation8_spill] sm:$0xff] %v6916_v7 }
 0x416   :  { %v6918_v52 = vmax.f32 %v2768_v25, %v2771_v9  ;;  %v6931_v9 = vpop.f32.mrf.mxu3 }
 0x417   :  { %v2300_v29 = vpop.f32.mrf.mxu2  ;;  %8072 = vst [vmem:[#allocation9_spill] sm:$0xff] %v6931_v9 }
 0x418   :  { %v2492_v24 = vadd.f32 %v2300_v29, %v1707_v20  ;;  %v6897_v15 = vpop.f32.mrf.mxu0  ;;  %v6899_v63 = vpop.f32.mrf.mxu1  ;;  %v6911_v29 = vld [vmem:[%s8064_s28 + $0x848] sm:$0xff]  ;;  %v431_v20 = vpack.c.bf16 %v329_v41, %v328_v60 }
 0x419   :  { %8070 = vst [vmem:[#allocation7_spill] sm:$0xff] %v6911_v29  ;;  %v579_v4 = vpack.c.bf16 %v6916_v7, %v6911_v29 }
 0x41a   :  { %v2634_v32 = vadd.f32 %v6566_v19, %v2492_v24 }
 0x41c   :  { %v2772_v61 = vmax.f32 %v2634_v32, 0.0 }
 0x41e   :  { %v6920_v36 = vmax.f32 %v2769_v49, %v2772_v61  ;;  %v6933_v26 = vpop.f32.mrf.mxu3 }
 0x41f   :  { %v6922_v43 = vpop.f32.mrf.mxu2  ;;  %8073 = vst [vmem:[#allocation10_spill] sm:$0xff] %v6933_v26 }
 0x420   :  { %v1117_v27 = vpop.f32.mrf.mxu0  ;;  %v1711_v14 = vpop.f32.mrf.mxu1 }
 0x421   :  { %v1712_v49 = vadd.f32 %v1711_v14, %v1117_v27 }
 0x423   :  { %4996 = vmatmul.msk.bf16.gmra.mxu0 %vm596_vm1, %v505_v56  ;;  %5070 = vmatmul.msk.bf16.gmra.mxu1 %vm596_vm1, %v431_v20 }
 0x424   :  { %5144 = vmatmul.msk.bf16.gmra.mxu2 %vm596_vm1, %v579_v4 }
 0x426   :  { %v6937_v13 = vpop.f32.mrf.mxu3 }
 0x427   :  { %v2305_v54 = vpop.f32.mrf.mxu2  ;;  %8074 = vst [vmem:[#allocation11_spill] sm:$0xff] %v6937_v13 }
 0x428   :  { %v1119_v18 = vpop.f32.mrf.mxu0  ;;  %v1713_v24 = vpop.f32.mrf.mxu1  ;;  %v2494_v57 = vadd.f32 %v2305_v54, %v1712_v49 }
 0x429   :  { %v1714_v49 = vadd.f32 %v1713_v24, %v1119_v18 }
 0x42a   :  { %v2636_v20 = vadd.f32 %v6566_v19, %v2494_v57 }
 0x42c   :  { %v2774_v8 = vmax.f32 %v2636_v20, 0.0 }
 0x42f   :  { %v2307_v60 = vpop.f32.mrf.mxu2 }
 0x430   :  { %v1122_v41 = vpop.f32.mrf.mxu0  ;;  %v1716_v32 = vpop.f32.mrf.mxu1 }
 0x431   :  { %v1717_v48 = vadd.f32 %v1716_v32, %v1122_v41 }
 0x437   :  { %v2310_v25 = vpop.f32.mrf.mxu2 }
 0x438   :  { %v1124_v61 = vpop.f32.mrf.mxu0  ;;  %v1718_v37 = vpop.f32.mrf.mxu1  ;;  %v2496_v57 = vadd.f32 %v2310_v25, %v1717_v48 }
 0x439   :  { %v1719_v56 = vadd.f32 %v1718_v37, %v1124_v61  ;;  %v6941_v37 = vpop.f32.mrf.mxu3 }
 0x43a   :  { %8075 = vst [vmem:[#allocation12_spill] sm:$0xff] %v6941_v37 }
 0x43f   :  { %v2312_v1 = vpop.f32.mrf.mxu2 }
 0x440   :  { %v2497_v4 = vadd.f32 %v2312_v1, %v1719_v56  ;;  %v1127_v34 = vpop.f32.mrf.mxu0  ;;  %v1721_v31 = vpop.f32.mrf.mxu1  ;;  %v2495_v1 = vadd.f32 %v2307_v60, %v1714_v49 }
 0x441   :  { %v1722_v27 = vadd.f32 %v1721_v31, %v1127_v34  ;;  %v2638_v31 = vadd.f32 %v6566_v19, %v2496_v57  ;;  %v6947_v32 = vpop.f32.mrf.mxu3 }
 0x442   :  { %v2639_v59 = vadd.f32 %v6566_v19, %v2497_v4  ;;  %8076 = vst [vmem:[#allocation13_spill] sm:$0xff] %v6947_v32 }
 0x443   :  { %v2776_v60 = vmax.f32 %v2638_v31, 0.0 }
 0x444   :  { %v2777_v9 = vmax.f32 %v2639_v59, 0.0 }
 0x446   :  { %v2855_v46 = vmax.f32 %v2774_v8, %v2777_v9  ;;  %v2637_v8 = vadd.f32 %v6566_v19, %v2495_v1 }
 0x447   :  { %v2315_v14 = vpop.f32.mrf.mxu2 }
 0x448   :  { %v1129_v7 = vpop.f32.mrf.mxu0  ;;  %v1723_v26 = vpop.f32.mrf.mxu1  ;;  %v2897_v54 = vpack.c.bf16 %v2855_v46, %v6856_v28  ;;  %v2498_v61 = vadd.f32 %v2315_v14, %v1722_v27  ;;  %v2775_v24 = vmax.f32 %v2637_v8, 0.0 }
 0x449   :  { %v1724_v20 = vadd.f32 %v1723_v26, %v1129_v7  ;;  %v6950_v49 = vpop.f32.mrf.mxu3 }
 0x44a   :  { %5168 = vmatmul.msk.bf16.gmra.mxu3 %vm2926_vm3, %v2897_v54  ;;  %v2640_v56 = vadd.f32 %v6566_v19, %v2498_v61  ;;  %8077 = vst [vmem:[#allocation14_spill] sm:$0xff] %v6950_v49 }
 0x44c   :  { %v2778_v28 = vmax.f32 %v2640_v56, 0.0 }
 0x44e   :  { %v2856_v25 = vmax.f32 %v2775_v24, %v2778_v28 }
 0x44f   :  { %v2317_v59 = vpop.f32.mrf.mxu2 }
 0x450   :  { %v2499_v34 = vadd.f32 %v2317_v59, %v1724_v20  ;;  %v1132_v9 = vpop.f32.mrf.mxu0  ;;  %v1726_v41 = vpop.f32.mrf.mxu1 }
 0x451   :  { %v1727_v46 = vadd.f32 %v1726_v41, %v1132_v9  ;;  %v6952_v20 = vpop.f32.mrf.mxu3 }
 0x452   :  { %v2641_v18 = vadd.f32 %v6566_v19, %v2499_v34  ;;  %8078 = vst [vmem:[#allocation15_spill] sm:$0xff] %v6952_v20 }
 0x454   :  { %v2779_v48 = vmax.f32 %v2641_v18, 0.0 }
 0x456   :  { %v2857_v4 = vmax.f32 %v2776_v60, %v2779_v48 }
 0x457   :  { %v2320_v7 = vpop.f32.mrf.mxu2 }
 0x458   :  { %v2500_v26 = vadd.f32 %v2320_v7, %v1727_v46  ;;  %v1134_v27 = vpop.f32.mrf.mxu0  ;;  %v1728_v14 = vpop.f32.mrf.mxu1  ;;  %v2898_v54 = vpack.c.bf16 %v2857_v4, %v2856_v25 }
 0x459   :  { %v6954_v18 = vpop.f32.mrf.mxu3  ;;  %v1729_v60 = vadd.f32 %v1728_v14, %v1134_v27 }
 0x45a   :  { %5169 = vmatmul.msk.bf16.gmra.mxu3 %vm2926_vm3, %v2898_v54  ;;  %8079 = vst [vmem:[#allocation16_spill] sm:$0xff] %v6954_v18  ;;  %v2642_v54 = vadd.f32 %v6566_v19, %v2500_v26  ;;  %v6969_v26 = vld [vmem:[%s8065_s30] ss:$0 sm:$0xff] }
 0x45c   :  { %v2780_v18 = vmax.f32 %v2642_v54, 0.0 }
 0x45f   :  { %v2322_v61 = vpop.f32.mrf.mxu2 }
 0x460   :  { %v1137_v1 = vpop.f32.mrf.mxu0  ;;  %v1731_v57 = vpop.f32.mrf.mxu1  ;;  %v2501_v25 = vadd.f32 %v2322_v61, %v1729_v60 }
 0x461   :  { %v1732_v56 = vadd.f32 %v1731_v57, %v1137_v1 }
 0x462   :  { %v2643_v1 = vadd.f32 %v6566_v19, %v2501_v25 }
 0x467   :  { %v2325_v59 = vpop.f32.mrf.mxu2 }
 0x468   :  { %v2502_v8 = vadd.f32 %v2325_v59, %v1732_v56  ;;  %v1139_v31 = vpop.f32.mrf.mxu0  ;;  %v1733_v34 = vpop.f32.mrf.mxu1 }
 0x469   :  { %v1734_v41 = vadd.f32 %v1733_v34, %v1139_v31  ;;  %v6960_v34 = vpop.f32.mrf.mxu3 }
 0x46a   :  { %8080 = vst [vmem:[#allocation17_spill] sm:$0xff] %v6960_v34 }
 0x46f   :  { %v2327_v9 = vpop.f32.mrf.mxu2 }
 0x470   :  { %v1142_v46 = vpop.f32.mrf.mxu0  ;;  %v1736_v28 = vpop.f32.mrf.mxu1  ;;  %v2503_v48 = vadd.f32 %v2327_v9, %v1734_v41 }
 0x471   :  { %v1737_v24 = vadd.f32 %v1736_v28, %v1142_v46  ;;  %v2781_v46 = vmax.f32 %v2643_v1, 0.0  ;;  %v2644_v28 = vadd.f32 %v6969_v26, %v2502_v8 }
 0x472   :  { %v2645_v4 = vadd.f32 %v6566_v19, %v2503_v48 }
 0x474   :  { %v2783_v20 = vmax.f32 %v2645_v4, 0.0  ;;  %v6975_v4 = vpop.f32.mrf.mxu3 }
 0x475   :  { %8081 = vst [vmem:[#allocation18_spill] sm:$0xff] %v6975_v4 }
 0x476   :  { %v6962_v14 = vmax.f32 %v2780_v18, %v2783_v20  ;;  %v2782_v18 = vmax.f32 %v2644_v28, 0.0 }
 0x477   :  { %v2330_v7 = vpop.f32.mrf.mxu2 }
 0x478   :  { %v2504_v57 = vadd.f32 %v2330_v7, %v1737_v24  ;;  %v1144_v56 = vpop.f32.mrf.mxu0  ;;  %v1738_v59 = vpop.f32.mrf.mxu1 }
 0x479   :  { %v1739_v9 = vadd.f32 %v1738_v59, %v1144_v56 }
 0x47a   :  { %v2646_v31 = vadd.f32 %v6566_v19, %v2504_v57 }
 0x47c   :  { %v2784_v27 = vmax.f32 %v2646_v31, 0.0  ;;  %v6981_v56 = vpop.f32.mrf.mxu3 }
 0x47d   :  { %8083 = vst [vmem:[#allocation20_spill] sm:$0xff] %v6981_v56 }
 0x47e   :  { %v6964_v61 = vmax.f32 %v2781_v46, %v2784_v27 }
 0x47f   :  { %v2332_v41 = vpop.f32.mrf.mxu2 }
 0x480   :  { %v2505_v24 = vadd.f32 %v2332_v41, %v1739_v9  ;;  %v1147_v60 = vpop.f32.mrf.mxu0  ;;  %v1741_v48 = vpop.f32.mrf.mxu1 }
 0x482   :  { %v2647_v20 = vadd.f32 %v6969_v26, %v2505_v24 }
 0x484   :  { %v2785_v25 = vmax.f32 %v2647_v20, 0.0  ;;  %v6983_v27 = vpop.f32.mrf.mxu3 }
 0x485   :  { %8084 = vst [vmem:[#allocation21_spill] sm:$0xff] %v6983_v27 }
 0x486   :  { %v6977_v7 = vmax.f32 %v2782_v18, %v2785_v25  ;;  %v1742_v18 = vadd.f32 %v1741_v48, %v1147_v60 }
 0x487   :  { %v2335_v54 = vpop.f32.mrf.mxu2 }
 0x488   :  { %8082 = vst [vmem:[#allocation19_spill] sm:$0xff] %v6977_v7  ;;  %v1149_v1 = vpop.f32.mrf.mxu0  ;;  %v1743_v57 = vpop.f32.mrf.mxu1  ;;  %v2506_v8 = vadd.f32 %v2335_v54, %v1742_v18 }
 0x489   :  { %v1744_v34 = vadd.f32 %v1743_v57, %v1149_v1 }
 0x48a   :  { %v2648_v27 = vadd.f32 %v6969_v26, %v2506_v8 }
 0x48c   :  { %v6985_v24 = vpop.f32.mrf.mxu3  ;;  %v2786_v1 = vmax.f32 %v2648_v27, 0.0 }
 0x48d   :  { %8085 = vst [vmem:[#allocation22_spill] sm:$0xff] %v6985_v24 }
 0x48f   :  { %v2337_v59 = vpop.f32.mrf.mxu2 }
 0x490   :  { %v1152_v31 = vpop.f32.mrf.mxu0  ;;  %v1746_v46 = vpop.f32.mrf.mxu1  ;;  %v2507_v32 = vadd.f32 %v2337_v59, %v1744_v34 }
 0x491   :  { %v1747_v34 = vadd.f32 %v1746_v46, %v1152_v31 }
 0x492   :  { %v2649_v29 = vadd.f32 %v6969_v26, %v2507_v32 }
 0x494   :  { %v6990_v7 = vpop.f32.mrf.mxu3  ;;  %v2787_v57 = vmax.f32 %v2649_v29, 0.0 }
 0x497   :  { %v2340_v9 = vpop.f32.mrf.mxu2 }
 0x498   :  { %v1154_v41 = vpop.f32.mrf.mxu0  ;;  %v1748_v28 = vpop.f32.mrf.mxu1 }
 0x499   :  { %v1749_v25 = vadd.f32 %v1748_v28, %v1154_v41 }
 0x49f   :  { %v2342_v20 = vpop.f32.mrf.mxu2 }
 0x4a0   :  { %v1157_v19 = vpop.f32.mrf.mxu0  ;;  %v1751_v4 = vpop.f32.mrf.mxu1  ;;  %v2509_v49 = vadd.f32 %v2342_v20, %v1749_v25  ;;  %v2508_v20 = vadd.f32 %v2340_v9, %v1747_v34 }
 0x4a1   :  { %v1752_v56 = vadd.f32 %v1751_v4, %v1157_v19 }
 0x4a2   :  { %v2651_v37 = vadd.f32 %v6969_v26, %v2509_v49 }
 0x4a4   :  { %v2789_v24 = vmax.f32 %v2651_v37, 0.0 }
 0x4a6   :  { %v2861_v19 = vmax.f32 %v2786_v1, %v2789_v24  ;;  %v8088_v1 = vpack.c.bf16 %v5837_v6, %v5726_v16 }
 0x4a7   :  { %v2345_v13 = vpop.f32.mrf.mxu2 }
 0x4a8   :  { %v2510_v55 = vadd.f32 %v2345_v13, %v1752_v56  ;;  %v1159_v48 = vpop.f32.mrf.mxu0  ;;  %v1753_v41 = vpop.f32.mrf.mxu1  ;;  %v5154_v13 = vld [vmem:[%s8066_s24 + $0x10] sm:$0xff]  ;;  %v2650_v56 = vadd.f32 %v6969_v26, %v2508_v20  ;;  %v8098_v20 = vpack.c.bf16 %v6255_v30, %v6239_v11 }
 0x4a9   :  { %v1754_v49 = vadd.f32 %v1753_v41, %v1159_v48  ;;  %v2925_v37 = vpack.c.bf16 %v5154_v13, %v5154_v13 }
 0x4aa   :  { %v2652_v60 = vadd.f32 %v6969_v26, %v2510_v55  ;;  %v6997_v55 = vpop.f32.mrf.mxu3  ;;  %v2788_v46 = vmax.f32 %v2650_v56, 0.0 }
 0x4ab   :  { %v3268_v32 = vsel %vm2978_vm2, %v2925_v37, 0 }
 0x4ac   :  { %v2790_v54 = vmax.f32 %v2652_v60, 0.0  ;;  %3277 = vmatpush.bf16.msra.mxu3 %v3268_v32  ;;  %v8086_v60 = vpack.c.bf16 %v5716_v3, %v5700_v53  ;;  %v8092_v3 = vpack.c.bf16 %v5988_v42, %v5972_v39 }
 0x4ae   :  { %v2862_v4 = vmax.f32 %v2787_v57, %v2790_v54  ;;  %v2869_v54 = vpack.c.bf16 %v5865_v38, %v5855_v23 }
 0x4af   :  { %v2347_v59 = vpop.f32.mrf.mxu2 }
 0x4b0   :  { %v2899_v28 = vpack.c.bf16 %v2862_v4, %v2861_v19  ;;  %v2511_v8 = vadd.f32 %v2347_v59, %v1754_v49  ;;  %v2871_v4 = vpack.c.bf16 %v6101_v17, %v5998_v0  ;;  %v2872_v59 = vpack.c.bf16 %v6132_v50, %v6117_v33 }
 0x4b2   :  { %5170 = vmatmul.msk.bf16.gmra.mxu3 %vm2926_vm3, %v2899_v28  ;;  %v2653_v29 = vadd.f32 %v6969_v26, %v2511_v8  ;;  %v7002_v9 = vpop.f32.mrf.mxu3 }
 0x4b4   :  { %v2791_v31 = vmax.f32 %v2653_v29, 0.0  ;;  %v2874_v29 = vpack.c.bf16 %v6365_v22, %v6265_v21 }
 0x4b6   :  { %v2863_v27 = vmax.f32 %v2788_v46, %v2791_v31  ;;  %v2875_v31 = vpack.c.bf16 %v6391_v45, %v6381_v47 }
 0x4b8   :  { %v2900_v24 = vpack.c.bf16 %v2863_v27, %v2863_v27 }
 0x4ba   :  { %v7005_v18 = vpop.f32.mrf.mxu3 }
 0x4c2   :  { %5171 = vmatmul.msk.bf16.gmra.mxu3 %vm2926_vm3, %v2900_v24  ;;  %v7007_v25 = vpop.f32.mrf.mxu3  ;;  %v8099_v24 = vpack.c.bf16 %v6513_v62, %v6497_v2 }
 0x4ca   :  { %v7013_v48 = vpop.f32.mrf.mxu3 }
 0x4cb   :  { %8087 = vst [vmem:[#allocation23_spill] sm:$0xff] %v7013_v48 }
 0x4d2   :  { %5172 = vmatmul.msk.bf16.vlgmr.msrb.gmra.mxu3 %vm2926_vm3, %v8086_v60  ;;  %v7015_v41 = vpop.f32.mrf.mxu3 }
 0x4da   :  { %v7021_v57 = vpop.f32.mrf.mxu3 }
 0x4db   :  { %8089 = vst [vmem:[#allocation24_spill] sm:$0xff] %v7021_v57 }
 0x4e2   :  { %5173 = vmatmul.msk.bf16.gmra.mxu3 %vm2926_vm3, %v8088_v1  ;;  %v7026_v34 = vpop.f32.mrf.mxu3 }
 0x4e3   :  { %8090 = vst [vmem:[#allocation25_spill] sm:$0xff] %v7026_v34  ;;  %v2902_v34 = vpack.c.bf16 %v5972_v39, %v5865_v38  ;;  %v337_v38 = vld [vmem:[%s8064_s28 + $0x860] sm:$0xff] }
 0x4ea   :  { %v7028_v53 = vpop.f32.mrf.mxu3 }
 0x4eb   :  { %8091 = vst [vmem:[#allocation26_spill] sm:$0xff] %v7028_v53 }
 0x4f2   :  { %5174 = vmatmul.msk.bf16.gmra.mxu3 %vm2926_vm3, %v2869_v54  ;;  %v7034_v19 = vpop.f32.mrf.mxu3  ;;  %v2877_v54 = vpack.c.bf16 %v6628_v44, %v6523_v12 }
 0x4f3   :  { %8093 = vst [vmem:[#allocation27_spill] sm:$0xff] %v7034_v19 }
 0x4fa   :  { %v7036_v16 = vpop.f32.mrf.mxu3 }
 0x4fb   :  { %8094 = vst [vmem:[#allocation28_spill] sm:$0xff] %v7036_v16  ;;  %v8104_v16 = vpack.c.bf16 %v5855_v23, %v5837_v6  ;;  %v340_v6 = vld [vmem:[%s8064_s28 + $0x878] sm:$0xff] }
 0x502   :  { %5175 = vmatmul.msk.bf16.gmra.mxu3 %vm2926_vm3, %v8092_v3  ;;  %v7041_v49 = vpop.f32.mrf.mxu3 }
 0x503   :  { %8095 = vst [vmem:[#allocation29_spill] sm:$0xff] %v7041_v49 }
 0x50a   :  { %v7046_v28 = vpop.f32.mrf.mxu3 }
 0x50b   :  { %8096 = vst [vmem:[#allocation30_spill] sm:$0xff] %v7046_v28 }
 0x512   :  { %5176 = vmatmul.msk.bf16.gmra.mxu3 %vm2926_vm3, %v2871_v4  ;;  %v7048_v8 = vpop.f32.mrf.mxu3 }
 0x513   :  { %8097 = vst [vmem:[#allocation31_spill] sm:$0xff] %v7048_v8 }
 0x522   :  { %5177 = vmatmul.msk.bf16.gmra.mxu3 %vm2926_vm3, %v2872_v59  ;;  %v2878_v59 = vpack.c.bf16 %v6654_v58, %v6644_v40 }
 0x532   :  { %5178 = vmatmul.msk.bf16.gmra.mxu3 %vm2926_vm3, %v8098_v20 }
 0x535   :  { %v3066_v13 = vpop.f32.mrf.mxu3 }
 0x53d   :  { %v3067_v37 = vpop.f32.mrf.mxu3 }
 0x53e   :  { %v8100_v37 = vpack.c.bf16 %v6780_v51, %v6764_v10 }
 0x542   :  { %5179 = vmatmul.msk.bf16.gmra.mxu3 %vm2926_vm3, %v2874_v29 }
 0x545   :  { %v3069_v32 = vpop.f32.mrf.mxu3 }
 0x54d   :  { %v3070_v56 = vpop.f32.mrf.mxu3 }
 0x54e   :  { %v1709_v56 = vadd.f32 %v6899_v63, %v6897_v15 }
 0x552   :  { %5180 = vmatmul.msk.bf16.gmra.mxu3 %vm2926_vm3, %v2875_v31  ;;  %v2493_v31 = vadd.f32 %v6922_v43, %v1709_v56  ;;  %v8101_v56 = vpack.c.bf16 %v6964_v61, %v6962_v14 }
 0x555   :  { %v7060_v46 = vpop.f32.mrf.mxu3 }
 0x55d   :  { %v7062_v27 = vpop.f32.mrf.mxu3 }
 0x562   :  { %5181 = vmatmul.msk.bf16.gmra.mxu3 %vm2926_vm3, %v8099_v24  ;;  %v2880_v24 = vpack.c.bf16 %v6918_v52, %v6790_v35 }
 0x565   :  { %v7068_v60 = vpop.f32.mrf.mxu3 }
 0x56d   :  { %v7070_v1 = vpop.f32.mrf.mxu3 }
 0x572   :  { %5182 = vmatmul.msk.bf16.gmra.mxu3 %vm2926_vm3, %v2877_v54  ;;  %v2635_v54 = vadd.f32 %v6969_v26, %v2493_v31 }
 0x574   :  { %v2773_v8 = vmax.f32 %v2635_v54, 0.0  ;;  %v5206_v54 = vld [vmem:[%s8103_s22 + $0x10] sm:$0xff] }
 0x575   :  { %v7075_v3 = vpop.f32.mrf.mxu3 }
 0x57d   :  { %v7077_v4 = vpop.f32.mrf.mxu3 }
 0x582   :  { %5183 = vmatmul.msk.bf16.gmra.mxu3 %vm2926_vm3, %v2878_v59 }
 0x585   :  { %v7082_v20 = vpop.f32.mrf.mxu3 }
 0x58d   :  { %v7084_v13 = vpop.f32.mrf.mxu3 }
 0x592   :  { %5184 = vmatmul.msk.bf16.gmra.mxu3 %vm2926_vm3, %v8100_v37  ;;  %v2632_v37 = vadd.f32 %v6969_v26, %v6874_v5 }
 0x594   :  { %v2770_v28 = vmax.f32 %v2632_v37, 0.0  ;;  %v5207_v37 = vld [vmem:[%s8103_s22 + $0x18] sm:$0xff] }
 0x595   :  { %v7090_v29 = vpop.f32.mrf.mxu3 }
 0x596   :  { %v7105_v19 = vmax.f32 %v2770_v28, %v2773_v8  ;;  %v8102_v8 = vld [vmem:[#allocation19_spill] sm:$0xff] }
 0x597   :  { %v2883_v31 = vpack.c.bf16 %v8102_v8, %v8102_v8 }
 0x598   :  { %v2881_v15 = vpack.c.bf16 %v7105_v19, %v6920_v36 }
 0x59d   :  { %v7092_v32 = vpop.f32.mrf.mxu3 }
 0x5a2   :  { %5185 = vmatmul.msk.bf16.gmra.mxu3 %vm2926_vm3, %v2880_v24 }
 0x5a5   :  { %v7101_v59 = vpop.f32.mrf.mxu3 }
 0x5ad   :  { %v7107_v49 = vpop.f32.mrf.mxu3 }
 0x5b2   :  { %5186 = vmatmul.msk.bf16.gmra.mxu3 %vm2926_vm3, %v2881_v15  ;;  %v3484_v15 = vpack.c.bf16 %v5207_v37, %v5206_v54  ;;  %v339_v54 = vld [vmem:[%s8064_s28 + $0x870] sm:$0xff]  ;;  %v8107_v37 = vld [vmem:[#allocation7_spill] sm:$0xff] }
 0x5b3   :  { %v580_v23 = vpack.c.bf16 %v340_v6, %v339_v54 }
 0x5b4   :  { %3506 = vmatpush.bf16.msrb.mxu3 %v3484_v15 }
 0x5b5   :  { %v7112_v63 = vpop.f32.mrf.mxu3  ;;  %5145 = vmatmul.msk.bf16.gmra.mxu2 %vm596_vm1, %v580_v23  ;;  %v2903_v23 = vpack.c.bf16 %v5998_v0, %v5988_v42  ;;  %v342_v42 = vld [vmem:[%s8064_s28 + $0x888] sm:$0xff] }
 0x5bd   :  { %v7114_v43 = vpop.f32.mrf.mxu3 }
 0x5c2   :  { %5187 = vmatmul.msk.bf16.gmra.mxu3 %vm2926_vm3, %v8101_v56 }
 0x5c5   :  { %v7120_v5 = vpop.f32.mrf.mxu3 }
 0x5cd   :  { %v7122_v28 = vpop.f32.mrf.mxu3 }
 0x5d2   :  { %5188 = vmatmul.msk.bf16.gmra.mxu3 %vm2926_vm3, %v2883_v31 }
 0x5d5   :  { %v7127_v24 = vpop.f32.mrf.mxu3 }
 0x5dd   :  { %v7135_v56 = vpop.f32.mrf.mxu3 }
 0x5e2   :  { %5189 = vmatmul.msk.bf16.vlgmr.msra.gmra.mxu3 %vm2926_vm3, %v8104_v16  ;;  %v336_v16 = vld [vmem:[%s8064_s28 + $0x858] sm:$0xff] }
 0x5e3   :  { %v506_v39 = vpack.c.bf16 %v337_v38, %v336_v16  ;;  %v341_v16 = vld [vmem:[%s8064_s28 + $0x880] sm:$0xff] }
 0x5e4   :  { %v345_v38 = vld [vmem:[%s8064_s28 + $0x8a0] sm:$0xff] }
 0x5e5   :  { %v7141_v31 = vpop.f32.mrf.mxu3  ;;  %4997 = vmatmul.msk.bf16.gmra.mxu0 %vm596_vm1, %v506_v39  ;;  %v338_v39 = vld [vmem:[%s8064_s28 + $0x868] sm:$0xff] }
 0x5e6   :  { %v507_v0 = vpack.c.bf16 %v342_v42, %v338_v39  ;;  %v343_v42 = vld [vmem:[%s8064_s28 + $0x890] sm:$0xff] }
 0x5ed   :  { %v7143_v53 = vpop.f32.mrf.mxu3 }
 0x5f2   :  { %5190 = vmatmul.msk.bf16.gmra.mxu3 %vm2926_vm3, %v2902_v34  ;;  %v8106_v34 = vld [vmem:[#allocation6_spill] sm:$0xff] }
 0x5f3   :  { %v432_v15 = vpack.c.bf16 %v8107_v37, %v8106_v34  ;;  %v581_v34 = vpack.c.bf16 %v345_v38, %v341_v16  ;;  %v8109_v37 = vld [vmem:[#allocation8_spill] sm:$0xff]  ;;  %v8110_v38 = vpack.c.bf16 %v6117_v33, %v6101_v17  ;;  %v344_v17 = vld [vmem:[%s8064_s28 + $0x898] sm:$0xff] }
 0x5f4   :  { %v508_v33 = vpack.c.bf16 %v344_v17, %v343_v42  ;;  %v2908_v42 = vpack.c.bf16 %v6497_v2, %v6391_v45  ;;  %v8114_v45 = vpack.c.bf16 %v6644_v40, %v6628_v44  ;;  %v8115_v2 = vld [vmem:[#allocation9_spill] sm:$0xff]  ;;  %v2911_v40 = vpack.c.bf16 %v6764_v10, %v6654_v58 }
 0x5f5   :  { %v7148_v48 = vpop.f32.mrf.mxu3  ;;  %5071 = vmatmul.msk.bf16.gmra.mxu1 %vm596_vm1, %v432_v15  ;;  %5146 = vmatmul.msk.bf16.gmra.mxu2 %vm596_vm1, %v581_v34  ;;  %v433_v15 = vpack.c.bf16 %v339_v54, %v8109_v37  ;;  %v347_v54 = vld [vmem:[%s8064_s28 + $0x8b0] sm:$0xff] }
 0x5f6   :  { %8105 = vst [vmem:[#allocation19_spill] sm:$0xff] %v7148_v48  ;;  %4998 = vmatmul.msk.bf16.gmra.mxu0 %vm596_vm1, %v507_v0  ;;  %v434_v0 = vpack.c.bf16 %v341_v16, %v340_v6 }
 0x5fd   :  { %v7165_v48 = vpop.f32.mrf.mxu3 }
 0x602   :  { %5191 = vmatmul.msk.bf16.gmra.mxu3 %vm2926_vm3, %v2903_v23 }
 0x605   :  { %v7172_v57 = vpop.f32.mrf.mxu3  ;;  %5072 = vmatmul.msk.bf16.gmra.mxu1 %vm596_vm1, %v433_v15 }
 0x606   :  { %8108 = vst [vmem:[#allocation6_spill] sm:$0xff] %v7172_v57  ;;  %v346_v57 = vld [vmem:[%s8064_s28 + $0x8a8] sm:$0xff]  ;;  %4999 = vmatmul.msk.bf16.gmra.mxu0 %vm596_vm1, %v508_v33 }
 0x607   :  { %v582_v39 = vpack.c.bf16 %v347_v54, %v346_v57  ;;  %v2905_v57 = vpack.c.bf16 %v6239_v11, %v6132_v50  ;;  %v2906_v54 = vpack.c.bf16 %v6265_v21, %v6255_v30  ;;  %v2909_v21 = vpack.c.bf16 %v6523_v12, %v6513_v62  ;;  %v8112_v33 = vld [vmem:[#allocation4_spill] sm:$0xff] }
 0x608   :  { %v3141_v62 = vadd.f32 %v7068_v60, %v8115_v2 }
 0x609   :  { %5147 = vmatmul.msk.bf16.gmra.mxu2 %vm596_vm1, %v582_v39  ;;  %v8111_v39 = vpack.c.bf16 %v6381_v47, %v6365_v22 }
 0x60d   :  { %v7188_v23 = vpop.f32.mrf.mxu3 }
 0x612   :  { %5192 = vmatmul.msk.bf16.gmra.mxu3 %vm2926_vm3, %v8110_v38 }
 0x615   :  { %v7196_v34 = vpop.f32.mrf.mxu3  ;;  %5073 = vmatmul.msk.bf16.gmra.mxu1 %vm596_vm1, %v434_v0  ;;  %v3136_v0 = vadd.f32 %v7060_v46, %v8112_v33  ;;  %v7252_v46 = vld [vmem:[%s8032_s4] ss:$0 sm:$0xff] }
 0x61d   :  { %v7211_v37 = vpop.f32.mrf.mxu3 }
 0x622   :  { %5193 = vmatmul.msk.bf16.gmra.mxu3 %vm2926_vm3, %v2905_v57  ;;  %v8113_v57 = vld [vmem:[#allocation5_spill] sm:$0xff] }
 0x625   :  { %v7218_v15 = vpop.f32.mrf.mxu3 }
 0x62d   :  { %v7220_v38 = vpop.f32.mrf.mxu3 }
 0x632   :  { %5194 = vmatmul.msk.bf16.gmra.mxu3 %vm2926_vm3, %v2906_v54  ;;  %v3138_v54 = vadd.f32 %v7062_v27, %v8113_v57 }
 0x635   :  { %v7225_v6 = vpop.f32.mrf.mxu3 }
 0x63d   :  { %v7227_v16 = vpop.f32.mrf.mxu3 }
 0x642   :  { %5195 = vmatmul.msk.bf16.gmra.mxu3 %vm2926_vm3, %v8111_v39 }
 0x645   :  { %v3210_v50 = vpop.f32.mrf.mxu3 }
 0x64d   :  { %v3211_v11 = vpop.f32.mrf.mxu3 }
 0x652   :  { %5196 = vmatmul.msk.bf16.gmra.mxu3 %vm2926_vm3, %v2908_v42  ;;  %v8116_v42 = vld [vmem:[#allocation10_spill] sm:$0xff] }
 0x653   :  { %v3143_v27 = vadd.f32 %v7070_v1, %v8116_v42 }
 0x655   :  { %v3213_v17 = vpop.f32.mrf.mxu3 }
 0x65d   :  { %v3214_v30 = vpop.f32.mrf.mxu3 }
 0x662   :  { %5197 = vmatmul.msk.bf16.gmra.mxu3 %vm2926_vm3, %v2909_v21 }
 0x665   :  { %v3279_v22 = vpop.f32.mrf.mxu3 }
 0x666   :  { %v3360_v47 = vadd.f32 %v3279_v22, %v3136_v0  ;;  %v8117_v0 = vld [vmem:[#allocation11_spill] sm:$0xff] }
 0x667   :  { %v3146_v22 = vadd.f32 %v7075_v3, %v8117_v0  ;;  %v2350_v0 = vpop.f32.mrf.mxu2 }
 0x668   :  { %v3394_v30 = vadd.f32 %v7252_v46, %v3360_v47 }
 0x66a   :  { %v3424_v60 = vmax.f32 %v3394_v30, 0.0  ;;  %v1162_v30 = vpop.f32.mrf.mxu0 }
 0x66d   :  { %v3281_v39 = vpop.f32.mrf.mxu3 }
 0x66e   :  { %v3361_v50 = vadd.f32 %v3281_v39, %v3138_v54 }
 0x670   :  { %v3395_v1 = vadd.f32 %v7252_v46, %v3361_v50  ;;  %v2912_v50 = vpack.c.bf16 %v6790_v35, %v6780_v51 }
 0x672   :  { %5198 = vmatmul.msk.bf16.gmra.mxu3 %vm2926_vm3, %v8114_v45  ;;  %v3425_v45 = vmax.f32 %v3395_v1, 0.0 }
 0x675   :  { %v3284_v12 = vpop.f32.mrf.mxu3 }
 0x676   :  { %v3362_v11 = vadd.f32 %v3284_v12, %v3141_v62  ;;  %v8118_v62 = vld [vmem:[#allocation12_spill] sm:$0xff] }
 0x677   :  { %v3148_v58 = vadd.f32 %v7077_v4, %v8118_v62  ;;  %v8119_v4 = vld [vmem:[#allocation13_spill] sm:$0xff]  ;;  %v8122_v62 = vld [vmem:[#allocation15_spill] sm:$0xff] }
 0x678   :  { %v3396_v42 = vadd.f32 %v7252_v46, %v3362_v11 }
 0x67d   :  { %v3286_v17 = vpop.f32.mrf.mxu3 }
 0x67e   :  { %v3363_v21 = vadd.f32 %v3286_v17, %v3143_v27 }
 0x680   :  { %v3397_v44 = vadd.f32 %v7252_v46, %v3363_v21  ;;  %v1756_v21 = vpop.f32.mrf.mxu1 }
 0x682   :  { %v3427_v33 = vmax.f32 %v3397_v44, 0.0  ;;  %5199 = vmatmul.msk.bf16.gmra.mxu3 %vm2926_vm3, %v2911_v40  ;;  %v3426_v44 = vmax.f32 %v3396_v42, 0.0 }
 0x684   :  { %v7263_v57 = vmax.f32 %v3424_v60, %v3427_v33  ;;  %v3151_v60 = vadd.f32 %v7082_v20, %v8119_v4  ;;  %v3156_v20 = vadd.f32 %v7090_v29, %v8122_v62 }
 0x685   :  { %v3289_v54 = vpop.f32.mrf.mxu3 }
 0x686   :  { %v3364_v39 = vadd.f32 %v3289_v54, %v3146_v22  ;;  %v1164_v54 = vpop.f32.mrf.mxu0 }
 0x688   :  { %v3398_v47 = vadd.f32 %v7252_v46, %v3364_v39  ;;  %v1758_v1 = vpop.f32.mrf.mxu1  ;;  %v8120_v39 = vld [vmem:[#allocation14_spill] sm:$0xff] }
 0x68a   :  { %v3428_v2 = vmax.f32 %v3398_v47, 0.0  ;;  %v3153_v47 = vadd.f32 %v7084_v13, %v8120_v39 }
 0x68c   :  { %v7269_v10 = vmax.f32 %v3425_v45, %v3428_v2  ;;  %v2352_v45 = vpop.f32.mrf.mxu2  ;;  %v8121_v2 = vpack.c.bf16 %v6920_v36, %v6918_v52  ;;  %v2914_v36 = vpack.c.bf16 %v6962_v14, %v7105_v19  ;;  %v8125_v19 = vld [vmem:[#allocation18_spill] sm:$0xff] }
 0x68d   :  { %v3291_v12 = vpop.f32.mrf.mxu3 }
 0x68e   :  { %v3365_v27 = vadd.f32 %v3291_v12, %v3148_v58  ;;  %v1167_v58 = vpop.f32.mrf.mxu0 }
 0x690   :  { %v3399_v17 = vadd.f32 %v7252_v46, %v3365_v27  ;;  %v1761_v42 = vpop.f32.mrf.mxu1 }
 0x692   :  { %v3429_v40 = vmax.f32 %v3399_v17, 0.0  ;;  %5200 = vmatmul.msk.bf16.gmra.mxu3 %vm2926_vm3, %v2912_v50  ;;  %v8123_v50 = vld [vmem:[#allocation16_spill] sm:$0xff] }
 0x694   :  { %v7280_v33 = vmax.f32 %v3426_v44, %v3429_v40  ;;  %v2355_v17 = vpop.f32.mrf.mxu2  ;;  %v3158_v44 = vadd.f32 %v7092_v32, %v8123_v50 }
 0x695   :  { %v3294_v11 = vpop.f32.mrf.mxu3 }
 0x696   :  { %v3366_v22 = vadd.f32 %v3294_v11, %v3151_v60  ;;  %v1169_v60 = vpop.f32.mrf.mxu0 }
 0x698   :  { %v3400_v40 = vadd.f32 %v7252_v46, %v3366_v22  ;;  %v1763_v11 = vpop.f32.mrf.mxu1 }
 0x69a   :  { %v3430_v29 = vmax.f32 %v3400_v40, 0.0  ;;  %v3163_v40 = vadd.f32 %v7107_v49, %v8125_v19 }
 0x69d   :  { %v3296_v51 = vpop.f32.mrf.mxu3 }
 0x69e   :  { %v3367_v35 = vadd.f32 %v3296_v51, %v3153_v47  ;;  %v2357_v47 = vpop.f32.mrf.mxu2  ;;  %v8124_v51 = vld [vmem:[#allocation17_spill] sm:$0xff]  ;;  %v1172_v50 = vpop.f32.mrf.mxu0 }
 0x6a0   :  { %v3401_v22 = vadd.f32 %v7252_v46, %v3367_v35 }
 0x6a2   :  { %5201 = vmatmul.msk.bf16.gmra.mxu3 %vm2926_vm3, %v8121_v2  ;;  %v3161_v2 = vadd.f32 %v7101_v59, %v8124_v51 }
 0x6a5   :  { %v3299_v12 = vpop.f32.mrf.mxu3 }
 0x6a6   :  { %v3368_v27 = vadd.f32 %v3299_v12, %v3156_v20  ;;  %v1174_v19 = vpop.f32.mrf.mxu0 }
 0x6a8   :  { %v3402_v35 = vadd.f32 %v7252_v46, %v3368_v27 }
 0x6ad   :  { %v3301_v13 = vpop.f32.mrf.mxu3 }
 0x6ae   :  { %v3369_v4 = vadd.f32 %v3301_v13, %v3158_v44  ;;  %v1766_v44 = vpop.f32.mrf.mxu1  ;;  %v3431_v13 = vmax.f32 %v3401_v22, 0.0 }
 0x6af   :  { %v1767_v59 = vadd.f32 %v1766_v44, %v1172_v50 }
 0x6b0   :  { %v3403_v52 = vadd.f32 %v7252_v46, %v3369_v4  ;;  %v1757_v4 = vadd.f32 %v1756_v21, %v1162_v30  ;;  %v3432_v30 = vmax.f32 %v3402_v35, 0.0 }
 0x6b2   :  { %v3433_v39 = vmax.f32 %v3403_v52, 0.0  ;;  %5202 = vmatmul.msk.bf16.gmra.mxu3 %vm2926_vm3, %v2914_v36  ;;  %v1759_v52 = vadd.f32 %v1758_v1, %v1164_v54  ;;  %v1764_v36 = vadd.f32 %v1763_v11, %v1169_v60  ;;  %v8126_v54 = vpack.c.bf16 %v8102_v8, %v6964_v61  ;;  %v8127_v1 = vld [vmem:[#allocation20_spill] sm:$0xff] }
 0x6b3   :  { %v3166_v27 = vadd.f32 %v7112_v63, %v8127_v1 }
 0x6b4   :  { %v7299_v32 = vmax.f32 %v3430_v29, %v3433_v39  ;;  %v2360_v29 = vpop.f32.mrf.mxu2  ;;  %v2513_v22 = vadd.f32 %v2352_v45, %v1759_v52 }
 0x6b5   :  { %v3304_v62 = vpop.f32.mrf.mxu3 }
 0x6b6   :  { %v3370_v20 = vadd.f32 %v3304_v62, %v3161_v2  ;;  %v2512_v62 = vadd.f32 %v2350_v0, %v1757_v4  ;;  %v2655_v11 = vadd.f32 %v6969_v26, %v2513_v22  ;;  %v1762_v4 = vadd.f32 %v1761_v42, %v1167_v58 }
 0x6b8   :  { %v3404_v12 = vadd.f32 %v7252_v46, %v3370_v20  ;;  %v2515_v20 = vadd.f32 %v2357_v47, %v1764_v36  ;;  %v2654_v60 = vadd.f32 %v6969_v26, %v2512_v62  ;;  %v8128_v62 = vld [vmem:[#allocation22_spill] sm:$0xff] }
 0x6b9   :  { %v3171_v22 = vadd.f32 %v7120_v5, %v8128_v62 }
 0x6ba   :  { %v3434_v14 = vmax.f32 %v3404_v12, 0.0  ;;  %v2516_v12 = vadd.f32 %v2360_v29, %v1767_v59  ;;  %v2657_v0 = vadd.f32 %v6969_v26, %v2515_v20 }
 0x6bc   :  { %v7305_v3 = vmax.f32 %v3431_v13, %v3434_v14  ;;  %v2658_v45 = vadd.f32 %v6969_v26, %v2516_v12  ;;  %v2792_v13 = vmax.f32 %v2654_v60, 0.0  ;;  %v2793_v14 = vmax.f32 %v2655_v11, 0.0  ;;  %v2362_v59 = vpop.f32.mrf.mxu2  ;;  %v8129_v60 = vld [vmem:[#allocation21_spill] sm:$0xff] }
 0x6bd   :  { %v3306_v39 = vpop.f32.mrf.mxu3  ;;  %v2795_v61 = vmax.f32 %v2657_v0, 0.0  ;;  %v3168_v11 = vadd.f32 %v7114_v43, %v8129_v60 }
 0x6be   :  { %v3472_v51 = vpack.c.bf16 %v7305_v3, %v7299_v32  ;;  %v3371_v2 = vadd.f32 %v3306_v39, %v3163_v40  ;;  %v2796_v8 = vmax.f32 %v2658_v45, 0.0  ;;  %v1768_v40 = vpop.f32.mrf.mxu1  ;;  %v2514_v39 = vadd.f32 %v2355_v17, %v1762_v4 }
 0x6bf   :  { %v2864_v63 = vmax.f32 %v2792_v13, %v2795_v61  ;;  %v1769_v36 = vadd.f32 %v1768_v40, %v1174_v19  ;;  %v3176_v13 = vadd.f32 %v7127_v24, %v6997_v55  ;;  %v3478_v40 = vld [vmem:[%s8103_s22] sm:$0xff]  ;;  %v3479_v55 = vld [vmem:[%s8103_s22 + $0x8] sm:$0xff]  ;;  %v3178_v4 = vadd.f32 %v7135_v56, %v7002_v9 }
 0x6c0   :  { %v3405_v49 = vadd.f32 %v7252_v46, %v3371_v2  ;;  %v2865_v52 = vmax.f32 %v2793_v14, %v2796_v8  ;;  %v2656_v20 = vadd.f32 %v6969_v26, %v2514_v39  ;;  %v3480_v24 = vpack.c.bf16 %v3479_v55, %v3478_v40 }
 0x6c1   :  { %v2517_v2 = vadd.f32 %v2362_v59, %v1769_v36 }
 0x6c2   :  { %v3435_v21 = vmax.f32 %v3405_v49, 0.0  ;;  %5203 = vmatmul.msk.bf16.gmra.mxu3 %vm2926_vm3, %v8126_v54  ;;  %v2916_v35 = vpack.c.bf16 %v2865_v52, %v2864_v63  ;;  %v2794_v58 = vmax.f32 %v2656_v20, 0.0 }
 0x6c3   :  { %v2659_v12 = vadd.f32 %v6969_v26, %v2517_v2  ;;  %3539 = vmatpush.bf16.msra.mxu3 %v3480_v24 }
 0x6c4   :  { %v7321_v47 = vmax.f32 %v3432_v30, %v3435_v21  ;;  %v3173_v21 = vadd.f32 %v7122_v28, %v6990_v7 }
 0x6c5   :  { %v3309_v50 = vpop.f32.mrf.mxu3  ;;  %v2797_v42 = vmax.f32 %v2659_v12, 0.0  ;;  %v3181_v12 = vadd.f32 %v7141_v31, %v7005_v18 }
 0x6c6   :  { %v3372_v44 = vadd.f32 %v3309_v50, %v3166_v27 }
 0x6c7   :  { %v2866_v54 = vmax.f32 %v2794_v58, %v2797_v42 }
 0x6c8   :  { %v3406_v1 = vadd.f32 %v7252_v46, %v3372_v44 }
 0x6c9   :  { %v2917_v5 = vpack.c.bf16 %v2866_v54, %v2866_v54 }
 0x6ca   :  { %v3436_v45 = vmax.f32 %v3406_v1, 0.0  ;;  %v8130_v1 = vld [vmem:[#allocation24_spill] sm:$0xff] }
 0x6cd   :  { %v3311_v29 = vpop.f32.mrf.mxu3 }
 0x6ce   :  { %v3373_v26 = vadd.f32 %v3311_v29, %v3168_v11 }
 0x6d0   :  { %v3407_v44 = vadd.f32 %v7252_v46, %v3373_v26 }
 0x6d2   :  { %5204 = vmatmul.msk.bf16.gmra.mxu3 %vm2926_vm3, %v2916_v35  ;;  %v3437_v8 = vmax.f32 %v3407_v44, 0.0 }
 0x6d5   :  { %v3314_v49 = vpop.f32.mrf.mxu3 }
 0x6d6   :  { %v3374_v30 = vadd.f32 %v3314_v49, %v3171_v22 }
 0x6d8   :  { %v3408_v36 = vadd.f32 %v7252_v46, %v3374_v30  ;;  %v3188_v30 = vadd.f32 %v7165_v48, %v7015_v41 }
 0x6da   :  { %v3438_v35 = vmax.f32 %v3408_v36, 0.0 }
 0x6dd   :  { %v3316_v17 = vpop.f32.mrf.mxu3 }
 0x6de   :  { %v3375_v27 = vadd.f32 %v3316_v17, %v3173_v21 }
 0x6e0   :  { %v3409_v0 = vadd.f32 %v7252_v46, %v3375_v27  ;;  %v8131_v27 = vld [vmem:[#allocation6_spill] sm:$0xff] }
 0x6e1   :  { %v3191_v60 = vadd.f32 %v8131_v27, %v8130_v1  ;;  %v8140_v1 = vld [vmem:[#allocation30_spill] sm:$0xff] }
 0x6e2   :  { %v3439_v50 = vmax.f32 %v3409_v0, 0.0  ;;  %5205 = vmatmul.msk.bf16.gmra.mxu3 %vm2926_vm3, %v2917_v5  ;;  %v8132_v5 = vld [vmem:[#allocation23_spill] sm:$0xff] }
 0x6e3   :  { %v8133_v0 = vld [vmem:[#allocation19_spill] sm:$0xff] }
 0x6e4   :  { %v7337_v7 = vmax.f32 %v3436_v45, %v3439_v50  ;;  %v3186_v45 = vadd.f32 %v8133_v0, %v8132_v5 }
 0x6e5   :  { %v3319_v28 = vpop.f32.mrf.mxu3 }
 0x6e6   :  { %v3376_v14 = vadd.f32 %v3319_v28, %v3176_v13  ;;  %v3470_v43 = vpack.c.bf16 %v7337_v7, %v7280_v33  ;;  %v5208_v13 = vld [vmem:[%s8103_s22 + $0x20] sm:$0xff]  ;;  %v5209_v28 = vld [vmem:[%s8103_s22 + $0x28] sm:$0xff] }
 0x6e7   :  { %v3488_v44 = vpack.c.bf16 %v5209_v28, %v5208_v13 }
 0x6e8   :  { %v3410_v61 = vadd.f32 %v7252_v46, %v3376_v14 }
 0x6ea   :  { %v3440_v19 = vmax.f32 %v3410_v61, 0.0 }
 0x6ec   :  { %v7351_v63 = vmax.f32 %v3437_v8, %v3440_v19 }
 0x6ed   :  { %v3321_v52 = vpop.f32.mrf.mxu3 }
 0x6ee   :  { %v3475_v59 = vpack.c.bf16 %v7351_v63, %v7337_v7  ;;  %v3377_v29 = vadd.f32 %v3321_v52, %v3178_v4  ;;  %v8135_v52 = vld [vmem:[#allocation26_spill] sm:$0xff] }
 0x6ef   :  { %v3196_v36 = vadd.f32 %v7196_v34, %v8135_v52  ;;  %v3622_v7 = vld [vmem:[%s8035_s7 + $0x30] sm:$0xff] }
 0x6f0   :  { %v3411_v39 = vadd.f32 %v7252_v46, %v3377_v29 }
 0x6f2   :  { %v3441_v2 = vmax.f32 %v3411_v39, 0.0  ;;  %5210 = vmatmul.msk.bf16.vlgmr.msrb.gmra.mxu3 %vm3489_vm4, %v3472_v51  ;;  %v3183_v51 = vadd.f32 %v7143_v53, %v7007_v25 }
 0x6f3   :  { %3572 = vmatpush.bf16.msrb.mxu3 %v3488_v44 }
 0x6f4   :  { %v7361_v9 = vmax.f32 %v3438_v35, %v3441_v2 }
 0x6f5   :  { %v3324_v56 = vpop.f32.mrf.mxu3 }
 0x6f6   :  { %v3471_v62 = vpack.c.bf16 %v7361_v9, %v7351_v63  ;;  %v3378_v49 = vadd.f32 %v3324_v56, %v3181_v12  ;;  %v8136_v56 = vld [vmem:[#allocation28_spill] sm:$0xff]  ;;  %v3623_v63 = vld [vmem:[%s8035_s7 + $0x38] sm:$0xff] }
 0x6f8   :  { %v3412_v3 = vadd.f32 %v7252_v46, %v3378_v49  ;;  %v8137_v49 = vpack.c.bf16 %v7269_v10, %v7263_v57  ;;  %v3206_v57 = vadd.f32 %v7225_v6, %v8140_v1 }
 0x6fa   :  { %v3442_v21 = vmax.f32 %v3412_v3, 0.0 }
 0x6fd   :  { %v3326_v22 = vpop.f32.mrf.mxu3 }
 0x6fe   :  { %v3379_v54 = vadd.f32 %v3326_v22, %v3183_v51  ;;  %v3201_v22 = vadd.f32 %v7218_v15, %v8136_v56  ;;  %v8139_v51 = vld [vmem:[#allocation27_spill] sm:$0xff] }
 0x6ff   :  { %v3616_v56 = vld [vmem:[%s8035_s7] sm:$0xff] }
 0x700   :  { %v3413_v11 = vadd.f32 %v7252_v46, %v3379_v54 }
 0x702   :  { %v3443_v53 = vmax.f32 %v3413_v11, 0.0 }
 0x705   :  { %v3329_v20 = vpop.f32.mrf.mxu3 }
 0x706   :  { %v3380_v26 = vadd.f32 %v3329_v20, %v3186_v45 }
 0x708   :  { %v3414_v19 = vadd.f32 %v7252_v46, %v3380_v26 }
 0x70a   :  { %v3444_v24 = vmax.f32 %v3414_v19, 0.0 }
 0x70d   :  { %v3331_v58 = vpop.f32.mrf.mxu3 }
 0x70e   :  { %v3381_v32 = vadd.f32 %v3331_v58, %v3188_v30  ;;  %v8138_v30 = vld [vmem:[#allocation29_spill] sm:$0xff] }
 0x70f   :  { %v3203_v34 = vadd.f32 %v7220_v38, %v8138_v30 }
 0x710   :  { %v3415_v42 = vadd.f32 %v7252_v46, %v3381_v32 }
 0x712   :  { %v3445_v17 = vmax.f32 %v3415_v42, 0.0  ;;  %v3198_v42 = vadd.f32 %v7211_v37, %v8139_v51 }
 0x714   :  { %v3463_v18 = vmax.f32 %v3442_v21, %v3445_v17 }
 0x715   :  { %v3334_v31 = vpop.f32.mrf.mxu3 }
 0x716   :  { %v3382_v48 = vadd.f32 %v3334_v31, %v3191_v60  ;;  %v3473_v41 = vpack.c.bf16 %v3463_v18, %v7321_v47  ;;  %v8134_v47 = vld [vmem:[#allocation25_spill] sm:$0xff] }
 0x717   :  { %v3193_v14 = vadd.f32 %v7188_v23, %v8134_v47 }
 0x718   :  { %v3416_v25 = vadd.f32 %v7252_v46, %v3382_v48  ;;  %5211 = vmatmul.msk.bf16.gmra.mxu3 %vm3489_vm4, %v3473_v41  ;;  %v8141_v48 = vld [vmem:[#allocation31_spill] sm:$0xff] }
 0x719   :  { %v3208_v41 = vadd.f32 %v7227_v16, %v8141_v48 }
 0x71a   :  { %v3446_v50 = vmax.f32 %v3416_v25, 0.0 }
 0x71c   :  { %v3464_v61 = vmax.f32 %v3443_v53, %v3446_v50 }
 0x71d   :  { %v3336_v8 = vpop.f32.mrf.mxu3 }
 0x71e   :  { %v3383_v40 = vadd.f32 %v3336_v8, %v3193_v14 }
 0x720   :  { %v3417_v55 = vadd.f32 %v7252_v46, %v3383_v40 }
 0x722   :  { %v3447_v4 = vmax.f32 %v3417_v55, 0.0 }
 0x724   :  { %v3465_v29 = vmax.f32 %v3444_v24, %v3447_v4  ;;  %v3620_v24 = vld [vmem:[%s8035_s7 + $0x20] sm:$0xff]  ;;  %v3621_v4 = vld [vmem:[%s8035_s7 + $0x28] sm:$0xff] }
 0x725   :  { %v3339_v39 = vpop.f32.mrf.mxu3  ;;  %v3626_v52 = vpack.c.bf16 %v3621_v4, %v3620_v24 }
 0x726   :  { %v3384_v35 = vadd.f32 %v3339_v39, %v3196_v36  ;;  %v3474_v2 = vpack.c.bf16 %v3465_v29, %v3464_v61  ;;  %v3618_v39 = vld [vmem:[%s8035_s7 + $0x10] sm:$0xff] }
 0x728   :  { %5212 = vmatmul.msk.bf16.gmra.mxu3 %vm3489_vm4, %v3474_v2  ;;  %v3418_v3 = vadd.f32 %v7252_v46, %v3384_v35  ;;  %v3619_v35 = vld [vmem:[%s8035_s7 + $0x18] sm:$0xff] }
 0x729   :  { %v3625_v2 = vpack.c.bf16 %v3619_v35, %v3618_v39 }
 0x72a   :  { %v3448_v15 = vmax.f32 %v3418_v3, 0.0 }
 0x72d   :  { %v3341_v23 = vpop.f32.mrf.mxu3 }
 0x72e   :  { %v3385_v54 = vadd.f32 %v3341_v23, %v3198_v42 }
 0x730   :  { %v3419_v60 = vadd.f32 %v7252_v46, %v3385_v54  ;;  %v3658_v54 = vld [vmem:[%s8036_s8 + $0x8] sm:$0xff] }
 0x732   :  { %v3449_v37 = vmax.f32 %v3419_v60, 0.0 }
 0x735   :  { %v3344_v20 = vpop.f32.mrf.mxu3 }
 0x736   :  { %v3386_v12 = vadd.f32 %v3344_v20, %v3201_v22  ;;  %v3617_v22 = vld [vmem:[%s8035_s7 + $0x8] sm:$0xff] }
 0x738   :  { %5213 = vmatmul.msk.bf16.vlgmr.msra.gmra.mxu3 %vm3489_vm4, %v8137_v49  ;;  %v3420_v0 = vadd.f32 %v7252_v46, %v3386_v12  ;;  %v3624_v12 = vpack.c.bf16 %v3617_v22, %v3616_v56 }
 0x73a   :  { %v3450_v53 = vmax.f32 %v3420_v0, 0.0 }
 0x73d   :  { %v3346_v58 = vpop.f32.mrf.mxu3 }
 0x73e   :  { %v3387_v32 = vadd.f32 %v3346_v58, %v3203_v34  ;;  %v3659_v34 = vld [vmem:[%s8036_s8 + $0x10] sm:$0xff]  ;;  %v3660_v58 = vld [vmem:[%s8036_s8 + $0x18] sm:$0xff] }
 0x73f   :  { %v7459_v3 = vpack.c.bf16 %v3660_v58, %v3659_v34 }
 0x740   :  { %v3421_v21 = vadd.f32 %v7252_v46, %v3387_v32 }
 0x742   :  { %v3451_v17 = vmax.f32 %v3421_v21, 0.0 }
 0x744   :  { %v3466_v10 = vmax.f32 %v3448_v15, %v3451_v17  ;;  %v3657_v15 = vld [vmem:[%s8036_s8] sm:$0xff] }
 0x745   :  { %v3349_v27 = vpop.f32.mrf.mxu3  ;;  %v7468_v17 = vpack.c.bf16 %v3658_v54, %v3657_v15 }
 0x746   :  { %v3388_v38 = vadd.f32 %v3349_v27, %v3206_v57  ;;  %v3476_v18 = vpack.c.bf16 %v3466_v10, %v7361_v9  ;;  %v5249_v57 = vld [vmem:[%s8033_s6] ss:$0 sm:$0xff] }
 0x748   :  { %v3422_v31 = vadd.f32 %v7252_v46, %v3388_v38  ;;  %5214 = vmatmul.msk.bf16.gmra.mxu3 %vm3489_vm4, %v3470_v43 }
 0x74a   :  { %v3452_v11 = vmax.f32 %v3422_v31, 0.0 }
 0x74c   :  { %v3467_v6 = vmax.f32 %v3449_v37, %v3452_v11 }
 0x74d   :  { %v3351_v5 = vpop.f32.mrf.mxu3 }
 0x74e   :  { %v3389_v45 = vadd.f32 %v3351_v5, %v3208_v41 }
 0x750   :  { %v3423_v25 = vadd.f32 %v7252_v46, %v3389_v45 }
 0x752   :  { %v3453_v26 = vmax.f32 %v3423_v25, 0.0 }
 0x754   :  { %v3468_v50 = vmax.f32 %v3450_v53, %v3453_v26 }
 0x755   :  { %v3354_v13 = vpop.f32.mrf.mxu3 }
 0x756   :  { %v3477_v28 = vpack.c.bf16 %v3468_v50, %v3467_v6 }
 0x758   :  { %5215 = vmatmul.msk.bf16.gmra.mxu3 %vm3489_vm4, %v3471_v62 }
 0x75d   :  { %v3355_v33 = vpop.f32.mrf.mxu3 }
 0x765   :  { %v3357_v43 = vpop.f32.mrf.mxu3 }
 0x768   :  { %5216 = vmatmul.msk.bf16.vlgmr.msrb.gmra.mxu3 %vm3489_vm4, %v3475_v59  ;;  %v3627_v59 = vpack.c.bf16 %v3623_v63, %v3622_v7 }
 0x76a   :  { %3643 = vmatpush.bf16.msra.mxu3 %v3627_v59 }
 0x76d   :  { %v3358_v16 = vpop.f32.mrf.mxu3 }
 0x76e   :  { %3644 = vmatpush.bf16.msra.mxu3 %v3626_v52 }
 0x772   :  { %3645 = vmatpush.bf16.msra.mxu3 %v3625_v2 }
 0x775   :  { %v3508_v46 = vpop.f32.mrf.mxu3 }
 0x776   :  { %3646 = vmatpush.bf16.msra.mxu3 %v3624_v12 }
 0x778   :  { %5217 = vmatmul.msk.bf16.gmra.mxu3 %vm3489_vm4, %v3476_v18 }
 0x77a   :  { %3673 = vmatpush.bf16.msrb.mxu3 %v7459_v3 }
 0x77d   :  { %v3510_v44 = vpop.f32.mrf.mxu3 }
 0x77e   :  { %3674 = vmatpush.bf16.msrb.mxu3 %v7468_v17 }
 0x788   :  { %5218 = vmatmul.msk.bf16.gmra.mxu3 %vm3489_vm4, %v3477_v28 }
 0x79b   :  { %v3513_v47 = vpop.f32.mrf.mxu3 }
 0x7a3   :  { %v3515_v14 = vpop.f32.mrf.mxu3 }
 0x7ab   :  { %v3518_v61 = vpop.f32.mrf.mxu3 }
 0x7b3   :  { %v3520_v9 = vpop.f32.mrf.mxu3 }
 0x7bb   :  { %v3541_v8 = vpop.f32.mrf.mxu3 }
 0x7bc   :  { %v3542_v62 = vadd.f32 %v3541_v8, %v3508_v46 }
 0x7c3   :  { %v3543_v19 = vpop.f32.mrf.mxu3 }
 0x7c4   :  { %v3544_v42 = vadd.f32 %v3543_v19, %v3510_v44 }
 0x7cb   :  { %v3546_v40 = vpop.f32.mrf.mxu3 }
 0x7cc   :  { %v3547_v55 = vadd.f32 %v3546_v40, %v3513_v47  ;;  %v5392_v47 = vmov 0  }
 0x7d3   :  { %v3548_v36 = vpop.f32.mrf.mxu3 }
 0x7d4   :  { %v3549_v51 = vadd.f32 %v3548_v36, %v3515_v14 }
 0x7db   :  { %v3551_v29 = vpop.f32.mrf.mxu3 }
 0x7dc   :  { %v3552_v27 = vadd.f32 %v3551_v29, %v3518_v61 }
 0x7e3   :  { %v3553_v23 = vpop.f32.mrf.mxu3 }
 0x7e4   :  { %v3554_v0 = vadd.f32 %v3553_v23, %v3520_v9  ;;  %v7484_v9 = vld [vmem:[%s8034_s9] ss:$0 sm:$0xff]  ;;  %s5394_s9 = smov 32  }
 0x7eb   :  { %v3574_v20 = vpop.f32.mrf.mxu3 }
 0x7ec   :  { %v3589_v1 = vadd.f32 %v3574_v20, %v3542_v62 }
 0x7ee   :  { %v3599_v18 = vadd.f32 %v5249_v57, %v3589_v1 }
 0x7f0   :  { %v3605_v41 = vmax.f32 %v3599_v18, 0.0 }
 0x7f3   :  { %v3576_v49 = vpop.f32.mrf.mxu3 }
 0x7f4   :  { %v3590_v10 = vadd.f32 %v3576_v49, %v3544_v42 }
 0x7f6   :  { %v3600_v31 = vadd.f32 %v5249_v57, %v3590_v10 }
 0x7f8   :  { %v3606_v6 = vmax.f32 %v3600_v31, 0.0 }
 0x7fb   :  { %v3579_v30 = vpop.f32.mrf.mxu3 }
 0x7fc   :  { %v3591_v13 = vadd.f32 %v3579_v30, %v3547_v55 }
 0x7fe   :  { %v3601_v33 = vadd.f32 %v5249_v57, %v3591_v13 }
 0x800   :  { %v3607_v16 = vmax.f32 %v3601_v33, 0.0 }
 0x803   :  { %v3581_v32 = vpop.f32.mrf.mxu3 }
 0x804   :  { %v3592_v21 = vadd.f32 %v3581_v32, %v3549_v51 }
 0x806   :  { %v3602_v60 = vadd.f32 %v5249_v57, %v3592_v21 }
 0x808   :  { %v3608_v11 = vmax.f32 %v3602_v60, 0.0 }
 0x80a   :  { %v3611_v45 = vmax.f32 %v3605_v41, %v3608_v11 }
 0x80b   :  { %v3584_v38 = vpop.f32.mrf.mxu3 }
 0x80c   :  { %v3593_v37 = vadd.f32 %v3584_v38, %v3552_v27 }
 0x80e   :  { %v3603_v48 = vadd.f32 %v5249_v57, %v3593_v37 }
 0x810   :  { %v3609_v5 = vmax.f32 %v3603_v48, 0.0 }
 0x812   :  { %v3612_v25 = vmax.f32 %v3606_v6, %v3609_v5 }
 0x813   :  { %v3586_v53 = vpop.f32.mrf.mxu3 }
 0x814   :  { %v3614_v26 = vpack.c.bf16 %v3612_v25, %v3611_v45  ;;  %v3594_v50 = vadd.f32 %v3586_v53, %v3554_v0 }
 0x816   :  { %5219 = vmatmul.msk.bf16.vlgmr.msra.gmra.mxu3 %vm3632_vm5, %v3614_v26  ;;  %v3604_v28 = vadd.f32 %v5249_v57, %v3594_v50 }
 0x817   :  { %3716 = vmatpush.bf16.msra.mxu3 %v7459_v3 }
 0x818   :  { %v3610_v43 = vmax.f32 %v3604_v28, 0.0 }
 0x81a   :  { %v3613_v46 = vmax.f32 %v3607_v16, %v3610_v43 }
 0x81b   :  { %3717 = vmatpush.bf16.msra.mxu3 %v7468_v17 }
 0x81c   :  { %v3615_v44 = vpack.c.bf16 %v3613_v46, %v3613_v46 }
 0x826   :  { %5220 = vmatmul.msk.bf16.gmra.mxu3 %vm3632_vm5, %v3615_v44 }
 0x836   :  { %3675 = vmatmul.bf16.vlgmr.msrb.gmra.mxu3 %v5392_v47 }
 0x837   :  { %3766 = vmatpush.bf16.msrb.mxu3 %v7459_v3 }
 0x83b   :  { %3767 = vmatpush.bf16.msrb.mxu3 %v7468_v17 }
 0x899   :  { %v3648_v14 = vpop.f32.mrf.mxu3 }
 0x89a   :  { %v7490_v7 = vadd.f32 %v7484_v9, %v3648_v14 }
 0x8a1   :  { %v7479_v61 = vpop.f32.mrf.mxu3 }
 0x8a9   :  { %v3653_v8 = vpop.f32.mrf.mxu3 }
 0x8aa   :  { %v7487_v62 = vadd.f32 %v7484_v9, %v3653_v8 }
 0x8b1   :  { %v3655_v19 = vpop.f32.mrf.mxu3 }
 0x8b9   :  { %v3676_v63 = vpop.f32.mrf.mxu3 }
 0x8ba   :  { %v3680_v59 = vadd.f32 %v3676_v63, %v7490_v7 }
 0x8bc   :  { %5266 = vtanh.f32 %v3680_v59  ;;  %v3681_v24 = vmul.f32 0.5, %v3680_v59 }
 0x8be   :  { %5268 = vtanh.f32 %v3681_v24 }
 0x8c1   :  { %v3678_v40 = vpop.f32.mrf.mxu3 }
 0x8c2   :  { %v5267_v55 = vpop.eup %5266 }
 0x8c3   :  { %3688 = vrot.lane.b32.xlu0 %v5267_v55, %s5393_s26 }
 0x8c4   :  { %v5269_v4 = vpop.eup %5268 }
 0x8c5   :  { %v3683_v52 = vmul.f32 0.5, %v5269_v4 }
 0x8c7   :  { %v3684_v36 = vadd.f32 0.5, %v3683_v52 }
 0x8c9   :  { %v3686_v35 = vmul.f32 0.0, %v3684_v36 }
 0x935   :  { %v3689_v29 = vpop.permute.xlu0 %3688 }
 0x936   :  { %v3691_v39 = vmul.f32 %v3689_v29, %v3684_v36 }
 0x938   :  { %3693 = vrot.lane.b32.xlu0 %v3691_v39, %s5394_s9 }
 0x9aa   :  { %v3694_v2 = vpop.permute.xlu0 %3693 }
 0x9ab   :  { %v3696_v23 = vadd.f32 %v3694_v2, %v3686_v35 }
 0x9ad   :  { %5270 = vtanh.f32 %v3696_v23  ;;  %v3733_v10 = vrot.slane %v3696_v23, 6 }
 0x9b3   :  { %v5271_v56 = vpop.eup %5270 }
 0x9b4   :  { %3699 = vrot.lane.b32.xlu1 %v5271_v56, %s5393_s26 }
 0xa26   :  { %v3700_v22 = vpop.permute.xlu1 %3699 }
 0xa27   :  { %v7496_v20 = vmul.f32 %v3700_v22, %v3684_v36 }
 0xa29   :  { %v3703_v12 = vpack.c.bf16 %v7496_v20, %v7496_v20 }
 0xa2b   :  { %3705 = vrot.lane.b32.xlu1 %v3703_v12, %s5394_s9 }
 0xa9d   :  { %v3706_v49 = vpop.permute.xlu1 %3705 }
 0xa9e   :  { %5221 = vmatmul.msk.bf16.vlgmr.msra.gmra.mxu3 %vm3663_vm6, %v3706_v49 }
 0xa9f   :  { %3816 = vmatpush.bf16.msra.mxu3 %v7459_v3 }
 0xaa3   :  { %3817 = vmatpush.bf16.msra.mxu3 %v7468_v17 }
 0xb21   :  { %v3719_v30 = vpop.f32.mrf.mxu3 }
 0xb22   :  { %v3724_v34 = vrot.slane %v3719_v30, 6 }
 0xb24   :  { %v3726_v58 = vadd.f32 %v3724_v34, %v7490_v7 }
 0xb26   :  { %5272 = vtanh.f32 %v3726_v58  ;;  %v3727_v42 = vmul.f32 0.5, %v3726_v58 }
 0xb28   :  { %5274 = vtanh.f32 %v3727_v42 }
 0xb29   :  { %v3721_v32 = vpop.f32.mrf.mxu3 }
 0xb2c   :  { %v5273_v51 = vpop.eup %5272 }
 0xb2d   :  { %3737 = vrot.lane.b32.xlu2 %v5273_v51, %s5393_s26 }
 0xb2e   :  { %v5275_v21 = vpop.eup %5274 }
 0xb2f   :  { %v3729_v15 = vmul.f32 0.5, %v5275_v21 }
 0xb31   :  { %v3730_v54 = vadd.f32 0.5, %v3729_v15 }
 0xb33   :  { %v3735_v27 = vmul.f32 %v3733_v10, %v3730_v54 }
 0xb87   :  { %v3738_v1 = vpop.permute.xlu2 %3737 }
 0xb88   :  { %v3740_v57 = vmul.f32 %v3738_v1, %v3730_v54 }
 0xb8a   :  { %3742 = vrot.lane.b32.xlu2 %v3740_v57, %s5394_s9 }
 0xbe4   :  { %v3743_v60 = vpop.permute.xlu2 %3742 }
 0xbe5   :  { %v3745_v38 = vadd.f32 %v3743_v60, %v3735_v27 }
 0xbe7   :  { %5276 = vtanh.f32 %v3745_v38  ;;  %v3783_v43 = vrot.slane %v3745_v38, 6 }
 0xbed   :  { %v5277_v18 = vpop.eup %5276 }
 0xbee   :  { %3748 = vrot.lane.b32.xlu0 %v5277_v18, %s5393_s26 }
 0xc60   :  { %v3749_v31 = vpop.permute.xlu0 %3748 }
 0xc61   :  { %v3751_v37 = vmul.f32 %v3749_v31, %v3730_v54  ;;  %v7536_v54 = vadd.f32 %v7484_v9, %v7479_v61 }
 0xc63   :  { %v3752_v11 = vpack.c.bf16 %v3751_v37, %v3751_v37  ;;  %v4144_v63 = vsel %vm819_vm0, %v7496_v20, %v3751_v37 }
 0xc65   :  { %v3754_v48 = vrot.slane %v3752_v11, 1 }
 0xc67   :  { %3755 = vrot.lane.b32.xlu1 %v3754_v48, %s5394_s9 }
 0xcd9   :  { %v3756_v41 = vpop.permute.xlu1 %3755 }
 0xcda   :  { %5222 = vmatmul.msk.bf16.vlgmr.msrb.gmra.mxu3 %vm3663_vm6, %v3756_v41 }
 0xcdb   :  { %3866 = vmatpush.bf16.msrb.mxu3 %v7459_v3 }
 0xcdf   :  { %3867 = vmatpush.bf16.msrb.mxu3 %v7468_v17 }
 0xd5d   :  { %v3769_v6 = vpop.f32.mrf.mxu3 }
 0xd5e   :  { %v3774_v5 = vrot.slane %v3769_v6, 4 }
 0xd60   :  { %v3776_v0 = vadd.f32 %v3774_v5, %v7490_v7 }
 0xd62   :  { %5278 = vtanh.f32 %v3776_v0  ;;  %v3777_v53 = vmul.f32 0.5, %v3776_v0 }
 0xd64   :  { %5280 = vtanh.f32 %v3777_v53 }
 0xd65   :  { %v3771_v45 = vpop.f32.mrf.mxu3 }
 0xd68   :  { %v5279_v25 = vpop.eup %5278 }
 0xd69   :  { %3787 = vrot.lane.b32.xlu2 %v5279_v25, %s5393_s26 }
 0xd6a   :  { %v5281_v26 = vpop.eup %5280 }
 0xd6b   :  { %v3779_v50 = vmul.f32 0.5, %v5281_v26 }
 0xd6d   :  { %v3780_v13 = vadd.f32 0.5, %v3779_v50 }
 0xd6f   :  { %v3785_v16 = vmul.f32 %v3783_v43, %v3780_v13 }
 0xdc3   :  { %v3788_v28 = vpop.permute.xlu2 %3787 }
 0xdc4   :  { %v3790_v33 = vmul.f32 %v3788_v28, %v3780_v13 }
 0xdc6   :  { %3792 = vrot.lane.b32.xlu0 %v3790_v33, %s5394_s9 }
 0xe38   :  { %v3793_v46 = vpop.permute.xlu0 %3792 }
 0xe39   :  { %v3795_v44 = vadd.f32 %v3793_v46, %v3785_v16 }
 0xe3b   :  { %5282 = vtanh.f32 %v3795_v44  ;;  %v3833_v12 = vrot.slane %v3795_v44, 6 }
 0xe41   :  { %v5283_v14 = vpop.eup %5282 }
 0xe42   :  { %3798 = vrot.lane.b32.xlu1 %v5283_v14, %s5393_s26 }
 0xeb4   :  { %v3799_v8 = vpop.permute.xlu1 %3798 }
 0xeb5   :  { %v3801_v19 = vmul.f32 %v3799_v8, %v3780_v13 }
 0xeb7   :  { %v3802_v59 = vpack.c.bf16 %v3801_v19, %v3801_v19  ;;  %v4145_v40 = vsel %vm2978_vm2, %v4144_v63, %v3801_v19 }
 0xeb9   :  { %v3804_v55 = vrot.slane %v3802_v59, 2 }
 0xebb   :  { %3805 = vrot.lane.b32.xlu2 %v3804_v55, %s5394_s9 }
 0xf15   :  { %v3806_v24 = vpop.permute.xlu2 %3805 }
 0xf16   :  { %5223 = vmatmul.msk.bf16.vlgmr.msra.gmra.mxu3 %vm3663_vm6, %v3806_v24 }
 0xf17   :  { %3912 = vmatpush.bf16.msra.mxu3 %v7459_v3 }
 0xf1b   :  { %3913 = vmatpush.bf16.msra.mxu3 %v7468_v17 }
 0xf99   :  { %v3819_v4 = vpop.f32.mrf.mxu3 }
 0xf9a   :  { %v3824_v52 = vrot.slane %v3819_v4, 2 }
 0xf9c   :  { %v3826_v36 = vadd.f32 %v3824_v52, %v7490_v7 }
 0xf9e   :  { %5284 = vtanh.f32 %v3826_v36  ;;  %v3827_v35 = vmul.f32 0.5, %v3826_v36 }
 0xfa0   :  { %5286 = vtanh.f32 %v3827_v35 }
 0xfa1   :  { %v3821_v29 = vpop.f32.mrf.mxu3 }
 0xfa4   :  { %v5285_v39 = vpop.eup %5284 }
 0xfa5   :  { %3837 = vrot.lane.b32.xlu0 %v5285_v39, %s5393_s26 }
 0xfa6   :  { %v5287_v2 = vpop.eup %5286 }
 0xfa7   :  { %v3829_v23 = vmul.f32 0.5, %v5287_v2 }
 0xfa9   :  { %v3830_v56 = vadd.f32 0.5, %v3829_v23 }
 0xfab   :  { %v3835_v49 = vmul.f32 %v3833_v12, %v3830_v56 }
0x1017   :  { %v3838_v22 = vpop.permute.xlu0 %3837 }
0x1018   :  { %v3840_v20 = vmul.f32 %v3838_v22, %v3830_v56 }
0x101a   :  { %3842 = vrot.lane.b32.xlu1 %v3840_v20, %s5394_s9 }
0x108c   :  { %v3843_v30 = vpop.permute.xlu1 %3842 }
0x108d   :  { %v3845_v34 = vadd.f32 %v3843_v30, %v3835_v49 }
0x108f   :  { %5288 = vtanh.f32 %v3845_v34  ;;  %v3880_v48 = vrot.slane %v3845_v34, 6 }
0x1095   :  { %v5289_v7 = vpop.eup %5288 }
0x1096   :  { %3848 = vrot.lane.b32.xlu2 %v5289_v7, %s5393_s26 }
0x10f0   :  { %v3849_v58 = vpop.permute.xlu2 %3848 }
0x10f1   :  { %v3851_v32 = vmul.f32 %v3849_v58, %v3830_v56 }
0x10f3   :  { %v3852_v51 = vpack.c.bf16 %v3851_v32, %v3851_v32  ;;  %v7528_v42 = vsel %vm4146_vm7, %v4145_v40, %v3851_v32 }
0x10f5   :  { %v3854_v21 = vrot.slane %v3852_v51, 3 }
0x10f7   :  { %3855 = vrot.lane.b32.xlu0 %v3854_v21, %s5394_s9 }
0x1169   :  { %v3856_v15 = vpop.permute.xlu0 %3855 }
0x116a   :  { %5224 = vmatmul.msk.bf16.vlgmr.msrb.gmra.mxu3 %vm3663_vm6, %v3856_v15 }
0x116b   :  { %3962 = vmatpush.bf16.msrb.mxu3 %v7459_v3 }
0x116f   :  { %3963 = vmatpush.bf16.msrb.mxu3 %v7468_v17 }
0x11ed   :  { %v3869_v1 = vpop.f32.mrf.mxu3 }
0x11ee   :  { %v3873_v57 = vadd.f32 %v3869_v1, %v7536_v54 }
0x11f0   :  { %5290 = vtanh.f32 %v3873_v57  ;;  %v3874_v60 = vmul.f32 0.5, %v3873_v57 }
0x11f2   :  { %5292 = vtanh.f32 %v3874_v60 }
0x11f5   :  { %v3871_v10 = vpop.f32.mrf.mxu3 }
0x11f6   :  { %v5291_v27 = vpop.eup %5290 }
0x11f7   :  { %3884 = vrot.lane.b32.xlu1 %v5291_v27, %s5393_s26 }
0x11f8   :  { %v5293_v38 = vpop.eup %5292 }
0x11f9   :  { %v3876_v18 = vmul.f32 0.5, %v5293_v38  ;;  %v4198_v38 = vld [vmem:[%s8037_s12 + $0x10] sm:$0xff] }
0x11fb   :  { %v3877_v31 = vadd.f32 0.5, %v3876_v18  ;;  %v4199_v18 = vld [vmem:[%s8037_s12 + $0x18] sm:$0xff] }
0x11fd   :  { %v3882_v61 = vmul.f32 %v3880_v48, %v3877_v31 }
0x1269   :  { %v3885_v37 = vpop.permute.xlu1 %3884 }
0x126a   :  { %v3887_v11 = vmul.f32 %v3885_v37, %v3877_v31  ;;  %v4201_v37 = vpack.c.bf16 %v4199_v18, %v4198_v38  ;;  %v5390_v38 = vld [vmem:[%s8064_s28 + $0x8a8] sm:$0xff] }
0x126c   :  { %3889 = vrot.lane.b32.xlu2 %v3887_v11, %s5394_s9  ;;  %v4233_v11 = vld [vmem:[%s8038_s13 + $0x18] sm:$0xff]  ;;  %4218 = vmatpush.bf16.msrb.mxu0 %v4201_v37  ;;  %v7657_v37 = vld [vmem:[%s8064_s28 + $0x8d0] sm:$0xff] }
0x12c6   :  { %v3890_v9 = vpop.permute.xlu2 %3889 }
0x12c7   :  { %v3892_v41 = vadd.f32 %v3890_v9, %v3882_v61 }
0x12c9   :  { %5294 = vtanh.f32 %v3892_v41  ;;  %v3929_v8 = vrot.slane %v3892_v41, 6 }
0x12cf   :  { %v5295_v6 = vpop.eup %5294 }
0x12d0   :  { %3895 = vrot.lane.b32.xlu0 %v5295_v6, %s5393_s26 }
0x1342   :  { %v3896_v5 = vpop.permute.xlu0 %3895 }
0x1343   :  { %v7542_v0 = vmul.f32 %v3896_v5, %v3877_v31  ;;  %v4232_v31 = vld [vmem:[%s8038_s13 + $0x10] sm:$0xff] }
0x1345   :  { %v3899_v45 = vpack.c.bf16 %v7542_v0, %v7542_v0 }
0x1347   :  { %3901 = vrot.lane.b32.xlu1 %v3899_v45, %s5394_s9 }
0x13b9   :  { %v3902_v25 = vpop.permute.xlu1 %3901 }
0x13ba   :  { %5225 = vmatmul.msk.bf16.vlgmr.msra.gmra.mxu3 %vm3663_vm6, %v3902_v25 }
0x13bb   :  { %4012 = vmatpush.bf16.msra.mxu3 %v7459_v3 }
0x13bf   :  { %4013 = vmatpush.bf16.msra.mxu3 %v7468_v17 }
0x143d   :  { %v3915_v53 = vpop.f32.mrf.mxu3 }
0x143e   :  { %v3920_v26 = vrot.slane %v3915_v53, 6 }
0x1440   :  { %v3922_v50 = vadd.f32 %v3920_v26, %v7536_v54 }
0x1442   :  { %5296 = vtanh.f32 %v3922_v50  ;;  %v3923_v33 = vmul.f32 0.5, %v3922_v50 }
0x1444   :  { %5298 = vtanh.f32 %v3923_v33 }
0x1445   :  { %v3917_v13 = vpop.f32.mrf.mxu3 }
0x1448   :  { %v5297_v28 = vpop.eup %5296 }
0x1449   :  { %3933 = vrot.lane.b32.xlu2 %v5297_v28, %s5393_s26 }
0x144a   :  { %v5299_v43 = vpop.eup %5298 }
0x144b   :  { %v3925_v16 = vmul.f32 0.5, %v5299_v43 }
0x144d   :  { %v3926_v46 = vadd.f32 0.5, %v3925_v16 }
0x144f   :  { %v3931_v19 = vmul.f32 %v3929_v8, %v3926_v46 }
0x14a3   :  { %v3934_v44 = vpop.permute.xlu2 %3933 }
0x14a4   :  { %v3936_v14 = vmul.f32 %v3934_v44, %v3926_v46 }
0x14a6   :  { %3938 = vrot.lane.b32.xlu0 %v3936_v14, %s5394_s9 }
0x1518   :  { %v3939_v63 = vpop.permute.xlu0 %3938 }
0x1519   :  { %v3941_v59 = vadd.f32 %v3939_v63, %v3931_v19  ;;  %v4196_v19 = vld [vmem:[%s8037_s12] sm:$0xff]  ;;  %v4197_v63 = vld [vmem:[%s8037_s12 + $0x8] sm:$0xff] }
0x151b   :  { %5300 = vtanh.f32 %v3941_v59  ;;  %v3979_v34 = vrot.slane %v3941_v59, 6  ;;  %v4230_v59 = vld [vmem:[%s8038_s13] sm:$0xff] }
0x1521   :  { %v5301_v40 = vpop.eup %5300 }
0x1522   :  { %3944 = vrot.lane.b32.xlu1 %v5301_v40, %s5393_s26  ;;  %v4200_v40 = vpack.c.bf16 %v4197_v63, %v4196_v19 }
0x1524   :  { %4219 = vmatpush.bf16.msrb.mxu0 %v4200_v40 }
0x1594   :  { %v3945_v55 = vpop.permute.xlu1 %3944 }
0x1595   :  { %v3947_v24 = vmul.f32 %v3945_v55, %v3926_v46 }
0x1597   :  { %v3948_v4 = vpack.c.bf16 %v3947_v24, %v3947_v24  ;;  %v4148_v1 = vsel %vm819_vm0, %v7542_v0, %v3947_v24 }
0x1599   :  { %v3950_v52 = vrot.slane %v3948_v4, 1 }
0x159b   :  { %3951 = vrot.lane.b32.xlu2 %v3950_v52, %s5394_s9 }
0x15f5   :  { %v3952_v36 = vpop.permute.xlu2 %3951 }
0x15f6   :  { %5226 = vmatmul.msk.bf16.vlgmr.msrb.gmra.mxu3 %vm3663_vm6, %v3952_v36 }
0x15f7   :  { %4062 = vmatpush.bf16.msrb.mxu3 %v7459_v3 }
0x15fb   :  { %4063 = vmatpush.bf16.msrb.mxu3 %v7468_v17 }
0x1679   :  { %v3965_v29 = vpop.f32.mrf.mxu3 }
0x167a   :  { %v3970_v39 = vrot.slane %v3965_v29, 4 }
0x167c   :  { %v3972_v35 = vadd.f32 %v3970_v39, %v7536_v54 }
0x167e   :  { %5302 = vtanh.f32 %v3972_v35  ;;  %v3973_v56 = vmul.f32 0.5, %v3972_v35 }
0x1680   :  { %5304 = vtanh.f32 %v3973_v56 }
0x1681   :  { %v3967_v2 = vpop.f32.mrf.mxu3 }
0x1684   :  { %v5303_v23 = vpop.eup %5302 }
0x1685   :  { %3983 = vrot.lane.b32.xlu0 %v5303_v23, %s5393_s26 }
0x1686   :  { %v5305_v22 = vpop.eup %5304 }
0x1687   :  { %v3975_v20 = vmul.f32 0.5, %v5305_v22 }
0x1689   :  { %v3976_v12 = vadd.f32 0.5, %v3975_v20 }
0x168b   :  { %v3981_v7 = vmul.f32 %v3979_v34, %v3976_v12 }
0x16f7   :  { %v3984_v49 = vpop.permute.xlu0 %3983 }
0x16f8   :  { %v3986_v30 = vmul.f32 %v3984_v49, %v3976_v12 }
0x16fa   :  { %3988 = vrot.lane.b32.xlu1 %v3986_v30, %s5394_s9 }
0x176c   :  { %v3989_v58 = vpop.permute.xlu1 %3988 }
0x176d   :  { %v3991_v32 = vadd.f32 %v3989_v58, %v3981_v7 }
0x176f   :  { %5306 = vtanh.f32 %v3991_v32  ;;  %v4029_v26 = vrot.slane %v3991_v32, 6  ;;  %v4156_v32 = vld [vmem:[%s8039_s10 + $0x10] sm:$0xff] }
0x1775   :  { %v5307_v51 = vpop.eup %5306 }
0x1776   :  { %3994 = vrot.lane.b32.xlu2 %v5307_v51, %s5393_s26  ;;  %v4157_v51 = vld [vmem:[%s8039_s10 + $0x18] sm:$0xff] }
0x17d0   :  { %v3995_v21 = vpop.permute.xlu2 %3994 }
0x17d1   :  { %v3997_v15 = vmul.f32 %v3995_v21, %v3976_v12  ;;  %v4154_v21 = vld [vmem:[%s8039_s10] sm:$0xff] }
0x17d3   :  { %v3998_v57 = vpack.c.bf16 %v3997_v15, %v3997_v15  ;;  %v4149_v10 = vsel %vm2978_vm2, %v4148_v1, %v3997_v15  ;;  %v4159_v15 = vpack.c.bf16 %v4157_v51, %v4156_v32  ;;  %v4155_v1 = vld [vmem:[%s8039_s10 + $0x8] sm:$0xff] }
0x17d5   :  { %v4000_v27 = vrot.slane %v3998_v57, 2  ;;  %v4158_v57 = vpack.c.bf16 %v4155_v1, %v4154_v21 }
0x17d7   :  { %4001 = vrot.lane.b32.xlu0 %v4000_v27, %s5394_s9  ;;  %v349_v27 = vld [vmem:[%s8064_s28 + $0x8c0] sm:$0xff] }
0x1849   :  { %v4002_v60 = vpop.permute.xlu0 %4001 }
0x184a   :  { %5227 = vmatmul.msk.bf16.vlgmr.msra.gmra.mxu3 %vm3663_vm6, %v4002_v60  ;;  %v5389_v60 = vld [vmem:[%s8064_s28 + $0x8a0] sm:$0xff] }
0x184b   :  { %4108 = vmatpush.bf16.msra.mxu3 %v7459_v3  ;;  %v7581_v3 = vpack.c.bf16 %v4233_v11, %v4232_v31  ;;  %v435_v18 = vpack.c.bf16 %v5390_v38, %v5389_v60  ;;  %v350_v11 = vld [vmem:[%s8064_s28 + $0x8c8] sm:$0xff] }
0x184d   :  { %4242 = vmatpush.bf16.msrb.mxu1 %v7581_v3  ;;  %4285 = vmatpush.bf16.msrb.mxu2 %v7581_v3 }
0x184e   :  { %4531 = vmatpush.bf16.msra.mxu0 %v7581_v3  ;;  %5074 = vmatmul.msk.bf16.gmra.mxu1 %vm596_vm1, %v435_v18 }
0x184f   :  { %4109 = vmatpush.bf16.msra.mxu3 %v7468_v17 }
0x18cd   :  { %v4015_v17 = vpop.f32.mrf.mxu3 }
0x18ce   :  { %v4020_v48 = vrot.slane %v4015_v17, 2  ;;  %v354_v17 = vld [vmem:[%s8064_s28 + $0x8e8] sm:$0xff] }
0x18d0   :  { %v4022_v61 = vadd.f32 %v4020_v48, %v7536_v54  ;;  %v5391_v48 = vld [vmem:[%s8064_s28 + $0x8b0] sm:$0xff] }
0x18d2   :  { %5308 = vtanh.f32 %v4022_v61  ;;  %v4023_v6 = vmul.f32 0.5, %v4022_v61  ;;  %v436_v61 = vpack.c.bf16 %v7657_v37, %v5391_v48 }
0x18d4   :  { %5310 = vtanh.f32 %v4023_v6  ;;  %5075 = vmatmul.msk.bf16.gmra.mxu1 %vm596_vm1, %v436_v61  ;;  %v7677_v6 = vld [vmem:[%s8064_s28 + $0x8d8] sm:$0xff] }
0x18d5   :  { %v4017_v9 = vpop.f32.mrf.mxu3 }
0x18d8   :  { %v5309_v41 = vpop.eup %5308 }
0x18d9   :  { %4033 = vrot.lane.b32.xlu1 %v5309_v41, %s5393_s26  ;;  %v510_v41 = vpack.c.bf16 %v354_v17, %v350_v11 }
0x18da   :  { %v5311_v5 = vpop.eup %5310 }
0x18db   :  { %v4025_v0 = vmul.f32 0.5, %v5311_v5  ;;  %v7682_v5 = vld [vmem:[%s8064_s28 + $0x8e0] sm:$0xff] }
0x18dd   :  { %v4026_v45 = vadd.f32 0.5, %v4025_v0  ;;  %v355_v0 = vld [vmem:[%s8064_s28 + $0x8f0] sm:$0xff] }
0x18df   :  { %v4031_v50 = vmul.f32 %v4029_v26, %v4026_v45 }
0x194b   :  { %v4034_v25 = vpop.permute.xlu1 %4033 }
0x194c   :  { %v4036_v53 = vmul.f32 %v4034_v25, %v4026_v45  ;;  %v437_v25 = vpack.c.bf16 %v7682_v5, %v7677_v6 }
0x194e   :  { %4038 = vrot.lane.b32.xlu2 %v4036_v53, %s5394_s9  ;;  %5076 = vmatmul.msk.bf16.gmra.mxu1 %vm596_vm1, %v437_v25 }
0x19a8   :  { %v4039_v13 = vpop.permute.xlu2 %4038 }
0x19a9   :  { %v4041_v28 = vadd.f32 %v4039_v13, %v4031_v50  ;;  %v7700_v50 = vld [vmem:[%s8064_s28 + $0x900] sm:$0xff]  ;;  %v7705_v13 = vld [vmem:[%s8064_s28 + $0x908] sm:$0xff] }
0x19ab   :  { %5312 = vtanh.f32 %v4041_v28  ;;  %v4076_v22 = vrot.slane %v4041_v28, 6  ;;  %v360_v28 = vld [vmem:[%s8064_s28 + $0x918] sm:$0xff] }
0x19b1   :  { %v5313_v54 = vpop.eup %5312 }
0x19b2   :  { %4044 = vrot.lane.b32.xlu0 %v5313_v54, %s5393_s26  ;;  %v361_v54 = vld [vmem:[%s8064_s28 + $0x920] sm:$0xff] }
0x1a24   :  { %v4045_v33 = vpop.permute.xlu0 %4044 }
0x1a25   :  { %v4047_v43 = vmul.f32 %v4045_v33, %v4026_v45  ;;  %v356_v45 = vld [vmem:[%s8064_s28 + $0x8f8] sm:$0xff]  ;;  %v438_v33 = vpack.c.bf16 %v7705_v13, %v7700_v50 }
0x1a26   :  { %v511_v26 = vpack.c.bf16 %v356_v45, %v355_v0 }
0x1a27   :  { %v4048_v16 = vpack.c.bf16 %v4047_v43, %v4047_v43  ;;  %v4150_v46 = vsel %vm4146_vm7, %v4149_v10, %v4047_v43  ;;  %v348_v10 = vld [vmem:[%s8064_s28 + $0x8b8] sm:$0xff]  ;;  %v512_v43 = vpack.c.bf16 %v361_v54, %v360_v28  ;;  %5077 = vmatmul.msk.bf16.gmra.mxu1 %vm596_vm1, %v438_v33 }
0x1a28   :  { %v4152_v44 = vpack.c.bf16 %v4150_v46, %v7528_v42  ;;  %v4231_v42 = vld [vmem:[%s8038_s13 + $0x8] sm:$0xff]  ;;  %v509_v31 = vpack.c.bf16 %v349_v27, %v348_v10  ;;  %v7743_v27 = vld [vmem:[%s8041_s14] ss:$0 sm:$0xff] }
0x1a29   :  { %v4050_v14 = vrot.slane %v4048_v16, 3  ;;  %v7605_v55 = vpack.c.bf16 %v4231_v42, %v4230_v59  ;;  %v362_v16 = vld [vmem:[%s8064_s28 + $0x928] sm:$0xff] }
0x1a2a   :  { %5000 = vmatmul.msk.bf16.gmra.mxu0 %vm596_vm1, %v509_v31  ;;  %v513_v46 = vpack.c.bf16 %v362_v16, %v362_v16 }
0x1a2b   :  { %4051 = vrot.lane.b32.xlu1 %v4050_v14, %s5394_s9  ;;  %4243 = vmatpush.bf16.msrb.mxu1 %v7605_v55 }
0x1a2c   :  { %4286 = vmatpush.bf16.msrb.mxu2 %v7605_v55  ;;  %4532 = vmatpush.bf16.msra.mxu0 %v7605_v55 }
0x1a2f   :  { %4385 = vmatpush.bf16.msra.mxu1 %v7581_v3 }
0x1a30   :  { %4435 = vmatpush.bf16.msra.mxu2 %v7581_v3 }
0x1a33   :  { %4386 = vmatpush.bf16.msra.mxu1 %v7605_v55 }
0x1a34   :  { %4436 = vmatpush.bf16.msra.mxu2 %v7605_v55 }
0x1a3a   :  { %5001 = vmatmul.msk.bf16.gmra.mxu0 %vm596_vm1, %v510_v41 }
0x1a4a   :  { %5002 = vmatmul.msk.bf16.gmra.mxu0 %vm596_vm1, %v511_v26 }
0x1a5a   :  { %5003 = vmatmul.msk.bf16.gmra.mxu0 %vm596_vm1, %v512_v43  ;;  %v584_v43 = vpack.c.bf16 %v7700_v50, %v7682_v5  ;;  %v363_v5 = vld [vmem:[%s8064_s28 + $0x930] sm:$0xff]  ;;  %v364_v50 = vld [vmem:[%s8064_s28 + $0x938] sm:$0xff] }
0x1a6a   :  { %5004 = vmatmul.msk.bf16.gmra.mxu0 %vm596_vm1, %v513_v46 }
0x1a9d   :  { %v4052_v8 = vpop.permute.xlu1 %4051 }
0x1a9e   :  { %5228 = vmatmul.msk.bf16.vlgmr.msrb.gmra.mxu3 %vm3663_vm6, %v4052_v8  ;;  %v1771_v8 = vpop.f32.mrf.mxu1 }
0x1a9f   :  { %4182 = vmatpush.bf16.msrb.mxu3 %v4159_v15 }
0x1aa3   :  { %4183 = vmatpush.bf16.msrb.mxu3 %v4158_v57 }
0x1aa6   :  { %v1772_v63 = vpop.f32.mrf.mxu1 }
0x1aa7   :  { %v1177_v19 = vpop.f32.mrf.mxu0 }
0x1aae   :  { %v1774_v40 = vpop.f32.mrf.mxu1 }
0x1aaf   :  { %v1178_v59 = vpop.f32.mrf.mxu0  ;;  %v586_v40 = vpack.c.bf16 %v364_v50, %v363_v5 }
0x1ab7   :  { %v1180_v42 = vpop.f32.mrf.mxu0 }
0x1ab8   :  { %v365_v42 = vld [vmem:[%s8064_s28 + $0x940] sm:$0xff] }
0x1b21   :  { %v4065_v24 = vpop.f32.mrf.mxu3 }
0x1b22   :  { %v4069_v4 = vadd.f32 %v4065_v24, %v7487_v62 }
0x1b24   :  { %5314 = vtanh.f32 %v4069_v4  ;;  %v4070_v29 = vmul.f32 0.5, %v4069_v4  ;;  %v1775_v4 = vpop.f32.mrf.mxu1 }
0x1b26   :  { %5316 = vtanh.f32 %v4070_v29 }
0x1b29   :  { %v4067_v52 = vpop.f32.mrf.mxu3 }
0x1b2a   :  { %v5315_v36 = vpop.eup %5314  ;;  %v1181_v52 = vpop.f32.mrf.mxu0 }
0x1b2b   :  { %4080 = vrot.lane.b32.xlu2 %v5315_v36, %s5393_s26 }
0x1b2c   :  { %v5317_v39 = vpop.eup %5316  ;;  %v1777_v29 = vpop.f32.mrf.mxu1 }
0x1b2d   :  { %v4072_v35 = vmul.f32 0.5, %v5317_v39 }
0x1b2f   :  { %v4073_v2 = vadd.f32 0.5, %v4072_v35 }
0x1b31   :  { %v4078_v20 = vmul.f32 %v4076_v22, %v4073_v2 }
0x1b32   :  { %v1183_v39 = vpop.f32.mrf.mxu0 }
0x1b85   :  { %v4081_v23 = vpop.permute.xlu2 %4080 }
0x1b86   :  { %v4083_v56 = vmul.f32 %v4081_v23, %v4073_v2  ;;  %v7735_v23 = vld [vmem:[%s8040_s11] ss:$0 sm:$0xff] }
0x1b88   :  { %4085 = vrot.lane.b32.xlu0 %v4083_v56, %s5394_s9 }
0x1b90   :  { %4166 = vrot.lane.b32.xlu0 %v4152_v44, %s5394_s9  ;;  %v7723_v44 = vld [vmem:[%s8064_s28 + $0x910] sm:$0xff] }
0x1b91   :  { %v439_v14 = vpack.c.bf16 %v7723_v44, %v7723_v44  ;;  %v585_v59 = vpack.c.bf16 %v7723_v44, %v7705_v13  ;;  %v587_v13 = vpack.c.bf16 %v365_v42, %v365_v42 }
0x1b93   :  { %5078 = vmatmul.msk.bf16.gmra.mxu1 %vm596_vm1, %v439_v14 }
0x1ba3   :  { %4244 = vmatmul.bf16.vlgmr.msrb.gmra.mxu1 %v5392_v47  ;;  %v1184_v47 = vpop.f32.mrf.mxu0 }
0x1ba4   :  { %4581 = vmatpush.bf16.msrb.mxu1 %v7581_v3 }
0x1ba8   :  { %4582 = vmatpush.bf16.msrb.mxu1 %v7605_v55 }
0x1bfa   :  { %v4086_v12 = vpop.permute.xlu0 %4085 }
0x1bfb   :  { %v7619_v49 = vadd.f32 %v4086_v12, %v4078_v20 }
0x1bfd   :  { %5318 = vtanh.f32 %v7619_v49 }
0x1c02   :  { %v4167_v53 = vpop.permute.xlu0 %4166 }
0x1c03   :  { %v5319_v30 = vpop.eup %5318 }
0x1c04   :  { %4091 = vrot.lane.b32.xlu1 %v5319_v30, %s5393_s26 }
0x1c76   :  { %v4092_v34 = vpop.permute.xlu1 %4091 }
0x1c77   :  { %v7623_v7 = vmul.f32 %v4092_v34, %v4073_v2  ;;  %v1778_v2 = vpop.f32.mrf.mxu1  ;;  %v1186_v34 = vpop.f32.mrf.mxu0 }
0x1c79   :  { %v4095_v58 = vpack.c.bf16 %v7623_v7, %v7623_v7 }
0x1c7b   :  { %4097 = vrot.lane.b32.xlu2 %v4095_v58, %s5394_s9 }
0x1c7f   :  { %v1780_v30 = vpop.f32.mrf.mxu1  ;;  %v1187_v32 = vpop.f32.mrf.mxu0 }
0x1c80   :  { %v4125_v30 = vrot.slane %v7619_v49, 6 }
0x1c87   :  { %v1781_v58 = vpop.f32.mrf.mxu1  ;;  %v1189_v51 = vpop.f32.mrf.mxu0 }
0x1c8f   :  { %v1783_v21 = vpop.f32.mrf.mxu1  ;;  %v1190_v15 = vpop.f32.mrf.mxu0 }
0x1c97   :  { %v1784_v1 = vpop.f32.mrf.mxu1 }
0x1c9f   :  { %v4245_v57 = vpop.f32.mrf.mxu1 }
0x1ca7   :  { %v4247_v10 = vpop.f32.mrf.mxu1 }
0x1cd5   :  { %v4098_v9 = vpop.permute.xlu2 %4097 }
0x1cd6   :  { %5229 = vmatmul.msk.bf16.vlgmr.msra.gmra.mxu3 %vm3663_vm6, %v4098_v9 }
0x1cd7   :  { %4335 = vmatpush.bf16.msra.mxu3 %v7581_v3 }
0x1cdb   :  { %4336 = vmatpush.bf16.msra.mxu3 %v7605_v55 }
0x1ce6   :  { %5230 = vmatmul.msk.bf16.vlgmr.msrb.gmra.mxu3 %vm3663_vm6, %v4167_v53 }
0x1ce7   :  { %4481 = vmatpush.bf16.msrb.mxu3 %v7581_v3 }
0x1ceb   :  { %4482 = vmatpush.bf16.msrb.mxu3 %v7605_v55 }
0x1d59   :  { %v4111_v24 = vpop.f32.mrf.mxu3 }
0x1d5a   :  { %v4116_v61 = vrot.slane %v4111_v24, 6 }
0x1d5c   :  { %v4118_v41 = vadd.f32 %v4116_v61, %v7487_v62  ;;  %v583_v62 = vpack.c.bf16 %v7677_v6, %v7657_v37 }
0x1d5e   :  { %5148 = vmatmul.msk.bf16.gmra.mxu2 %vm596_vm1, %v583_v62  ;;  %v4119_v33 = vmul.f32 0.5, %v4118_v41 }
0x1d61   :  { %v4113_v36 = vpop.f32.mrf.mxu3 }
0x1d69   :  { %v4185_v35 = vpop.f32.mrf.mxu3 }
0x1d6a   :  { %v4186_v22 = vadd.f32 %v7735_v23, %v4185_v35 }
0x1d6e   :  { %5149 = vmatmul.msk.bf16.gmra.mxu2 %vm596_vm1, %v584_v43 }
0x1d71   :  { %v4187_v56 = vpop.f32.mrf.mxu3 }
0x1d72   :  { %v4188_v20 = vadd.f32 %v7735_v23, %v4187_v56 }
0x1d74   :  { %v4194_v12 = vpack.c.bf16 %v4188_v20, %v4186_v22 }
0x1d76   :  { %5232 = vmatmul.msk.bf16.vlgmr.msrb.gmra.mxu0 %vm3663_vm6, %v4194_v12 }
0x1d7e   :  { %5150 = vmatmul.msk.bf16.gmra.mxu2 %vm596_vm1, %v585_v59 }
0x1d8e   :  { %5151 = vmatmul.msk.bf16.gmra.mxu2 %vm596_vm1, %v586_v40 }
0x1d9e   :  { %5152 = vmatmul.msk.bf16.gmra.mxu2 %vm596_vm1, %v587_v13 }
0x1de1   :  { %v2365_v44 = vpop.f32.mrf.mxu2 }
0x1de9   :  { %v2366_v4 = vpop.f32.mrf.mxu2 }
0x1df1   :  { %v2368_v52 = vpop.f32.mrf.mxu2 }
0x1df3   :  { %v4221_v60 = vpop.f32.mrf.mxu0 }
0x1df4   :  { %v7746_v38 = vadd.f32 %v7743_v27, %v4221_v60 }
0x1df6   :  { %v4249_v18 = vadd.f32 %v4245_v57, %v7746_v38 }
0x1df8   :  { %5320 = vtanh.f32 %v4249_v18  ;;  %v4250_v11 = vmul.f32 0.5, %v4249_v18 }
0x1df9   :  { %v2369_v36 = vpop.f32.mrf.mxu2 }
0x1dfa   :  { %5322 = vtanh.f32 %v4250_v11 }
0x1dfb   :  { %5324 = vtanh.f32 %v4118_v41 }
0x1dfe   :  { %v5321_v31 = vpop.eup %5320 }
0x1dff   :  { %4257 = vrot.lane.b32.xlu1 %v5321_v31, %s5393_s26 }
0x1e00   :  { %v5323_v17 = vpop.eup %5322 }
0x1e01   :  { %v4252_v48 = vmul.f32 0.5, %v5323_v17  ;;  %v5325_v25 = vpop.eup %5324  ;;  %v2371_v29 = vpop.f32.mrf.mxu2 }
0x1e03   :  { %v4253_v9 = vadd.f32 0.5, %v4252_v48 }
0x1e05   :  { %v4255_v53 = vmul.f32 0.0, %v4253_v9 }
0x1e09   :  { %v2372_v39 = vpop.f32.mrf.mxu2 }
0x1e11   :  { %v2374_v35 = vpop.f32.mrf.mxu2 }
0x1e19   :  { %v2375_v2 = vpop.f32.mrf.mxu2 }
0x1e21   :  { %v2377_v47 = vpop.f32.mrf.mxu2 }
0x1e29   :  { %v2378_v56 = vpop.f32.mrf.mxu2 }
0x1e71   :  { %v4258_v0 = vpop.permute.xlu1 %4257 }
0x1e72   :  { %v4260_v45 = vmul.f32 %v4258_v0, %v4253_v9 }
0x1e74   :  { %4262 = vrot.lane.b32.xlu2 %v4260_v45, %s5394_s9 }
0x1e7c   :  { %4129 = vrot.lane.b32.xlu2 %v5325_v25, %s5393_s26 }
0x1ece   :  { %v4263_v26 = vpop.permute.xlu2 %4262 }
0x1ecf   :  { %v7753_v28 = vadd.f32 %v4263_v26, %v4255_v53 }
0x1ed1   :  { %5326 = vtanh.f32 %v7753_v28  ;;  %v4302_v61 = vrot.slane %v7753_v28, 6 }
0x1ed2   :  { %5328 = vtanh.f32 %v4119_v33 }
0x1ed6   :  { %v4130_v37 = vpop.permute.xlu2 %4129 }
0x1ed7   :  { %v5327_v54 = vpop.eup %5326 }
0x1ed8   :  { %4268 = vrot.lane.b32.xlu0 %v5327_v54, %s5393_s26  ;;  %v5329_v14 = vpop.eup %5328 }
0x1ed9   :  { %v4121_v19 = vmul.f32 0.5, %v5329_v14  ;;  %v4223_v14 = vpop.f32.mrf.mxu0 }
0x1edb   :  { %v4122_v6 = vadd.f32 0.5, %v4121_v19 }
0x1edd   :  { %v4132_v63 = vmul.f32 %v4130_v37, %v4122_v6  ;;  %v4127_v58 = vmul.f32 %v4125_v30, %v4122_v6 }
0x1f4a   :  { %v4269_v16 = vpop.permute.xlu0 %4268 }
0x1f4b   :  { %v7763_v46 = vmul.f32 %v4269_v16, %v4253_v9 }
0x1f4d   :  { %v4272_v8 = vpack.c.bf16 %v7763_v46, %v7763_v46 }
0x1f4f   :  { %4274 = vrot.lane.b32.xlu1 %v4272_v8, %s5394_s9 }
0x1f57   :  { %4134 = vrot.lane.b32.xlu1 %v4132_v63, %s5394_s9 }
0x1fc1   :  { %v4275_v24 = vpop.permute.xlu1 %4274 }
0x1fc2   :  { %5234 = vmatmul.msk.bf16.vlgmr.msrb.gmra.mxu2 %vm3663_vm6, %v4275_v24 }
0x1fc3   :  { %4631 = vmatpush.bf16.msrb.mxu2 %v7581_v3 }
0x1fc7   :  { %4632 = vmatpush.bf16.msrb.mxu2 %v7605_v55 }
0x1fc9   :  { %v4135_v34 = vpop.permute.xlu1 %4134 }
0x1fca   :  { %v4137_v51 = vadd.f32 %v4135_v34, %v4127_v58 }
0x2045   :  { %v4288_v22 = vpop.f32.mrf.mxu2 }
0x2046   :  { %v4293_v20 = vrot.slane %v4288_v22, 6 }
0x2048   :  { %v4295_v12 = vadd.f32 %v4293_v20, %v7746_v38 }
0x204a   :  { %5330 = vtanh.f32 %v4295_v12  ;;  %v4296_v1 = vmul.f32 0.5, %v4295_v12 }
0x204b   :  { %5332 = vtanh.f32 %v4137_v51 }
0x204c   :  { %5334 = vtanh.f32 %v4296_v1 }
0x204d   :  { %v4290_v32 = vpop.f32.mrf.mxu2 }
0x2050   :  { %v5331_v21 = vpop.eup %5330 }
0x2051   :  { %4306 = vrot.lane.b32.xlu0 %v5331_v21, %s5393_s26  ;;  %v5333_v15 = vpop.eup %5332 }
0x2052   :  { %v5335_v57 = vpop.eup %5334 }
0x2053   :  { %v4298_v10 = vmul.f32 0.5, %v5335_v57 }
0x2055   :  { %v4299_v60 = vadd.f32 0.5, %v4298_v10 }
0x2057   :  { %v4304_v9 = vmul.f32 %v4302_v61, %v4299_v60 }
0x2059   :  { %4140 = vrot.lane.b32.xlu0 %v5333_v15, %s5393_s26 }
0x20c3   :  { %v4307_v18 = vpop.permute.xlu0 %4306 }
0x20c4   :  { %v4309_v31 = vmul.f32 %v4307_v18, %v4299_v60 }
0x20c6   :  { %4311 = vrot.lane.b32.xlu2 %v4309_v31, %s5394_s9 }
0x20cb   :  { %v4141_v49 = vpop.permute.xlu0 %4140 }
0x20cc   :  { %v4143_v11 = vmul.f32 %v4141_v49, %v4122_v6 }
0x20ce   :  { %v4151_v17 = vsel %vm819_vm0, %v7623_v7, %v4143_v11 }
0x20cf   :  { %v4153_v48 = vpack.c.bf16 %v4151_v17, %v4151_v17  ;;  %v7830_v17 = vadd.f32 %v7743_v27, %v4223_v14 }
0x20d1   :  { %4168 = vrot.lane.b32.xlu2 %v4153_v48, %s5394_s9 }
0x2120   :  { %v4312_v41 = vpop.permute.xlu2 %4311 }
0x2121   :  { %v4314_v0 = vadd.f32 %v4312_v41, %v4304_v9 }
0x2123   :  { %5336 = vtanh.f32 %v4314_v0  ;;  %v4352_v13 = vrot.slane %v4314_v0, 6 }
0x2129   :  { %v5337_v45 = vpop.eup %5336 }
0x212a   :  { %4317 = vrot.lane.b32.xlu1 %v5337_v45, %s5393_s26 }
0x212b   :  { %v4169_v25 = vpop.permute.xlu2 %4168 }
0x212c   :  { %5231 = vmatmul.msk.bf16.gmra.mxu3 %vm3663_vm6, %v4169_v25 }
0x219c   :  { %v4318_v53 = vpop.permute.xlu1 %4317 }
0x219d   :  { %v7797_v26 = vmul.f32 %v4318_v53, %v4299_v60 }
0x219f   :  { %v4321_v7 = vpack.c.bf16 %v7797_v26, %v7797_v26 }
0x21a1   :  { %v4323_v54 = vrot.slane %v4321_v7, 1 }
0x21a3   :  { %4324 = vrot.lane.b32.xlu0 %v4323_v54, %s5394_s9 }
0x21af   :  { %v4190_v28 = vpop.f32.mrf.mxu3 }
0x21b0   :  { %v4191_v62 = vadd.f32 %v7735_v23, %v4190_v28 }
0x21b2   :  { %v4195_v33 = vpack.c.bf16 %v4191_v62, %v4191_v62 }
0x21b4   :  { %5233 = vmatmul.msk.bf16.gmra.mxu0 %vm3663_vm6, %v4195_v33 }
0x21b7   :  { %v4192_v43 = vpop.f32.mrf.mxu3 }
0x2215   :  { %v4325_v16 = vpop.permute.xlu0 %4324 }
0x2216   :  { %5235 = vmatmul.msk.bf16.vlgmr.msra.gmra.mxu3 %vm3663_vm6, %v4325_v16 }
0x2217   :  { %4677 = vmatpush.bf16.msra.mxu3 %v7581_v3 }
0x221b   :  { %4678 = vmatpush.bf16.msra.mxu3 %v7605_v55 }
0x2231   :  { %v7807_v8 = vpop.f32.mrf.mxu0 }
0x2239   :  { %v4228_v19 = vpop.f32.mrf.mxu0 }
0x2299   :  { %v4338_v37 = vpop.f32.mrf.mxu3 }
0x229a   :  { %v4343_v6 = vrot.slane %v4338_v37, 4 }
0x229c   :  { %v4345_v63 = vadd.f32 %v4343_v6, %v7746_v38 }
0x229e   :  { %5338 = vtanh.f32 %v4345_v63  ;;  %v4346_v5 = vmul.f32 0.5, %v4345_v63 }
0x22a0   :  { %5340 = vtanh.f32 %v4346_v5 }
0x22a1   :  { %v4340_v23 = vpop.f32.mrf.mxu3 }
0x22a4   :  { %v5339_v59 = vpop.eup %5338 }
0x22a5   :  { %4356 = vrot.lane.b32.xlu1 %v5339_v59, %s5393_s26 }
0x22a6   :  { %v5341_v50 = vpop.eup %5340 }
0x22a7   :  { %v4348_v40 = vmul.f32 0.5, %v5341_v50 }
0x22a9   :  { %v4349_v3 = vadd.f32 0.5, %v4348_v40 }
0x22ab   :  { %v4354_v44 = vmul.f32 %v4352_v13, %v4349_v3 }
0x2317   :  { %v4357_v42 = vpop.permute.xlu1 %4356 }
0x2318   :  { %v4359_v55 = vmul.f32 %v4357_v42, %v4349_v3 }
0x231a   :  { %4361 = vrot.lane.b32.xlu2 %v4359_v55, %s5394_s9 }
0x2374   :  { %v4362_v24 = vpop.permute.xlu2 %4361 }
0x2375   :  { %v4364_v4 = vadd.f32 %v4362_v24, %v4354_v44 }
0x2377   :  { %5342 = vtanh.f32 %v4364_v4  ;;  %v4402_v15 = vrot.slane %v4364_v4, 6 }
0x237d   :  { %v5343_v52 = vpop.eup %5342 }
0x237e   :  { %4367 = vrot.lane.b32.xlu0 %v5343_v52, %s5393_s26 }
0x23f0   :  { %v4368_v36 = vpop.permute.xlu0 %4367 }
0x23f1   :  { %v7813_v29 = vmul.f32 %v4368_v36, %v4349_v3 }
0x23f3   :  { %v4371_v39 = vpack.c.bf16 %v7813_v29, %v7813_v29 }
0x23f5   :  { %v4373_v35 = vrot.slane %v4371_v39, 2 }
0x23f7   :  { %4374 = vrot.lane.b32.xlu1 %v4373_v35, %s5394_s9 }
0x2469   :  { %v4375_v2 = vpop.permute.xlu1 %4374 }
0x246a   :  { %5236 = vmatmul.msk.bf16.vlgmr.msra.gmra.mxu1 %vm3663_vm6, %v4375_v2 }
0x24e7   :  { %v4388_v47 = vpop.f32.mrf.mxu1 }
0x24e8   :  { %v4393_v56 = vrot.slane %v4388_v47, 2 }
0x24ea   :  { %v4395_v22 = vadd.f32 %v4393_v56, %v7746_v38 }
0x24ec   :  { %5344 = vtanh.f32 %v4395_v22  ;;  %v4396_v30 = vmul.f32 0.5, %v4395_v22 }
0x24ee   :  { %5346 = vtanh.f32 %v4396_v30 }
0x24ef   :  { %v4390_v20 = vpop.f32.mrf.mxu1 }
0x24f2   :  { %v5345_v12 = vpop.eup %5344 }
0x24f3   :  { %4406 = vrot.lane.b32.xlu2 %v5345_v12, %s5393_s26 }
0x24f4   :  { %v5347_v34 = vpop.eup %5346 }
0x24f5   :  { %v4398_v58 = vmul.f32 0.5, %v5347_v34 }
0x24f7   :  { %v4399_v32 = vadd.f32 0.5, %v4398_v58 }
0x24f9   :  { %v4404_v1 = vmul.f32 %v4402_v15, %v4399_v32 }
0x254d   :  { %v4407_v51 = vpop.permute.xlu2 %4406 }
0x254e   :  { %v4409_v21 = vmul.f32 %v4407_v51, %v4399_v32 }
0x2550   :  { %4411 = vrot.lane.b32.xlu0 %v4409_v21, %s5394_s9 }
0x25c2   :  { %v4412_v57 = vpop.permute.xlu0 %4411 }
0x25c3   :  { %v4414_v10 = vadd.f32 %v4412_v57, %v4404_v1 }
0x25c5   :  { %5348 = vtanh.f32 %v4414_v10  ;;  %v4449_v28 = vrot.slane %v4414_v10, 6 }
0x25cb   :  { %v5349_v38 = vpop.eup %5348 }
0x25cc   :  { %4417 = vrot.lane.b32.xlu1 %v5349_v38, %s5393_s26 }
0x263e   :  { %v4418_v60 = vpop.permute.xlu1 %4417 }
0x263f   :  { %v7823_v18 = vmul.f32 %v4418_v60, %v4399_v32 }
0x2641   :  { %v4421_v31 = vpack.c.bf16 %v7823_v18, %v7823_v18 }
0x2643   :  { %v4423_v49 = vrot.slane %v4421_v31, 3 }
0x2645   :  { %4424 = vrot.lane.b32.xlu2 %v4423_v49, %s5394_s9 }
0x269f   :  { %v4425_v11 = vpop.permute.xlu2 %4424 }
0x26a0   :  { %5237 = vmatmul.msk.bf16.vlgmr.msra.gmra.mxu2 %vm3663_vm6, %v4425_v11 }
0x2723   :  { %v4438_v48 = vpop.f32.mrf.mxu2 }
0x2724   :  { %v4442_v61 = vadd.f32 %v4438_v48, %v7830_v17 }
0x2726   :  { %5350 = vtanh.f32 %v4442_v61  ;;  %v4443_v0 = vmul.f32 0.5, %v4442_v61 }
0x2728   :  { %5352 = vtanh.f32 %v4443_v0 }
0x272b   :  { %v4440_v9 = vpop.f32.mrf.mxu2 }
0x272c   :  { %v5351_v41 = vpop.eup %5350 }
0x272d   :  { %4453 = vrot.lane.b32.xlu0 %v5351_v41, %s5393_s26 }
0x272e   :  { %v5353_v45 = vpop.eup %5352 }
0x272f   :  { %v4445_v25 = vmul.f32 0.5, %v5353_v45 }
0x2731   :  { %v4446_v53 = vadd.f32 0.5, %v4445_v25 }
0x2733   :  { %v4451_v62 = vmul.f32 %v4449_v28, %v4446_v53 }
0x279f   :  { %v4454_v7 = vpop.permute.xlu0 %4453 }
0x27a0   :  { %v4456_v54 = vmul.f32 %v4454_v7, %v4446_v53 }
0x27a2   :  { %4458 = vrot.lane.b32.xlu1 %v4456_v54, %s5394_s9 }
0x2814   :  { %v4459_v33 = vpop.permute.xlu1 %4458 }
0x2815   :  { %v4461_v43 = vadd.f32 %v4459_v33, %v4451_v62 }
0x2817   :  { %5354 = vtanh.f32 %v4461_v43  ;;  %v4498_v24 = vrot.slane %v4461_v43, 6 }
0x281d   :  { %v5355_v16 = vpop.eup %5354 }
0x281e   :  { %4464 = vrot.lane.b32.xlu2 %v5355_v16, %s5393_s26 }
0x2878   :  { %v4465_v14 = vpop.permute.xlu2 %4464 }
0x2879   :  { %v7836_v19 = vmul.f32 %v4465_v14, %v4446_v53 }
0x287b   :  { %v4468_v37 = vpack.c.bf16 %v7836_v19, %v7836_v19 }
0x287d   :  { %4470 = vrot.lane.b32.xlu0 %v4468_v37, %s5394_s9 }
0x28ef   :  { %v4471_v6 = vpop.permute.xlu0 %4470 }
0x28f0   :  { %5238 = vmatmul.msk.bf16.vlgmr.msrb.gmra.mxu3 %vm3663_vm6, %v4471_v6 }
0x2973   :  { %v4484_v63 = vpop.f32.mrf.mxu3 }
0x2974   :  { %v4489_v23 = vrot.slane %v4484_v63, 6 }
0x2976   :  { %v4491_v59 = vadd.f32 %v4489_v23, %v7830_v17 }
0x2978   :  { %5356 = vtanh.f32 %v4491_v59  ;;  %v4492_v40 = vmul.f32 0.5, %v4491_v59 }
0x297a   :  { %5358 = vtanh.f32 %v4492_v40 }
0x297b   :  { %v4486_v5 = vpop.f32.mrf.mxu3 }
0x297e   :  { %v5357_v50 = vpop.eup %5356 }
0x297f   :  { %4502 = vrot.lane.b32.xlu1 %v5357_v50, %s5393_s26 }
0x2980   :  { %v5359_v3 = vpop.eup %5358 }
0x2981   :  { %v4494_v42 = vmul.f32 0.5, %v5359_v3  ;;  %v4227_v3 = vadd.f32 %v7743_v27, %v7807_v8 }
0x2983   :  { %v4495_v55 = vadd.f32 0.5, %v4494_v42 }
0x2985   :  { %v4500_v4 = vmul.f32 %v4498_v24, %v4495_v55 }
0x29f1   :  { %v4503_v13 = vpop.permute.xlu1 %4502 }
0x29f2   :  { %v4505_v44 = vmul.f32 %v4503_v13, %v4495_v55 }
0x29f4   :  { %4507 = vrot.lane.b32.xlu2 %v4505_v44, %s5394_s9 }
0x2a4e   :  { %v4508_v52 = vpop.permute.xlu2 %4507 }
0x2a4f   :  { %v4510_v36 = vadd.f32 %v4508_v52, %v4500_v4 }
0x2a51   :  { %5360 = vtanh.f32 %v4510_v36  ;;  %v4548_v10 = vrot.slane %v4510_v36, 6 }
0x2a57   :  { %v5361_v39 = vpop.eup %5360 }
0x2a58   :  { %4513 = vrot.lane.b32.xlu0 %v5361_v39, %s5393_s26 }
0x2aca   :  { %v4514_v35 = vpop.permute.xlu0 %4513 }
0x2acb   :  { %v7846_v2 = vmul.f32 %v4514_v35, %v4495_v55 }
0x2acd   :  { %v4517_v47 = vpack.c.bf16 %v7846_v2, %v7846_v2 }
0x2acf   :  { %v4519_v56 = vrot.slane %v4517_v47, 1 }
0x2ad1   :  { %4520 = vrot.lane.b32.xlu1 %v4519_v56, %s5394_s9 }
0x2b43   :  { %v4521_v22 = vpop.permute.xlu1 %4520 }
0x2b44   :  { %5239 = vmatmul.msk.bf16.vlgmr.msra.gmra.mxu0 %vm3663_vm6, %v4521_v22 }
0x2bc1   :  { %v4534_v20 = vpop.f32.mrf.mxu0 }
0x2bc2   :  { %v4539_v12 = vrot.slane %v4534_v20, 4 }
0x2bc4   :  { %v4541_v30 = vadd.f32 %v4539_v12, %v7830_v17 }
0x2bc6   :  { %5362 = vtanh.f32 %v4541_v30  ;;  %v4542_v32 = vmul.f32 0.5, %v4541_v30 }
0x2bc8   :  { %5364 = vtanh.f32 %v4542_v32  ;;  %v4714_v32 = vrot.slane %v7797_v26, 2 }
0x2bc9   :  { %v4536_v34 = vpop.f32.mrf.mxu0 }
0x2bca   :  { %v5253_v34 = vld [vmem:[%s8042_s15] ss:$0 sm:$0xff] }
0x2bcc   :  { %v5363_v58 = vpop.eup %5362 }
0x2bcd   :  { %4552 = vrot.lane.b32.xlu2 %v5363_v58, %s5393_s26 }
0x2bce   :  { %v5365_v51 = vpop.eup %5364 }
0x2bcf   :  { %v4544_v21 = vmul.f32 0.5, %v5365_v51 }
0x2bd1   :  { %v4545_v15 = vadd.f32 0.5, %v4544_v21 }
0x2bd3   :  { %v4550_v38 = vmul.f32 %v4548_v10, %v4545_v15 }
0x2c27   :  { %v4553_v1 = vpop.permute.xlu2 %4552 }
0x2c28   :  { %v4555_v57 = vmul.f32 %v4553_v1, %v4545_v15 }
0x2c2a   :  { %4557 = vrot.lane.b32.xlu0 %v4555_v57, %s5394_s9 }
0x2c9c   :  { %v4558_v60 = vpop.permute.xlu0 %4557 }
0x2c9d   :  { %v4560_v31 = vadd.f32 %v4558_v60, %v4550_v38 }
0x2c9f   :  { %5366 = vtanh.f32 %v4560_v31  ;;  %v4598_v14 = vrot.slane %v4560_v31, 6 }
0x2ca5   :  { %v5367_v49 = vpop.eup %5366 }
0x2ca6   :  { %4563 = vrot.lane.b32.xlu1 %v5367_v49, %s5393_s26 }
0x2d18   :  { %v4564_v11 = vpop.permute.xlu1 %4563 }
0x2d19   :  { %v7856_v48 = vmul.f32 %v4564_v11, %v4545_v15 }
0x2d1b   :  { %v4567_v61 = vpack.c.bf16 %v7856_v48, %v7856_v48 }
0x2d1d   :  { %v4569_v9 = vrot.slane %v4567_v61, 2 }
0x2d1f   :  { %4570 = vrot.lane.b32.xlu2 %v4569_v9, %s5394_s9 }
0x2d79   :  { %v4571_v41 = vpop.permute.xlu2 %4570 }
0x2d7a   :  { %5240 = vmatmul.msk.bf16.vlgmr.msrb.gmra.mxu1 %vm3663_vm6, %v4571_v41 }
0x2df7   :  { %v4584_v0 = vpop.f32.mrf.mxu1 }
0x2df8   :  { %v4589_v45 = vrot.slane %v4584_v0, 2 }
0x2dfa   :  { %v4591_v25 = vadd.f32 %v4589_v45, %v7830_v17  ;;  %v4720_v45 = vrot.slane %v7823_v18, 6 }
0x2dfc   :  { %5368 = vtanh.f32 %v4591_v25  ;;  %v4592_v54 = vmul.f32 0.5, %v4591_v25 }
0x2dfe   :  { %5370 = vtanh.f32 %v4592_v54 }
0x2dff   :  { %v4586_v53 = vpop.f32.mrf.mxu1 }
0x2e00   :  { %v4726_v53 = vrot.slane %v7856_v48, 4  ;;  %v4717_v48 = vrot.slane %v7813_v29, 4 }
0x2e02   :  { %v5369_v7 = vpop.eup %5368 }
0x2e03   :  { %4602 = vrot.lane.b32.xlu0 %v5369_v7, %s5393_s26 }
0x2e04   :  { %v5371_v28 = vpop.eup %5370 }
0x2e05   :  { %v4594_v62 = vmul.f32 0.5, %v5371_v28 }
0x2e07   :  { %v4595_v33 = vadd.f32 0.5, %v4594_v62 }
0x2e09   :  { %v4600_v37 = vmul.f32 %v4598_v14, %v4595_v33 }
0x2e75   :  { %v4603_v43 = vpop.permute.xlu0 %4602 }
0x2e76   :  { %v4605_v16 = vmul.f32 %v4603_v43, %v4595_v33 }
0x2e78   :  { %4607 = vrot.lane.b32.xlu1 %v4605_v16, %s5394_s9 }
0x2eea   :  { %v4608_v6 = vpop.permute.xlu1 %4607 }
0x2eeb   :  { %v4610_v63 = vadd.f32 %v4608_v6, %v4600_v37 }
0x2eed   :  { %5372 = vtanh.f32 %v4610_v63  ;;  %v4645_v47 = vrot.slane %v4610_v63, 6  ;;  %v4723_v63 = vrot.slane %v7846_v2, 2  ;;  %v26_v2 = vstv %s8044_s16 }
0x2eee   :  { %27 = vst [vmem:[#allocation2] sm:$0x1] %v26_v2 }
0x2ef3   :  { %v5373_v17 = vpop.eup %5372 }
0x2ef4   :  { %4613 = vrot.lane.b32.xlu2 %v5373_v17, %s5393_s26 }
0x2f4e   :  { %v4614_v23 = vpop.permute.xlu2 %4613 }
0x2f4f   :  { %v4616_v59 = vmul.f32 %v4614_v23, %v4595_v33 }
0x2f51   :  { %v4617_v5 = vpack.c.bf16 %v4616_v59, %v4616_v59  ;;  %v4729_v1 = vrot.slane %v4616_v59, 6 }
0x2f53   :  { %v4619_v50 = vrot.slane %v4617_v5, 3 }
0x2f55   :  { %4620 = vrot.lane.b32.xlu0 %v4619_v50, %s5394_s9 }
0x2fc7   :  { %v4621_v40 = vpop.permute.xlu0 %4620 }
0x2fc8   :  { %5241 = vmatmul.msk.bf16.vlgmr.msrb.gmra.mxu2 %vm3663_vm6, %v4621_v40 }
0x304b   :  { %v4634_v42 = vpop.f32.mrf.mxu2 }
0x304c   :  { %v4638_v55 = vadd.f32 %v4634_v42, %v4227_v3 }
0x304e   :  { %5374 = vtanh.f32 %v4638_v55  ;;  %v4639_v24 = vmul.f32 0.5, %v4638_v55 }
0x3050   :  { %5376 = vtanh.f32 %v4639_v24 }
0x3053   :  { %v4636_v13 = vpop.f32.mrf.mxu2 }
0x3054   :  { %v5375_v44 = vpop.eup %5374 }
0x3055   :  { %4649 = vrot.lane.b32.xlu1 %v5375_v44, %s5393_s26 }
0x3056   :  { %v5377_v4 = vpop.eup %5376 }
0x3057   :  { %v4641_v52 = vmul.f32 0.5, %v5377_v4 }
0x3059   :  { %v4642_v36 = vadd.f32 0.5, %v4641_v52  ;;  %v7924_v52 = vld [vmem:[#allocation2] ss:$0 sm:$0xff] }
0x305b   :  { %v4647_v56 = vmul.f32 %v4645_v47, %v4642_v36 }
0x30c7   :  { %v4650_v39 = vpop.permute.xlu1 %4649 }
0x30c8   :  { %v4652_v35 = vmul.f32 %v4650_v39, %v4642_v36 }
0x30ca   :  { %4654 = vrot.lane.b32.xlu2 %v4652_v35, %s5394_s9 }
0x3124   :  { %v4655_v22 = vpop.permute.xlu2 %4654 }
0x3125   :  { %v4657_v27 = vadd.f32 %v4655_v22, %v4647_v56 }
0x3127   :  { %5378 = vtanh.f32 %v4657_v27  ;;  %v4694_v54 = vrot.slane %v4657_v27, 6 }
0x312d   :  { %v5379_v8 = vpop.eup %5378 }
0x312e   :  { %4660 = vrot.lane.b32.xlu0 %v5379_v8, %s5393_s26 }
0x31a0   :  { %v4661_v20 = vpop.permute.xlu0 %4660 }
0x31a1   :  { %v7873_v12 = vmul.f32 %v4661_v20, %v4642_v36 }
0x31a3   :  { %v4664_v30 = vpack.c.bf16 %v7873_v12, %v7873_v12 }
0x31a5   :  { %4666 = vrot.lane.b32.xlu1 %v4664_v30, %s5394_s9 }
0x31ad   :  { %4737 = vrot.lane.b32.xlu1 %v5253_v34, %s5395_s23  ;;  %v5255_v34 = vld [vmem:[%s8043_s17] ss:$0 sm:$0xff] }
0x3217   :  { %v4667_v58 = vpop.permute.xlu1 %4666 }
0x3218   :  { %5242 = vmatmul.msk.bf16.vlgmr.msra.gmra.mxu3 %vm3663_vm6, %v4667_v58  ;;  %v5258_v58 = vld [vmem:[%s8043_s17 + $0x1] ss:$0 sm:$0xff] }
0x321f   :  { %v7883_v51 = vpop.permute.xlu1 %4737 }
0x3220   :  { %v4741_v21 = vmul.f32 %v7883_v51, %v4714_v32  ;;  %v4744_v15 = vmul.f32 %v7883_v51, %v7836_v19  ;;  %v4747_v57 = vmul.f32 %v7883_v51, %v4729_v1  ;;  %v4740_v0 = vmul.f32 %v7883_v51, %v7763_v46 }
0x3221   :  { %v4743_v25 = vmul.f32 %v7883_v51, %v4720_v45  ;;  %v4746_v7 = vmul.f32 %v7883_v51, %v4726_v53  ;;  %v4742_v37 = vmul.f32 %v7883_v51, %v4717_v48  ;;  %v4745_v23 = vmul.f32 %v7883_v51, %v4723_v63  ;;  %v5261_v63 = vld [vmem:[%s8043_s17 + $0x8] ss:$0 sm:$0xff] }
0x3222   :  { %4762 = vrot.lane.b32.xlu1 %v4741_v21, %s5394_s9  ;;  %v4748_v29 = vmul.f32 %v7883_v51, %v7873_v12 }
0x322a   :  { %4768 = vrot.lane.b32.xlu1 %v4744_v15, %s5394_s9 }
0x3232   :  { %4774 = vrot.lane.b32.xlu1 %v4747_v57, %s5394_s9 }
0x3294   :  { %v4763_v43 = vpop.permute.xlu1 %4762 }
0x3295   :  { %v4794_v5 = vsel %vm4790_vm8, %v4763_v43, 0.0 }
0x329b   :  { %v4680_v10 = vpop.f32.mrf.mxu3 }
0x329c   :  { %v4685_v38 = vrot.slane %v4680_v10, 6  ;;  %v4769_v14 = vpop.permute.xlu1 %4768 }
0x329d   :  { %v4803_v6 = vsel %vm4790_vm8, %v4769_v14, 0.0  ;;  %v5263_v14 = vld [vmem:[%s8043_s17 + $0x6] ss:$0 sm:$0xff] }
0x329e   :  { %v4687_v60 = vadd.f32 %v4685_v38, %v4227_v3 }
0x32a0   :  { %5380 = vtanh.f32 %v4687_v60  ;;  %v4688_v49 = vmul.f32 0.5, %v4687_v60 }
0x32a2   :  { %5382 = vtanh.f32 %v4688_v49 }
0x32a3   :  { %v4682_v26 = vpop.f32.mrf.mxu3 }
0x32a4   :  { %v4775_v17 = vpop.permute.xlu1 %4774 }
0x32a5   :  { %v4812_v59 = vsel %vm4790_vm8, %v4775_v17, 0.0 }
0x32a6   :  { %v5381_v31 = vpop.eup %5380 }
0x32a7   :  { %4698 = vrot.lane.b32.xlu2 %v5381_v31, %s5393_s26 }
0x32a8   :  { %v5383_v11 = vpop.eup %5382 }
0x32a9   :  { %v4690_v61 = vmul.f32 0.5, %v5383_v11 }
0x32ab   :  { %v4691_v19 = vadd.f32 0.5, %v4690_v61 }
0x32ad   :  { %v4696_v28 = vmul.f32 %v4694_v54, %v4691_v19  ;;  %v5260_v54 = vld [vmem:[%s8043_s17 + $0x5] ss:$0 sm:$0xff] }
0x3301   :  { %v4699_v9 = vpop.permute.xlu2 %4698 }
0x3302   :  { %v4701_v41 = vmul.f32 %v4699_v9, %v4691_v19  ;;  %v28_v9 = vstv %s8046_s18 }
0x3303   :  { %29 = vst [vmem:[#allocation3] sm:$0x1] %v28_v9 }
0x3304   :  { %4703 = vrot.lane.b32.xlu0 %v4701_v41, %s5394_s9  ;;  %v5259_v41 = vld [vmem:[%s8043_s17 + $0x3] ss:$0 sm:$0xff] }
0x330c   :  { %4760 = vrot.lane.b32.xlu0 %v4740_v0, %s5394_s9  ;;  %v5262_v0 = vld [vmem:[%s8043_s17 + $0x2] ss:$0 sm:$0xff] }
0x3314   :  { %4766 = vrot.lane.b32.xlu0 %v4743_v25, %s5394_s9  ;;  %v5256_v25 = vld [vmem:[%s8043_s17 + $0x4] ss:$0 sm:$0xff] }
0x331c   :  { %4772 = vrot.lane.b32.xlu0 %v4746_v7, %s5394_s9 }
0x3376   :  { %v4704_v62 = vpop.permute.xlu0 %4703 }
0x3377   :  { %v4706_v33 = vadd.f32 %v4704_v62, %v4696_v28 }
0x3379   :  { %5384 = vtanh.f32 %v4706_v33 }
0x337e   :  { %v4761_v46 = vpop.permute.xlu0 %4760 }
0x337f   :  { %v5385_v16 = vpop.eup %5384  ;;  %v4791_v18 = vsel %vm4790_vm8, %v4761_v46, 0.0  ;;  %v5257_v46 = vld [vmem:[%s8043_s17 + $0x7] ss:$0 sm:$0xff] }
0x3380   :  { %4792 = vadd.xlane.f32.xlu1 %v4791_v18  ;;  %4709 = vrot.lane.b32.xlu2 %v5385_v16, %s5393_s26 }
0x3386   :  { %v4767_v50 = vpop.permute.xlu0 %4766 }
0x3387   :  { %v4800_v40 = vsel %vm4790_vm8, %v4767_v50, 0.0 }
0x3388   :  { %4804 = vadd.xlane.f32.xlu1 %v4803_v6  ;;  %4764 = vrot.lane.b32.xlu2 %v4742_v37, %s5394_s9 }
0x338e   :  { %v4773_v12 = vpop.permute.xlu0 %4772 }
0x338f   :  { %v4809_v30 = vsel %vm4790_vm8, %v4773_v12, 0.0 }
0x3390   :  { %4813 = vadd.xlane.f32.xlu1 %v4812_v59  ;;  %4770 = vrot.lane.b32.xlu2 %v4745_v23, %s5394_s9 }
0x3398   :  { %4776 = vrot.lane.b32.xlu2 %v4748_v29, %s5394_s9 }
0x33c1   :  { %4795 = vadd.xlane.f32.xlu2 %v4794_v5 }
0x33c9   :  { %4801 = vadd.xlane.f32.xlu2 %v4800_v40 }
0x33da   :  { %v4710_v3 = vpop.permute.xlu2 %4709 }
0x33db   :  { %v4712_v42 = vmul.f32 %v4710_v3, %v4691_v19 }
0x33dd   :  { %v4732_v55 = vrot.slane %v4712_v42, 2 }
0x33df   :  { %v4749_v13 = vmul.f32 %v7883_v51, %v4732_v55 }
0x33e1   :  { %4778 = vrot.lane.b32.xlu0 %v4749_v13, %s5394_s9 }
0x33e2   :  { %v4765_v44 = vpop.permute.xlu2 %4764 }
0x33e3   :  { %v4797_v20 = vsel %vm4790_vm8, %v4765_v44, 0.0 }
0x33ea   :  { %v4771_v24 = vpop.permute.xlu2 %4770 }
0x33eb   :  { %v4806_v4 = vsel %vm4790_vm8, %v4771_v24, 0.0  ;;  %v5264_v24 = vld [vmem:[%s8043_s17 + $0x9] ss:$0 sm:$0xff] }
0x33ec   :  { %4807 = vadd.xlane.f32.xlu2 %v4806_v4 }
0x33f2   :  { %v4777_v36 = vpop.permute.xlu2 %4776 }
0x33f3   :  { %v4793_v39 = vpop.xlane.xlu1 %4792  ;;  %v4815_v35 = vsel %vm4790_vm8, %v4777_v36, 0.0 }
0x33f4   :  { %v4825_v47 = vadd.f32 %v7924_v52, %v4793_v39  ;;  %4816 = vadd.xlane.f32.xlu2 %v4815_v35  ;;  %v5265_v35 = vld [vmem:[#allocation3] ss:$0 sm:$0xff] }
0x33f6   :  { %4836 = vst.msk [vmem:[%s8045_s19] sm:$0x3] %vm4835_vm9, %v4825_v47  ;;  %v4886_v51 = vmul.f32 %v5255_v34, %v4825_v47 }
0x33f8   :  { %v4896_v1 = vsel %vm4835_vm9, %v4886_v51, 0.0 }
0x33fb   :  { %v4805_v56 = vpop.xlane.xlu1 %4804 }
0x33fc   :  { %v4829_v22 = vadd.f32 %v7924_v52, %v4805_v56 }
0x33fe   :  { %4840 = vst.msk [vmem:[%s8045_s19 + $0x8] sm:$0x3] %vm4835_vm9, %v4829_v22  ;;  %v4890_v62 = vmul.f32 %v5256_v25, %v4829_v22 }
0x3400   :  { %v4903_v6 = vsel %vm4835_vm9, %v4890_v62, 0.0 }
0x3403   :  { %v4814_v27 = vpop.xlane.xlu1 %4813 }
0x3404   :  { %v4832_v8 = vadd.f32 %v7924_v52, %v4814_v27 }
0x3406   :  { %4843 = vst.msk [vmem:[%s8045_s19 + $0xe] sm:$0x3] %vm4835_vm9, %v4832_v8  ;;  %v4893_v59 = vmul.f32 %v5257_v46, %v4832_v8 }
0x3408   :  { %v4909_v42 = vsel %vm4835_vm9, %v4893_v59, 0.0 }
0x340b   :  { %4798 = vadd.xlane.f32.xlu0 %v4797_v20 }
0x3413   :  { %4810 = vadd.xlane.f32.xlu0 %v4809_v30 }
0x3434   :  { %v4796_v32 = vpop.xlane.xlu2 %4795 }
0x3435   :  { %v4826_v21 = vadd.f32 %v7924_v52, %v4796_v32 }
0x3437   :  { %4837 = vst.msk [vmem:[%s8045_s19 + $0x2] sm:$0x3] %vm4835_vm9, %v4826_v21  ;;  %v4887_v15 = vmul.f32 %v5258_v58, %v4826_v21 }
0x3439   :  { %v4897_v57 = vsel %vm4835_vm9, %v4887_v15, 0.0 }
0x343a   :  { %v4898_v10 = vadd.f32 %v4897_v57, %v4896_v1 }
0x343c   :  { %v4802_v38 = vpop.xlane.xlu2 %4801 }
0x343d   :  { %v4828_v60 = vadd.f32 %v7924_v52, %v4802_v38 }
0x343f   :  { %4839 = vst.msk [vmem:[%s8045_s19 + $0x6] sm:$0x3] %vm4835_vm9, %v4828_v60  ;;  %v4889_v7 = vmul.f32 %v5259_v41, %v4828_v60 }
0x3441   :  { %v4901_v16 = vsel %vm4835_vm9, %v4889_v7, 0.0 }
0x3453   :  { %v4779_v26 = vpop.permute.xlu0 %4778 }
0x3454   :  { %v4818_v31 = vsel %vm4790_vm8, %v4779_v26, 0.0 }
0x3455   :  { %4819 = vadd.xlane.f32.xlu0 %v4818_v31 }
0x345f   :  { %v4808_v49 = vpop.xlane.xlu2 %4807 }
0x3460   :  { %v4830_v11 = vadd.f32 %v7924_v52, %v4808_v49 }
0x3462   :  { %4841 = vst.msk [vmem:[%s8045_s19 + $0xa] sm:$0x3] %vm4835_vm9, %v4830_v11  ;;  %v4891_v18 = vmul.f32 %v5260_v54, %v4830_v11 }
0x3464   :  { %v4905_v29 = vsel %vm4835_vm9, %v4891_v18, 0.0 }
0x3467   :  { %v4817_v61 = vpop.xlane.xlu2 %4816 }
0x3468   :  { %v4833_v19 = vadd.f32 %v7924_v52, %v4817_v61 }
0x346a   :  { %4844 = vst.msk [vmem:[%s8045_s19 + $0x10] sm:$0x3] %vm4835_vm9, %v4833_v19  ;;  %v4894_v40 = vmul.f32 %v5261_v63, %v4833_v19 }
0x346c   :  { %v4911_v13 = vsel %vm4835_vm9, %v4894_v40, 0.0 }
0x347e   :  { %v4799_v45 = vpop.xlane.xlu0 %4798 }
0x347f   :  { %v4827_v53 = vadd.f32 %v7924_v52, %v4799_v45 }
0x3481   :  { %4838 = vst.msk [vmem:[%s8045_s19 + $0x4] sm:$0x3] %vm4835_vm9, %v4827_v53  ;;  %v4888_v28 = vmul.f32 %v5262_v0, %v4827_v53 }
0x3483   :  { %v4899_v33 = vsel %vm4835_vm9, %v4888_v28, 0.0 }
0x3484   :  { %v4900_v43 = vadd.f32 %v4899_v33, %v4898_v10 }
0x3486   :  { %v4902_v48 = vadd.f32 %v4901_v16, %v4900_v43  ;;  %v4811_v37 = vpop.xlane.xlu0 %4810 }
0x3487   :  { %v4831_v17 = vadd.f32 %v7924_v52, %v4811_v37 }
0x3488   :  { %v4904_v23 = vadd.f32 %v4903_v6, %v4902_v48 }
0x3489   :  { %4842 = vst.msk [vmem:[%s8045_s19 + $0xc] sm:$0x3] %vm4835_vm9, %v4831_v17  ;;  %v4892_v5 = vmul.f32 %v5263_v14, %v4831_v17 }
0x348a   :  { %v4906_v50 = vadd.f32 %v4905_v29, %v4904_v23 }
0x348b   :  { %v4907_v2 = vsel %vm4835_vm9, %v4892_v5, 0.0 }
0x348c   :  { %v4908_v3 = vadd.f32 %v4907_v2, %v4906_v50 }
0x348e   :  { %v4910_v55 = vadd.f32 %v4909_v42, %v4908_v3 }
0x3490   :  { %v4912_v44 = vadd.f32 %v4911_v13, %v4910_v55 }
0x34c8   :  { %v4820_v4 = vpop.xlane.xlu0 %4819 }
0x34c9   :  { %v4834_v36 = vadd.f32 %v7924_v52, %v4820_v4 }
0x34cb   :  { %4845 = vst.msk [vmem:[%s8045_s19 + $0x12] sm:$0x3] %vm4835_vm9, %v4834_v36  ;;  %v4895_v39 = vmul.f32 %v5264_v24, %v4834_v36 }
0x34cd   :  { %v4913_v47 = vsel %vm4835_vm9, %v4895_v39, 0.0 }
0x34ce   :  { %v4914_v56 = vadd.f32 %v4913_v47, %v4912_v44 }
0x34d0   :  { %v4919_v22 = vadd.f32 %v5265_v35, %v4914_v56 }
0x34d2   :  { %4920 = vst.msk [vmem:[%s8047_s20] sm:$0x3] %vm4835_vm9, %v4919_v22 }

</bundles_post_ra>
